<compile_context>
chip_gen: v6e
topology: v6e:2x2x1
jax: 0.10.0
libtpu: 0.0.40
codegen_flags: <defaults>
</compile_context>

<pallas_src>
import jax
import jax.numpy as jnp
from jax.experimental import pallas as pl
from jax.experimental.pallas import tpu as pltpu

EMB_VOCAB = 201
EMB_DIM = 64
HID = 40
HP = 128                 # lane-padded hidden width (one vreg lane tile)
NGATE = 4                # PyTorch LSTM gate order: i, f, g, o


# ---------------------------------------------------------------------------
# Fused encoder + decoder kernel (single grid step, in-kernel recurrent loops).
# ---------------------------------------------------------------------------
def _seq2seq_kernel(emb_ref, x0_ref,
                    e_wih_ref, e_whh_ref, e_b_ref,
                    d_wih_ref, d_whh_ref, d_b_ref,
                    out_ref):
    B = x0_ref.shape[0]
    S = emb_ref.shape[0]
    T = out_ref.shape[0]

    # --- hoist weight loads + bias broadcasts out of the recurrent loops ---
    e_wih = e_wih_ref[...]                                   # (64,  4*HP)
    e_whh = e_whh_ref[...]                                   # (HP,  4*HP)
    e_b = jnp.broadcast_to(e_b_ref[...], (B, NGATE * HP))    # (B,   4*HP)
    d_wih = d_wih_ref[...]                                   # (HP,  4*HP)
    d_whh = d_whh_ref[...]                                   # (HP,  4*HP)
    d_b = jnp.broadcast_to(d_b_ref[...], (B, NGATE * HP))    # (B,   4*HP)

    def cell(x, h, c, wih, whh, b):
        # One fused gate matmul pair -> (B, 4*HP); gate slices are 128-lane aligned.
        z = (jnp.dot(x, wih, preferred_element_type=jnp.float32)
             + jnp.dot(h, whh, preferred_element_type=jnp.float32)
             + b)
        i = jax.nn.sigmoid(z[:, 0 * HP:1 * HP])
        f = jax.nn.sigmoid(z[:, 1 * HP:2 * HP])
        g = jnp.tanh(z[:, 2 * HP:3 * HP])
        o = jax.nn.sigmoid(z[:, 3 * HP:4 * HP])
        c_new = f * c + i * g
        h_new = o * jnp.tanh(c_new)
        return h_new, c_new

    # ---------------- encoder: S steps, fully unrolled (static trip count) -------
    h = jnp.zeros((B, HP), jnp.float32)
    c = jnp.zeros((B, HP), jnp.float32)
    for t in range(S):
        h, c = cell(emb_ref[t], h, c, e_wih, e_whh, e_b)

    # ---------------- decoder: T steps, output fed back as next input ------------
    U = 4 if T % 4 == 0 else (2 if T % 2 == 0 else 1)   # partial unroll factor

    def dec_chunk(ci, carry):
        x, hh, cc = carry
        base = ci * U
        for u in range(U):                               # unrolled inside the rolled loop
            hh, cc = cell(x, hh, cc, d_wih, d_whh, d_b)
            out_ref[base + u] = hh                       # lane-dense (B, HP) VMEM store
            x = hh
        return (x, hh, cc)

    jax.lax.fori_loop(0, T // U, dec_chunk, (x0_ref[...], h, c))


def _seq2seq_pallas(emb, x0p, e_wih, e_whh, e_b, d_wih, d_whh, d_b, n_steps):
    S, B, E = emb.shape

    def full(shape):
        return pl.BlockSpec(shape, lambda i, _s=shape: (0,) * len(_s))

    return pl.pallas_call(
        _seq2seq_kernel,
        out_shape=jax.ShapeDtypeStruct((n_steps, B, HP), jnp.float32),
        grid_spec=pltpu.PrefetchScalarGridSpec(
            num_scalar_prefetch=0,
            grid=(1,),
            in_specs=[
                full((S, B, E)),
                full((B, HP)),
                full((E, NGATE * HP)),
                full((HP, NGATE * HP)),
                full((1, NGATE * HP)),
                full((HP, NGATE * HP)),
                full((HP, NGATE * HP)),
                full((1, NGATE * HP)),
            ],
            out_specs=full((n_steps, B, HP)),
        ),
        compiler_params=pltpu.CompilerParams(dimension_semantics=("arbitrary",)),
    )(emb, x0p, e_wih, e_whh, e_b, d_wih, d_whh, d_b)


# ---------------------------------------------------------------------------
# Parameter packing: per-gate (4, in_dim, HID) -> fused lane-padded (in_pad, 4*HP).
# Extra rows/cols are zero so the 128-lane-padded state recurrence is exact.
# ---------------------------------------------------------------------------
def _pack_gate_weights(w4, in_pad):
    g, d, h = w4.shape
    wp = jnp.zeros((in_pad, g * HP), jnp.float32)
    for gi in range(g):
        wp = wp.at[:d, gi * HP:gi * HP + h].set(w4[gi])
    return wp


def _pack_gate_bias(b4):
    g, _, h = b4.shape
    bp = jnp.zeros((1, g * HP), jnp.float32)
    for gi in range(g):
        bp = bp.at[:, gi * HP:gi * HP + h].set(b4[gi])
    return bp


def init_params(key):
    ks = jax.random.split(key, 9)
    bound = 1.0 / (HID ** 0.5)
    u = lambda kk, shape: jax.random.uniform(kk, shape, jnp.float32, -bound, bound)
    enc_wih = u(ks[1], (NGATE, EMB_DIM, HID))
    enc_whh = u(ks[2], (NGATE, HID, HID))
    enc_b = u(ks[3], (NGATE, 1, HID)) + u(ks[4], (NGATE, 1, HID))   # b_ih + b_hh
    dec_wih = u(ks[5], (NGATE, HID, HID))
    dec_whh = u(ks[6], (NGATE, HID, HID))
    dec_b = u(ks[7], (NGATE, 1, HID)) + u(ks[8], (NGATE, 1, HID))
    return {
        "emb": jax.random.normal(ks[0], (EMB_VOCAB, EMB_DIM), jnp.float32),
        "enc_wih_f": _pack_gate_weights(enc_wih, EMB_DIM),   # (64, 512)
        "enc_whh_f": _pack_gate_weights(enc_whh, HP),        # (128, 512)
        "enc_b_f": _pack_gate_bias(enc_b),                   # (1, 512)
        "dec_wih_f": _pack_gate_weights(dec_wih, HP),        # (128, 512)
        "dec_whh_f": _pack_gate_weights(dec_whh, HP),        # (128, 512)
        "dec_b_f": _pack_gate_bias(dec_b),                   # (1, 512)
    }


@jax.jit
def seq2seq_forward(params, source, decoder_input):
    # source: (S, B) int32 token ids (seq-major, like nn.LSTM default);
    # decoder_input: (1, 40, 40).  The PyTorch module hard-codes the decoder batch to
    # 40, so source batch must be 40, and decoder length = source.size(1) = 40.
    S, B = source.shape
    if B != 40:
        raise ValueError("Seq2Seq requires batch == 40 (decoder_input is randn(1,40,40)).")
    # TODO(synk): embedding gather kept as an XLA take in the wrapper (tiny win to fold in-kernel).
    emb = jnp.take(params["emb"], source, axis=0)            # (S, B, 64)
    x0 = jnp.pad(decoder_input[0], ((0, 0), (0, HP - HID)))  # (B, HP), zero lane pad
    n_steps = B                                              # source.size(1)
    out = _seq2seq_pallas(emb, x0,
                          params["enc_wih_f"], params["enc_whh_f"], params["enc_b_f"],
                          params["dec_wih_f"], params["dec_whh_f"], params["dec_b_f"],
                          n_steps)                           # (T, B, HP)
    outs = out[:, :, :HID]                                   # (T, 40, 40)
    # torch.stack(outputs, dim=1) of T tensors each (1, 40, 40) -> (1, T, 40, 40)
    return outs[None, ...]


if __name__ == "__main__":
    key = jax.random.PRNGKey(0)
    k_param, k_src, k_dec = jax.random.split(key, 3)

    params = init_params(k_param)

    SEQ_LEN = 8
    BATCH = 40   # fixed by the module (decoder_input = randn(1, 40, 40))
    source = jax.random.randint(k_src, (SEQ_LEN, BATCH), 0, EMB_VOCAB, dtype=jnp.int32)
    # TODO(synk): PyTorch draws torch.randn inside forward (fresh RNG state each call);
    # replaced with a deterministic jax.random draw of the same shape.
    decoder_input = jax.random.normal(k_dec, (1, 40, 40), jnp.float32)

    out = seq2seq_forward(params, source, decoder_input)
    out = jax.block_until_ready(out)
    assert out.shape == (1, BATCH, HID, HID)
    print("KERNEL_OK")
</pallas_src>

<mosaic_0001>
module attributes {stable_mosaic.version = 11 : i64} {
  func.func @_seq2seq_kernel(%arg0: i32, %arg1: memref<8x40x64xf32, #tpu.memory_space<vmem>>, %arg2: memref<40x128xf32, #tpu.memory_space<vmem>>, %arg3: memref<64x512xf32, #tpu.memory_space<vmem>>, %arg4: memref<128x512xf32, #tpu.memory_space<vmem>>, %arg5: memref<1x512xf32, #tpu.memory_space<vmem>>, %arg6: memref<128x512xf32, #tpu.memory_space<vmem>>, %arg7: memref<128x512xf32, #tpu.memory_space<vmem>>, %arg8: memref<1x512xf32, #tpu.memory_space<vmem>>, %arg9: memref<40x40x128xf32, #tpu.memory_space<vmem>>) attributes {dimension_semantics = [#tpu.dimension_semantics<arbitrary>], iteration_bounds = array<i64: 1>, scalar_prefetch = 0 : i64, scratch_operands = 0 : i64, tpu.core_type = #tpu.core_type<tc>, window_params = [{pipeline_mode = #tpu.pipeline_mode<synchronous>, transform_indices = @transform_0, window_bounds = array<i64: 8, 40, 64>}, {pipeline_mode = #tpu.pipeline_mode<synchronous>, transform_indices = @transform_1, window_bounds = array<i64: 40, 128>}, {pipeline_mode = #tpu.pipeline_mode<synchronous>, transform_indices = @transform_2, window_bounds = array<i64: 64, 512>}, {pipeline_mode = #tpu.pipeline_mode<synchronous>, transform_indices = @transform_3, window_bounds = array<i64: 128, 512>}, {pipeline_mode = #tpu.pipeline_mode<synchronous>, transform_indices = @transform_4, window_bounds = array<i64: 1, 512>}, {pipeline_mode = #tpu.pipeline_mode<synchronous>, transform_indices = @transform_5, window_bounds = array<i64: 128, 512>}, {pipeline_mode = #tpu.pipeline_mode<synchronous>, transform_indices = @transform_6, window_bounds = array<i64: 128, 512>}, {pipeline_mode = #tpu.pipeline_mode<synchronous>, transform_indices = @transform_7, window_bounds = array<i64: 1, 512>}, {pipeline_mode = #tpu.pipeline_mode<synchronous>, transform_indices = @transform_8, window_bounds = array<i64: 40, 40, 128>}]} {
    %c0 = arith.constant 0 : index
    %c0_0 = arith.constant 0 : index
    %0 = vector.load %arg3[%c0, %c0_0] : memref<64x512xf32, #tpu.memory_space<vmem>>, vector<64x512xf32>
    %c0_1 = arith.constant 0 : index
    %c0_2 = arith.constant 0 : index
    %1 = vector.load %arg4[%c0_1, %c0_2] : memref<128x512xf32, #tpu.memory_space<vmem>>, vector<128x512xf32>
    %c0_3 = arith.constant 0 : index
    %c0_4 = arith.constant 0 : index
    %2 = vector.load %arg5[%c0_3, %c0_4] : memref<1x512xf32, #tpu.memory_space<vmem>>, vector<1x512xf32>
    %3 = vector.shape_cast %2 : vector<1x512xf32> to vector<1x512xf32>
    %4 = vector.broadcast %3 : vector<1x512xf32> to vector<40x512xf32>
    %c0_5 = arith.constant 0 : index
    %c0_6 = arith.constant 0 : index
    %5 = vector.load %arg6[%c0_5, %c0_6] : memref<128x512xf32, #tpu.memory_space<vmem>>, vector<128x512xf32>
    %c0_7 = arith.constant 0 : index
    %c0_8 = arith.constant 0 : index
    %6 = vector.load %arg7[%c0_7, %c0_8] : memref<128x512xf32, #tpu.memory_space<vmem>>, vector<128x512xf32>
    %c0_9 = arith.constant 0 : index
    %c0_10 = arith.constant 0 : index
    %7 = vector.load %arg8[%c0_9, %c0_10] : memref<1x512xf32, #tpu.memory_space<vmem>>, vector<1x512xf32>
    %8 = vector.shape_cast %7 : vector<1x512xf32> to vector<1x512xf32>
    %9 = vector.broadcast %8 : vector<1x512xf32> to vector<40x512xf32>
    %cst = arith.constant 0.000000e+00 : f32
    %10 = vector.broadcast %cst : f32 to vector<40x128xf32>
    %cst_11 = arith.constant 0.000000e+00 : f32
    %11 = vector.broadcast %cst_11 : f32 to vector<40x128xf32>
    %c0_12 = arith.constant 0 : index
    %c0_13 = arith.constant 0 : index
    %c0_14 = arith.constant 0 : index
    %12 = vector.load %arg1[%c0_12, %c0_13, %c0_14] : memref<8x40x64xf32, #tpu.memory_space<vmem>>, vector<1x40x64xf32>
    %13 = vector.shape_cast %12 : vector<1x40x64xf32> to vector<40x64xf32>
    %cst_15 = arith.constant dense<0.000000e+00> : vector<40x512xf32>
    %14 = tpu.matmul %13, %0, %cst_15 {dimension_numbers = #tpu.dot_dimension_numbers<[1], [0], [0], [1], [0, 0, 1, 1], [], []>} : vector<40x64xf32>, vector<64x512xf32>, vector<40x512xf32> -> vector<40x512xf32>
    %cst_16 = arith.constant dense<0.000000e+00> : vector<40x512xf32>
    %15 = tpu.matmul %10, %1, %cst_16 {dimension_numbers = #tpu.dot_dimension_numbers<[1], [0], [0], [1], [0, 0, 1, 1], [], []>} : vector<40x128xf32>, vector<128x512xf32>, vector<40x512xf32> -> vector<40x512xf32>
    %16 = arith.addf %14, %15 : vector<40x512xf32>
    %17 = arith.addf %16, %4 : vector<40x512xf32>
    %18 = vector.extract_strided_slice %17 {offsets = [0, 0], sizes = [40, 128], strides = [1, 1]} : vector<40x512xf32> to vector<40x128xf32>
    %19 = arith.negf %18 : vector<40x128xf32>
    %20 = math.exp %19 : vector<40x128xf32>
    %cst_17 = arith.constant 1.000000e+00 : f32
    %21 = vector.broadcast %cst_17 : f32 to vector<40x128xf32>
    %22 = arith.addf %21, %20 : vector<40x128xf32>
    %23 = arith.divf %21, %22 : vector<40x128xf32>
    %24 = vector.extract_strided_slice %17 {offsets = [0, 128], sizes = [40, 128], strides = [1, 1]} : vector<40x512xf32> to vector<40x128xf32>
    %25 = arith.negf %24 : vector<40x128xf32>
    %26 = math.exp %25 : vector<40x128xf32>
    %cst_18 = arith.constant 1.000000e+00 : f32
    %27 = vector.broadcast %cst_18 : f32 to vector<40x128xf32>
    %28 = arith.addf %27, %26 : vector<40x128xf32>
    %29 = arith.divf %27, %28 : vector<40x128xf32>
    %30 = vector.extract_strided_slice %17 {offsets = [0, 256], sizes = [40, 128], strides = [1, 1]} : vector<40x512xf32> to vector<40x128xf32>
    %31 = math.tanh %30 : vector<40x128xf32>
    %32 = vector.extract_strided_slice %17 {offsets = [0, 384], sizes = [40, 128], strides = [1, 1]} : vector<40x512xf32> to vector<40x128xf32>
    %33 = arith.negf %32 : vector<40x128xf32>
    %34 = math.exp %33 : vector<40x128xf32>
    %cst_19 = arith.constant 1.000000e+00 : f32
    %35 = vector.broadcast %cst_19 : f32 to vector<40x128xf32>
    %36 = arith.addf %35, %34 : vector<40x128xf32>
    %37 = arith.divf %35, %36 : vector<40x128xf32>
    %38 = arith.mulf %29, %11 : vector<40x128xf32>
    %39 = arith.mulf %23, %31 : vector<40x128xf32>
    %40 = arith.addf %38, %39 : vector<40x128xf32>
    %41 = math.tanh %40 : vector<40x128xf32>
    %42 = arith.mulf %37, %41 : vector<40x128xf32>
    %c1 = arith.constant 1 : index
    %c0_20 = arith.constant 0 : index
    %c0_21 = arith.constant 0 : index
    %43 = vector.load %arg1[%c1, %c0_20, %c0_21] : memref<8x40x64xf32, #tpu.memory_space<vmem>>, vector<1x40x64xf32>
    %44 = vector.shape_cast %43 : vector<1x40x64xf32> to vector<40x64xf32>
    %cst_22 = arith.constant dense<0.000000e+00> : vector<40x512xf32>
    %45 = tpu.matmul %44, %0, %cst_22 {dimension_numbers = #tpu.dot_dimension_numbers<[1], [0], [0], [1], [0, 0, 1, 1], [], []>} : vector<40x64xf32>, vector<64x512xf32>, vector<40x512xf32> -> vector<40x512xf32>
    %cst_23 = arith.constant dense<0.000000e+00> : vector<40x512xf32>
    %46 = tpu.matmul %42, %1, %cst_23 {dimension_numbers = #tpu.dot_dimension_numbers<[1], [0], [0], [1], [0, 0, 1, 1], [], []>} : vector<40x128xf32>, vector<128x512xf32>, vector<40x512xf32> -> vector<40x512xf32>
    %47 = arith.addf %45, %46 : vector<40x512xf32>
    %48 = arith.addf %47, %4 : vector<40x512xf32>
    %49 = vector.extract_strided_slice %48 {offsets = [0, 0], sizes = [40, 128], strides = [1, 1]} : vector<40x512xf32> to vector<40x128xf32>
    %50 = arith.negf %49 : vector<40x128xf32>
    %51 = math.exp %50 : vector<40x128xf32>
    %cst_24 = arith.constant 1.000000e+00 : f32
    %52 = vector.broadcast %cst_24 : f32 to vector<40x128xf32>
    %53 = arith.addf %52, %51 : vector<40x128xf32>
    %54 = arith.divf %52, %53 : vector<40x128xf32>
    %55 = vector.extract_strided_slice %48 {offsets = [0, 128], sizes = [40, 128], strides = [1, 1]} : vector<40x512xf32> to vector<40x128xf32>
    %56 = arith.negf %55 : vector<40x128xf32>
    %57 = math.exp %56 : vector<40x128xf32>
    %cst_25 = arith.constant 1.000000e+00 : f32
    %58 = vector.broadcast %cst_25 : f32 to vector<40x128xf32>
    %59 = arith.addf %58, %57 : vector<40x128xf32>
    %60 = arith.divf %58, %59 : vector<40x128xf32>
    %61 = vector.extract_strided_slice %48 {offsets = [0, 256], sizes = [40, 128], strides = [1, 1]} : vector<40x512xf32> to vector<40x128xf32>
    %62 = math.tanh %61 : vector<40x128xf32>
    %63 = vector.extract_strided_slice %48 {offsets = [0, 384], sizes = [40, 128], strides = [1, 1]} : vector<40x512xf32> to vector<40x128xf32>
    %64 = arith.negf %63 : vector<40x128xf32>
    %65 = math.exp %64 : vector<40x128xf32>
    %cst_26 = arith.constant 1.000000e+00 : f32
    %66 = vector.broadcast %cst_26 : f32 to vector<40x128xf32>
    %67 = arith.addf %66, %65 : vector<40x128xf32>
    %68 = arith.divf %66, %67 : vector<40x128xf32>
    %69 = arith.mulf %60, %40 : vector<40x128xf32>
    %70 = arith.mulf %54, %62 : vector<40x128xf32>
    %71 = arith.addf %69, %70 : vector<40x128xf32>
    %72 = math.tanh %71 : vector<40x128xf32>
    %73 = arith.mulf %68, %72 : vector<40x128xf32>
    %c2 = arith.constant 2 : index
    %c0_27 = arith.constant 0 : index
    %c0_28 = arith.constant 0 : index
    %74 = vector.load %arg1[%c2, %c0_27, %c0_28] : memref<8x40x64xf32, #tpu.memory_space<vmem>>, vector<1x40x64xf32>
    %75 = vector.shape_cast %74 : vector<1x40x64xf32> to vector<40x64xf32>
    %cst_29 = arith.constant dense<0.000000e+00> : vector<40x512xf32>
    %76 = tpu.matmul %75, %0, %cst_29 {dimension_numbers = #tpu.dot_dimension_numbers<[1], [0], [0], [1], [0, 0, 1, 1], [], []>} : vector<40x64xf32>, vector<64x512xf32>, vector<40x512xf32> -> vector<40x512xf32>
    %cst_30 = arith.constant dense<0.000000e+00> : vector<40x512xf32>
    %77 = tpu.matmul %73, %1, %cst_30 {dimension_numbers = #tpu.dot_dimension_numbers<[1], [0], [0], [1], [0, 0, 1, 1], [], []>} : vector<40x128xf32>, vector<128x512xf32>, vector<40x512xf32> -> vector<40x512xf32>
    %78 = arith.addf %76, %77 : vector<40x512xf32>
    %79 = arith.addf %78, %4 : vector<40x512xf32>
    %80 = vector.extract_strided_slice %79 {offsets = [0, 0], sizes = [40, 128], strides = [1, 1]} : vector<40x512xf32> to vector<40x128xf32>
    %81 = arith.negf %80 : vector<40x128xf32>
    %82 = math.exp %81 : vector<40x128xf32>
    %cst_31 = arith.constant 1.000000e+00 : f32
    %83 = vector.broadcast %cst_31 : f32 to vector<40x128xf32>
    %84 = arith.addf %83, %82 : vector<40x128xf32>
    %85 = arith.divf %83, %84 : vector<40x128xf32>
    %86 = vector.extract_strided_slice %79 {offsets = [0, 128], sizes = [40, 128], strides = [1, 1]} : vector<40x512xf32> to vector<40x128xf32>
    %87 = arith.negf %86 : vector<40x128xf32>
    %88 = math.exp %87 : vector<40x128xf32>
    %cst_32 = arith.constant 1.000000e+00 : f32
    %89 = vector.broadcast %cst_32 : f32 to vector<40x128xf32>
    %90 = arith.addf %89, %88 : vector<40x128xf32>
    %91 = arith.divf %89, %90 : vector<40x128xf32>
    %92 = vector.extract_strided_slice %79 {offsets = [0, 256], sizes = [40, 128], strides = [1, 1]} : vector<40x512xf32> to vector<40x128xf32>
    %93 = math.tanh %92 : vector<40x128xf32>
    %94 = vector.extract_strided_slice %79 {offsets = [0, 384], sizes = [40, 128], strides = [1, 1]} : vector<40x512xf32> to vector<40x128xf32>
    %95 = arith.negf %94 : vector<40x128xf32>
    %96 = math.exp %95 : vector<40x128xf32>
    %cst_33 = arith.constant 1.000000e+00 : f32
    %97 = vector.broadcast %cst_33 : f32 to vector<40x128xf32>
    %98 = arith.addf %97, %96 : vector<40x128xf32>
    %99 = arith.divf %97, %98 : vector<40x128xf32>
    %100 = arith.mulf %91, %71 : vector<40x128xf32>
    %101 = arith.mulf %85, %93 : vector<40x128xf32>
    %102 = arith.addf %100, %101 : vector<40x128xf32>
    %103 = math.tanh %102 : vector<40x128xf32>
    %104 = arith.mulf %99, %103 : vector<40x128xf32>
    %c3 = arith.constant 3 : index
    %c0_34 = arith.constant 0 : index
    %c0_35 = arith.constant 0 : index
    %105 = vector.load %arg1[%c3, %c0_34, %c0_35] : memref<8x40x64xf32, #tpu.memory_space<vmem>>, vector<1x40x64xf32>
    %106 = vector.shape_cast %105 : vector<1x40x64xf32> to vector<40x64xf32>
    %cst_36 = arith.constant dense<0.000000e+00> : vector<40x512xf32>
    %107 = tpu.matmul %106, %0, %cst_36 {dimension_numbers = #tpu.dot_dimension_numbers<[1], [0], [0], [1], [0, 0, 1, 1], [], []>} : vector<40x64xf32>, vector<64x512xf32>, vector<40x512xf32> -> vector<40x512xf32>
    %cst_37 = arith.constant dense<0.000000e+00> : vector<40x512xf32>
    %108 = tpu.matmul %104, %1, %cst_37 {dimension_numbers = #tpu.dot_dimension_numbers<[1], [0], [0], [1], [0, 0, 1, 1], [], []>} : vector<40x128xf32>, vector<128x512xf32>, vector<40x512xf32> -> vector<40x512xf32>
    %109 = arith.addf %107, %108 : vector<40x512xf32>
    %110 = arith.addf %109, %4 : vector<40x512xf32>
    %111 = vector.extract_strided_slice %110 {offsets = [0, 0], sizes = [40, 128], strides = [1, 1]} : vector<40x512xf32> to vector<40x128xf32>
    %112 = arith.negf %111 : vector<40x128xf32>
    %113 = math.exp %112 : vector<40x128xf32>
    %cst_38 = arith.constant 1.000000e+00 : f32
    %114 = vector.broadcast %cst_38 : f32 to vector<40x128xf32>
    %115 = arith.addf %114, %113 : vector<40x128xf32>
    %116 = arith.divf %114, %115 : vector<40x128xf32>
    %117 = vector.extract_strided_slice %110 {offsets = [0, 128], sizes = [40, 128], strides = [1, 1]} : vector<40x512xf32> to vector<40x128xf32>
    %118 = arith.negf %117 : vector<40x128xf32>
    %119 = math.exp %118 : vector<40x128xf32>
    %cst_39 = arith.constant 1.000000e+00 : f32
    %120 = vector.broadcast %cst_39 : f32 to vector<40x128xf32>
    %121 = arith.addf %120, %119 : vector<40x128xf32>
    %122 = arith.divf %120, %121 : vector<40x128xf32>
    %123 = vector.extract_strided_slice %110 {offsets = [0, 256], sizes = [40, 128], strides = [1, 1]} : vector<40x512xf32> to vector<40x128xf32>
    %124 = math.tanh %123 : vector<40x128xf32>
    %125 = vector.extract_strided_slice %110 {offsets = [0, 384], sizes = [40, 128], strides = [1, 1]} : vector<40x512xf32> to vector<40x128xf32>
    %126 = arith.negf %125 : vector<40x128xf32>
    %127 = math.exp %126 : vector<40x128xf32>
    %cst_40 = arith.constant 1.000000e+00 : f32
    %128 = vector.broadcast %cst_40 : f32 to vector<40x128xf32>
    %129 = arith.addf %128, %127 : vector<40x128xf32>
    %130 = arith.divf %128, %129 : vector<40x128xf32>
    %131 = arith.mulf %122, %102 : vector<40x128xf32>
    %132 = arith.mulf %116, %124 : vector<40x128xf32>
    %133 = arith.addf %131, %132 : vector<40x128xf32>
    %134 = math.tanh %133 : vector<40x128xf32>
    %135 = arith.mulf %130, %134 : vector<40x128xf32>
    %c4 = arith.constant 4 : index
    %c0_41 = arith.constant 0 : index
    %c0_42 = arith.constant 0 : index
    %136 = vector.load %arg1[%c4, %c0_41, %c0_42] : memref<8x40x64xf32, #tpu.memory_space<vmem>>, vector<1x40x64xf32>
    %137 = vector.shape_cast %136 : vector<1x40x64xf32> to vector<40x64xf32>
    %cst_43 = arith.constant dense<0.000000e+00> : vector<40x512xf32>
    %138 = tpu.matmul %137, %0, %cst_43 {dimension_numbers = #tpu.dot_dimension_numbers<[1], [0], [0], [1], [0, 0, 1, 1], [], []>} : vector<40x64xf32>, vector<64x512xf32>, vector<40x512xf32> -> vector<40x512xf32>
    %cst_44 = arith.constant dense<0.000000e+00> : vector<40x512xf32>
    %139 = tpu.matmul %135, %1, %cst_44 {dimension_numbers = #tpu.dot_dimension_numbers<[1], [0], [0], [1], [0, 0, 1, 1], [], []>} : vector<40x128xf32>, vector<128x512xf32>, vector<40x512xf32> -> vector<40x512xf32>
    %140 = arith.addf %138, %139 : vector<40x512xf32>
    %141 = arith.addf %140, %4 : vector<40x512xf32>
    %142 = vector.extract_strided_slice %141 {offsets = [0, 0], sizes = [40, 128], strides = [1, 1]} : vector<40x512xf32> to vector<40x128xf32>
    %143 = arith.negf %142 : vector<40x128xf32>
    %144 = math.exp %143 : vector<40x128xf32>
    %cst_45 = arith.constant 1.000000e+00 : f32
    %145 = vector.broadcast %cst_45 : f32 to vector<40x128xf32>
    %146 = arith.addf %145, %144 : vector<40x128xf32>
    %147 = arith.divf %145, %146 : vector<40x128xf32>
    %148 = vector.extract_strided_slice %141 {offsets = [0, 128], sizes = [40, 128], strides = [1, 1]} : vector<40x512xf32> to vector<40x128xf32>
    %149 = arith.negf %148 : vector<40x128xf32>
    %150 = math.exp %149 : vector<40x128xf32>
    %cst_46 = arith.constant 1.000000e+00 : f32
    %151 = vector.broadcast %cst_46 : f32 to vector<40x128xf32>
    %152 = arith.addf %151, %150 : vector<40x128xf32>
    %153 = arith.divf %151, %152 : vector<40x128xf32>
    %154 = vector.extract_strided_slice %141 {offsets = [0, 256], sizes = [40, 128], strides = [1, 1]} : vector<40x512xf32> to vector<40x128xf32>
    %155 = math.tanh %154 : vector<40x128xf32>
    %156 = vector.extract_strided_slice %141 {offsets = [0, 384], sizes = [40, 128], strides = [1, 1]} : vector<40x512xf32> to vector<40x128xf32>
    %157 = arith.negf %156 : vector<40x128xf32>
    %158 = math.exp %157 : vector<40x128xf32>
    %cst_47 = arith.constant 1.000000e+00 : f32
    %159 = vector.broadcast %cst_47 : f32 to vector<40x128xf32>
    %160 = arith.addf %159, %158 : vector<40x128xf32>
    %161 = arith.divf %159, %160 : vector<40x128xf32>
    %162 = arith.mulf %153, %133 : vector<40x128xf32>
    %163 = arith.mulf %147, %155 : vector<40x128xf32>
    %164 = arith.addf %162, %163 : vector<40x128xf32>
    %165 = math.tanh %164 : vector<40x128xf32>
    %166 = arith.mulf %161, %165 : vector<40x128xf32>
    %c5 = arith.constant 5 : index
    %c0_48 = arith.constant 0 : index
    %c0_49 = arith.constant 0 : index
    %167 = vector.load %arg1[%c5, %c0_48, %c0_49] : memref<8x40x64xf32, #tpu.memory_space<vmem>>, vector<1x40x64xf32>
    %168 = vector.shape_cast %167 : vector<1x40x64xf32> to vector<40x64xf32>
    %cst_50 = arith.constant dense<0.000000e+00> : vector<40x512xf32>
    %169 = tpu.matmul %168, %0, %cst_50 {dimension_numbers = #tpu.dot_dimension_numbers<[1], [0], [0], [1], [0, 0, 1, 1], [], []>} : vector<40x64xf32>, vector<64x512xf32>, vector<40x512xf32> -> vector<40x512xf32>
    %cst_51 = arith.constant dense<0.000000e+00> : vector<40x512xf32>
    %170 = tpu.matmul %166, %1, %cst_51 {dimension_numbers = #tpu.dot_dimension_numbers<[1], [0], [0], [1], [0, 0, 1, 1], [], []>} : vector<40x128xf32>, vector<128x512xf32>, vector<40x512xf32> -> vector<40x512xf32>
    %171 = arith.addf %169, %170 : vector<40x512xf32>
    %172 = arith.addf %171, %4 : vector<40x512xf32>
    %173 = vector.extract_strided_slice %172 {offsets = [0, 0], sizes = [40, 128], strides = [1, 1]} : vector<40x512xf32> to vector<40x128xf32>
    %174 = arith.negf %173 : vector<40x128xf32>
    %175 = math.exp %174 : vector<40x128xf32>
    %cst_52 = arith.constant 1.000000e+00 : f32
    %176 = vector.broadcast %cst_52 : f32 to vector<40x128xf32>
    %177 = arith.addf %176, %175 : vector<40x128xf32>
    %178 = arith.divf %176, %177 : vector<40x128xf32>
    %179 = vector.extract_strided_slice %172 {offsets = [0, 128], sizes = [40, 128], strides = [1, 1]} : vector<40x512xf32> to vector<40x128xf32>
    %180 = arith.negf %179 : vector<40x128xf32>
    %181 = math.exp %180 : vector<40x128xf32>
    %cst_53 = arith.constant 1.000000e+00 : f32
    %182 = vector.broadcast %cst_53 : f32 to vector<40x128xf32>
    %183 = arith.addf %182, %181 : vector<40x128xf32>
    %184 = arith.divf %182, %183 : vector<40x128xf32>
    %185 = vector.extract_strided_slice %172 {offsets = [0, 256], sizes = [40, 128], strides = [1, 1]} : vector<40x512xf32> to vector<40x128xf32>
    %186 = math.tanh %185 : vector<40x128xf32>
    %187 = vector.extract_strided_slice %172 {offsets = [0, 384], sizes = [40, 128], strides = [1, 1]} : vector<40x512xf32> to vector<40x128xf32>
    %188 = arith.negf %187 : vector<40x128xf32>
    %189 = math.exp %188 : vector<40x128xf32>
    %cst_54 = arith.constant 1.000000e+00 : f32
    %190 = vector.broadcast %cst_54 : f32 to vector<40x128xf32>
    %191 = arith.addf %190, %189 : vector<40x128xf32>
    %192 = arith.divf %190, %191 : vector<40x128xf32>
    %193 = arith.mulf %184, %164 : vector<40x128xf32>
    %194 = arith.mulf %178, %186 : vector<40x128xf32>
    %195 = arith.addf %193, %194 : vector<40x128xf32>
    %196 = math.tanh %195 : vector<40x128xf32>
    %197 = arith.mulf %192, %196 : vector<40x128xf32>
    %c6 = arith.constant 6 : index
    %c0_55 = arith.constant 0 : index
    %c0_56 = arith.constant 0 : index
    %198 = vector.load %arg1[%c6, %c0_55, %c0_56] : memref<8x40x64xf32, #tpu.memory_space<vmem>>, vector<1x40x64xf32>
    %199 = vector.shape_cast %198 : vector<1x40x64xf32> to vector<40x64xf32>
    %cst_57 = arith.constant dense<0.000000e+00> : vector<40x512xf32>
    %200 = tpu.matmul %199, %0, %cst_57 {dimension_numbers = #tpu.dot_dimension_numbers<[1], [0], [0], [1], [0, 0, 1, 1], [], []>} : vector<40x64xf32>, vector<64x512xf32>, vector<40x512xf32> -> vector<40x512xf32>
    %cst_58 = arith.constant dense<0.000000e+00> : vector<40x512xf32>
    %201 = tpu.matmul %197, %1, %cst_58 {dimension_numbers = #tpu.dot_dimension_numbers<[1], [0], [0], [1], [0, 0, 1, 1], [], []>} : vector<40x128xf32>, vector<128x512xf32>, vector<40x512xf32> -> vector<40x512xf32>
    %202 = arith.addf %200, %201 : vector<40x512xf32>
    %203 = arith.addf %202, %4 : vector<40x512xf32>
    %204 = vector.extract_strided_slice %203 {offsets = [0, 0], sizes = [40, 128], strides = [1, 1]} : vector<40x512xf32> to vector<40x128xf32>
    %205 = arith.negf %204 : vector<40x128xf32>
    %206 = math.exp %205 : vector<40x128xf32>
    %cst_59 = arith.constant 1.000000e+00 : f32
    %207 = vector.broadcast %cst_59 : f32 to vector<40x128xf32>
    %208 = arith.addf %207, %206 : vector<40x128xf32>
    %209 = arith.divf %207, %208 : vector<40x128xf32>
    %210 = vector.extract_strided_slice %203 {offsets = [0, 128], sizes = [40, 128], strides = [1, 1]} : vector<40x512xf32> to vector<40x128xf32>
    %211 = arith.negf %210 : vector<40x128xf32>
    %212 = math.exp %211 : vector<40x128xf32>
    %cst_60 = arith.constant 1.000000e+00 : f32
    %213 = vector.broadcast %cst_60 : f32 to vector<40x128xf32>
    %214 = arith.addf %213, %212 : vector<40x128xf32>
    %215 = arith.divf %213, %214 : vector<40x128xf32>
    %216 = vector.extract_strided_slice %203 {offsets = [0, 256], sizes = [40, 128], strides = [1, 1]} : vector<40x512xf32> to vector<40x128xf32>
    %217 = math.tanh %216 : vector<40x128xf32>
    %218 = vector.extract_strided_slice %203 {offsets = [0, 384], sizes = [40, 128], strides = [1, 1]} : vector<40x512xf32> to vector<40x128xf32>
    %219 = arith.negf %218 : vector<40x128xf32>
    %220 = math.exp %219 : vector<40x128xf32>
    %cst_61 = arith.constant 1.000000e+00 : f32
    %221 = vector.broadcast %cst_61 : f32 to vector<40x128xf32>
    %222 = arith.addf %221, %220 : vector<40x128xf32>
    %223 = arith.divf %221, %222 : vector<40x128xf32>
    %224 = arith.mulf %215, %195 : vector<40x128xf32>
    %225 = arith.mulf %209, %217 : vector<40x128xf32>
    %226 = arith.addf %224, %225 : vector<40x128xf32>
    %227 = math.tanh %226 : vector<40x128xf32>
    %228 = arith.mulf %223, %227 : vector<40x128xf32>
    %c7 = arith.constant 7 : index
    %c0_62 = arith.constant 0 : index
    %c0_63 = arith.constant 0 : index
    %229 = vector.load %arg1[%c7, %c0_62, %c0_63] : memref<8x40x64xf32, #tpu.memory_space<vmem>>, vector<1x40x64xf32>
    %230 = vector.shape_cast %229 : vector<1x40x64xf32> to vector<40x64xf32>
    %cst_64 = arith.constant dense<0.000000e+00> : vector<40x512xf32>
    %231 = tpu.matmul %230, %0, %cst_64 {dimension_numbers = #tpu.dot_dimension_numbers<[1], [0], [0], [1], [0, 0, 1, 1], [], []>} : vector<40x64xf32>, vector<64x512xf32>, vector<40x512xf32> -> vector<40x512xf32>
    %cst_65 = arith.constant dense<0.000000e+00> : vector<40x512xf32>
    %232 = tpu.matmul %228, %1, %cst_65 {dimension_numbers = #tpu.dot_dimension_numbers<[1], [0], [0], [1], [0, 0, 1, 1], [], []>} : vector<40x128xf32>, vector<128x512xf32>, vector<40x512xf32> -> vector<40x512xf32>
    %233 = arith.addf %231, %232 : vector<40x512xf32>
    %234 = arith.addf %233, %4 : vector<40x512xf32>
    %235 = vector.extract_strided_slice %234 {offsets = [0, 0], sizes = [40, 128], strides = [1, 1]} : vector<40x512xf32> to vector<40x128xf32>
    %236 = arith.negf %235 : vector<40x128xf32>
    %237 = math.exp %236 : vector<40x128xf32>
    %cst_66 = arith.constant 1.000000e+00 : f32
    %238 = vector.broadcast %cst_66 : f32 to vector<40x128xf32>
    %239 = arith.addf %238, %237 : vector<40x128xf32>
    %240 = arith.divf %238, %239 : vector<40x128xf32>
    %241 = vector.extract_strided_slice %234 {offsets = [0, 128], sizes = [40, 128], strides = [1, 1]} : vector<40x512xf32> to vector<40x128xf32>
    %242 = arith.negf %241 : vector<40x128xf32>
    %243 = math.exp %242 : vector<40x128xf32>
    %cst_67 = arith.constant 1.000000e+00 : f32
    %244 = vector.broadcast %cst_67 : f32 to vector<40x128xf32>
    %245 = arith.addf %244, %243 : vector<40x128xf32>
    %246 = arith.divf %244, %245 : vector<40x128xf32>
    %247 = vector.extract_strided_slice %234 {offsets = [0, 256], sizes = [40, 128], strides = [1, 1]} : vector<40x512xf32> to vector<40x128xf32>
    %248 = math.tanh %247 : vector<40x128xf32>
    %249 = vector.extract_strided_slice %234 {offsets = [0, 384], sizes = [40, 128], strides = [1, 1]} : vector<40x512xf32> to vector<40x128xf32>
    %250 = arith.negf %249 : vector<40x128xf32>
    %251 = math.exp %250 : vector<40x128xf32>
    %cst_68 = arith.constant 1.000000e+00 : f32
    %252 = vector.broadcast %cst_68 : f32 to vector<40x128xf32>
    %253 = arith.addf %252, %251 : vector<40x128xf32>
    %254 = arith.divf %252, %253 : vector<40x128xf32>
    %255 = arith.mulf %246, %226 : vector<40x128xf32>
    %256 = arith.mulf %240, %248 : vector<40x128xf32>
    %257 = arith.addf %255, %256 : vector<40x128xf32>
    %258 = math.tanh %257 : vector<40x128xf32>
    %259 = arith.mulf %254, %258 : vector<40x128xf32>
    %c0_69 = arith.constant 0 : index
    %c0_70 = arith.constant 0 : index
    %260 = vector.load %arg2[%c0_69, %c0_70] : memref<40x128xf32, #tpu.memory_space<vmem>>, vector<40x128xf32>
    %c0_i32 = arith.constant 0 : i32
    %c10_i32 = arith.constant 10 : i32
    %261 = arith.addi %c0_i32, %c10_i32 : i32
    %c1_i32 = arith.constant 1 : i32
    %262:3 = scf.for %arg10 = %c0_i32 to %261 step %c1_i32 iter_args(%arg11 = %260, %arg12 = %259, %arg13 = %257) -> (vector<40x128xf32>, vector<40x128xf32>, vector<40x128xf32>)  : i32 {
      %c4_i32 = arith.constant 4 : i32
      %263 = arith.muli %arg10, %c4_i32 : i32
      %cst_72 = arith.constant dense<0.000000e+00> : vector<40x512xf32>
      %264 = tpu.matmul %arg11, %5, %cst_72 {dimension_numbers = #tpu.dot_dimension_numbers<[1], [0], [0], [1], [0, 0, 1, 1], [], []>} : vector<40x128xf32>, vector<128x512xf32>, vector<40x512xf32> -> vector<40x512xf32>
      %cst_73 = arith.constant dense<0.000000e+00> : vector<40x512xf32>
      %265 = tpu.matmul %arg12, %6, %cst_73 {dimension_numbers = #tpu.dot_dimension_numbers<[1], [0], [0], [1], [0, 0, 1, 1], [], []>} : vector<40x128xf32>, vector<128x512xf32>, vector<40x512xf32> -> vector<40x512xf32>
      %266 = arith.addf %264, %265 : vector<40x512xf32>
      %267 = arith.addf %266, %9 : vector<40x512xf32>
      %268 = vector.extract_strided_slice %267 {offsets = [0, 0], sizes = [40, 128], strides = [1, 1]} : vector<40x512xf32> to vector<40x128xf32>
      %269 = arith.negf %268 : vector<40x128xf32>
      %270 = math.exp %269 : vector<40x128xf32>
      %cst_74 = arith.constant 1.000000e+00 : f32
      %271 = vector.broadcast %cst_74 : f32 to vector<40x128xf32>
      %272 = arith.addf %271, %270 : vector<40x128xf32>
      %273 = arith.divf %271, %272 : vector<40x128xf32>
      %274 = vector.extract_strided_slice %267 {offsets = [0, 128], sizes = [40, 128], strides = [1, 1]} : vector<40x512xf32> to vector<40x128xf32>
      %275 = arith.negf %274 : vector<40x128xf32>
      %276 = math.exp %275 : vector<40x128xf32>
      %cst_75 = arith.constant 1.000000e+00 : f32
      %277 = vector.broadcast %cst_75 : f32 to vector<40x128xf32>
      %278 = arith.addf %277, %276 : vector<40x128xf32>
      %279 = arith.divf %277, %278 : vector<40x128xf32>
      %280 = vector.extract_strided_slice %267 {offsets = [0, 256], sizes = [40, 128], strides = [1, 1]} : vector<40x512xf32> to vector<40x128xf32>
      %281 = math.tanh %280 : vector<40x128xf32>
      %282 = vector.extract_strided_slice %267 {offsets = [0, 384], sizes = [40, 128], strides = [1, 1]} : vector<40x512xf32> to vector<40x128xf32>
      %283 = arith.negf %282 : vector<40x128xf32>
      %284 = math.exp %283 : vector<40x128xf32>
      %cst_76 = arith.constant 1.000000e+00 : f32
      %285 = vector.broadcast %cst_76 : f32 to vector<40x128xf32>
      %286 = arith.addf %285, %284 : vector<40x128xf32>
      %287 = arith.divf %285, %286 : vector<40x128xf32>
      %288 = arith.mulf %279, %arg13 : vector<40x128xf32>
      %289 = arith.mulf %273, %281 : vector<40x128xf32>
      %290 = arith.addf %288, %289 : vector<40x128xf32>
      %291 = math.tanh %290 : vector<40x128xf32>
      %292 = arith.mulf %287, %291 : vector<40x128xf32>
      %c0_i32_77 = arith.constant 0 : i32
      %293 = arith.addi %263, %c0_i32_77 : i32
      %294 = arith.index_cast %293 : i32 to index
      %c0_78 = arith.constant 0 : index
      %c0_79 = arith.constant 0 : index
      %295 = vector.load %arg9[%294, %c0_78, %c0_79] : memref<40x40x128xf32, #tpu.memory_space<vmem>>, vector<1x40x128xf32>
      %296 = vector.shape_cast %295 : vector<1x40x128xf32> to vector<40x128xf32>
      %297 = vector.shape_cast %292 : vector<40x128xf32> to vector<1x40x128xf32>
      tpu.vector_store %arg9[%294, %c0_78, %c0_79], %297 {strides = array<i32>} : memref<40x40x128xf32, #tpu.memory_space<vmem>>, vector<1x40x128xf32>,
      %cst_80 = arith.constant dense<0.000000e+00> : vector<40x512xf32>
      %298 = tpu.matmul %292, %5, %cst_80 {dimension_numbers = #tpu.dot_dimension_numbers<[1], [0], [0], [1], [0, 0, 1, 1], [], []>} : vector<40x128xf32>, vector<128x512xf32>, vector<40x512xf32> -> vector<40x512xf32>
      %cst_81 = arith.constant dense<0.000000e+00> : vector<40x512xf32>
      %299 = tpu.matmul %292, %6, %cst_81 {dimension_numbers = #tpu.dot_dimension_numbers<[1], [0], [0], [1], [0, 0, 1, 1], [], []>} : vector<40x128xf32>, vector<128x512xf32>, vector<40x512xf32> -> vector<40x512xf32>
      %300 = arith.addf %298, %299 : vector<40x512xf32>
      %301 = arith.addf %300, %9 : vector<40x512xf32>
      %302 = vector.extract_strided_slice %301 {offsets = [0, 0], sizes = [40, 128], strides = [1, 1]} : vector<40x512xf32> to vector<40x128xf32>
      %303 = arith.negf %302 : vector<40x128xf32>
      %304 = math.exp %303 : vector<40x128xf32>
      %cst_82 = arith.constant 1.000000e+00 : f32
      %305 = vector.broadcast %cst_82 : f32 to vector<40x128xf32>
      %306 = arith.addf %305, %304 : vector<40x128xf32>
      %307 = arith.divf %305, %306 : vector<40x128xf32>
      %308 = vector.extract_strided_slice %301 {offsets = [0, 128], sizes = [40, 128], strides = [1, 1]} : vector<40x512xf32> to vector<40x128xf32>
      %309 = arith.negf %308 : vector<40x128xf32>
      %310 = math.exp %309 : vector<40x128xf32>
      %cst_83 = arith.constant 1.000000e+00 : f32
      %311 = vector.broadcast %cst_83 : f32 to vector<40x128xf32>
      %312 = arith.addf %311, %310 : vector<40x128xf32>
      %313 = arith.divf %311, %312 : vector<40x128xf32>
      %314 = vector.extract_strided_slice %301 {offsets = [0, 256], sizes = [40, 128], strides = [1, 1]} : vector<40x512xf32> to vector<40x128xf32>
      %315 = math.tanh %314 : vector<40x128xf32>
      %316 = vector.extract_strided_slice %301 {offsets = [0, 384], sizes = [40, 128], strides = [1, 1]} : vector<40x512xf32> to vector<40x128xf32>
      %317 = arith.negf %316 : vector<40x128xf32>
      %318 = math.exp %317 : vector<40x128xf32>
      %cst_84 = arith.constant 1.000000e+00 : f32
      %319 = vector.broadcast %cst_84 : f32 to vector<40x128xf32>
      %320 = arith.addf %319, %318 : vector<40x128xf32>
      %321 = arith.divf %319, %320 : vector<40x128xf32>
      %322 = arith.mulf %313, %290 : vector<40x128xf32>
      %323 = arith.mulf %307, %315 : vector<40x128xf32>
      %324 = arith.addf %322, %323 : vector<40x128xf32>
      %325 = math.tanh %324 : vector<40x128xf32>
      %326 = arith.mulf %321, %325 : vector<40x128xf32>
      %c1_i32_85 = arith.constant 1 : i32
      %327 = arith.addi %263, %c1_i32_85 : i32
      %328 = arith.index_cast %327 : i32 to index
      %c0_86 = arith.constant 0 : index
      %c0_87 = arith.constant 0 : index
      %329 = vector.load %arg9[%328, %c0_86, %c0_87] : memref<40x40x128xf32, #tpu.memory_space<vmem>>, vector<1x40x128xf32>
      %330 = vector.shape_cast %329 : vector<1x40x128xf32> to vector<40x128xf32>
      %331 = vector.shape_cast %326 : vector<40x128xf32> to vector<1x40x128xf32>
      tpu.vector_store %arg9[%328, %c0_86, %c0_87], %331 {strides = array<i32>} : memref<40x40x128xf32, #tpu.memory_space<vmem>>, vector<1x40x128xf32>,
      %cst_88 = arith.constant dense<0.000000e+00> : vector<40x512xf32>
      %332 = tpu.matmul %326, %5, %cst_88 {dimension_numbers = #tpu.dot_dimension_numbers<[1], [0], [0], [1], [0, 0, 1, 1], [], []>} : vector<40x128xf32>, vector<128x512xf32>, vector<40x512xf32> -> vector<40x512xf32>
      %cst_89 = arith.constant dense<0.000000e+00> : vector<40x512xf32>
      %333 = tpu.matmul %326, %6, %cst_89 {dimension_numbers = #tpu.dot_dimension_numbers<[1], [0], [0], [1], [0, 0, 1, 1], [], []>} : vector<40x128xf32>, vector<128x512xf32>, vector<40x512xf32> -> vector<40x512xf32>
      %334 = arith.addf %332, %333 : vector<40x512xf32>
      %335 = arith.addf %334, %9 : vector<40x512xf32>
      %336 = vector.extract_strided_slice %335 {offsets = [0, 0], sizes = [40, 128], strides = [1, 1]} : vector<40x512xf32> to vector<40x128xf32>
      %337 = arith.negf %336 : vector<40x128xf32>
      %338 = math.exp %337 : vector<40x128xf32>
      %cst_90 = arith.constant 1.000000e+00 : f32
      %339 = vector.broadcast %cst_90 : f32 to vector<40x128xf32>
      %340 = arith.addf %339, %338 : vector<40x128xf32>
      %341 = arith.divf %339, %340 : vector<40x128xf32>
      %342 = vector.extract_strided_slice %335 {offsets = [0, 128], sizes = [40, 128], strides = [1, 1]} : vector<40x512xf32> to vector<40x128xf32>
      %343 = arith.negf %342 : vector<40x128xf32>
      %344 = math.exp %343 : vector<40x128xf32>
      %cst_91 = arith.constant 1.000000e+00 : f32
      %345 = vector.broadcast %cst_91 : f32 to vector<40x128xf32>
      %346 = arith.addf %345, %344 : vector<40x128xf32>
      %347 = arith.divf %345, %346 : vector<40x128xf32>
      %348 = vector.extract_strided_slice %335 {offsets = [0, 256], sizes = [40, 128], strides = [1, 1]} : vector<40x512xf32> to vector<40x128xf32>
      %349 = math.tanh %348 : vector<40x128xf32>
      %350 = vector.extract_strided_slice %335 {offsets = [0, 384], sizes = [40, 128], strides = [1, 1]} : vector<40x512xf32> to vector<40x128xf32>
      %351 = arith.negf %350 : vector<40x128xf32>
      %352 = math.exp %351 : vector<40x128xf32>
      %cst_92 = arith.constant 1.000000e+00 : f32
      %353 = vector.broadcast %cst_92 : f32 to vector<40x128xf32>
      %354 = arith.addf %353, %352 : vector<40x128xf32>
      %355 = arith.divf %353, %354 : vector<40x128xf32>
      %356 = arith.mulf %347, %324 : vector<40x128xf32>
      %357 = arith.mulf %341, %349 : vector<40x128xf32>
      %358 = arith.addf %356, %357 : vector<40x128xf32>
      %359 = math.tanh %358 : vector<40x128xf32>
      %360 = arith.mulf %355, %359 : vector<40x128xf32>
      %c2_i32 = arith.constant 2 : i32
      %361 = arith.addi %263, %c2_i32 : i32
      %362 = arith.index_cast %361 : i32 to index
      %c0_93 = arith.constant 0 : index
      %c0_94 = arith.constant 0 : index
      %363 = vector.load %arg9[%362, %c0_93, %c0_94] : memref<40x40x128xf32, #tpu.memory_space<vmem>>, vector<1x40x128xf32>
      %364 = vector.shape_cast %363 : vector<1x40x128xf32> to vector<40x128xf32>
      %365 = vector.shape_cast %360 : vector<40x128xf32> to vector<1x40x128xf32>
      tpu.vector_store %arg9[%362, %c0_93, %c0_94], %365 {strides = array<i32>} : memref<40x40x128xf32, #tpu.memory_space<vmem>>, vector<1x40x128xf32>,
      %cst_95 = arith.constant dense<0.000000e+00> : vector<40x512xf32>
      %366 = tpu.matmul %360, %5, %cst_95 {dimension_numbers = #tpu.dot_dimension_numbers<[1], [0], [0], [1], [0, 0, 1, 1], [], []>} : vector<40x128xf32>, vector<128x512xf32>, vector<40x512xf32> -> vector<40x512xf32>
      %cst_96 = arith.constant dense<0.000000e+00> : vector<40x512xf32>
      %367 = tpu.matmul %360, %6, %cst_96 {dimension_numbers = #tpu.dot_dimension_numbers<[1], [0], [0], [1], [0, 0, 1, 1], [], []>} : vector<40x128xf32>, vector<128x512xf32>, vector<40x512xf32> -> vector<40x512xf32>
      %368 = arith.addf %366, %367 : vector<40x512xf32>
      %369 = arith.addf %368, %9 : vector<40x512xf32>
      %370 = vector.extract_strided_slice %369 {offsets = [0, 0], sizes = [40, 128], strides = [1, 1]} : vector<40x512xf32> to vector<40x128xf32>
      %371 = arith.negf %370 : vector<40x128xf32>
      %372 = math.exp %371 : vector<40x128xf32>
      %cst_97 = arith.constant 1.000000e+00 : f32
      %373 = vector.broadcast %cst_97 : f32 to vector<40x128xf32>
      %374 = arith.addf %373, %372 : vector<40x128xf32>
      %375 = arith.divf %373, %374 : vector<40x128xf32>
      %376 = vector.extract_strided_slice %369 {offsets = [0, 128], sizes = [40, 128], strides = [1, 1]} : vector<40x512xf32> to vector<40x128xf32>
      %377 = arith.negf %376 : vector<40x128xf32>
      %378 = math.exp %377 : vector<40x128xf32>
      %cst_98 = arith.constant 1.000000e+00 : f32
      %379 = vector.broadcast %cst_98 : f32 to vector<40x128xf32>
      %380 = arith.addf %379, %378 : vector<40x128xf32>
      %381 = arith.divf %379, %380 : vector<40x128xf32>
      %382 = vector.extract_strided_slice %369 {offsets = [0, 256], sizes = [40, 128], strides = [1, 1]} : vector<40x512xf32> to vector<40x128xf32>
      %383 = math.tanh %382 : vector<40x128xf32>
      %384 = vector.extract_strided_slice %369 {offsets = [0, 384], sizes = [40, 128], strides = [1, 1]} : vector<40x512xf32> to vector<40x128xf32>
      %385 = arith.negf %384 : vector<40x128xf32>
      %386 = math.exp %385 : vector<40x128xf32>
      %cst_99 = arith.constant 1.000000e+00 : f32
      %387 = vector.broadcast %cst_99 : f32 to vector<40x128xf32>
      %388 = arith.addf %387, %386 : vector<40x128xf32>
      %389 = arith.divf %387, %388 : vector<40x128xf32>
      %390 = arith.mulf %381, %358 : vector<40x128xf32>
      %391 = arith.mulf %375, %383 : vector<40x128xf32>
      %392 = arith.addf %390, %391 : vector<40x128xf32>
      %393 = math.tanh %392 : vector<40x128xf32>
      %394 = arith.mulf %389, %393 : vector<40x128xf32>
      %c3_i32 = arith.constant 3 : i32
      %395 = arith.addi %263, %c3_i32 : i32
      %396 = arith.index_cast %395 : i32 to index
      %c0_100 = arith.constant 0 : index
      %c0_101 = arith.constant 0 : index
      %397 = vector.load %arg9[%396, %c0_100, %c0_101] : memref<40x40x128xf32, #tpu.memory_space<vmem>>, vector<1x40x128xf32>
      %398 = vector.shape_cast %397 : vector<1x40x128xf32> to vector<40x128xf32>
      %399 = vector.shape_cast %394 : vector<40x128xf32> to vector<1x40x128xf32>
      tpu.vector_store %arg9[%396, %c0_100, %c0_101], %399 {strides = array<i32>} : memref<40x40x128xf32, #tpu.memory_space<vmem>>, vector<1x40x128xf32>,
      scf.yield %394, %394, %392 : vector<40x128xf32>, vector<40x128xf32>, vector<40x128xf32>
    }
    %c10_i32_71 = arith.constant 10 : i32
    return
  }
  func.func @transform_0(%arg0: i32) -> (i32, i32, i32) {
    %c0_i32 = arith.constant 0 : i32
    %c0_i32_0 = arith.constant 0 : i32
    %c0_i32_1 = arith.constant 0 : i32
    %c0_i32_2 = arith.constant 0 : i32
    return %c0_i32, %c0_i32_0, %c0_i32_1 : i32, i32, i32
  }
  func.func @transform_1(%arg0: i32) -> (i32, i32) {
    %c0_i32 = arith.constant 0 : i32
    %c0_i32_0 = arith.constant 0 : i32
    %c0_i32_1 = arith.constant 0 : i32
    return %c0_i32, %c0_i32_0 : i32, i32
  }
  func.func @transform_2(%arg0: i32) -> (i32, i32) {
    %c0_i32 = arith.constant 0 : i32
    %c0_i32_0 = arith.constant 0 : i32
    %c0_i32_1 = arith.constant 0 : i32
    return %c0_i32, %c0_i32_0 : i32, i32
  }
  func.func @transform_3(%arg0: i32) -> (i32, i32) {
    %c0_i32 = arith.constant 0 : i32
    %c0_i32_0 = arith.constant 0 : i32
    %c0_i32_1 = arith.constant 0 : i32
    return %c0_i32, %c0_i32_0 : i32, i32
  }
  func.func @transform_4(%arg0: i32) -> (i32, i32) {
    %c0_i32 = arith.constant 0 : i32
    %c0_i32_0 = arith.constant 0 : i32
    %c0_i32_1 = arith.constant 0 : i32
    return %c0_i32, %c0_i32_0 : i32, i32
  }
  func.func @transform_5(%arg0: i32) -> (i32, i32) {
    %c0_i32 = arith.constant 0 : i32
    %c0_i32_0 = arith.constant 0 : i32
    %c0_i32_1 = arith.constant 0 : i32
    return %c0_i32, %c0_i32_0 : i32, i32
  }
  func.func @transform_6(%arg0: i32) -> (i32, i32) {
    %c0_i32 = arith.constant 0 : i32
    %c0_i32_0 = arith.constant 0 : i32
    %c0_i32_1 = arith.constant 0 : i32
    return %c0_i32, %c0_i32_0 : i32, i32
  }
  func.func @transform_7(%arg0: i32) -> (i32, i32) {
    %c0_i32 = arith.constant 0 : i32
    %c0_i32_0 = arith.constant 0 : i32
    %c0_i32_1 = arith.constant 0 : i32
    return %c0_i32, %c0_i32_0 : i32, i32
  }
  func.func @transform_8(%arg0: i32) -> (i32, i32, i32) {
    %c0_i32 = arith.constant 0 : i32
    %c0_i32_0 = arith.constant 0 : i32
    %c0_i32_1 = arith.constant 0 : i32
    %c0_i32_2 = arith.constant 0 : i32
    return %c0_i32, %c0_i32_0, %c0_i32_1 : i32, i32, i32
  }
}

</mosaic_0001>

<bundles_post_ra>
// kernel: seq2seq_forward.1
= control target key start
LH: loop header
LB: loop body
LE: loop exit
PB: predicated region body
PF: predicated region fallthrough
CT: control target
= control target key end

     0   :  { %v14021_v3 = vmov 0.0   ;;  %vm492_vm0 = vcmask 523264   ;;  %s14012_s3 = inlined_call_operand.vmem [shape: f32[128,512], index: 3, kind: input, shape index: {}]   ;;  %s14013_s5 = inlined_call_operand.vmem [shape: f32[128,512], index: 5, kind: input, shape index: {}]   ;;  %s14014_s8 = inlined_call_operand.vmem [shape: f32[40,40,128], index: 8, kind: output, shape index: {}]   ;;  %s14015_s6 = inlined_call_operand.vmem [shape: f32[128,512], index: 6, kind: input, shape index: {}]   ;;  %s14016_s2 = inlined_call_operand.vmem [shape: f32[64,512], index: 2, kind: input, shape index: {}]   ;;  %s14017_s0 = inlined_call_operand.vmem [shape: f32[8,40,64], index: 0, kind: input, shape index: {}]   ;;  %s14018_s7 = inlined_call_operand.vmem [shape: f32[1,512], index: 7, kind: input, shape index: {}]   ;;  %s14019_s4 = inlined_call_operand.vmem [shape: f32[1,512], index: 4, kind: input, shape index: {}]   ;;  %s14020_s1 = inlined_call_operand.vmem [shape: f32[40,128], index: 1, kind: input, shape index: {}]  }
   0x1   :  { %v8705_v0 = vld [vmem:[%s14012_s3 + $0x1e8] sm:$0xff]  ;;  %v8710_v1 = vld [vmem:[%s14013_s5] sm:$0xff]  ;;  %366 = vmatprep.mubr.f32.mxu0 %v14021_v3  ;;  %461 = vmatprep.mubr.f32.mxu1 %v14021_v3  ;;  %v8722_v4 = vld [vmem:[%s14013_s5 + $0x10] sm:$0xff] }
   0x2   :  { %14448 = vst [vmem:[#allocation2_spill] sm:$0xff] %v8710_v1  ;;  %v8715_v2 = vld [vmem:[%s14013_s5 + $0x8] sm:$0xff]  ;;  %14450 = vst [vmem:[#allocation4_spill] sm:$0xff] %v8722_v4  ;;  %v8727_v5 = vld [vmem:[%s14013_s5 + $0x18] sm:$0xff]  ;;  %302 = vmatprep.subr.mxu0 %v8705_v0 }
   0x3   :  { %14449 = vst [vmem:[#allocation3_spill] sm:$0xff] %v8715_v2  ;;  %14451 = vst [vmem:[#allocation5_spill] sm:$0xff] %v8727_v5  ;;  %v8732_v6 = vld [vmem:[%s14013_s5 + $0x20] sm:$0xff]  ;;  %v8738_v7 = vld [vmem:[%s14013_s5 + $0x28] sm:$0xff] }
   0x4   :  { %14452 = vst [vmem:[#allocation6_spill] sm:$0xff] %v8732_v6  ;;  %14453 = vst [vmem:[#allocation7_spill] sm:$0xff] %v8738_v7  ;;  %v8743_v8 = vld [vmem:[%s14013_s5 + $0x30] sm:$0xff]  ;;  %v8748_v9 = vld [vmem:[%s14013_s5 + $0x38] sm:$0xff] }
   0x5   :  { %14454 = vst [vmem:[#allocation8_spill] sm:$0xff] %v8743_v8  ;;  %14455 = vst [vmem:[#allocation9_spill] sm:$0xff] %v8748_v9  ;;  %v8753_v10 = vld [vmem:[%s14013_s5 + $0x40] sm:$0xff]  ;;  %v8758_v11 = vld [vmem:[%s14013_s5 + $0x48] sm:$0xff] }
   0x6   :  { %14456 = vst [vmem:[#allocation10_spill] sm:$0xff] %v8753_v10  ;;  %14457 = vst [vmem:[#allocation11_spill] sm:$0xff] %v8758_v11  ;;  %v8763_v12 = vld [vmem:[%s14013_s5 + $0x50] sm:$0xff]  ;;  %v8768_v13 = vld [vmem:[%s14013_s5 + $0x58] sm:$0xff] }
   0x7   :  { %14458 = vst [vmem:[#allocation12_spill] sm:$0xff] %v8763_v12  ;;  %14459 = vst [vmem:[#allocation13_spill] sm:$0xff] %v8768_v13  ;;  %v8773_v14 = vld [vmem:[%s14013_s5 + $0x60] sm:$0xff]  ;;  %v8778_v15 = vld [vmem:[%s14013_s5 + $0x68] sm:$0xff] }
   0x8   :  { %14460 = vst [vmem:[#allocation14_spill] sm:$0xff] %v8773_v14  ;;  %14461 = vst [vmem:[#allocation15_spill] sm:$0xff] %v8778_v15  ;;  %v8783_v16 = vld [vmem:[%s14013_s5 + $0x70] sm:$0xff]  ;;  %v8788_v17 = vld [vmem:[%s14013_s5 + $0x78] sm:$0xff] }
   0x9   :  { %14462 = vst [vmem:[#allocation16_spill] sm:$0xff] %v8783_v16  ;;  %14463 = vst [vmem:[#allocation17_spill] sm:$0xff] %v8788_v17  ;;  %v8793_v18 = vld [vmem:[%s14013_s5 + $0x80] sm:$0xff]  ;;  %v8798_v19 = vld [vmem:[%s14013_s5 + $0x88] sm:$0xff] }
   0xa   :  { %14464 = vst [vmem:[#allocation18_spill] sm:$0xff] %v8793_v18  ;;  %14465 = vst [vmem:[#allocation19_spill] sm:$0xff] %v8798_v19  ;;  %v8803_v20 = vld [vmem:[%s14013_s5 + $0x90] sm:$0xff]  ;;  %v8808_v21 = vld [vmem:[%s14013_s5 + $0x98] sm:$0xff] }
   0xb   :  { %14466 = vst [vmem:[#allocation20_spill] sm:$0xff] %v8803_v20  ;;  %14467 = vst [vmem:[#allocation21_spill] sm:$0xff] %v8808_v21  ;;  %v8813_v22 = vld [vmem:[%s14013_s5 + $0xa0] sm:$0xff]  ;;  %v8818_v23 = vld [vmem:[%s14013_s5 + $0xa8] sm:$0xff] }
   0xc   :  { %14468 = vst [vmem:[#allocation22_spill] sm:$0xff] %v8813_v22  ;;  %14469 = vst [vmem:[#allocation23_spill] sm:$0xff] %v8818_v23  ;;  %v8823_v24 = vld [vmem:[%s14013_s5 + $0xb0] sm:$0xff]  ;;  %v8828_v25 = vld [vmem:[%s14013_s5 + $0xb8] sm:$0xff] }
   0xd   :  { %14470 = vst [vmem:[#allocation24_spill] sm:$0xff] %v8823_v24  ;;  %14471 = vst [vmem:[#allocation25_spill] sm:$0xff] %v8828_v25  ;;  %v8833_v26 = vld [vmem:[%s14013_s5 + $0xc0] sm:$0xff]  ;;  %v8838_v27 = vld [vmem:[%s14013_s5 + $0xc8] sm:$0xff] }
   0xe   :  { %14472 = vst [vmem:[#allocation26_spill] sm:$0xff] %v8833_v26  ;;  %14473 = vst [vmem:[#allocation27_spill] sm:$0xff] %v8838_v27  ;;  %v8843_v28 = vld [vmem:[%s14013_s5 + $0xd0] sm:$0xff]  ;;  %v8848_v29 = vld [vmem:[%s14013_s5 + $0xd8] sm:$0xff] }
   0xf   :  { %14474 = vst [vmem:[#allocation28_spill] sm:$0xff] %v8843_v28  ;;  %14475 = vst [vmem:[#allocation29_spill] sm:$0xff] %v8848_v29  ;;  %v8853_v30 = vld [vmem:[%s14013_s5 + $0xe0] sm:$0xff]  ;;  %v8858_v31 = vld [vmem:[%s14013_s5 + $0xe8] sm:$0xff] }
  0x10   :  { %14476 = vst [vmem:[#allocation30_spill] sm:$0xff] %v8853_v30  ;;  %14477 = vst [vmem:[#allocation31_spill] sm:$0xff] %v8858_v31  ;;  %v8863_v32 = vld [vmem:[%s14013_s5 + $0xf0] sm:$0xff]  ;;  %v8868_v33 = vld [vmem:[%s14013_s5 + $0xf8] sm:$0xff] }
  0x11   :  { %14478 = vst [vmem:[#allocation32_spill] sm:$0xff] %v8863_v32  ;;  %14479 = vst [vmem:[#allocation33_spill] sm:$0xff] %v8868_v33  ;;  %v8873_v34 = vld [vmem:[%s14013_s5 + $0x100] sm:$0xff]  ;;  %v8878_v35 = vld [vmem:[%s14013_s5 + $0x108] sm:$0xff] }
  0x12   :  { %14480 = vst [vmem:[#allocation34_spill] sm:$0xff] %v8873_v34  ;;  %14481 = vst [vmem:[#allocation35_spill] sm:$0xff] %v8878_v35  ;;  %v8883_v36 = vld [vmem:[%s14013_s5 + $0x110] sm:$0xff]  ;;  %v8888_v37 = vld [vmem:[%s14013_s5 + $0x118] sm:$0xff] }
  0x13   :  { %14482 = vst [vmem:[#allocation36_spill] sm:$0xff] %v8883_v36  ;;  %14483 = vst [vmem:[#allocation37_spill] sm:$0xff] %v8888_v37  ;;  %v8893_v38 = vld [vmem:[%s14013_s5 + $0x120] sm:$0xff]  ;;  %v8898_v39 = vld [vmem:[%s14013_s5 + $0x128] sm:$0xff] }
  0x14   :  { %14484 = vst [vmem:[#allocation38_spill] sm:$0xff] %v8893_v38  ;;  %14485 = vst [vmem:[#allocation39_spill] sm:$0xff] %v8898_v39  ;;  %v8903_v40 = vld [vmem:[%s14013_s5 + $0x130] sm:$0xff]  ;;  %v8908_v41 = vld [vmem:[%s14013_s5 + $0x138] sm:$0xff] }
  0x15   :  { %14486 = vst [vmem:[#allocation40_spill] sm:$0xff] %v8903_v40  ;;  %14487 = vst [vmem:[#allocation41_spill] sm:$0xff] %v8908_v41  ;;  %v8913_v42 = vld [vmem:[%s14013_s5 + $0x140] sm:$0xff]  ;;  %v8918_v43 = vld [vmem:[%s14013_s5 + $0x148] sm:$0xff] }
  0x16   :  { %14488 = vst [vmem:[#allocation42_spill] sm:$0xff] %v8913_v42  ;;  %14489 = vst [vmem:[#allocation43_spill] sm:$0xff] %v8918_v43  ;;  %v8923_v44 = vld [vmem:[%s14013_s5 + $0x150] sm:$0xff]  ;;  %v8928_v45 = vld [vmem:[%s14013_s5 + $0x158] sm:$0xff] }
  0x17   :  { %14490 = vst [vmem:[#allocation44_spill] sm:$0xff] %v8923_v44  ;;  %14491 = vst [vmem:[#allocation45_spill] sm:$0xff] %v8928_v45  ;;  %v8933_v46 = vld [vmem:[%s14013_s5 + $0x160] sm:$0xff]  ;;  %v8938_v47 = vld [vmem:[%s14013_s5 + $0x168] sm:$0xff] }
  0x18   :  { %14492 = vst [vmem:[#allocation46_spill] sm:$0xff] %v8933_v46  ;;  %14493 = vst [vmem:[#allocation47_spill] sm:$0xff] %v8938_v47  ;;  %v8943_v48 = vld [vmem:[%s14013_s5 + $0x170] sm:$0xff]  ;;  %v8948_v49 = vld [vmem:[%s14013_s5 + $0x178] sm:$0xff] }
  0x19   :  { %14494 = vst [vmem:[#allocation48_spill] sm:$0xff] %v8943_v48  ;;  %14495 = vst [vmem:[#allocation49_spill] sm:$0xff] %v8948_v49  ;;  %v8953_v50 = vld [vmem:[%s14013_s5 + $0x180] sm:$0xff]  ;;  %v8958_v51 = vld [vmem:[%s14013_s5 + $0x188] sm:$0xff] }
  0x1a   :  { %14496 = vst [vmem:[#allocation50_spill] sm:$0xff] %v8953_v50  ;;  %14497 = vst [vmem:[#allocation51_spill] sm:$0xff] %v8958_v51  ;;  %v8963_v52 = vld [vmem:[%s14013_s5 + $0x190] sm:$0xff]  ;;  %v8968_v53 = vld [vmem:[%s14013_s5 + $0x198] sm:$0xff] }
  0x1b   :  { %14498 = vst [vmem:[#allocation52_spill] sm:$0xff] %v8963_v52  ;;  %14499 = vst [vmem:[#allocation53_spill] sm:$0xff] %v8968_v53  ;;  %v8973_v54 = vld [vmem:[%s14013_s5 + $0x1a0] sm:$0xff]  ;;  %v8978_v55 = vld [vmem:[%s14013_s5 + $0x1a8] sm:$0xff] }
  0x1c   :  { %14500 = vst [vmem:[#allocation54_spill] sm:$0xff] %v8973_v54  ;;  %14501 = vst [vmem:[#allocation55_spill] sm:$0xff] %v8978_v55  ;;  %v8983_v56 = vld [vmem:[%s14013_s5 + $0x1b0] sm:$0xff]  ;;  %v8988_v57 = vld [vmem:[%s14013_s5 + $0x1b8] sm:$0xff] }
  0x1d   :  { %14502 = vst [vmem:[#allocation56_spill] sm:$0xff] %v8983_v56  ;;  %14503 = vst [vmem:[#allocation57_spill] sm:$0xff] %v8988_v57  ;;  %v8993_v58 = vld [vmem:[%s14013_s5 + $0x1c0] sm:$0xff]  ;;  %v8998_v59 = vld [vmem:[%s14013_s5 + $0x1c8] sm:$0xff] }
  0x1e   :  { %14504 = vst [vmem:[#allocation58_spill] sm:$0xff] %v8993_v58  ;;  %14505 = vst [vmem:[#allocation59_spill] sm:$0xff] %v8998_v59  ;;  %v9003_v60 = vld [vmem:[%s14013_s5 + $0x1d0] sm:$0xff]  ;;  %v9008_v61 = vld [vmem:[%s14013_s5 + $0x1d8] sm:$0xff] }
  0x1f   :  { %14506 = vst [vmem:[#allocation60_spill] sm:$0xff] %v9003_v60  ;;  %14507 = vst [vmem:[#allocation61_spill] sm:$0xff] %v9008_v61  ;;  %v9013_v62 = vld [vmem:[%s14013_s5 + $0x1e0] sm:$0xff]  ;;  %v9018_v63 = vld [vmem:[%s14013_s5 + $0x1e8] sm:$0xff] }
  0x20   :  { %14508 = vst [vmem:[#allocation62_spill] sm:$0xff] %v9013_v62  ;;  %14509 = vst [vmem:[#allocation63_spill] sm:$0xff] %v9018_v63  ;;  %v9023_v3 = vld [vmem:[%s14013_s5 + $0x1f0] sm:$0xff]  ;;  %v9028_v4 = vld [vmem:[%s14013_s5 + $0x1f8] sm:$0xff] }
  0x21   :  { %14510 = vst [vmem:[#allocation64_spill] sm:$0xff] %v9023_v3  ;;  %14511 = vst [vmem:[#allocation65_spill] sm:$0xff] %v9028_v4  ;;  %v9033_v1 = vld [vmem:[%s14015_s6] sm:$0xff]  ;;  %v9038_v5 = vld [vmem:[%s14015_s6 + $0x8] sm:$0xff] }
  0x22   :  { %14512 = vst [vmem:[#allocation66_spill] sm:$0xff] %v9033_v1  ;;  %14513 = vst [vmem:[#allocation67_spill] sm:$0xff] %v9038_v5  ;;  %v9043_v2 = vld [vmem:[%s14015_s6 + $0x10] sm:$0xff]  ;;  %v9048_v8 = vld [vmem:[%s14015_s6 + $0x18] sm:$0xff] }
  0x23   :  { %14514 = vst [vmem:[#allocation68_spill] sm:$0xff] %v9043_v2  ;;  %14515 = vst [vmem:[#allocation69_spill] sm:$0xff] %v9048_v8  ;;  %v9053_v6 = vld [vmem:[%s14015_s6 + $0x20] sm:$0xff]  ;;  %v9058_v9 = vld [vmem:[%s14015_s6 + $0x28] sm:$0xff] }
  0x24   :  { %14516 = vst [vmem:[#allocation70_spill] sm:$0xff] %v9053_v6  ;;  %14517 = vst [vmem:[#allocation71_spill] sm:$0xff] %v9058_v9  ;;  %v9063_v7 = vld [vmem:[%s14015_s6 + $0x30] sm:$0xff]  ;;  %v9068_v12 = vld [vmem:[%s14015_s6 + $0x38] sm:$0xff] }
  0x25   :  { %14518 = vst [vmem:[#allocation72_spill] sm:$0xff] %v9063_v7  ;;  %14519 = vst [vmem:[#allocation73_spill] sm:$0xff] %v9068_v12  ;;  %v9073_v10 = vld [vmem:[%s14015_s6 + $0x40] sm:$0xff]  ;;  %v9078_v13 = vld [vmem:[%s14015_s6 + $0x48] sm:$0xff] }
  0x26   :  { %14520 = vst [vmem:[#allocation74_spill] sm:$0xff] %v9073_v10  ;;  %14521 = vst [vmem:[#allocation75_spill] sm:$0xff] %v9078_v13  ;;  %v9083_v11 = vld [vmem:[%s14015_s6 + $0x50] sm:$0xff]  ;;  %v9088_v16 = vld [vmem:[%s14015_s6 + $0x58] sm:$0xff] }
  0x27   :  { %14522 = vst [vmem:[#allocation76_spill] sm:$0xff] %v9083_v11  ;;  %14523 = vst [vmem:[#allocation77_spill] sm:$0xff] %v9088_v16  ;;  %v9093_v14 = vld [vmem:[%s14015_s6 + $0x60] sm:$0xff]  ;;  %v9098_v17 = vld [vmem:[%s14015_s6 + $0x68] sm:$0xff] }
  0x28   :  { %14524 = vst [vmem:[#allocation78_spill] sm:$0xff] %v9093_v14  ;;  %14525 = vst [vmem:[#allocation79_spill] sm:$0xff] %v9098_v17  ;;  %v9103_v15 = vld [vmem:[%s14015_s6 + $0x70] sm:$0xff]  ;;  %v9108_v20 = vld [vmem:[%s14015_s6 + $0x78] sm:$0xff] }
  0x29   :  { %14526 = vst [vmem:[#allocation80_spill] sm:$0xff] %v9103_v15  ;;  %14527 = vst [vmem:[#allocation81_spill] sm:$0xff] %v9108_v20  ;;  %v9113_v18 = vld [vmem:[%s14015_s6 + $0x80] sm:$0xff]  ;;  %v9118_v21 = vld [vmem:[%s14015_s6 + $0x88] sm:$0xff] }
  0x2a   :  { %14528 = vst [vmem:[#allocation82_spill] sm:$0xff] %v9113_v18  ;;  %14529 = vst [vmem:[#allocation83_spill] sm:$0xff] %v9118_v21  ;;  %v9123_v19 = vld [vmem:[%s14015_s6 + $0x90] sm:$0xff]  ;;  %v9128_v24 = vld [vmem:[%s14015_s6 + $0x98] sm:$0xff] }
  0x2b   :  { %14530 = vst [vmem:[#allocation84_spill] sm:$0xff] %v9123_v19  ;;  %14531 = vst [vmem:[#allocation85_spill] sm:$0xff] %v9128_v24  ;;  %v9133_v22 = vld [vmem:[%s14015_s6 + $0xa0] sm:$0xff]  ;;  %v9138_v25 = vld [vmem:[%s14015_s6 + $0xa8] sm:$0xff] }
  0x2c   :  { %14532 = vst [vmem:[#allocation86_spill] sm:$0xff] %v9133_v22  ;;  %14533 = vst [vmem:[#allocation87_spill] sm:$0xff] %v9138_v25  ;;  %v9143_v23 = vld [vmem:[%s14015_s6 + $0xb0] sm:$0xff]  ;;  %v9148_v28 = vld [vmem:[%s14015_s6 + $0xb8] sm:$0xff] }
  0x2d   :  { %14534 = vst [vmem:[#allocation88_spill] sm:$0xff] %v9143_v23  ;;  %14535 = vst [vmem:[#allocation89_spill] sm:$0xff] %v9148_v28  ;;  %v9153_v26 = vld [vmem:[%s14015_s6 + $0xc0] sm:$0xff]  ;;  %v9158_v29 = vld [vmem:[%s14015_s6 + $0xc8] sm:$0xff] }
  0x2e   :  { %14536 = vst [vmem:[#allocation90_spill] sm:$0xff] %v9153_v26  ;;  %14537 = vst [vmem:[#allocation91_spill] sm:$0xff] %v9158_v29  ;;  %v9163_v27 = vld [vmem:[%s14015_s6 + $0xd0] sm:$0xff]  ;;  %v9168_v32 = vld [vmem:[%s14015_s6 + $0xd8] sm:$0xff] }
  0x2f   :  { %14538 = vst [vmem:[#allocation92_spill] sm:$0xff] %v9163_v27  ;;  %14539 = vst [vmem:[#allocation93_spill] sm:$0xff] %v9168_v32  ;;  %v9173_v30 = vld [vmem:[%s14015_s6 + $0xe0] sm:$0xff]  ;;  %v9178_v33 = vld [vmem:[%s14015_s6 + $0xe8] sm:$0xff] }
  0x30   :  { %14540 = vst [vmem:[#allocation94_spill] sm:$0xff] %v9173_v30  ;;  %14541 = vst [vmem:[#allocation95_spill] sm:$0xff] %v9178_v33  ;;  %v9183_v31 = vld [vmem:[%s14015_s6 + $0xf0] sm:$0xff]  ;;  %v9188_v36 = vld [vmem:[%s14015_s6 + $0xf8] sm:$0xff] }
  0x31   :  { %14542 = vst [vmem:[#allocation96_spill] sm:$0xff] %v9183_v31  ;;  %14543 = vst [vmem:[#allocation97_spill] sm:$0xff] %v9188_v36  ;;  %v9193_v34 = vld [vmem:[%s14015_s6 + $0x100] sm:$0xff]  ;;  %v9198_v37 = vld [vmem:[%s14015_s6 + $0x108] sm:$0xff] }
  0x32   :  { %14544 = vst [vmem:[#allocation98_spill] sm:$0xff] %v9193_v34  ;;  %14545 = vst [vmem:[#allocation99_spill] sm:$0xff] %v9198_v37  ;;  %v9203_v35 = vld [vmem:[%s14015_s6 + $0x110] sm:$0xff]  ;;  %v9208_v40 = vld [vmem:[%s14015_s6 + $0x118] sm:$0xff] }
  0x33   :  { %14546 = vst [vmem:[#allocation100_spill] sm:$0xff] %v9203_v35  ;;  %14547 = vst [vmem:[#allocation101_spill] sm:$0xff] %v9208_v40  ;;  %v9213_v38 = vld [vmem:[%s14015_s6 + $0x120] sm:$0xff]  ;;  %v9218_v41 = vld [vmem:[%s14015_s6 + $0x128] sm:$0xff] }
  0x34   :  { %14548 = vst [vmem:[#allocation102_spill] sm:$0xff] %v9213_v38  ;;  %14549 = vst [vmem:[#allocation103_spill] sm:$0xff] %v9218_v41  ;;  %v9223_v39 = vld [vmem:[%s14015_s6 + $0x130] sm:$0xff]  ;;  %v9228_v44 = vld [vmem:[%s14015_s6 + $0x138] sm:$0xff] }
  0x35   :  { %14550 = vst [vmem:[#allocation104_spill] sm:$0xff] %v9223_v39  ;;  %14551 = vst [vmem:[#allocation105_spill] sm:$0xff] %v9228_v44  ;;  %v9233_v42 = vld [vmem:[%s14015_s6 + $0x140] sm:$0xff]  ;;  %v9238_v45 = vld [vmem:[%s14015_s6 + $0x148] sm:$0xff] }
  0x36   :  { %14552 = vst [vmem:[#allocation106_spill] sm:$0xff] %v9233_v42  ;;  %14553 = vst [vmem:[#allocation107_spill] sm:$0xff] %v9238_v45  ;;  %v9243_v43 = vld [vmem:[%s14015_s6 + $0x150] sm:$0xff]  ;;  %v9248_v48 = vld [vmem:[%s14015_s6 + $0x158] sm:$0xff] }
  0x37   :  { %14554 = vst [vmem:[#allocation108_spill] sm:$0xff] %v9243_v43  ;;  %14555 = vst [vmem:[#allocation109_spill] sm:$0xff] %v9248_v48  ;;  %v9253_v46 = vld [vmem:[%s14015_s6 + $0x160] sm:$0xff]  ;;  %v9258_v49 = vld [vmem:[%s14015_s6 + $0x168] sm:$0xff] }
  0x38   :  { %14556 = vst [vmem:[#allocation110_spill] sm:$0xff] %v9253_v46  ;;  %14557 = vst [vmem:[#allocation111_spill] sm:$0xff] %v9258_v49  ;;  %v9263_v47 = vld [vmem:[%s14015_s6 + $0x170] sm:$0xff]  ;;  %v9268_v52 = vld [vmem:[%s14015_s6 + $0x178] sm:$0xff] }
  0x39   :  { %14558 = vst [vmem:[#allocation112_spill] sm:$0xff] %v9263_v47  ;;  %14559 = vst [vmem:[#allocation113_spill] sm:$0xff] %v9268_v52  ;;  %v9273_v50 = vld [vmem:[%s14015_s6 + $0x180] sm:$0xff]  ;;  %v9278_v53 = vld [vmem:[%s14015_s6 + $0x188] sm:$0xff] }
  0x3a   :  { %14560 = vst [vmem:[#allocation114_spill] sm:$0xff] %v9273_v50  ;;  %14561 = vst [vmem:[#allocation115_spill] sm:$0xff] %v9278_v53  ;;  %v9283_v51 = vld [vmem:[%s14015_s6 + $0x190] sm:$0xff]  ;;  %v9288_v56 = vld [vmem:[%s14015_s6 + $0x198] sm:$0xff] }
  0x3b   :  { %14562 = vst [vmem:[#allocation116_spill] sm:$0xff] %v9283_v51  ;;  %14563 = vst [vmem:[#allocation117_spill] sm:$0xff] %v9288_v56  ;;  %v9293_v54 = vld [vmem:[%s14015_s6 + $0x1a0] sm:$0xff]  ;;  %v9298_v57 = vld [vmem:[%s14015_s6 + $0x1a8] sm:$0xff] }
  0x3c   :  { %14564 = vst [vmem:[#allocation118_spill] sm:$0xff] %v9293_v54  ;;  %14565 = vst [vmem:[#allocation119_spill] sm:$0xff] %v9298_v57  ;;  %v9303_v55 = vld [vmem:[%s14015_s6 + $0x1b0] sm:$0xff]  ;;  %v9308_v60 = vld [vmem:[%s14015_s6 + $0x1b8] sm:$0xff] }
  0x3d   :  { %14566 = vst [vmem:[#allocation120_spill] sm:$0xff] %v9303_v55  ;;  %14567 = vst [vmem:[#allocation121_spill] sm:$0xff] %v9308_v60  ;;  %v9313_v58 = vld [vmem:[%s14015_s6 + $0x1c0] sm:$0xff]  ;;  %v9318_v61 = vld [vmem:[%s14015_s6 + $0x1c8] sm:$0xff] }
  0x3e   :  { %14568 = vst [vmem:[#allocation122_spill] sm:$0xff] %v9313_v58  ;;  %14569 = vst [vmem:[#allocation123_spill] sm:$0xff] %v9318_v61  ;;  %v9323_v59 = vld [vmem:[%s14015_s6 + $0x1d0] sm:$0xff]  ;;  %v9328_v3 = vld [vmem:[%s14015_s6 + $0x1d8] sm:$0xff] }
  0x3f   :  { %14570 = vst [vmem:[#allocation124_spill] sm:$0xff] %v9323_v59  ;;  %14571 = vst [vmem:[#allocation125_spill] sm:$0xff] %v9328_v3  ;;  %v9333_v62 = vld [vmem:[%s14015_s6 + $0x1e0] sm:$0xff]  ;;  %v9338_v4 = vld [vmem:[%s14015_s6 + $0x1e8] sm:$0xff] }
  0x40   :  { %14572 = vst [vmem:[#allocation126_spill] sm:$0xff] %v9333_v62  ;;  %14573 = vst [vmem:[#allocation127_spill] sm:$0xff] %v9338_v4  ;;  %v9343_v63 = vld [vmem:[%s14015_s6 + $0x1f0] sm:$0xff]  ;;  %v9348_v2 = vld [vmem:[%s14015_s6 + $0x1f8] sm:$0xff] }
  0x41   :  { %14574 = vst [vmem:[#allocation128_spill] sm:$0xff] %v9343_v63  ;;  %14575 = vst [vmem:[#allocation129_spill] sm:$0xff] %v9348_v2  ;;  %v9353_v1 = vld [vmem:[%s14012_s3 + $0x1f8] sm:$0xff]  ;;  %v9358_v8 = vld [vmem:[%s14012_s3 + $0x1e0] sm:$0xff] }
  0x42   :  { %v9363_v5 = vld [vmem:[%s14012_s3 + $0x1f0] sm:$0xff]  ;;  %397 = vmatprep.subr.mxu1 %v9353_v1  ;;  %303 = vmatpush1.msra.mxu0 %v9358_v8  ;;  %v9370_v7 = vld [vmem:[%s14012_s3 + $0x1c8] sm:$0xff]  ;;  %v9375_v6 = vld [vmem:[%s14012_s3 + $0x1d8] sm:$0xff] }
  0x43   :  { %v9380_v12 = vld [vmem:[%s14012_s3 + $0x1c0] sm:$0xff]  ;;  %398 = vmatpush1.msra.mxu1 %v9363_v5  ;;  %304 = vmatprep.subr.mxu0 %v9370_v7  ;;  %v9387_v9 = vld [vmem:[%s14012_s3 + $0x1d0] sm:$0xff]  ;;  %v9392_v11 = vld [vmem:[%s14012_s3 + $0x1a8] sm:$0xff] }
  0x44   :  { %v9397_v10 = vld [vmem:[%s14012_s3 + $0x1b8] sm:$0xff]  ;;  %399 = vmatprep.subr.mxu1 %v9375_v6  ;;  %305 = vmatpush1.msra.mxu0 %v9380_v12  ;;  %v9404_v16 = vld [vmem:[%s14012_s3 + $0x1a0] sm:$0xff]  ;;  %v9409_v13 = vld [vmem:[%s14012_s3 + $0x1b0] sm:$0xff] }
  0x45   :  { %v9414_v15 = vld [vmem:[%s14012_s3 + $0x188] sm:$0xff]  ;;  %400 = vmatpush1.msra.mxu1 %v9387_v9  ;;  %306 = vmatprep.subr.mxu0 %v9392_v11  ;;  %v9421_v14 = vld [vmem:[%s14012_s3 + $0x198] sm:$0xff]  ;;  %v9426_v20 = vld [vmem:[%s14012_s3 + $0x180] sm:$0xff] }
  0x46   :  { %401 = vmatprep.subr.mxu1 %v9397_v10  ;;  %307 = vmatpush1.msra.mxu0 %v9404_v16  ;;  %v9433_v17 = vld [vmem:[%s14012_s3 + $0x190] sm:$0xff]  ;;  %v9438_v19 = vld [vmem:[%s14012_s3 + $0x168] sm:$0xff]  ;;  %v9445_v18 = vld [vmem:[%s14012_s3 + $0x178] sm:$0xff] }
  0x47   :  { %402 = vmatpush1.msra.mxu1 %v9409_v13  ;;  %308 = vmatprep.subr.mxu0 %v9414_v15  ;;  %v9450_v24 = vld [vmem:[%s14012_s3 + $0x160] sm:$0xff]  ;;  %v9457_v21 = vld [vmem:[%s14012_s3 + $0x170] sm:$0xff]  ;;  %v9462_v23 = vld [vmem:[%s14012_s3 + $0x148] sm:$0xff] }
  0x48   :  { %403 = vmatprep.subr.mxu1 %v9421_v14  ;;  %309 = vmatpush1.msra.mxu0 %v9426_v20  ;;  %v9469_v22 = vld [vmem:[%s14012_s3 + $0x158] sm:$0xff]  ;;  %v9474_v28 = vld [vmem:[%s14012_s3 + $0x140] sm:$0xff]  ;;  %v9481_v25 = vld [vmem:[%s14012_s3 + $0x150] sm:$0xff] }
  0x49   :  { %404 = vmatpush1.msra.mxu1 %v9433_v17  ;;  %310 = vmatprep.subr.mxu0 %v9438_v19  ;;  %v9486_v27 = vld [vmem:[%s14012_s3 + $0x128] sm:$0xff]  ;;  %v9493_v26 = vld [vmem:[%s14012_s3 + $0x138] sm:$0xff]  ;;  %v9498_v32 = vld [vmem:[%s14012_s3 + $0x120] sm:$0xff] }
  0x4a   :  { %405 = vmatprep.subr.mxu1 %v9445_v18  ;;  %311 = vmatpush1.msra.mxu0 %v9450_v24  ;;  %v9505_v29 = vld [vmem:[%s14012_s3 + $0x130] sm:$0xff]  ;;  %v9510_v31 = vld [vmem:[%s14012_s3 + $0x108] sm:$0xff]  ;;  %v9517_v30 = vld [vmem:[%s14012_s3 + $0x118] sm:$0xff] }
  0x4b   :  { %406 = vmatpush1.msra.mxu1 %v9457_v21  ;;  %312 = vmatprep.subr.mxu0 %v9462_v23  ;;  %v9522_v36 = vld [vmem:[%s14012_s3 + $0x100] sm:$0xff]  ;;  %v9529_v33 = vld [vmem:[%s14012_s3 + $0x110] sm:$0xff]  ;;  %v9534_v35 = vld [vmem:[%s14012_s3 + $0xe8] sm:$0xff] }
  0x4c   :  { %407 = vmatprep.subr.mxu1 %v9469_v22  ;;  %313 = vmatpush1.msra.mxu0 %v9474_v28  ;;  %v9541_v34 = vld [vmem:[%s14012_s3 + $0xf8] sm:$0xff]  ;;  %v9546_v40 = vld [vmem:[%s14012_s3 + $0xe0] sm:$0xff]  ;;  %v9553_v37 = vld [vmem:[%s14012_s3 + $0xf0] sm:$0xff] }
  0x4d   :  { %408 = vmatpush1.msra.mxu1 %v9481_v25  ;;  %314 = vmatprep.subr.mxu0 %v9486_v27  ;;  %v9558_v39 = vld [vmem:[%s14012_s3 + $0xc8] sm:$0xff]  ;;  %v9565_v38 = vld [vmem:[%s14012_s3 + $0xd8] sm:$0xff]  ;;  %v9570_v44 = vld [vmem:[%s14012_s3 + $0xc0] sm:$0xff] }
  0x4e   :  { %409 = vmatprep.subr.mxu1 %v9493_v26  ;;  %315 = vmatpush1.msra.mxu0 %v9498_v32  ;;  %v9577_v41 = vld [vmem:[%s14012_s3 + $0xd0] sm:$0xff]  ;;  %v9582_v43 = vld [vmem:[%s14012_s3 + $0xa8] sm:$0xff]  ;;  %v9589_v42 = vld [vmem:[%s14012_s3 + $0xb8] sm:$0xff] }
  0x4f   :  { %410 = vmatpush1.msra.mxu1 %v9505_v29  ;;  %316 = vmatprep.subr.mxu0 %v9510_v31  ;;  %v9594_v48 = vld [vmem:[%s14012_s3 + $0xa0] sm:$0xff]  ;;  %v9601_v45 = vld [vmem:[%s14012_s3 + $0xb0] sm:$0xff]  ;;  %v9606_v47 = vld [vmem:[%s14012_s3 + $0x88] sm:$0xff] }
  0x50   :  { %411 = vmatprep.subr.mxu1 %v9517_v30  ;;  %317 = vmatpush1.msra.mxu0 %v9522_v36  ;;  %v9613_v46 = vld [vmem:[%s14012_s3 + $0x98] sm:$0xff]  ;;  %v9618_v52 = vld [vmem:[%s14012_s3 + $0x80] sm:$0xff]  ;;  %v9625_v49 = vld [vmem:[%s14012_s3 + $0x90] sm:$0xff] }
  0x51   :  { %412 = vmatpush1.msra.mxu1 %v9529_v33  ;;  %318 = vmatprep.subr.mxu0 %v9534_v35  ;;  %v9630_v51 = vld [vmem:[%s14012_s3 + $0x68] sm:$0xff]  ;;  %v9637_v50 = vld [vmem:[%s14012_s3 + $0x78] sm:$0xff]  ;;  %v9642_v56 = vld [vmem:[%s14012_s3 + $0x60] sm:$0xff] }
  0x52   :  { %413 = vmatprep.subr.mxu1 %v9541_v34  ;;  %319 = vmatpush1.msra.mxu0 %v9546_v40  ;;  %v9649_v53 = vld [vmem:[%s14012_s3 + $0x70] sm:$0xff]  ;;  %v9654_v55 = vld [vmem:[%s14012_s3 + $0x48] sm:$0xff]  ;;  %v9661_v54 = vld [vmem:[%s14012_s3 + $0x58] sm:$0xff] }
  0x53   :  { %414 = vmatpush1.msra.mxu1 %v9553_v37  ;;  %320 = vmatprep.subr.mxu0 %v9558_v39  ;;  %v9666_v60 = vld [vmem:[%s14012_s3 + $0x40] sm:$0xff]  ;;  %v9673_v57 = vld [vmem:[%s14012_s3 + $0x50] sm:$0xff]  ;;  %v9678_v59 = vld [vmem:[%s14012_s3 + $0x28] sm:$0xff] }
  0x54   :  { %415 = vmatprep.subr.mxu1 %v9565_v38  ;;  %321 = vmatpush1.msra.mxu0 %v9570_v44  ;;  %14576 = vst [vmem:[#allocation130_spill] sm:$0xff] %v9673_v57  ;;  %14577 = vst [vmem:[#allocation131_spill] sm:$0xff] %v9678_v59  ;;  %v9685_v58 = vld [vmem:[%s14012_s3 + $0x38] sm:$0xff]  ;;  %v9690_v3 = vld [vmem:[%s14012_s3 + $0x20] sm:$0xff] }
  0x55   :  { %416 = vmatpush1.msra.mxu1 %v9577_v41  ;;  %322 = vmatprep.subr.mxu0 %v9582_v43  ;;  %14578 = vst [vmem:[#allocation132_spill] sm:$0xff] %v9685_v58  ;;  %14579 = vst [vmem:[#allocation133_spill] sm:$0xff] %v9690_v3  ;;  %v9697_v61 = vld [vmem:[%s14012_s3 + $0x30] sm:$0xff]  ;;  %v9702_v63 = vld [vmem:[%s14012_s3 + $0x8] sm:$0xff] }
  0x56   :  { %417 = vmatprep.subr.mxu1 %v9589_v42  ;;  %323 = vmatpush1.msra.mxu0 %v9594_v48  ;;  %14580 = vst [vmem:[#allocation134_spill] sm:$0xff] %v9697_v61  ;;  %14581 = vst [vmem:[#allocation135_spill] sm:$0xff] %v9702_v63  ;;  %v9709_v62 = vld [vmem:[%s14012_s3 + $0x18] sm:$0xff]  ;;  %v9714_v2 = vld [vmem:[%s14012_s3] sm:$0xff] }
  0x57   :  { %418 = vmatpush1.msra.mxu1 %v9601_v45  ;;  %324 = vmatprep.subr.mxu0 %v9606_v47  ;;  %14582 = vst [vmem:[#allocation136_spill] sm:$0xff] %v9709_v62  ;;  %14583 = vst [vmem:[#allocation137_spill] sm:$0xff] %v9714_v2  ;;  %v9721_v4 = vld [vmem:[%s14012_s3 + $0x10] sm:$0xff] }
  0x58   :  { %419 = vmatprep.subr.mxu1 %v9613_v46  ;;  %325 = vmatpush1.msra.mxu0 %v9618_v52  ;;  %14584 = vst [vmem:[#allocation138_spill] sm:$0xff] %v9721_v4 }
  0x59   :  { %420 = vmatpush1.msra.mxu1 %v9625_v49  ;;  %326 = vmatprep.subr.mxu0 %v9630_v51 }
  0x5a   :  { %421 = vmatprep.subr.mxu1 %v9637_v50  ;;  %327 = vmatpush1.msra.mxu0 %v9642_v56 }
  0x5b   :  { %422 = vmatpush1.msra.mxu1 %v9649_v53  ;;  %328 = vmatprep.subr.mxu0 %v9654_v55 }
  0x5c   :  { %423 = vmatprep.subr.mxu1 %v9661_v54  ;;  %329 = vmatpush1.msra.mxu0 %v9666_v60 }
  0x5d   :  { %424 = vmatpush1.msra.mxu1 %v9673_v57  ;;  %330 = vmatprep.subr.mxu0 %v9678_v59  ;;  %v9728_v59 = vld [vmem:[%s14016_s2 + $0xe8] sm:$0xff]  ;;  %v297_v57 = vld [vmem:[%s14017_s0] sm:$0xff] }
  0x5e   :  { %425 = vmatprep.subr.mxu1 %v9685_v58  ;;  %331 = vmatpush1.msra.mxu0 %v9690_v3  ;;  %14585 = vst [vmem:[#allocation139_spill] sm:$0xff] %v9728_v59  ;;  %v9735_v3 = vld [vmem:[%s14016_s2 + $0xe0] sm:$0xff]  ;;  %v14587_v58 = vmov 0.0  }
  0x5f   :  { %426 = vmatpush1.msra.mxu1 %v9697_v61  ;;  %332 = vmatprep.subr.mxu0 %v9702_v63  ;;  %14586 = vst [vmem:[#allocation140_spill] sm:$0xff] %v9735_v3  ;;  %v9742_v63 = vld [vmem:[%s14016_s2 + $0xc8] sm:$0xff] }
  0x60   :  { %427 = vmatprep.subr.mxu1 %v9709_v62  ;;  %333 = vmatpush1.msra.mxu0 %v9714_v2  ;;  %14588 = vst [vmem:[#allocation141_spill] sm:$0xff] %v9742_v63  ;;  %v9749_v2 = vld [vmem:[%s14016_s2 + $0xf8] sm:$0xff]  ;;  %v9775_v62 = vld [vmem:[%s14016_s2 + $0xa0] sm:$0xff]  ;;  %v9796_v61 = vld [vmem:[%s14016_s2 + $0x88] sm:$0xff] }
  0x61   :  { %428 = vmatpush1.msra.mxu1 %v9721_v4  ;;  %367 = vmatmul.mubr.f32.vlgmr.msra.gmra.mxu0 %v14587_v58  ;;  %14589 = vst [vmem:[#allocation142_spill] sm:$0xff] %v9749_v2  ;;  %v9756_v4 = vld [vmem:[%s14016_s2 + $0xc0] sm:$0xff]  ;;  %14593 = vst [vmem:[#allocation146_spill] sm:$0xff] %v9775_v62 }
  0x62   :  { %462 = vmatmul.mubr.f32.vlgmr.msra.gmra.mxu1 %v14587_v58  ;;  %524 = vmatprep.subr.mxu0 %v9728_v59  ;;  %14590 = vst [vmem:[#allocation143_spill] sm:$0xff] %v9756_v4  ;;  %v9763_v59 = vld [vmem:[%s14016_s2 + $0xa8] sm:$0xff]  ;;  %14596 = vst [vmem:[#allocation149_spill] sm:$0xff] %v9796_v61 }
  0x63   :  { %525 = vmatpush1.msra.mxu0 %v9735_v3  ;;  %372 = vmatprep.mubr.f32.mxu0 %v14587_v58  ;;  %14591 = vst [vmem:[#allocation144_spill] sm:$0xff] %v9763_v59  ;;  %v9768_v3 = vld [vmem:[%s14016_s2 + $0xf0] sm:$0xff] }
  0x64   :  { %467 = vmatprep.mubr.f32.mxu1 %v14587_v58  ;;  %526 = vmatprep.subr.mxu0 %v9742_v63  ;;  %14592 = vst [vmem:[#allocation145_spill] sm:$0xff] %v9768_v3  ;;  %v9780_v63 = vld [vmem:[%s14016_s2 + $0xd8] sm:$0xff] }
  0x65   :  { %373 = vmatmul.mubr.f32.gmra.mxu0 %v14587_v58  ;;  %619 = vmatprep.subr.mxu1 %v9749_v2  ;;  %14594 = vst [vmem:[#allocation147_spill] sm:$0xff] %v9780_v63  ;;  %v9789_v2 = vld [vmem:[%s14016_s2 + $0xd0] sm:$0xff] }
  0x66   :  { %468 = vmatmul.mubr.f32.gmra.mxu1 %v14587_v58  ;;  %527 = vmatpush1.msra.mxu0 %v9756_v4  ;;  %14595 = vst [vmem:[#allocation148_spill] sm:$0xff] %v9789_v2  ;;  %v9834_v4 = vld [vmem:[%s14016_s2 + $0x60] sm:$0xff] }
  0x67   :  { %528 = vmatprep.subr.mxu0 %v9763_v59  ;;  %620 = vmatpush1.msra.mxu1 %v9768_v3  ;;  %v9803_v59 = vld [vmem:[%s14016_s2 + $0xb8] sm:$0xff]  ;;  %v9820_v3 = vld [vmem:[%s14016_s2 + $0x68] sm:$0xff]  ;;  %14602 = vst [vmem:[#allocation155_spill] sm:$0xff] %v9834_v4 }
  0x68   :  { %529 = vmatpush1.msra.mxu0 %v9775_v62  ;;  %621 = vmatprep.subr.mxu1 %v9780_v63  ;;  %14597 = vst [vmem:[#allocation150_spill] sm:$0xff] %v9803_v59  ;;  %v9808_v62 = vld [vmem:[%s14016_s2 + $0x80] sm:$0xff]  ;;  %v9815_v63 = vld [vmem:[%s14016_s2 + $0xb0] sm:$0xff]  ;;  %14600 = vst [vmem:[#allocation153_spill] sm:$0xff] %v9820_v3 }
  0x69   :  { %378 = vmatprep.mubr.f32.mxu0 %v14587_v58  ;;  %473 = vmatprep.mubr.f32.mxu1 %v14587_v58  ;;  %14598 = vst [vmem:[#allocation151_spill] sm:$0xff] %v9808_v62  ;;  %14599 = vst [vmem:[#allocation152_spill] sm:$0xff] %v9815_v63 }
  0x6a   :  { %622 = vmatpush1.msra.mxu1 %v9789_v2  ;;  %379 = vmatmul.mubr.f32.gmra.mxu0 %v14587_v58  ;;  %v9827_v2 = vld [vmem:[%s14016_s2 + $0x98] sm:$0xff] }
  0x6b   :  { %474 = vmatmul.mubr.f32.gmra.mxu1 %v14587_v58  ;;  %530 = vmatprep.subr.mxu0 %v9796_v61  ;;  %14601 = vst [vmem:[#allocation154_spill] sm:$0xff] %v9827_v2  ;;  %v9841_v61 = vld [vmem:[%s14016_s2 + $0x90] sm:$0xff] }
  0x6c   :  { %623 = vmatprep.subr.mxu1 %v9803_v59  ;;  %531 = vmatpush1.msra.mxu0 %v9808_v62  ;;  %14603 = vst [vmem:[#allocation156_spill] sm:$0xff] %v9841_v61  ;;  %v9848_v62 = vld [vmem:[%s14016_s2 + $0x78] sm:$0xff]  ;;  %v9886_v59 = vld [vmem:[%s14016_s2 + $0x50] sm:$0xff] }
  0x6d   :  { %624 = vmatpush1.msra.mxu1 %v9815_v63  ;;  %532 = vmatprep.subr.mxu0 %v9820_v3  ;;  %14604 = vst [vmem:[#allocation157_spill] sm:$0xff] %v9848_v62  ;;  %v9855_v3 = vld [vmem:[%s14016_s2 + $0x48] sm:$0xff]  ;;  %v9867_v63 = vld [vmem:[%s14016_s2 + $0x40] sm:$0xff]  ;;  %14610 = vst [vmem:[#allocation163_spill] sm:$0xff] %v9886_v59 }
  0x6e   :  { %625 = vmatprep.subr.mxu1 %v9827_v2  ;;  %384 = vmatprep.mubr.f32.mxu0 %v14587_v58  ;;  %14605 = vst [vmem:[#allocation158_spill] sm:$0xff] %v9855_v3  ;;  %v9860_v2 = vld [vmem:[%s14016_s2 + $0x70] sm:$0xff]  ;;  %14607 = vst [vmem:[#allocation160_spill] sm:$0xff] %v9867_v63 }
  0x6f   :  { %479 = vmatprep.mubr.f32.mxu1 %v14587_v58  ;;  %533 = vmatpush1.msra.mxu0 %v9834_v4  ;;  %14606 = vst [vmem:[#allocation159_spill] sm:$0xff] %v9860_v2  ;;  %v9872_v4 = vld [vmem:[%s14016_s2 + $0x58] sm:$0xff] }
  0x70   :  { %626 = vmatpush1.msra.mxu1 %v9841_v61  ;;  %385 = vmatmul.mubr.f32.gmra.mxu0 %v14587_v58  ;;  %14608 = vst [vmem:[#allocation161_spill] sm:$0xff] %v9872_v4  ;;  %v9881_v61 = vld [vmem:[%s14016_s2 + $0x28] sm:$0xff] }
  0x71   :  { %480 = vmatmul.mubr.f32.gmra.mxu1 %v14587_v58  ;;  %627 = vmatprep.subr.mxu1 %v9848_v62  ;;  %14609 = vst [vmem:[#allocation162_spill] sm:$0xff] %v9881_v61  ;;  %v9931_v62 = vld [vmem:[%s14016_s2 + $0x10] sm:$0xff] }
  0x72   :  { %534 = vmatprep.subr.mxu0 %v9855_v3  ;;  %628 = vmatpush1.msra.mxu1 %v9860_v2  ;;  %v9895_v2 = vld [vmem:[%s14016_s2 + $0x20] sm:$0xff]  ;;  %v9900_v3 = vld [vmem:[%s14016_s2 + $0x38] sm:$0xff] }
  0x73   :  { %535 = vmatpush1.msra.mxu0 %v9867_v63  ;;  %629 = vmatprep.subr.mxu1 %v9872_v4  ;;  %v9907_v4 = vld [vmem:[%s14016_s2 + $0x30] sm:$0xff]  ;;  %v9912_v63 = vld [vmem:[%s14016_s2 + $0x8] sm:$0xff] }
  0x74   :  { %390 = vmatprep.mubr.f32.mxu0 %v14587_v58  ;;  %485 = vmatprep.mubr.f32.mxu1 %v14587_v58  ;;  %14611 = vst [vmem:[#allocation164_spill] sm:$0xff] %v9907_v4 }
  0x75   :  { %536 = vmatprep.subr.mxu0 %v9881_v61  ;;  %630 = vmatpush1.msra.mxu1 %v9886_v59  ;;  %v9919_v61 = vld [vmem:[%s14016_s2 + $0x18] sm:$0xff]  ;;  %v9924_v59 = vld [vmem:[%s14016_s2] sm:$0xff] }
  0x76   :  { %391 = vmatmul.mubr.f32.gmra.mxu0 %v14587_v58  ;;  %486 = vmatmul.mubr.f32.gmra.mxu1 %v14587_v58 }
  0x77   :  { %537 = vmatpush1.msra.mxu0 %v9895_v2  ;;  %631 = vmatprep.subr.mxu1 %v9900_v3 }
  0x78   :  { %632 = vmatpush1.msra.mxu1 %v9907_v4  ;;  %538 = vmatprep.subr.mxu0 %v9912_v63  ;;  %v298_v4 = vld [vmem:[%s14017_s0 + $0x8] sm:$0xff] }
  0x79   :  { %633 = vmatprep.subr.mxu1 %v9919_v61  ;;  %539 = vmatpush1.msra.mxu0 %v9924_v59 }
  0x7a   :  { %572 = vmatprep.mubr.f32.mxu0 %v14587_v58  ;;  %634 = vmatpush1.msra.mxu1 %v9931_v62 }
  0x7b   :  { %667 = vmatprep.mubr.f32.mxu1 %v14587_v58  ;;  %6831 = vmatmul.mubr.msk.f32.vlgmr.msra.gmra.mxu0 %vm492_vm0, %v297_v57 }
  0x7c   :  { %6836 = vmatmul.mubr.msk.f32.vlgmr.msra.gmra.mxu1 %vm492_vm0, %v297_v57  ;;  %578 = vmatprep.mubr.f32.mxu0 %v14587_v58  ;;  %v299_v57 = vld [vmem:[%s14017_s0 + $0x10] sm:$0xff] }
  0x7d   :  { %673 = vmatprep.mubr.f32.mxu1 %v14587_v58  ;;  %844 = vmatprep.subr.mxu0 %v8705_v0  ;;  %v300_v0 = vld [vmem:[%s14017_s0 + $0x18] sm:$0xff] }
  0x7e   :  { %939 = vmatprep.subr.mxu1 %v9353_v1  ;;  %845 = vmatpush1.msra.mxu0 %v9358_v8  ;;  %v301_v1 = vld [vmem:[%s14017_s0 + $0x20] sm:$0xff] }
  0x7f   :  { %6832 = vmatmul.mubr.msk.f32.gmra.mxu0 %vm492_vm0, %v298_v4  ;;  %940 = vmatpush1.msra.mxu1 %v9363_v5  ;;  %v14613_v5 = vld [vmem:[#allocation131_spill] sm:$0xff]  ;;  %v14616_v8 = vld [vmem:[#allocation134_spill] sm:$0xff] }
  0x80   :  { %6837 = vmatmul.mubr.msk.f32.gmra.mxu1 %vm492_vm0, %v298_v4  ;;  %584 = vmatprep.mubr.f32.mxu0 %v14587_v58  ;;  %v14612_v4 = vld [vmem:[#allocation130_spill] sm:$0xff] }
  0x81   :  { %679 = vmatprep.mubr.f32.mxu1 %v14587_v58  ;;  %846 = vmatprep.subr.mxu0 %v9370_v7  ;;  %v14615_v7 = vld [vmem:[#allocation133_spill] sm:$0xff] }
  0x82   :  { %941 = vmatprep.subr.mxu1 %v9375_v6  ;;  %847 = vmatpush1.msra.mxu0 %v9380_v12  ;;  %v14614_v6 = vld [vmem:[#allocation132_spill] sm:$0xff]  ;;  %v14620_v12 = vld [vmem:[#allocation138_spill] sm:$0xff] }
  0x83   :  { %6833 = vmatmul.mubr.msk.f32.gmra.mxu0 %vm492_vm0, %v299_v57  ;;  %942 = vmatpush1.msra.mxu1 %v9387_v9  ;;  %v14617_v9 = vld [vmem:[#allocation135_spill] sm:$0xff] }
  0x84   :  { %6838 = vmatmul.mubr.msk.f32.gmra.mxu1 %vm492_vm0, %v299_v57  ;;  %590 = vmatprep.mubr.f32.mxu0 %v14587_v58 }
  0x85   :  { %685 = vmatprep.mubr.f32.mxu1 %v14587_v58  ;;  %848 = vmatprep.subr.mxu0 %v9392_v11  ;;  %v14619_v11 = vld [vmem:[#allocation137_spill] sm:$0xff] }
  0x86   :  { %943 = vmatprep.subr.mxu1 %v9397_v10  ;;  %849 = vmatpush1.msra.mxu0 %v9404_v16  ;;  %v14618_v10 = vld [vmem:[#allocation136_spill] sm:$0xff] }
  0x87   :  { %6834 = vmatmul.mubr.msk.f32.gmra.mxu0 %vm492_vm0, %v300_v0  ;;  %944 = vmatpush1.msra.mxu1 %v9409_v13  ;;  %v14621_v13 = vld [vmem:[#allocation139_spill] sm:$0xff] }
  0x88   :  { %6839 = vmatmul.mubr.msk.f32.gmra.mxu1 %vm492_vm0, %v300_v0  ;;  %596 = vmatprep.mubr.f32.mxu0 %v14587_v58 }
  0x89   :  { %691 = vmatprep.mubr.f32.mxu1 %v14587_v58  ;;  %850 = vmatprep.subr.mxu0 %v9414_v15  ;;  %v127_v15 = vlaneseq }
  0x8a   :  { %945 = vmatprep.subr.mxu1 %v9421_v14  ;;  %851 = vmatpush1.msra.mxu0 %v9426_v20  ;;  %v14622_v14 = vld [vmem:[#allocation142_spill] sm:$0xff] }
  0x8b   :  { %6835 = vmatmul.mubr.msk.f32.gmra.mxu0 %vm492_vm0, %v301_v1  ;;  %946 = vmatpush1.msra.mxu1 %v9433_v17  ;;  %v128_v16 = vshrl.u32 %v127_v15, 7 }
  0x8c   :  { %6840 = vmatmul.mubr.msk.f32.gmra.mxu1 %vm492_vm0, %v301_v1  ;;  %852 = vmatprep.subr.mxu0 %v9438_v19 }
  0x8d   :  { %947 = vmatprep.subr.mxu1 %v9445_v18  ;;  %853 = vmatpush1.msra.mxu0 %v9450_v24  ;;  %v129_v17 = vsub.s32 0, %v128_v16  ;;  %v137_v18 = vsub.s32 2, %v128_v16  ;;  %v133_v19 = vsub.s32 1, %v128_v16  ;;  %v141_v20 = vsub.s32 3, %v128_v16 }
  0x8e   :  { %948 = vmatpush1.msra.mxu1 %v9457_v21  ;;  %854 = vmatprep.subr.mxu0 %v9462_v23  ;;  %v275_v21 = vld [vmem:[%s14018_s7] sm:$0xf] }
  0x8f   :  { %949 = vmatprep.subr.mxu1 %v9469_v22  ;;  %855 = vmatpush1.msra.mxu0 %v9474_v28  ;;  %v10044_v22 = vrot.slane %v275_v21, %v129_v17  ;;  %v10046_v23 = vrot.slane %v275_v21, %v133_v19  ;;  %v10048_v24 = vrot.slane %v275_v21, %v137_v18 }
  0x90   :  { %950 = vmatpush1.msra.mxu1 %v9481_v25  ;;  %856 = vmatprep.subr.mxu0 %v9486_v27  ;;  %v10050_v25 = vrot.slane %v275_v21, %v141_v20 }
  0x91   :  { %951 = vmatprep.subr.mxu1 %v9493_v26  ;;  %857 = vmatpush1.msra.mxu0 %v9498_v32  ;;  %14623 = vst [vmem:[#allocation130_spill] sm:$0xff] %v10044_v22  ;;  %14624 = vst [vmem:[#allocation131_spill] sm:$0xff] %v10046_v23  ;;  %v10507_v23 = vld [vmem:[%s14012_s3 + $0x48] sm:$0xff]  ;;  %v10513_v22 = vld [vmem:[%s14012_s3 + $0x58] sm:$0xff] }
  0x92   :  { %952 = vmatpush1.msra.mxu1 %v9505_v29  ;;  %858 = vmatprep.subr.mxu0 %v9510_v31  ;;  %14625 = vst [vmem:[#allocation132_spill] sm:$0xff] %v10048_v24  ;;  %14626 = vst [vmem:[#allocation133_spill] sm:$0xff] %v10050_v25  ;;  %v10495_v24 = vld [vmem:[%s14012_s3 + $0x60] sm:$0xff]  ;;  %v10501_v25 = vld [vmem:[%s14012_s3 + $0x70] sm:$0xff] }
  0x93   :  { %953 = vmatprep.subr.mxu1 %v9517_v30  ;;  %859 = vmatpush1.msra.mxu0 %v9522_v36  ;;  %14687 = vst [vmem:[#allocation170_spill] sm:$0xff] %v10495_v24  ;;  %14688 = vst [vmem:[#allocation171_spill] sm:$0xff] %v10501_v25 }
  0x94   :  { %954 = vmatpush1.msra.mxu1 %v9529_v33  ;;  %860 = vmatprep.subr.mxu0 %v9534_v35  ;;  %14689 = vst [vmem:[#allocation172_spill] sm:$0xff] %v10507_v23  ;;  %14690 = vst [vmem:[#allocation173_spill] sm:$0xff] %v10513_v22 }
  0x95   :  { %955 = vmatprep.subr.mxu1 %v9541_v34  ;;  %861 = vmatpush1.msra.mxu0 %v9546_v40 }
  0x96   :  { %956 = vmatpush1.msra.mxu1 %v9553_v37  ;;  %862 = vmatprep.subr.mxu0 %v9558_v39 }
  0x97   :  { %957 = vmatprep.subr.mxu1 %v9565_v38  ;;  %863 = vmatpush1.msra.mxu0 %v9570_v44  ;;  %v125_v44 = vld [vmem:[%s14019_s4] sm:$0xf] }
  0x98   :  { %958 = vmatpush1.msra.mxu1 %v9577_v41  ;;  %864 = vmatprep.subr.mxu0 %v9582_v43  ;;  %v10079_v16 = vrot.slane %v125_v44, %v137_v18 }
  0x99   :  { %959 = vmatprep.subr.mxu1 %v9589_v42  ;;  %865 = vmatpush1.msra.mxu0 %v9594_v48 }
  0x9a   :  { %960 = vmatpush1.msra.mxu1 %v9601_v45  ;;  %866 = vmatprep.subr.mxu0 %v9606_v47  ;;  %v10069_v47 = vrot.slane %v125_v44, %v129_v17 }
  0x9b   :  { %961 = vmatprep.subr.mxu1 %v9613_v46  ;;  %867 = vmatpush1.msra.mxu0 %v9618_v52 }
  0x9c   :  { %962 = vmatpush1.msra.mxu1 %v9625_v49  ;;  %868 = vmatprep.subr.mxu0 %v9630_v51  ;;  %v10071_v51 = vrot.slane %v125_v44, %v133_v19 }
  0x9d   :  { %963 = vmatprep.subr.mxu1 %v9637_v50  ;;  %869 = vmatpush1.msra.mxu0 %v9642_v56 }
  0x9e   :  { %964 = vmatpush1.msra.mxu1 %v9649_v53  ;;  %870 = vmatprep.subr.mxu0 %v9654_v55 }
  0x9f   :  { %965 = vmatprep.subr.mxu1 %v9661_v54  ;;  %871 = vmatpush1.msra.mxu0 %v9666_v60 }
  0xa0   :  { %966 = vmatpush1.msra.mxu1 %v14612_v4  ;;  %872 = vmatprep.subr.mxu0 %v14613_v5 }
  0xa1   :  { %967 = vmatprep.subr.mxu1 %v14614_v6  ;;  %873 = vmatpush1.msra.mxu0 %v14615_v7 }
  0xa2   :  { %968 = vmatpush1.msra.mxu1 %v14616_v8  ;;  %874 = vmatprep.subr.mxu0 %v14617_v9  ;;  %v10076_v9 = vrot.slane %v125_v44, %v141_v20 }
  0xa3   :  { %969 = vmatprep.subr.mxu1 %v14618_v10  ;;  %875 = vmatpush1.msra.mxu0 %v14619_v11 }
  0xa4   :  { %908 = vmatprep.mubr.f32.mxu0 %v14587_v58  ;;  %970 = vmatpush1.msra.mxu1 %v14620_v12 }
  0xa5   :  { %1003 = vmatprep.mubr.f32.mxu1 %v14587_v58  ;;  %1065 = vmatprep.subr.mxu0 %v14621_v13 }
  0xa6   :  { %1160 = vmatprep.subr.mxu1 %v14622_v14 }
 0x121   :  { %v368_v26 = vpop.f32.mrf.mxu0 }
 0x122   :  { %v463_v27 = vpop.f32.mrf.mxu1 }
 0x123   :  { %v370_v28 = vpop.f32.mrf.mxu0 }
 0x124   :  { %v465_v29 = vpop.f32.mrf.mxu1 }
 0x125   :  { %v374_v30 = vpop.f32.mrf.mxu0 }
 0x126   :  { %v469_v31 = vpop.f32.mrf.mxu1 }
 0x127   :  { %v376_v32 = vpop.f32.mrf.mxu0 }
 0x128   :  { %v471_v33 = vpop.f32.mrf.mxu1 }
 0x12a   :  { %v380_v34 = vpop.f32.mrf.mxu0 }
 0x12b   :  { %v10052_v35 = vpop.f32.mrf.mxu1 }
 0x12c   :  { %v382_v36 = vpop.f32.mrf.mxu0 }
 0x12d   :  { %v10054_v37 = vpop.f32.mrf.mxu1 }
 0x130   :  { %v386_v38 = vpop.f32.mrf.mxu0 }
 0x131   :  { %v10056_v39 = vpop.f32.mrf.mxu1 }
 0x132   :  { %v388_v40 = vpop.f32.mrf.mxu0 }
 0x133   :  { %v10058_v41 = vpop.f32.mrf.mxu1 }
 0x136   :  { %v392_v42 = vpop.f32.mrf.mxu0  ;;  %v10060_v43 = vpop.f32.mrf.mxu1 }
 0x138   :  { %v10065_v45 = vpop.f32.mrf.mxu0  ;;  %v10067_v46 = vpop.f32.mrf.mxu1 }
 0x13b   :  { %v574_v48 = vpop.f32.mrf.mxu0 }
 0x13c   :  { %v575_v49 = vadd.f32 %v574_v48, %v368_v26  ;;  %v669_v50 = vpop.f32.mrf.mxu1 }
 0x13d   :  { %v576_v52 = vpop.f32.mrf.mxu0  ;;  %v670_v17 = vadd.f32 %v669_v50, %v463_v27 }
 0x13e   :  { %v698_v53 = vadd.f32 %v575_v49, %v10069_v47  ;;  %v577_v54 = vadd.f32 %v576_v52, %v370_v28  ;;  %v671_v55 = vpop.f32.mrf.mxu1 }
 0x13f   :  { %v580_v56 = vpop.f32.mrf.mxu0  ;;  %v672_v10 = vadd.f32 %v671_v55, %v465_v29  ;;  %v700_v18 = vadd.f32 %v670_v17, %v10079_v16 }
 0x140   :  { %v6841_v60 = vmul.f32 -1.442695, %v698_v53  ;;  %v699_v57 = vadd.f32 %v577_v54, %v10071_v51  ;;  %v581_v0 = vadd.f32 %v580_v56, %v374_v30  ;;  %v675_v1 = vpop.f32.mrf.mxu1 }
 0x141   :  { %v582_v4 = vpop.f32.mrf.mxu0  ;;  %v701_v20 = vadd.f32 %v672_v10, %v10076_v9  ;;  %v676_v44 = vadd.f32 %v675_v1, %v469_v31 }
 0x142   :  { %7279 = vpow2.f32 %v6841_v60  ;;  %v6846_v5 = vmul.f32 -1.442695, %v699_v57  ;;  %v702_v6 = vadd.f32 %v581_v0, %v10069_v47  ;;  %v583_v7 = vadd.f32 %v582_v4, %v376_v32  ;;  %v677_v8 = vpop.f32.mrf.mxu1 }
 0x143   :  { %v586_v11 = vpop.f32.mrf.mxu0  ;;  %v678_v29 = vadd.f32 %v677_v8, %v471_v33  ;;  %v6851_v54 = vmul.f32 -1.442695, %v701_v20 }
 0x144   :  { %7281 = vpow2.f32 %v6846_v5  ;;  %v6842_v12 = vmul.f32 -1.442695, %v702_v6  ;;  %v703_v13 = vadd.f32 %v583_v7, %v10071_v51  ;;  %v587_v14 = vadd.f32 %v586_v11, %v380_v34  ;;  %v681_v15 = vpop.f32.mrf.mxu1 }
 0x145   :  { %v588_v19 = vpop.f32.mrf.mxu0  ;;  %v705_v55 = vadd.f32 %v678_v29, %v10076_v9  ;;  %v682_v7 = vadd.f32 %v681_v15, %v10052_v35 }
 0x146   :  { %7283 = vpow2.f32 %v6842_v12  ;;  %v6847_v21 = vmul.f32 -1.442695, %v703_v13  ;;  %v706_v26 = vadd.f32 %v587_v14, %v10069_v47  ;;  %v589_v28 = vadd.f32 %v588_v19, %v382_v36  ;;  %v683_v30 = vpop.f32.mrf.mxu1 }
 0x147   :  { %v592_v32 = vpop.f32.mrf.mxu0  ;;  %v684_v31 = vadd.f32 %v683_v30, %v10054_v37  ;;  %v6852_v6 = vmul.f32 -1.442695, %v705_v55  ;;  %v708_v17 = vadd.f32 %v682_v7, %v10079_v16 }
 0x148   :  { %7285 = vpow2.f32 %v6847_v21  ;;  %v6843_v48 = vmul.f32 -1.442695, %v706_v26  ;;  %v707_v49 = vadd.f32 %v589_v28, %v10071_v51  ;;  %v593_v34 = vadd.f32 %v592_v32, %v386_v38  ;;  %v687_v53 = vpop.f32.mrf.mxu1 }
 0x149   :  { %v594_v27 = vpop.f32.mrf.mxu0  ;;  %v704_v38 = vadd.f32 %v676_v44, %v10079_v16  ;;  %v709_v11 = vadd.f32 %v684_v31, %v10076_v9  ;;  %v688_v30 = vadd.f32 %v687_v53, %v10056_v39 }
 0x14a   :  { %7287 = vpow2.f32 %v6843_v48  ;;  %v6848_v50 = vmul.f32 -1.442695, %v707_v49  ;;  %v710_v52 = vadd.f32 %v593_v34, %v10069_v47  ;;  %v595_v36 = vadd.f32 %v594_v27, %v388_v40  ;;  %v689_v4 = vpop.f32.mrf.mxu1 }
 0x14b   :  { %v598_v33 = vpop.f32.mrf.mxu0  ;;  %v690_v37 = vadd.f32 %v689_v4, %v10058_v41  ;;  %v6853_v15 = vmul.f32 -1.442695, %v709_v11  ;;  %v712_v27 = vadd.f32 %v688_v30, %v10079_v16 }
 0x14c   :  { %7289 = vpow2.f32 %v6848_v50  ;;  %v6844_v56 = vmul.f32 -1.442695, %v710_v52  ;;  %v711_v60 = vadd.f32 %v595_v36, %v10071_v51  ;;  %v599_v57 = vadd.f32 %v598_v33, %v392_v42  ;;  %v693_v26 = vpop.f32.mrf.mxu1 }
 0x14d   :  { %7291 = vtanh.f32 %v700_v18  ;;  %v600_v0 = vpop.f32.mrf.mxu0  ;;  %v713_v21 = vadd.f32 %v690_v37, %v10076_v9  ;;  %v694_v53 = vadd.f32 %v693_v26, %v10060_v43 }
 0x14e   :  { %7293 = vpow2.f32 %v6844_v56  ;;  %v6849_v1 = vmul.f32 -1.442695, %v711_v60  ;;  %v714_v40 = vadd.f32 %v599_v57, %v10069_v47  ;;  %v601_v8 = vadd.f32 %v600_v0, %v10065_v45  ;;  %v695_v49 = vpop.f32.mrf.mxu1 }
 0x14f   :  { %v7280_v5 = vpop.eup %7279  ;;  %7295 = vpow2.f32 %v6851_v54  ;;  %v6854_v48 = vmul.f32 -1.442695, %v713_v21  ;;  %v696_v36 = vadd.f32 %v695_v49, %v10067_v46  ;;  %v716_v31 = vadd.f32 %v694_v53, %v10079_v16 }
 0x150   :  { %v733_v10 = vadd.f32 1.0, %v7280_v5  ;;  %7297 = vpow2.f32 %v6849_v1  ;;  %v6845_v12 = vmul.f32 -1.442695, %v714_v40  ;;  %v715_v19 = vadd.f32 %v601_v8, %v10071_v51 }
 0x151   :  { %v7282_v42 = vpop.eup %7281  ;;  %7299 = vtanh.f32 %v704_v38  ;;  %v717_v57 = vadd.f32 %v696_v36, %v10076_v9  ;;  %v14627_v36 = vld [vmem:[#allocation140_spill] sm:$0xff] }
 0x152   :  { %7301 = vrcp.f32 %v733_v10  ;;  %v763_v13 = vadd.f32 1.0, %v7282_v42  ;;  %v6850_v20 = vmul.f32 -1.442695, %v715_v19 }
 0x153   :  { %v7284_v14 = vpop.eup %7283  ;;  %7303 = vpow2.f32 %v6852_v6  ;;  %v6855_v6 = vmul.f32 -1.442695, %v717_v57  ;;  %v14630_v57 = vld [vmem:[#allocation145_spill] sm:$0xff] }
 0x154   :  { %7305 = vrcp.f32 %v763_v13  ;;  %v734_v35 = vadd.f32 1.0, %v7284_v14 }
 0x155   :  { %v7286_v45 = vpop.eup %7285  ;;  %7307 = vpow2.f32 %v6845_v12 }
 0x156   :  { %7309 = vrcp.f32 %v734_v35  ;;  %v764_v28 = vadd.f32 1.0, %v7286_v45 }
 0x157   :  { %v7288_v41 = vpop.eup %7287  ;;  %7311 = vtanh.f32 %v708_v17 }
 0x158   :  { %7313 = vrcp.f32 %v764_v28  ;;  %v735_v29 = vadd.f32 1.0, %v7288_v41 }
 0x159   :  { %v7290_v32 = vpop.eup %7289  ;;  %7315 = vpow2.f32 %v6853_v15 }
 0x15a   :  { %v7292_v34 = vpop.eup %7291  ;;  %7317 = vrcp.f32 %v735_v29  ;;  %v765_v18 = vadd.f32 1.0, %v7290_v32 }
 0x15b   :  { %v7294_v44 = vpop.eup %7293  ;;  %7319 = vpow2.f32 %v6850_v20 }
 0x15c   :  { %v7296_v50 = vpop.eup %7295  ;;  %7321 = vrcp.f32 %v765_v18  ;;  %v736_v52 = vadd.f32 1.0, %v7294_v44 }
 0x15d   :  { %v7298_v39 = vpop.eup %7297  ;;  %7323 = vpow2.f32 %v6854_v48  ;;  %v798_v60 = vadd.f32 1.0, %v7296_v50 }
 0x15e   :  { %v7300_v54 = vpop.eup %7299  ;;  %7325 = vrcp.f32 %v736_v52  ;;  %v766_v55 = vadd.f32 1.0, %v7298_v39 }
 0x15f   :  { %v7302_v33 = vpop.eup %7301  ;;  %7327 = vtanh.f32 %v712_v27 }
 0x160   :  { %v7304_v56 = vpop.eup %7303  ;;  %7329 = vrcp.f32 %v766_v55  ;;  %v818_v46 = vmul.f32 %v7302_v33, %v7292_v34 }
 0x161   :  { %v7306_v38 = vpop.eup %7305  ;;  %v799_v40 = vadd.f32 1.0, %v7304_v56  ;;  %7331 = vrcp.f32 %v798_v60  ;;  %v14629_v60 = vld [vmem:[#allocation143_spill] sm:$0xff] }
 0x162   :  { %v7308_v0 = vpop.eup %7307  ;;  %v813_v1 = vmul.f32 0.0, %v7306_v38  ;;  %7333 = vtanh.f32 %v716_v31 }
 0x163   :  { %v7310_v4 = vpop.eup %7309  ;;  %v737_v8 = vadd.f32 1.0, %v7308_v0 }
 0x164   :  { %v7312_v5 = vpop.eup %7311  ;;  %v10104_v43 = vadd.f32 %v818_v46, %v813_v1  ;;  %v819_v11 = vmul.f32 %v7310_v4, %v7300_v54  ;;  %v14628_v54 = vld [vmem:[#allocation141_spill] sm:$0xff]  ;;  %v14631_v1 = vld [vmem:[#allocation144_spill] sm:$0xff]  ;;  %v14632_v46 = vld [vmem:[#allocation147_spill] sm:$0xff] }
 0x165   :  { %v7314_v7 = vpop.eup %7313  ;;  %v14633_v4 = vld [vmem:[#allocation146_spill] sm:$0xff] }
 0x166   :  { %v7316_v10 = vpop.eup %7315  ;;  %7335 = vtanh.f32 %v10104_v43  ;;  %v814_v42 = vmul.f32 0.0, %v7314_v7 }
 0x167   :  { %v7318_v37 = vpop.eup %7317  ;;  %7337 = vrcp.f32 %v799_v40  ;;  %v800_v17 = vadd.f32 1.0, %v7316_v10  ;;  %v14636_v10 = vld [vmem:[#allocation150_spill] sm:$0xff] }
 0x168   :  { %v7320_v12 = vpop.eup %7319  ;;  %v10107_v13 = vadd.f32 %v819_v11, %v814_v42  ;;  %7339 = vpow2.f32 %v6855_v6  ;;  %v820_v15 = vmul.f32 %v7318_v37, %v7312_v5  ;;  %v14634_v5 = vld [vmem:[#allocation148_spill] sm:$0xff]  ;;  %v14637_v42 = vld [vmem:[#allocation151_spill] sm:$0xff] }
 0x169   :  { %v7322_v14 = vpop.eup %7321  ;;  %7341 = vrcp.f32 %v737_v8  ;;  %v767_v19 = vadd.f32 1.0, %v7320_v12  ;;  %v14635_v8 = vld [vmem:[#allocation149_spill] sm:$0xff]  ;;  %v14638_v11 = vld [vmem:[#allocation152_spill] sm:$0xff] }
 0x16a   :  { %v7324_v35 = vpop.eup %7323  ;;  %7343 = vtanh.f32 %v10107_v13  ;;  %v815_v45 = vmul.f32 0.0, %v7322_v14  ;;  %v14639_v12 = vld [vmem:[#allocation153_spill] sm:$0xff]  ;;  %v14640_v14 = vld [vmem:[#allocation154_spill] sm:$0xff] }
 0x16b   :  { %v7326_v21 = vpop.eup %7325  ;;  %7345 = vrcp.f32 %v767_v19  ;;  %v801_v30 = vadd.f32 1.0, %v7324_v35  ;;  %v14642_v19 = vld [vmem:[#allocation156_spill] sm:$0xff]  ;;  %v14643_v35 = vld [vmem:[#allocation157_spill] sm:$0xff] }
 0x16c   :  { %v7328_v26 = vpop.eup %7327  ;;  %v10110_v28 = vadd.f32 %v820_v15, %v815_v45  ;;  %7347 = vrcp.f32 %v800_v17  ;;  %v14641_v17 = vld [vmem:[#allocation155_spill] sm:$0xff]  ;;  %v14644_v45 = vld [vmem:[#allocation158_spill] sm:$0xff] }
 0x16d   :  { %v7330_v41 = vpop.eup %7329  ;;  %v821_v29 = vmul.f32 %v7328_v26, %v7326_v21  ;;  %v14645_v15 = vld [vmem:[#allocation159_spill] sm:$0xff]  ;;  %v14646_v21 = vld [vmem:[#allocation160_spill] sm:$0xff]  ;;  %v14647_v26 = vld [vmem:[#allocation161_spill] sm:$0xff] }
 0x16e   :  { %7349 = vtanh.f32 %v10110_v28  ;;  %v816_v20 = vmul.f32 0.0, %v7330_v41  ;;  %v7332_v48 = vpop.eup %7331  ;;  %v14648_v41 = vld [vmem:[#allocation162_spill] sm:$0xff] }
 0x16f   :  { %7351 = vrcp.f32 %v801_v30  ;;  %v7334_v49 = vpop.eup %7333 }
 0x170   :  { %v10113_v32 = vadd.f32 %v821_v29, %v816_v20  ;;  %v14649_v20 = vld [vmem:[#allocation163_spill] sm:$0xff] }
 0x172   :  { %7353 = vtanh.f32 %v10113_v32 }
 0x173   :  { %v7336_v34 = vpop.eup %7335 }
 0x174   :  { %v7338_v18 = vpop.eup %7337  ;;  %v833_v44 = vmul.f32 %v7336_v34, %v7332_v48  ;;  %v10159_v34 = vld [vmem:[%s14012_s3 + $0x1e8] sm:$0xff] }
 0x175   :  { %v7340_v27 = vpop.eup %7339 }
 0x176   :  { %v7342_v50 = vpop.eup %7341  ;;  %909 = vmatmul.mubr.f32.vlgmr.msra.gmra.mxu0 %v833_v44  ;;  %1004 = vmatmul.mubr.f32.vlgmr.msra.gmra.mxu1 %v833_v44  ;;  %v802_v53 = vadd.f32 1.0, %v7340_v27  ;;  %v6858_v44 = vld [vmem:[%s14017_s0 + $0x38] sm:$0xff]  ;;  %v10215_v27 = vld [vmem:[%s14012_s3 + $0x1c0] sm:$0xff] }
 0x177   :  { %v7344_v52 = vpop.eup %7343  ;;  %1066 = vmatpush1.msra.mxu0 %v14627_v36  ;;  %914 = vmatprep.mubr.f32.mxu0 %v14587_v58  ;;  %v822_v56 = vmul.f32 %v7342_v50, %v7334_v49  ;;  %v14650_v49 = vld [vmem:[#allocation164_spill] sm:$0xff]  ;;  %v10233_v36 = vld [vmem:[%s14012_s3 + $0x1b8] sm:$0xff] }
 0x178   :  { %v7346_v39 = vpop.eup %7345  ;;  %1009 = vmatprep.mubr.f32.mxu1 %v14587_v58  ;;  %1067 = vmatprep.subr.mxu0 %v14628_v54  ;;  %v834_v55 = vmul.f32 %v7344_v52, %v7338_v18  ;;  %7355 = vrcp.f32 %v802_v53  ;;  %v10202_v18 = vld [vmem:[%s14012_s3 + $0x1d8] sm:$0xff]  ;;  %v10221_v50 = vld [vmem:[%s14012_s3 + $0x1d0] sm:$0xff]  ;;  %v10227_v52 = vld [vmem:[%s14012_s3 + $0x1a8] sm:$0xff] }
 0x179   :  { %v817_v33 = vmul.f32 0.0, %v7346_v39  ;;  %1068 = vmatpush1.msra.mxu0 %v14629_v60  ;;  %1161 = vmatpush1.msra.mxu1 %v14630_v57  ;;  %v7348_v38 = vpop.eup %7347  ;;  %v6859_v39 = vld [vmem:[%s14017_s0 + $0x40] sm:$0xff]  ;;  %v10252_v54 = vld [vmem:[%s14012_s3 + $0x1b0] sm:$0xff] }
 0x17a   :  { %915 = vmatmul.mubr.f32.gmra.mxu0 %v834_v55  ;;  %1010 = vmatmul.mubr.f32.gmra.mxu1 %v834_v55  ;;  %v10246_v53 = vld [vmem:[%s14012_s3 + $0x1a0] sm:$0xff]  ;;  %v10258_v55 = vld [vmem:[%s14012_s3 + $0x188] sm:$0xff]  ;;  %v10283_v57 = vld [vmem:[%s14012_s3 + $0x190] sm:$0xff] }
 0x17b   :  { %v7350_v31 = vpop.eup %7349  ;;  %v10122_v0 = vadd.f32 %v822_v56, %v817_v33  ;;  %1069 = vmatprep.subr.mxu0 %v14631_v1  ;;  %1162 = vmatprep.subr.mxu1 %v14632_v46  ;;  %v10264_v33 = vld [vmem:[%s14012_s3 + $0x198] sm:$0xff]  ;;  %v6860_v56 = vld [vmem:[%s14017_s0 + $0x48] sm:$0xff]  ;;  %v10277_v60 = vld [vmem:[%s14012_s3 + $0x180] sm:$0xff]  ;;  %14652 = vst [vmem:[#allocation135_spill] sm:$0xff] %v10283_v57 }
 0x17c   :  { %1070 = vmatpush1.msra.mxu0 %v14633_v4  ;;  %920 = vmatprep.mubr.f32.mxu0 %v14587_v58  ;;  %v835_v40 = vmul.f32 %v7350_v31, %v7348_v38  ;;  %v7352_v6 = vpop.eup %7351  ;;  %14651 = vst [vmem:[#allocation134_spill] sm:$0xff] %v10277_v60  ;;  %v10289_v38 = vld [vmem:[%s14012_s3 + $0x168] sm:$0xff]  ;;  %v10295_v31 = vld [vmem:[%s14012_s3 + $0x178] sm:$0xff]  ;;  %v10303_v1 = vld [vmem:[%s14012_s3 + $0x160] sm:$0xff] }
 0x17d   :  { %7357 = vtanh.f32 %v10122_v0  ;;  %1015 = vmatprep.mubr.f32.mxu1 %v14587_v58  ;;  %1163 = vmatpush1.msra.mxu1 %v14634_v5  ;;  %14653 = vst [vmem:[#allocation136_spill] sm:$0xff] %v10289_v38  ;;  %14654 = vst [vmem:[#allocation137_spill] sm:$0xff] %v10295_v31  ;;  %v10309_v46 = vld [vmem:[%s14012_s3 + $0x170] sm:$0xff]  ;;  %v10315_v4 = vld [vmem:[%s14012_s3 + $0x148] sm:$0xff] }
 0x17e   :  { %921 = vmatmul.mubr.f32.gmra.mxu0 %v835_v40  ;;  %1016 = vmatmul.mubr.f32.gmra.mxu1 %v835_v40  ;;  %14655 = vst [vmem:[#allocation138_spill] sm:$0xff] %v10303_v1  ;;  %14656 = vst [vmem:[#allocation139_spill] sm:$0xff] %v10309_v46  ;;  %v10321_v40 = vld [vmem:[%s14012_s3 + $0x158] sm:$0xff]  ;;  %v10327_v5 = vld [vmem:[%s14012_s3 + $0x140] sm:$0xff] }
 0x17f   :  { %v7354_v7 = vpop.eup %7353  ;;  %1071 = vmatprep.subr.mxu0 %v14635_v8  ;;  %1164 = vmatprep.subr.mxu1 %v14636_v10  ;;  %14657 = vst [vmem:[#allocation142_spill] sm:$0xff] %v10315_v4  ;;  %14658 = vst [vmem:[#allocation140_spill] sm:$0xff] %v10321_v40  ;;  %v10345_v8 = vld [vmem:[%s14012_s3 + $0x138] sm:$0xff]  ;;  %v10351_v10 = vld [vmem:[%s14012_s3 + $0x120] sm:$0xff] }
 0x180   :  { %1072 = vmatpush1.msra.mxu0 %v14637_v42  ;;  %1165 = vmatpush1.msra.mxu1 %v14638_v11  ;;  %v836_v37 = vmul.f32 %v7354_v7, %v7352_v6  ;;  %14659 = vst [vmem:[#allocation141_spill] sm:$0xff] %v10327_v5  ;;  %v10333_v6 = vld [vmem:[%s14012_s3 + $0x150] sm:$0xff]  ;;  %v10339_v7 = vld [vmem:[%s14012_s3 + $0x128] sm:$0xff]  ;;  %14662 = vst [vmem:[#allocation144_spill] sm:$0xff] %v10345_v8 }
 0x181   :  { %1073 = vmatprep.subr.mxu0 %v14639_v12  ;;  %1166 = vmatprep.subr.mxu1 %v14640_v14  ;;  %14660 = vst [vmem:[#allocation143_spill] sm:$0xff] %v10333_v6  ;;  %14661 = vst [vmem:[#allocation145_spill] sm:$0xff] %v10339_v7  ;;  %v10357_v42 = vld [vmem:[%s14012_s3 + $0x130] sm:$0xff]  ;;  %v10363_v11 = vld [vmem:[%s14012_s3 + $0x108] sm:$0xff] }
 0x182   :  { %926 = vmatprep.mubr.f32.mxu0 %v14587_v58  ;;  %1021 = vmatprep.mubr.f32.mxu1 %v14587_v58  ;;  %14663 = vst [vmem:[#allocation147_spill] sm:$0xff] %v10351_v10  ;;  %14664 = vst [vmem:[#allocation146_spill] sm:$0xff] %v10357_v42  ;;  %v10375_v12 = vld [vmem:[%s14012_s3 + $0x100] sm:$0xff]  ;;  %v10381_v14 = vld [vmem:[%s14012_s3 + $0x110] sm:$0xff] }
 0x183   :  { %1074 = vmatpush1.msra.mxu0 %v14641_v17  ;;  %1167 = vmatpush1.msra.mxu1 %v14642_v19  ;;  %14665 = vst [vmem:[#allocation148_spill] sm:$0xff] %v10363_v11  ;;  %14667 = vst [vmem:[#allocation150_spill] sm:$0xff] %v10375_v12  ;;  %v10387_v17 = vld [vmem:[%s14012_s3 + $0xe8] sm:$0xff]  ;;  %v10393_v19 = vld [vmem:[%s14012_s3 + $0xf8] sm:$0xff] }
 0x184   :  { %927 = vmatmul.mubr.f32.gmra.mxu0 %v836_v37  ;;  %1022 = vmatmul.mubr.f32.gmra.mxu1 %v836_v37  ;;  %v10369_v37 = vld [vmem:[%s14012_s3 + $0x118] sm:$0xff]  ;;  %14668 = vst [vmem:[#allocation151_spill] sm:$0xff] %v10381_v14  ;;  %14669 = vst [vmem:[#allocation152_spill] sm:$0xff] %v10387_v17 }
 0x185   :  { %1168 = vmatprep.subr.mxu1 %v14643_v35  ;;  %1075 = vmatprep.subr.mxu0 %v14644_v45  ;;  %v7356_v30 = vpop.eup %7355  ;;  %14666 = vst [vmem:[#allocation149_spill] sm:$0xff] %v10369_v37  ;;  %14670 = vst [vmem:[#allocation153_spill] sm:$0xff] %v10393_v19  ;;  %v10399_v35 = vld [vmem:[%s14012_s3 + $0xe0] sm:$0xff]  ;;  %v10405_v45 = vld [vmem:[%s14012_s3 + $0xf0] sm:$0xff] }
 0x186   :  { %1169 = vmatpush1.msra.mxu1 %v14645_v15  ;;  %1076 = vmatpush1.msra.mxu0 %v14646_v21  ;;  %14671 = vst [vmem:[#allocation154_spill] sm:$0xff] %v10399_v35  ;;  %14672 = vst [vmem:[#allocation155_spill] sm:$0xff] %v10405_v45  ;;  %v10411_v15 = vld [vmem:[%s14012_s3 + $0xc8] sm:$0xff]  ;;  %v10417_v21 = vld [vmem:[%s14012_s3 + $0xd8] sm:$0xff] }
 0x187   :  { %1170 = vmatprep.subr.mxu1 %v14647_v26  ;;  %932 = vmatprep.mubr.f32.mxu0 %v14587_v58  ;;  %14673 = vst [vmem:[#allocation156_spill] sm:$0xff] %v10411_v15  ;;  %14674 = vst [vmem:[#allocation157_spill] sm:$0xff] %v10417_v21  ;;  %v10423_v26 = vld [vmem:[%s14012_s3 + $0xc0] sm:$0xff] }
 0x188   :  { %1027 = vmatprep.mubr.f32.mxu1 %v14587_v58  ;;  %1077 = vmatprep.subr.mxu0 %v14648_v41  ;;  %14675 = vst [vmem:[#allocation158_spill] sm:$0xff] %v10423_v26  ;;  %v10429_v41 = vld [vmem:[%s14012_s3 + $0xd0] sm:$0xff] }
 0x189   :  { %1171 = vmatpush1.msra.mxu1 %v14649_v20  ;;  %1078 = vmatpush1.msra.mxu0 %v9895_v2  ;;  %v6856_v2 = vld [vmem:[%s14017_s0 + $0x28] sm:$0xff]  ;;  %14676 = vst [vmem:[#allocation159_spill] sm:$0xff] %v10429_v41  ;;  %v10441_v20 = vld [vmem:[%s14012_s3 + $0xb8] sm:$0xff] }
 0x18a   :  { %v7358_v29 = vpop.eup %7357  ;;  %1172 = vmatprep.subr.mxu1 %v9900_v3  ;;  %1079 = vmatprep.subr.mxu0 %v9912_v63  ;;  %v10171_v3 = vld [vmem:[%s14012_s3 + $0x1f8] sm:$0xff]  ;;  %v10196_v63 = vld [vmem:[%s14012_s3 + $0x1c8] sm:$0xff]  ;;  %14678 = vst [vmem:[#allocation161_spill] sm:$0xff] %v10441_v20 }
 0x18b   :  { %v837_v48 = vmul.f32 %v7358_v29, %v7356_v30  ;;  %1173 = vmatpush1.msra.mxu1 %v14650_v49  ;;  %1080 = vmatpush1.msra.mxu0 %v9924_v59  ;;  %v6857_v59 = vld [vmem:[%s14017_s0 + $0x30] sm:$0xff]  ;;  %v10435_v30 = vld [vmem:[%s14012_s3 + $0xa8] sm:$0xff]  ;;  %v10447_v29 = vld [vmem:[%s14012_s3 + $0xa0] sm:$0xff] }
 0x18c   :  { %1174 = vmatprep.subr.mxu1 %v9919_v61  ;;  %1385 = vmatprep.subr.mxu0 %v10159_v34  ;;  %v10184_v61 = vld [vmem:[%s14012_s3 + $0x1e0] sm:$0xff]  ;;  %14677 = vst [vmem:[#allocation160_spill] sm:$0xff] %v10435_v30  ;;  %14679 = vst [vmem:[#allocation162_spill] sm:$0xff] %v10447_v29  ;;  %v10459_v49 = vld [vmem:[%s14012_s3 + $0x88] sm:$0xff] }
 0x18d   :  { %933 = vmatmul.mubr.f32.gmra.mxu0 %v837_v48  ;;  %1028 = vmatmul.mubr.f32.gmra.mxu1 %v837_v48  ;;  %v10453_v48 = vld [vmem:[%s14012_s3 + $0xb0] sm:$0xff]  ;;  %14681 = vst [vmem:[#allocation164_spill] sm:$0xff] %v10459_v49 }
 0x18e   :  { %1113 = vmatprep.mubr.f32.mxu0 %v14587_v58  ;;  %1175 = vmatpush1.msra.mxu1 %v9931_v62  ;;  %v10190_v62 = vld [vmem:[%s14012_s3 + $0x1f0] sm:$0xff]  ;;  %14680 = vst [vmem:[#allocation163_spill] sm:$0xff] %v10453_v48 }
 0x18f   :  { %1208 = vmatprep.mubr.f32.mxu1 %v14587_v58  ;;  %1480 = vmatprep.subr.mxu1 %v10171_v3 }
 0x191   :  { %6861 = vmatmul.mubr.msk.f32.vlgmr.msra.gmra.mxu0 %vm492_vm0, %v6856_v2  ;;  %6866 = vmatmul.mubr.msk.f32.vlgmr.msra.gmra.mxu1 %vm492_vm0, %v6856_v2  ;;  %v10465_v2 = vld [vmem:[%s14012_s3 + $0x98] sm:$0xff] }
 0x192   :  { %1119 = vmatprep.mubr.f32.mxu0 %v14587_v58  ;;  %1214 = vmatprep.mubr.f32.mxu1 %v14587_v58  ;;  %14682 = vst [vmem:[#allocation165_spill] sm:$0xff] %v10465_v2 }
 0x193   :  { %1386 = vmatpush1.msra.mxu0 %v10184_v61  ;;  %1481 = vmatpush1.msra.mxu1 %v10190_v62 }
 0x194   :  { %1387 = vmatprep.subr.mxu0 %v10196_v63  ;;  %1482 = vmatprep.subr.mxu1 %v10202_v18 }
 0x195   :  { %6862 = vmatmul.mubr.msk.f32.gmra.mxu0 %vm492_vm0, %v6857_v59  ;;  %6867 = vmatmul.mubr.msk.f32.gmra.mxu1 %vm492_vm0, %v6857_v59  ;;  %v10471_v59 = vld [vmem:[%s14012_s3 + $0x80] sm:$0xff] }
 0x196   :  { %1125 = vmatprep.mubr.f32.mxu0 %v14587_v58  ;;  %1220 = vmatprep.mubr.f32.mxu1 %v14587_v58  ;;  %14683 = vst [vmem:[#allocation166_spill] sm:$0xff] %v10471_v59 }
 0x197   :  { %1388 = vmatpush1.msra.mxu0 %v10215_v27  ;;  %1483 = vmatpush1.msra.mxu1 %v10221_v50 }
 0x198   :  { %1389 = vmatprep.subr.mxu0 %v10227_v52  ;;  %1484 = vmatprep.subr.mxu1 %v10233_v36 }
 0x199   :  { %6863 = vmatmul.mubr.msk.f32.gmra.mxu0 %vm492_vm0, %v6858_v44  ;;  %6868 = vmatmul.mubr.msk.f32.gmra.mxu1 %vm492_vm0, %v6858_v44  ;;  %v10477_v44 = vld [vmem:[%s14012_s3 + $0x90] sm:$0xff] }
 0x19a   :  { %1131 = vmatprep.mubr.f32.mxu0 %v14587_v58  ;;  %1226 = vmatprep.mubr.f32.mxu1 %v14587_v58  ;;  %14684 = vst [vmem:[#allocation167_spill] sm:$0xff] %v10477_v44 }
 0x19b   :  { %1390 = vmatpush1.msra.mxu0 %v10246_v53  ;;  %1485 = vmatpush1.msra.mxu1 %v10252_v54 }
 0x19c   :  { %1391 = vmatprep.subr.mxu0 %v10258_v55  ;;  %1486 = vmatprep.subr.mxu1 %v10264_v33 }
 0x19d   :  { %6864 = vmatmul.mubr.msk.f32.gmra.mxu0 %vm492_vm0, %v6859_v39  ;;  %6869 = vmatmul.mubr.msk.f32.gmra.mxu1 %vm492_vm0, %v6859_v39  ;;  %v10483_v39 = vld [vmem:[%s14012_s3 + $0x68] sm:$0xff] }
 0x19e   :  { %1137 = vmatprep.mubr.f32.mxu0 %v14587_v58  ;;  %1232 = vmatprep.mubr.f32.mxu1 %v14587_v58  ;;  %14685 = vst [vmem:[#allocation168_spill] sm:$0xff] %v10483_v39 }
 0x19f   :  { %1392 = vmatpush1.msra.mxu0 %v10277_v60  ;;  %1487 = vmatpush1.msra.mxu1 %v10283_v57 }
 0x1a0   :  { %1393 = vmatprep.subr.mxu0 %v10289_v38  ;;  %1488 = vmatprep.subr.mxu1 %v10295_v31 }
 0x1a1   :  { %6865 = vmatmul.mubr.msk.f32.gmra.mxu0 %vm492_vm0, %v6860_v56  ;;  %6870 = vmatmul.mubr.msk.f32.gmra.mxu1 %vm492_vm0, %v6860_v56  ;;  %v10489_v56 = vld [vmem:[%s14012_s3 + $0x78] sm:$0xff] }
 0x1a2   :  { %1394 = vmatpush1.msra.mxu0 %v10303_v1  ;;  %1489 = vmatpush1.msra.mxu1 %v10309_v46  ;;  %14686 = vst [vmem:[#allocation169_spill] sm:$0xff] %v10489_v56 }
 0x1a3   :  { %1395 = vmatprep.subr.mxu0 %v10315_v4  ;;  %1490 = vmatprep.subr.mxu1 %v10321_v40 }
 0x1a4   :  { %1396 = vmatpush1.msra.mxu0 %v10327_v5  ;;  %1491 = vmatpush1.msra.mxu1 %v10333_v6 }
 0x1a5   :  { %1397 = vmatprep.subr.mxu0 %v10339_v7  ;;  %1492 = vmatprep.subr.mxu1 %v10345_v8 }
 0x1a6   :  { %1398 = vmatpush1.msra.mxu0 %v10351_v10  ;;  %1493 = vmatpush1.msra.mxu1 %v10357_v42 }
 0x1a7   :  { %1399 = vmatprep.subr.mxu0 %v10363_v11  ;;  %1494 = vmatprep.subr.mxu1 %v10369_v37 }
 0x1a8   :  { %1400 = vmatpush1.msra.mxu0 %v10375_v12  ;;  %1495 = vmatpush1.msra.mxu1 %v10381_v14 }
 0x1a9   :  { %1401 = vmatprep.subr.mxu0 %v10387_v17  ;;  %1496 = vmatprep.subr.mxu1 %v10393_v19 }
 0x1aa   :  { %1402 = vmatpush1.msra.mxu0 %v10399_v35  ;;  %1497 = vmatpush1.msra.mxu1 %v10405_v45 }
 0x1ab   :  { %1403 = vmatprep.subr.mxu0 %v10411_v15  ;;  %1498 = vmatprep.subr.mxu1 %v10417_v21 }
 0x1ac   :  { %1404 = vmatpush1.msra.mxu0 %v10423_v26  ;;  %1499 = vmatpush1.msra.mxu1 %v10429_v41 }
 0x1ad   :  { %1405 = vmatprep.subr.mxu0 %v10435_v30  ;;  %1500 = vmatprep.subr.mxu1 %v10441_v20 }
 0x1ae   :  { %1406 = vmatpush1.msra.mxu0 %v10447_v29  ;;  %1501 = vmatpush1.msra.mxu1 %v10453_v48 }
 0x1af   :  { %1407 = vmatprep.subr.mxu0 %v10459_v49  ;;  %1502 = vmatprep.subr.mxu1 %v10465_v2 }
 0x1b0   :  { %1408 = vmatpush1.msra.mxu0 %v10471_v59  ;;  %1503 = vmatpush1.msra.mxu1 %v10477_v44 }
 0x1b1   :  { %1409 = vmatprep.subr.mxu0 %v10483_v39  ;;  %1504 = vmatprep.subr.mxu1 %v10489_v56 }
 0x1b2   :  { %1410 = vmatpush1.msra.mxu0 %v10495_v24  ;;  %1505 = vmatpush1.msra.mxu1 %v10501_v25  ;;  %v10519_v24 = vld [vmem:[%s14012_s3 + $0x40] sm:$0xff]  ;;  %v10525_v25 = vld [vmem:[%s14012_s3 + $0x50] sm:$0xff] }
 0x1b3   :  { %1411 = vmatprep.subr.mxu0 %v10507_v23  ;;  %1506 = vmatprep.subr.mxu1 %v10513_v22  ;;  %14691 = vst [vmem:[#allocation174_spill] sm:$0xff] %v10519_v24  ;;  %14692 = vst [vmem:[#allocation175_spill] sm:$0xff] %v10525_v25  ;;  %v10531_v23 = vld [vmem:[%s14012_s3 + $0x28] sm:$0xff]  ;;  %v10537_v22 = vld [vmem:[%s14012_s3 + $0x38] sm:$0xff] }
 0x1b4   :  { %1412 = vmatpush1.msra.mxu0 %v10519_v24  ;;  %1507 = vmatpush1.msra.mxu1 %v10525_v25  ;;  %14693 = vst [vmem:[#allocation176_spill] sm:$0xff] %v10531_v23  ;;  %14694 = vst [vmem:[#allocation177_spill] sm:$0xff] %v10537_v22  ;;  %v10543_v24 = vld [vmem:[%s14012_s3 + $0x20] sm:$0xff]  ;;  %v10549_v25 = vld [vmem:[%s14012_s3 + $0x30] sm:$0xff] }
 0x1b5   :  { %1413 = vmatprep.subr.mxu0 %v10531_v23  ;;  %1508 = vmatprep.subr.mxu1 %v10537_v22  ;;  %14695 = vst [vmem:[#allocation178_spill] sm:$0xff] %v10543_v24  ;;  %14696 = vst [vmem:[#allocation179_spill] sm:$0xff] %v10549_v25  ;;  %v10555_v23 = vld [vmem:[%s14012_s3 + $0x8] sm:$0xff]  ;;  %v10561_v22 = vld [vmem:[%s14012_s3 + $0x18] sm:$0xff] }
 0x1b6   :  { %1414 = vmatpush1.msra.mxu0 %v10543_v24  ;;  %1509 = vmatpush1.msra.mxu1 %v10549_v25  ;;  %14697 = vst [vmem:[#allocation180_spill] sm:$0xff] %v10555_v23  ;;  %14698 = vst [vmem:[#allocation181_spill] sm:$0xff] %v10561_v22  ;;  %v10567_v24 = vld [vmem:[%s14012_s3] sm:$0xff] }
 0x1b7   :  { %1415 = vmatprep.subr.mxu0 %v10555_v23  ;;  %1510 = vmatprep.subr.mxu1 %v10561_v22  ;;  %14699 = vst [vmem:[#allocation182_spill] sm:$0xff] %v10567_v24  ;;  %v10574_v23 = vld [vmem:[%s14012_s3 + $0x10] sm:$0xff]  ;;  %v10581_v22 = vld [vmem:[%s14016_s2 + $0xe8] sm:$0xff] }
 0x1b8   :  { %1416 = vmatpush1.msra.mxu0 %v10567_v24  ;;  %1449 = vmatprep.mubr.f32.mxu0 %v14587_v58  ;;  %14700 = vst [vmem:[#allocation183_spill] sm:$0xff] %v10574_v23  ;;  %14701 = vst [vmem:[#allocation184_spill] sm:$0xff] %v10581_v22  ;;  %v10587_v24 = vld [vmem:[%s14016_s2 + $0xf8] sm:$0xff] }
 0x1b9   :  { %1511 = vmatpush1.msra.mxu1 %v10574_v23  ;;  %1544 = vmatprep.mubr.f32.mxu1 %v14587_v58  ;;  %14702 = vst [vmem:[#allocation185_spill] sm:$0xff] %v10587_v24 }
 0x1ba   :  { %1606 = vmatprep.subr.mxu0 %v10581_v22  ;;  %1701 = vmatprep.subr.mxu1 %v10587_v24 }
 0x236   :  { %v910_v25 = vpop.f32.mrf.mxu0  ;;  %v1005_v56 = vpop.f32.mrf.mxu1 }
 0x238   :  { %v912_v39 = vpop.f32.mrf.mxu0  ;;  %v1007_v23 = vpop.f32.mrf.mxu1 }
 0x23a   :  { %v916_v44 = vpop.f32.mrf.mxu0  ;;  %v1011_v59 = vpop.f32.mrf.mxu1 }
 0x23c   :  { %v918_v2 = vpop.f32.mrf.mxu0  ;;  %v1013_v49 = vpop.f32.mrf.mxu1 }
 0x23e   :  { %v922_v48 = vpop.f32.mrf.mxu0  ;;  %v10590_v29 = vpop.f32.mrf.mxu1 }
 0x240   :  { %v924_v20 = vpop.f32.mrf.mxu0  ;;  %v10592_v22 = vpop.f32.mrf.mxu1 }
 0x244   :  { %v928_v30 = vpop.f32.mrf.mxu0  ;;  %v10594_v41 = vpop.f32.mrf.mxu1 }
 0x246   :  { %v930_v26 = vpop.f32.mrf.mxu0  ;;  %v10596_v21 = vpop.f32.mrf.mxu1 }
 0x24d   :  { %v934_v24 = vpop.f32.mrf.mxu0  ;;  %v10598_v15 = vpop.f32.mrf.mxu1 }
 0x24f   :  { %v10600_v45 = vpop.f32.mrf.mxu0  ;;  %v10602_v35 = vpop.f32.mrf.mxu1 }
 0x251   :  { %v1115_v19 = vpop.f32.mrf.mxu0  ;;  %v1210_v17 = vpop.f32.mrf.mxu1 }
 0x252   :  { %v1116_v14 = vadd.f32 %v1115_v19, %v910_v25  ;;  %v1211_v57 = vadd.f32 %v1210_v17, %v1005_v56 }
 0x253   :  { %v1117_v12 = vpop.f32.mrf.mxu0  ;;  %v1212_v37 = vpop.f32.mrf.mxu1 }
 0x254   :  { %v1239_v11 = vadd.f32 %v1116_v14, %v10069_v47  ;;  %v1118_v42 = vadd.f32 %v1117_v12, %v912_v39  ;;  %v1213_v1 = vadd.f32 %v1212_v37, %v1007_v23 }
 0x255   :  { %v1121_v10 = vpop.f32.mrf.mxu0  ;;  %v1216_v8 = vpop.f32.mrf.mxu1 }
 0x256   :  { %v6871_v7 = vmul.f32 -1.442695, %v1239_v11  ;;  %v1240_v6 = vadd.f32 %v1118_v42, %v10071_v51  ;;  %v1122_v5 = vadd.f32 %v1121_v10, %v916_v44  ;;  %v1242_v10 = vadd.f32 %v1213_v1, %v10076_v9 }
 0x257   :  { %v1123_v40 = vpop.f32.mrf.mxu0  ;;  %v1218_v4 = vpop.f32.mrf.mxu1  ;;  %v1217_v17 = vadd.f32 %v1216_v8, %v1011_v59 }
 0x258   :  { %7359 = vpow2.f32 %v6871_v7  ;;  %v6876_v46 = vmul.f32 -1.442695, %v1240_v6  ;;  %v1124_v31 = vadd.f32 %v1123_v40, %v918_v2  ;;  %v1243_v38 = vadd.f32 %v1122_v5, %v10069_v47 }
 0x259   :  { %v1127_v25 = vpop.f32.mrf.mxu0  ;;  %v1222_v19 = vpop.f32.mrf.mxu1  ;;  %v1219_v23 = vadd.f32 %v1218_v4, %v1013_v49  ;;  %v1241_v5 = vadd.f32 %v1211_v57, %v10079_v16  ;;  %v6881_v2 = vmul.f32 -1.442695, %v1242_v10  ;;  %v1245_v8 = vadd.f32 %v1217_v17, %v10079_v16 }
 0x25a   :  { %7361 = vpow2.f32 %v6876_v46  ;;  %v1244_v12 = vadd.f32 %v1124_v31, %v10071_v51  ;;  %v1128_v14 = vadd.f32 %v1127_v25, %v922_v48  ;;  %v6872_v39 = vmul.f32 -1.442695, %v1243_v38 }
 0x25b   :  { %v1129_v11 = vpop.f32.mrf.mxu0  ;;  %v1224_v60 = vpop.f32.mrf.mxu1  ;;  %v1246_v56 = vadd.f32 %v1219_v23, %v10076_v9 }
 0x25c   :  { %v6877_v42 = vmul.f32 -1.442695, %v1244_v12  ;;  %v1247_v7 = vadd.f32 %v1128_v14, %v10069_v47  ;;  %7363 = vpow2.f32 %v6872_v39  ;;  %v1130_v40 = vadd.f32 %v1129_v11, %v924_v20 }
 0x25d   :  { %v1133_v6 = vpop.f32.mrf.mxu0  ;;  %v1228_v38 = vpop.f32.mrf.mxu1  ;;  %v1223_v14 = vadd.f32 %v1222_v19, %v10590_v29  ;;  %v6882_v10 = vmul.f32 -1.442695, %v1246_v56 }
 0x25e   :  { %7365 = vpow2.f32 %v6877_v42  ;;  %v6873_v37 = vmul.f32 -1.442695, %v1247_v7  ;;  %v1134_v46 = vadd.f32 %v1133_v6, %v928_v30  ;;  %v1248_v31 = vadd.f32 %v1130_v40, %v10071_v51 }
 0x25f   :  { %v1135_v48 = vpop.f32.mrf.mxu0  ;;  %v1225_v30 = vadd.f32 %v1224_v60, %v10592_v22  ;;  %v1230_v59 = vpop.f32.mrf.mxu1  ;;  %v1249_v29 = vadd.f32 %v1223_v14, %v10079_v16 }
 0x260   :  { %7367 = vpow2.f32 %v6873_v37  ;;  %v1251_v1 = vadd.f32 %v1134_v46, %v10069_v47  ;;  %v1136_v44 = vadd.f32 %v1135_v48, %v930_v26  ;;  %v6878_v4 = vmul.f32 -1.442695, %v1248_v31 }
 0x261   :  { %v1139_v20 = vpop.f32.mrf.mxu0  ;;  %7369 = vtanh.f32 %v1241_v5  ;;  %v1250_v22 = vadd.f32 %v1225_v30, %v10076_v9  ;;  %v1229_v31 = vadd.f32 %v1228_v38, %v10594_v41 }
 0x262   :  { %v6874_v49 = vmul.f32 -1.442695, %v1251_v1  ;;  %v1252_v57 = vadd.f32 %v1136_v44, %v10071_v51  ;;  %v1140_v25 = vadd.f32 %v1139_v20, %v934_v24  ;;  %7371 = vpow2.f32 %v6878_v4 }
 0x263   :  { %v1141_v12 = vpop.f32.mrf.mxu0  ;;  %7373 = vpow2.f32 %v6881_v2  ;;  %v1231_v24 = vadd.f32 %v1230_v59, %v10596_v21  ;;  %v6883_v46 = vmul.f32 -1.442695, %v1250_v22  ;;  %v1234_v21 = vpop.f32.mrf.mxu1 }
 0x264   :  { %v6879_v26 = vmul.f32 -1.442695, %v1252_v57  ;;  %v1255_v39 = vadd.f32 %v1140_v25, %v10069_v47  ;;  %7375 = vpow2.f32 %v6874_v49  ;;  %v1142_v42 = vadd.f32 %v1141_v12, %v10600_v45 }
 0x265   :  { %v7360_v11 = vpop.eup %7359  ;;  %v1254_v45 = vadd.f32 %v1231_v24, %v10076_v9  ;;  %v1236_v4 = vpop.f32.mrf.mxu1  ;;  %v1253_v49 = vadd.f32 %v1229_v31, %v10079_v16  ;;  %v1235_v59 = vadd.f32 %v1234_v21, %v10598_v15 }
 0x266   :  { %v1274_v7 = vadd.f32 1.0, %v7360_v11  ;;  %7377 = vpow2.f32 %v6879_v26  ;;  %v6875_v60 = vmul.f32 -1.442695, %v1255_v39  ;;  %v1256_v19 = vadd.f32 %v1142_v42, %v10071_v51 }
 0x267   :  { %v7362_v23 = vpop.eup %7361  ;;  %7379 = vtanh.f32 %v1245_v8  ;;  %v6884_v44 = vmul.f32 -1.442695, %v1254_v45  ;;  %v1237_v41 = vadd.f32 %v1236_v4, %v10602_v35 }
 0x268   :  { %7381 = vrcp.f32 %v1274_v7  ;;  %v1304_v40 = vadd.f32 1.0, %v7362_v23  ;;  %v6880_v2 = vmul.f32 -1.442695, %v1256_v19  ;;  %v1257_v7 = vadd.f32 %v1235_v59, %v10079_v16 }
 0x269   :  { %7383 = vpow2.f32 %v6882_v10  ;;  %v7364_v6 = vpop.eup %7363  ;;  %v1258_v10 = vadd.f32 %v1237_v41, %v10076_v9 }
 0x26a   :  { %7385 = vrcp.f32 %v1304_v40  ;;  %v1275_v37 = vadd.f32 1.0, %v7364_v6 }
 0x26b   :  { %v7366_v5 = vpop.eup %7365  ;;  %7387 = vpow2.f32 %v6875_v60 }
 0x26c   :  { %v1305_v17 = vadd.f32 1.0, %v7366_v5  ;;  %7389 = vtanh.f32 %v1249_v29  ;;  %v6885_v29 = vmul.f32 -1.442695, %v1258_v10  ;;  %v10658_v10 = vld [vmem:[%s14016_s2 + $0xc8] sm:$0xff] }
 0x26d   :  { %v7368_v48 = vpop.eup %7367  ;;  %7391 = vrcp.f32 %v1275_v37 }
 0x26e   :  { %7393 = vrcp.f32 %v1305_v17  ;;  %v1276_v1 = vadd.f32 1.0, %v7368_v48  ;;  %v7370_v56 = vpop.eup %7369 }
 0x26f   :  { %7395 = vpow2.f32 %v6883_v46  ;;  %v7372_v20 = vpop.eup %7371 }
 0x270   :  { %7397 = vrcp.f32 %v1276_v1  ;;  %v7374_v57 = vpop.eup %7373  ;;  %v1306_v25 = vadd.f32 1.0, %v7372_v20 }
 0x271   :  { %7399 = vpow2.f32 %v6880_v2  ;;  %v7376_v8 = vpop.eup %7375  ;;  %v1339_v11 = vadd.f32 1.0, %v7374_v57 }
 0x272   :  { %7401 = vpow2.f32 %v6884_v44  ;;  %v1277_v30 = vadd.f32 1.0, %v7376_v8 }
 0x273   :  { %v7378_v38 = vpop.eup %7377  ;;  %7403 = vrcp.f32 %v1306_v25 }
 0x274   :  { %v7380_v12 = vpop.eup %7379  ;;  %7405 = vtanh.f32 %v1253_v49  ;;  %v1307_v14 = vadd.f32 1.0, %v7378_v38 }
 0x275   :  { %v7382_v26 = vpop.eup %7381  ;;  %7407 = vrcp.f32 %v1277_v30 }
 0x276   :  { %v7384_v39 = vpop.eup %7383  ;;  %7409 = vrcp.f32 %v1307_v14  ;;  %v1359_v35 = vmul.f32 %v7382_v26, %v7370_v56 }
 0x277   :  { %v7386_v42 = vpop.eup %7385  ;;  %v1340_v60 = vadd.f32 1.0, %v7384_v39  ;;  %7411 = vrcp.f32 %v1339_v11 }
 0x278   :  { %v7388_v24 = vpop.eup %7387  ;;  %v1354_v23 = vmul.f32 %v7386_v42, %v10104_v43  ;;  %7413 = vtanh.f32 %v1257_v7 }
 0x279   :  { %v7390_v22 = vpop.eup %7389  ;;  %v1278_v6 = vadd.f32 1.0, %v7388_v24  ;;  %v10664_v24 = vld [vmem:[%s14016_s2 + $0xc0] sm:$0xff] }
 0x27a   :  { %v7392_v15 = vpop.eup %7391  ;;  %v10632_v40 = vadd.f32 %v1359_v35, %v1354_v23  ;;  %v10670_v35 = vld [vmem:[%s14016_s2 + $0xf0] sm:$0xff] }
 0x27b   :  { %v7394_v19 = vpop.eup %7393  ;;  %v1360_v5 = vmul.f32 %v7392_v15, %v7380_v12  ;;  %v10683_v15 = vld [vmem:[%s14016_s2 + $0xd8] sm:$0xff] }
 0x27c   :  { %v7396_v45 = vpop.eup %7395  ;;  %7415 = vtanh.f32 %v10632_v40  ;;  %v1355_v37 = vmul.f32 %v7394_v19, %v10107_v13  ;;  %v10691_v19 = vld [vmem:[%s14016_s2 + $0xa0] sm:$0xff] }
 0x27d   :  { %v7398_v46 = vpop.eup %7397  ;;  %7417 = vrcp.f32 %v1340_v60  ;;  %v1341_v2 = vadd.f32 1.0, %v7396_v45  ;;  %v10677_v60 = vld [vmem:[%s14016_s2 + $0xa8] sm:$0xff] }
 0x27e   :  { %v7400_v21 = vpop.eup %7399  ;;  %7419 = vpow2.f32 %v6885_v29  ;;  %v10636_v43 = vadd.f32 %v1360_v5, %v1355_v37  ;;  %v1361_v44 = vmul.f32 %v7398_v46, %v7390_v22  ;;  %v10706_v37 = vld [vmem:[%s14016_s2 + $0x88] sm:$0xff]  ;;  %v10712_v46 = vld [vmem:[%s14016_s2 + $0xb8] sm:$0xff] }
 0x27f   :  { %v7402_v17 = vpop.eup %7401  ;;  %7421 = vrcp.f32 %v1278_v6  ;;  %v1308_v31 = vadd.f32 1.0, %v7400_v21  ;;  %v10699_v6 = vld [vmem:[%s14016_s2 + $0xd0] sm:$0xff] }
 0x280   :  { %v7404_v48 = vpop.eup %7403  ;;  %7423 = vtanh.f32 %v10636_v43  ;;  %v1342_v20 = vadd.f32 1.0, %v7402_v17  ;;  %v10718_v17 = vld [vmem:[%s14016_s2 + $0x80] sm:$0xff] }
 0x281   :  { %v7406_v1 = vpop.eup %7405  ;;  %7425 = vrcp.f32 %v1308_v31  ;;  %v1356_v56 = vmul.f32 %v7404_v48, %v10110_v28  ;;  %v10724_v31 = vld [vmem:[%s14016_s2 + $0xb0] sm:$0xff] }
 0x282   :  { %v7408_v4 = vpop.eup %7407  ;;  %7427 = vrcp.f32 %v1341_v2  ;;  %v10730_v2 = vld [vmem:[%s14016_s2 + $0x68] sm:$0xff] }
 0x283   :  { %v7410_v13 = vpop.eup %7409  ;;  %v10640_v49 = vadd.f32 %v1361_v44, %v1356_v56  ;;  %v1362_v57 = vmul.f32 %v7408_v4, %v7406_v1  ;;  %v10736_v1 = vld [vmem:[%s14016_s2 + $0x98] sm:$0xff]  ;;  %v10744_v44 = vld [vmem:[%s14016_s2 + $0x60] sm:$0xff]  ;;  %v10750_v56 = vld [vmem:[%s14016_s2 + $0x90] sm:$0xff] }
 0x284   :  { %v1357_v25 = vmul.f32 %v7410_v13, %v10113_v32  ;;  %v7412_v41 = vpop.eup %7411  ;;  %v10650_v32 = vld [vmem:[%s14016_s2 + $0xe0] sm:$0xff]  ;;  %14703 = vst [vmem:[#allocation186_spill] sm:$0xff] %v10744_v44  ;;  %14704 = vst [vmem:[#allocation187_spill] sm:$0xff] %v10750_v56  ;;  %v10756_v4 = vld [vmem:[%s14016_s2 + $0x78] sm:$0xff] }
 0x285   :  { %7429 = vtanh.f32 %v10640_v49  ;;  %v7414_v38 = vpop.eup %7413  ;;  %14705 = vst [vmem:[#allocation188_spill] sm:$0xff] %v10756_v4  ;;  %v10762_v13 = vld [vmem:[%s14016_s2 + $0x48] sm:$0xff] }
 0x286   :  { %v10644_v8 = vadd.f32 %v1362_v57, %v1357_v25  ;;  %7431 = vrcp.f32 %v1342_v20  ;;  %14706 = vst [vmem:[#allocation189_spill] sm:$0xff] %v10762_v13  ;;  %v10768_v20 = vld [vmem:[%s14016_s2 + $0x70] sm:$0xff]  ;;  %v10774_v57 = vld [vmem:[%s14016_s2 + $0x40] sm:$0xff]  ;;  %v10780_v25 = vld [vmem:[%s14016_s2 + $0x58] sm:$0xff] }
 0x287   :  { %14707 = vst [vmem:[#allocation190_spill] sm:$0xff] %v10768_v20  ;;  %14708 = vst [vmem:[#allocation191_spill] sm:$0xff] %v10774_v57 }
 0x288   :  { %7433 = vtanh.f32 %v10644_v8  ;;  %14709 = vst [vmem:[#allocation192_spill] sm:$0xff] %v10780_v25 }
 0x289   :  { %v7416_v30 = vpop.eup %7415 }
 0x28a   :  { %v7418_v28 = vpop.eup %7417  ;;  %v1374_v59 = vmul.f32 %v7416_v30, %v7412_v41  ;;  %v10788_v41 = vld [vmem:[%s14016_s2 + $0x28] sm:$0xff]  ;;  %v10794_v30 = vld [vmem:[%s14016_s2 + $0x50] sm:$0xff] }
 0x28b   :  { %v7420_v12 = vpop.eup %7419  ;;  %14710 = vst [vmem:[#allocation193_spill] sm:$0xff] %v10788_v41  ;;  %14711 = vst [vmem:[#allocation194_spill] sm:$0xff] %v10794_v30 }
 0x28c   :  { %v7422_v14 = vpop.eup %7421  ;;  %1450 = vmatmul.mubr.f32.vlgmr.msra.gmra.mxu0 %v1374_v59  ;;  %1545 = vmatmul.mubr.f32.vlgmr.msra.gmra.mxu1 %v1374_v59  ;;  %v1343_v11 = vadd.f32 1.0, %v7420_v12  ;;  %v10806_v12 = vld [vmem:[%s14016_s2 + $0x38] sm:$0xff] }
 0x28d   :  { %v7424_v26 = vpop.eup %7423  ;;  %1607 = vmatpush1.msra.mxu0 %v10650_v32  ;;  %1455 = vmatprep.mubr.f32.mxu0 %v14587_v58  ;;  %v1363_v7 = vmul.f32 %v7422_v14, %v7414_v38  ;;  %14713 = vst [vmem:[#allocation196_spill] sm:$0xff] %v10806_v12  ;;  %v10812_v14 = vld [vmem:[%s14016_s2 + $0x8] sm:$0xff] }
 0x28e   :  { %v7426_v39 = vpop.eup %7425  ;;  %1550 = vmatprep.mubr.f32.mxu1 %v14587_v58  ;;  %1608 = vmatprep.subr.mxu0 %v10658_v10  ;;  %v1375_v42 = vmul.f32 %v7424_v26, %v7418_v28  ;;  %7435 = vrcp.f32 %v1343_v11  ;;  %v10800_v28 = vld [vmem:[%s14016_s2 + $0x20] sm:$0xff]  ;;  %14714 = vst [vmem:[#allocation197_spill] sm:$0xff] %v10812_v14 }
 0x28f   :  { %1609 = vmatpush1.msra.mxu0 %v10664_v24  ;;  %1702 = vmatpush1.msra.mxu1 %v10670_v35  ;;  %v1358_v23 = vmul.f32 %v7426_v39, %v10122_v0  ;;  %v7428_v22 = vpop.eup %7427  ;;  %14712 = vst [vmem:[#allocation195_spill] sm:$0xff] %v10800_v28  ;;  %v10818_v39 = vld [vmem:[%s14016_s2 + $0x30] sm:$0xff]  ;;  %v10824_v11 = vld [vmem:[%s14016_s2] sm:$0xff] }
 0x290   :  { %1456 = vmatmul.mubr.f32.gmra.mxu0 %v1375_v42  ;;  %1551 = vmatmul.mubr.f32.gmra.mxu1 %v1375_v42  ;;  %14715 = vst [vmem:[#allocation198_spill] sm:$0xff] %v10818_v39  ;;  %14716 = vst [vmem:[#allocation199_spill] sm:$0xff] %v10824_v11  ;;  %v10830_v42 = vld [vmem:[%s14016_s2 + $0x18] sm:$0xff] }
 0x291   :  { %1610 = vmatprep.subr.mxu0 %v10677_v60  ;;  %1703 = vmatprep.subr.mxu1 %v10683_v15  ;;  %v10686_v29 = vadd.f32 %v1363_v7, %v1358_v23  ;;  %14717 = vst [vmem:[#allocation200_spill] sm:$0xff] %v10830_v42  ;;  %v10838_v7 = vld [vmem:[%s14016_s2 + $0x10] sm:$0xff] }
 0x292   :  { %v7430_v0 = vpop.eup %7429  ;;  %1611 = vmatpush1.msra.mxu0 %v10691_v19  ;;  %1461 = vmatprep.mubr.f32.mxu0 %v14587_v58  ;;  %14718 = vst [vmem:[#allocation201_spill] sm:$0xff] %v10838_v7  ;;  %v6886_v23 = vld [vmem:[%s14017_s0 + $0x50] sm:$0xff] }
 0x293   :  { %1556 = vmatprep.mubr.f32.mxu1 %v14587_v58  ;;  %1704 = vmatpush1.msra.mxu1 %v10699_v6  ;;  %v1376_v45 = vmul.f32 %v7430_v0, %v7428_v22  ;;  %7437 = vtanh.f32 %v10686_v29  ;;  %v7432_v5 = vpop.eup %7431  ;;  %v14729_v22 = vld [vmem:[#allocation145_spill] sm:$0xff]  ;;  %v14730_v0 = vld [vmem:[#allocation144_spill] sm:$0xff] }
 0x294   :  { %1612 = vmatprep.subr.mxu0 %v10706_v37  ;;  %1705 = vmatprep.subr.mxu1 %v10712_v46 }
 0x295   :  { %v7434_v21 = vpop.eup %7433  ;;  %1462 = vmatmul.mubr.f32.gmra.mxu0 %v1376_v45  ;;  %1557 = vmatmul.mubr.f32.gmra.mxu1 %v1376_v45  ;;  %v14731_v45 = vld [vmem:[#allocation147_spill] sm:$0xff] }
 0x296   :  { %1613 = vmatpush1.msra.mxu0 %v10718_v17  ;;  %1706 = vmatpush1.msra.mxu1 %v10724_v31  ;;  %v1377_v48 = vmul.f32 %v7434_v21, %v7432_v5  ;;  %v14732_v5 = vld [vmem:[#allocation146_spill] sm:$0xff]  ;;  %v14733_v21 = vld [vmem:[#allocation148_spill] sm:$0xff] }
 0x297   :  { %1614 = vmatprep.subr.mxu0 %v10730_v2  ;;  %1707 = vmatprep.subr.mxu1 %v10736_v1 }
 0x298   :  { %1467 = vmatprep.mubr.f32.mxu0 %v14587_v58  ;;  %1562 = vmatprep.mubr.f32.mxu1 %v14587_v58 }
 0x299   :  { %1615 = vmatpush1.msra.mxu0 %v10744_v44  ;;  %1708 = vmatpush1.msra.mxu1 %v10750_v56 }
 0x29a   :  { %1468 = vmatmul.mubr.f32.gmra.mxu0 %v1377_v48  ;;  %1563 = vmatmul.mubr.f32.gmra.mxu1 %v1377_v48  ;;  %v14734_v48 = vld [vmem:[#allocation149_spill] sm:$0xff] }
 0x29b   :  { %1709 = vmatprep.subr.mxu1 %v10756_v4  ;;  %1616 = vmatprep.subr.mxu0 %v10762_v13  ;;  %v7436_v38 = vpop.eup %7435 }
 0x29c   :  { %1710 = vmatpush1.msra.mxu1 %v10768_v20  ;;  %1617 = vmatpush1.msra.mxu0 %v10774_v57 }
 0x29d   :  { %1711 = vmatprep.subr.mxu1 %v10780_v25  ;;  %1473 = vmatprep.mubr.f32.mxu0 %v14587_v58 }
 0x29e   :  { %1568 = vmatprep.mubr.f32.mxu1 %v14587_v58  ;;  %1618 = vmatprep.subr.mxu0 %v10788_v41 }
 0x29f   :  { %1712 = vmatpush1.msra.mxu1 %v10794_v30  ;;  %1619 = vmatpush1.msra.mxu0 %v10800_v28 }
 0x2a0   :  { %v7438_v59 = vpop.eup %7437  ;;  %1713 = vmatprep.subr.mxu1 %v10806_v12  ;;  %1620 = vmatprep.subr.mxu0 %v10812_v14 }
 0x2a1   :  { %v1378_v26 = vmul.f32 %v7438_v59, %v7436_v38  ;;  %1714 = vmatpush1.msra.mxu1 %v10818_v39  ;;  %1621 = vmatpush1.msra.mxu0 %v10824_v11  ;;  %v14735_v38 = vld [vmem:[#allocation150_spill] sm:$0xff]  ;;  %v14736_v59 = vld [vmem:[#allocation151_spill] sm:$0xff] }
 0x2a2   :  { %1715 = vmatprep.subr.mxu1 %v10830_v42  ;;  %1926 = vmatprep.subr.mxu0 %v10159_v34  ;;  %v6887_v34 = vld [vmem:[%s14017_s0 + $0x58] sm:$0xff] }
 0x2a3   :  { %1474 = vmatmul.mubr.f32.gmra.mxu0 %v1378_v26  ;;  %1569 = vmatmul.mubr.f32.gmra.mxu1 %v1378_v26  ;;  %v14737_v26 = vld [vmem:[#allocation152_spill] sm:$0xff] }
 0x2a4   :  { %1654 = vmatprep.mubr.f32.mxu0 %v14587_v58  ;;  %1716 = vmatpush1.msra.mxu1 %v10838_v7 }
 0x2a5   :  { %1749 = vmatprep.mubr.f32.mxu1 %v14587_v58  ;;  %2021 = vmatprep.subr.mxu1 %v10171_v3  ;;  %v6888_v3 = vld [vmem:[%s14017_s0 + $0x60] sm:$0xff] }
 0x2a7   :  { %6891 = vmatmul.mubr.msk.f32.vlgmr.msra.gmra.mxu0 %vm492_vm0, %v6886_v23  ;;  %6896 = vmatmul.mubr.msk.f32.vlgmr.msra.gmra.mxu1 %vm492_vm0, %v6886_v23  ;;  %v14738_v23 = vld [vmem:[#allocation153_spill] sm:$0xff] }
 0x2a8   :  { %1660 = vmatprep.mubr.f32.mxu0 %v14587_v58  ;;  %1755 = vmatprep.mubr.f32.mxu1 %v14587_v58 }
 0x2a9   :  { %1927 = vmatpush1.msra.mxu0 %v10184_v61  ;;  %2022 = vmatpush1.msra.mxu1 %v10190_v62  ;;  %v6889_v61 = vld [vmem:[%s14017_s0 + $0x68] sm:$0xff]  ;;  %v6890_v62 = vld [vmem:[%s14017_s0 + $0x70] sm:$0xff] }
 0x2aa   :  { %1928 = vmatprep.subr.mxu0 %v10196_v63  ;;  %2023 = vmatprep.subr.mxu1 %v10202_v18  ;;  %v14719_v63 = vld [vmem:[#allocation134_spill] sm:$0xff]  ;;  %v14720_v18 = vld [vmem:[#allocation135_spill] sm:$0xff] }
 0x2ab   :  { %6892 = vmatmul.mubr.msk.f32.gmra.mxu0 %vm492_vm0, %v6887_v34  ;;  %6897 = vmatmul.mubr.msk.f32.gmra.mxu1 %vm492_vm0, %v6887_v34  ;;  %v14739_v34 = vld [vmem:[#allocation154_spill] sm:$0xff] }
 0x2ac   :  { %1666 = vmatprep.mubr.f32.mxu0 %v14587_v58  ;;  %1761 = vmatprep.mubr.f32.mxu1 %v14587_v58 }
 0x2ad   :  { %1929 = vmatpush1.msra.mxu0 %v10215_v27  ;;  %2024 = vmatpush1.msra.mxu1 %v10221_v50  ;;  %v14721_v27 = vld [vmem:[#allocation136_spill] sm:$0xff]  ;;  %v14722_v50 = vld [vmem:[#allocation137_spill] sm:$0xff] }
 0x2ae   :  { %1930 = vmatprep.subr.mxu0 %v10227_v52  ;;  %2025 = vmatprep.subr.mxu1 %v10233_v36  ;;  %v14723_v52 = vld [vmem:[#allocation138_spill] sm:$0xff]  ;;  %v14724_v36 = vld [vmem:[#allocation139_spill] sm:$0xff] }
 0x2af   :  { %6893 = vmatmul.mubr.msk.f32.gmra.mxu0 %vm492_vm0, %v6888_v3  ;;  %6898 = vmatmul.mubr.msk.f32.gmra.mxu1 %vm492_vm0, %v6888_v3  ;;  %v14740_v3 = vld [vmem:[#allocation155_spill] sm:$0xff] }
 0x2b0   :  { %1672 = vmatprep.mubr.f32.mxu0 %v14587_v58  ;;  %1767 = vmatprep.mubr.f32.mxu1 %v14587_v58 }
 0x2b1   :  { %1931 = vmatpush1.msra.mxu0 %v10246_v53  ;;  %2026 = vmatpush1.msra.mxu1 %v10252_v54  ;;  %v14725_v53 = vld [vmem:[#allocation142_spill] sm:$0xff]  ;;  %v14726_v54 = vld [vmem:[#allocation140_spill] sm:$0xff] }
 0x2b2   :  { %1932 = vmatprep.subr.mxu0 %v10258_v55  ;;  %2027 = vmatprep.subr.mxu1 %v10264_v33  ;;  %v14727_v55 = vld [vmem:[#allocation141_spill] sm:$0xff]  ;;  %v14728_v33 = vld [vmem:[#allocation143_spill] sm:$0xff] }
 0x2b3   :  { %6894 = vmatmul.mubr.msk.f32.gmra.mxu0 %vm492_vm0, %v6889_v61  ;;  %6899 = vmatmul.mubr.msk.f32.gmra.mxu1 %vm492_vm0, %v6889_v61  ;;  %v14741_v61 = vld [vmem:[#allocation156_spill] sm:$0xff] }
 0x2b4   :  { %1678 = vmatprep.mubr.f32.mxu0 %v14587_v58  ;;  %1773 = vmatprep.mubr.f32.mxu1 %v14587_v58 }
 0x2b5   :  { %1933 = vmatpush1.msra.mxu0 %v14719_v63  ;;  %2028 = vmatpush1.msra.mxu1 %v14720_v18  ;;  %v14743_v63 = vld [vmem:[#allocation158_spill] sm:$0xff]  ;;  %v14744_v18 = vld [vmem:[#allocation159_spill] sm:$0xff] }
 0x2b6   :  { %1934 = vmatprep.subr.mxu0 %v14721_v27  ;;  %2029 = vmatprep.subr.mxu1 %v14722_v50  ;;  %v14745_v27 = vld [vmem:[#allocation160_spill] sm:$0xff]  ;;  %v14746_v50 = vld [vmem:[#allocation161_spill] sm:$0xff] }
 0x2b7   :  { %6895 = vmatmul.mubr.msk.f32.gmra.mxu0 %vm492_vm0, %v6890_v62  ;;  %6900 = vmatmul.mubr.msk.f32.gmra.mxu1 %vm492_vm0, %v6890_v62  ;;  %v14742_v62 = vld [vmem:[#allocation157_spill] sm:$0xff] }
 0x2b8   :  { %1935 = vmatpush1.msra.mxu0 %v14723_v52  ;;  %2030 = vmatpush1.msra.mxu1 %v14724_v36  ;;  %v14747_v52 = vld [vmem:[#allocation162_spill] sm:$0xff]  ;;  %v14748_v36 = vld [vmem:[#allocation163_spill] sm:$0xff] }
 0x2b9   :  { %1936 = vmatprep.subr.mxu0 %v14725_v53  ;;  %2031 = vmatprep.subr.mxu1 %v14726_v54  ;;  %v14749_v53 = vld [vmem:[#allocation164_spill] sm:$0xff]  ;;  %v14750_v54 = vld [vmem:[#allocation165_spill] sm:$0xff] }
 0x2ba   :  { %1937 = vmatpush1.msra.mxu0 %v14727_v55  ;;  %2032 = vmatpush1.msra.mxu1 %v14728_v33  ;;  %v14751_v55 = vld [vmem:[#allocation166_spill] sm:$0xff]  ;;  %v14752_v33 = vld [vmem:[#allocation167_spill] sm:$0xff] }
 0x2bb   :  { %1938 = vmatprep.subr.mxu0 %v14729_v22  ;;  %2033 = vmatprep.subr.mxu1 %v14730_v0  ;;  %v14753_v22 = vld [vmem:[#allocation168_spill] sm:$0xff]  ;;  %v14754_v0 = vld [vmem:[#allocation169_spill] sm:$0xff] }
 0x2bc   :  { %1939 = vmatpush1.msra.mxu0 %v14731_v45  ;;  %2034 = vmatpush1.msra.mxu1 %v14732_v5  ;;  %v14755_v45 = vld [vmem:[#allocation170_spill] sm:$0xff]  ;;  %v14756_v5 = vld [vmem:[#allocation171_spill] sm:$0xff] }
 0x2bd   :  { %1940 = vmatprep.subr.mxu0 %v14733_v21  ;;  %2035 = vmatprep.subr.mxu1 %v14734_v48  ;;  %v14757_v21 = vld [vmem:[#allocation172_spill] sm:$0xff]  ;;  %v14758_v48 = vld [vmem:[#allocation173_spill] sm:$0xff] }
 0x2be   :  { %1941 = vmatpush1.msra.mxu0 %v14735_v38  ;;  %2036 = vmatpush1.msra.mxu1 %v14736_v59  ;;  %v14759_v38 = vld [vmem:[#allocation174_spill] sm:$0xff]  ;;  %v14760_v59 = vld [vmem:[#allocation175_spill] sm:$0xff] }
 0x2bf   :  { %1942 = vmatprep.subr.mxu0 %v14737_v26  ;;  %2037 = vmatprep.subr.mxu1 %v14738_v23  ;;  %v14761_v26 = vld [vmem:[#allocation176_spill] sm:$0xff]  ;;  %v14762_v23 = vld [vmem:[#allocation177_spill] sm:$0xff] }
 0x2c0   :  { %1943 = vmatpush1.msra.mxu0 %v14739_v34  ;;  %2038 = vmatpush1.msra.mxu1 %v14740_v3  ;;  %v14763_v34 = vld [vmem:[#allocation178_spill] sm:$0xff]  ;;  %v14764_v3 = vld [vmem:[#allocation179_spill] sm:$0xff] }
 0x2c1   :  { %1944 = vmatprep.subr.mxu0 %v14741_v61  ;;  %2039 = vmatprep.subr.mxu1 %v14742_v62  ;;  %v14765_v61 = vld [vmem:[#allocation180_spill] sm:$0xff]  ;;  %v14766_v62 = vld [vmem:[#allocation181_spill] sm:$0xff] }
 0x2c2   :  { %1945 = vmatpush1.msra.mxu0 %v14743_v63  ;;  %2040 = vmatpush1.msra.mxu1 %v14744_v18  ;;  %v14767_v63 = vld [vmem:[#allocation182_spill] sm:$0xff]  ;;  %v14768_v18 = vld [vmem:[#allocation183_spill] sm:$0xff] }
 0x2c3   :  { %1946 = vmatprep.subr.mxu0 %v14745_v27  ;;  %2041 = vmatprep.subr.mxu1 %v14746_v50  ;;  %v14769_v27 = vld [vmem:[#allocation184_spill] sm:$0xff]  ;;  %v14770_v50 = vld [vmem:[#allocation185_spill] sm:$0xff] }
 0x2c4   :  { %1947 = vmatpush1.msra.mxu0 %v14747_v52  ;;  %2042 = vmatpush1.msra.mxu1 %v14748_v36 }
 0x2c5   :  { %1948 = vmatprep.subr.mxu0 %v14749_v53  ;;  %2043 = vmatprep.subr.mxu1 %v14750_v54 }
 0x2c6   :  { %1949 = vmatpush1.msra.mxu0 %v14751_v55  ;;  %2044 = vmatpush1.msra.mxu1 %v14752_v33 }
 0x2c7   :  { %1950 = vmatprep.subr.mxu0 %v14753_v22  ;;  %2045 = vmatprep.subr.mxu1 %v14754_v0 }
 0x2c8   :  { %1951 = vmatpush1.msra.mxu0 %v14755_v45  ;;  %2046 = vmatpush1.msra.mxu1 %v14756_v5 }
 0x2c9   :  { %1952 = vmatprep.subr.mxu0 %v14757_v21  ;;  %2047 = vmatprep.subr.mxu1 %v14758_v48 }
 0x2ca   :  { %1953 = vmatpush1.msra.mxu0 %v14759_v38  ;;  %2048 = vmatpush1.msra.mxu1 %v14760_v59 }
 0x2cb   :  { %1954 = vmatprep.subr.mxu0 %v14761_v26  ;;  %2049 = vmatprep.subr.mxu1 %v14762_v23 }
 0x2cc   :  { %1955 = vmatpush1.msra.mxu0 %v14763_v34  ;;  %2050 = vmatpush1.msra.mxu1 %v14764_v3 }
 0x2cd   :  { %1956 = vmatprep.subr.mxu0 %v14765_v61  ;;  %2051 = vmatprep.subr.mxu1 %v14766_v62 }
 0x2ce   :  { %1957 = vmatpush1.msra.mxu0 %v14767_v63  ;;  %1990 = vmatprep.mubr.f32.mxu0 %v14587_v58 }
 0x2cf   :  { %2052 = vmatpush1.msra.mxu1 %v14768_v18  ;;  %2085 = vmatprep.mubr.f32.mxu1 %v14587_v58 }
 0x2d0   :  { %2147 = vmatprep.subr.mxu0 %v14769_v27  ;;  %2242 = vmatprep.subr.mxu1 %v14770_v50 }
 0x34c   :  { %v1451_v52 = vpop.f32.mrf.mxu0  ;;  %v1546_v36 = vpop.f32.mrf.mxu1 }
 0x34e   :  { %v1453_v53 = vpop.f32.mrf.mxu0  ;;  %v1548_v54 = vpop.f32.mrf.mxu1 }
 0x350   :  { %v1457_v55 = vpop.f32.mrf.mxu0  ;;  %v1552_v33 = vpop.f32.mrf.mxu1 }
 0x352   :  { %v1459_v22 = vpop.f32.mrf.mxu0  ;;  %v1554_v0 = vpop.f32.mrf.mxu1 }
 0x355   :  { %v1463_v45 = vpop.f32.mrf.mxu0  ;;  %v10942_v5 = vpop.f32.mrf.mxu1 }
 0x357   :  { %v1465_v21 = vpop.f32.mrf.mxu0  ;;  %v10944_v48 = vpop.f32.mrf.mxu1 }
 0x35a   :  { %v1469_v38 = vpop.f32.mrf.mxu0  ;;  %v10946_v59 = vpop.f32.mrf.mxu1 }
 0x35c   :  { %v1471_v26 = vpop.f32.mrf.mxu0  ;;  %v10948_v23 = vpop.f32.mrf.mxu1 }
 0x363   :  { %v1475_v34 = vpop.f32.mrf.mxu0  ;;  %v10950_v3 = vpop.f32.mrf.mxu1 }
 0x365   :  { %v10952_v61 = vpop.f32.mrf.mxu0  ;;  %v10954_v62 = vpop.f32.mrf.mxu1 }
 0x367   :  { %v1656_v63 = vpop.f32.mrf.mxu0  ;;  %v1751_v18 = vpop.f32.mrf.mxu1 }
 0x368   :  { %v1657_v27 = vadd.f32 %v1656_v63, %v1451_v52  ;;  %v1752_v56 = vadd.f32 %v1751_v18, %v1546_v36 }
 0x369   :  { %v1658_v50 = vpop.f32.mrf.mxu0  ;;  %v1753_v7 = vpop.f32.mrf.mxu1 }
 0x36a   :  { %v1780_v42 = vadd.f32 %v1657_v27, %v10069_v47  ;;  %v1659_v11 = vadd.f32 %v1658_v50, %v1453_v53  ;;  %v1754_v20 = vadd.f32 %v1753_v7, %v1548_v54 }
 0x36b   :  { %v1662_v39 = vpop.f32.mrf.mxu0  ;;  %v1757_v14 = vpop.f32.mrf.mxu1 }
 0x36c   :  { %v6901_v12 = vmul.f32 -1.442695, %v1780_v42  ;;  %v1781_v28 = vadd.f32 %v1659_v11, %v10071_v51  ;;  %v1663_v30 = vadd.f32 %v1662_v39, %v1457_v55  ;;  %v1783_v39 = vadd.f32 %v1754_v20, %v10076_v9 }
 0x36d   :  { %v1664_v41 = vpop.f32.mrf.mxu0  ;;  %v1759_v25 = vpop.f32.mrf.mxu1  ;;  %v1758_v54 = vadd.f32 %v1757_v14, %v1552_v33 }
 0x36e   :  { %7439 = vpow2.f32 %v6901_v12  ;;  %v6906_v57 = vmul.f32 -1.442695, %v1781_v28  ;;  %v1665_v13 = vadd.f32 %v1664_v41, %v1459_v22  ;;  %v1784_v4 = vadd.f32 %v1663_v30, %v10069_v47 }
 0x36f   :  { %v1668_v52 = vpop.f32.mrf.mxu0  ;;  %v1763_v63 = vpop.f32.mrf.mxu1  ;;  %v1760_v28 = vadd.f32 %v1759_v25, %v1554_v0  ;;  %v1782_v30 = vadd.f32 %v1752_v56, %v10079_v16  ;;  %v6911_v22 = vmul.f32 -1.442695, %v1783_v39  ;;  %v1786_v14 = vadd.f32 %v1758_v54, %v10079_v16 }
 0x370   :  { %7441 = vpow2.f32 %v6906_v57  ;;  %v1785_v53 = vadd.f32 %v1665_v13, %v10071_v51  ;;  %v1669_v27 = vadd.f32 %v1668_v52, %v1463_v45  ;;  %v6902_v50 = vmul.f32 -1.442695, %v1784_v4 }
 0x371   :  { %v1670_v42 = vpop.f32.mrf.mxu0  ;;  %v1765_v44 = vpop.f32.mrf.mxu1  ;;  %v1787_v18 = vadd.f32 %v1760_v28, %v10076_v9 }
 0x372   :  { %v6907_v11 = vmul.f32 -1.442695, %v1785_v53  ;;  %v1788_v12 = vadd.f32 %v1669_v27, %v10069_v47  ;;  %7443 = vpow2.f32 %v6902_v50  ;;  %v1671_v41 = vadd.f32 %v1670_v42, %v1465_v21 }
 0x373   :  { %v1674_v7 = vpop.f32.mrf.mxu0  ;;  %v1769_v4 = vpop.f32.mrf.mxu1  ;;  %v1766_v33 = vadd.f32 %v1765_v44, %v10944_v48  ;;  %v1764_v27 = vadd.f32 %v1763_v63, %v10942_v5  ;;  %v6912_v39 = vmul.f32 -1.442695, %v1787_v18 }
 0x374   :  { %7445 = vpow2.f32 %v6907_v11  ;;  %v6903_v36 = vmul.f32 -1.442695, %v1788_v12  ;;  %v1675_v57 = vadd.f32 %v1674_v7, %v1469_v38  ;;  %v1789_v13 = vadd.f32 %v1671_v41, %v10071_v51 }
 0x375   :  { %v1676_v55 = vpop.f32.mrf.mxu0  ;;  %v1771_v38 = vpop.f32.mrf.mxu1  ;;  %v1791_v44 = vadd.f32 %v1766_v33, %v10076_v9  ;;  %v1790_v5 = vadd.f32 %v1764_v27, %v10079_v16 }
 0x376   :  { %7447 = vpow2.f32 %v6903_v36  ;;  %v1792_v20 = vadd.f32 %v1675_v57, %v10069_v47  ;;  %v1677_v45 = vadd.f32 %v1676_v55, %v1471_v26  ;;  %v6908_v25 = vmul.f32 -1.442695, %v1789_v13 }
 0x377   :  { %v1680_v0 = vpop.f32.mrf.mxu0  ;;  %7449 = vtanh.f32 %v1782_v30  ;;  %v6913_v57 = vmul.f32 -1.442695, %v1791_v44  ;;  %v1770_v13 = vadd.f32 %v1769_v4, %v10946_v59 }
 0x378   :  { %v6904_v21 = vmul.f32 -1.442695, %v1792_v20  ;;  %v1793_v56 = vadd.f32 %v1677_v45, %v10071_v51  ;;  %v1681_v52 = vadd.f32 %v1680_v0, %v1475_v34  ;;  %7451 = vpow2.f32 %v6908_v25 }
 0x379   :  { %v1682_v53 = vpop.f32.mrf.mxu0  ;;  %7453 = vpow2.f32 %v6911_v22  ;;  %v1772_v34 = vadd.f32 %v1771_v38, %v10948_v23  ;;  %v1775_v23 = vpop.f32.mrf.mxu1 }
 0x37a   :  { %v6909_v26 = vmul.f32 -1.442695, %v1793_v56  ;;  %v1796_v50 = vadd.f32 %v1681_v52, %v10069_v47  ;;  %7455 = vpow2.f32 %v6904_v21  ;;  %v1683_v11 = vadd.f32 %v1682_v53, %v10952_v61 }
 0x37b   :  { %v7440_v42 = vpop.eup %7439  ;;  %v1795_v61 = vadd.f32 %v1772_v34, %v10076_v9  ;;  %v1777_v25 = vpop.f32.mrf.mxu1  ;;  %v1794_v21 = vadd.f32 %v1770_v13, %v10079_v16  ;;  %v1776_v38 = vadd.f32 %v1775_v23, %v10950_v3 }
 0x37c   :  { %v1815_v12 = vadd.f32 1.0, %v7440_v42  ;;  %7457 = vpow2.f32 %v6909_v26  ;;  %v6905_v48 = vmul.f32 -1.442695, %v1796_v50  ;;  %v1797_v63 = vadd.f32 %v1683_v11, %v10071_v51 }
 0x37d   :  { %v7442_v28 = vpop.eup %7441  ;;  %7459 = vtanh.f32 %v1786_v14  ;;  %v6914_v45 = vmul.f32 -1.442695, %v1795_v61  ;;  %v1778_v59 = vadd.f32 %v1777_v25, %v10954_v62 }
 0x37e   :  { %7461 = vrcp.f32 %v1815_v12  ;;  %v1845_v41 = vadd.f32 1.0, %v7442_v28  ;;  %v6910_v22 = vmul.f32 -1.442695, %v1797_v63  ;;  %v1798_v12 = vadd.f32 %v1776_v38, %v10079_v16 }
 0x37f   :  { %7463 = vpow2.f32 %v6912_v39  ;;  %v7444_v7 = vpop.eup %7443  ;;  %v1799_v39 = vadd.f32 %v1778_v59, %v10076_v9 }
 0x380   :  { %7465 = vrcp.f32 %v1845_v41  ;;  %v1816_v36 = vadd.f32 1.0, %v7444_v7 }
 0x381   :  { %v7446_v30 = vpop.eup %7445  ;;  %7467 = vpow2.f32 %v6905_v48 }
 0x382   :  { %v1846_v54 = vadd.f32 1.0, %v7446_v30  ;;  %7469 = vtanh.f32 %v1790_v5  ;;  %v6915_v5 = vmul.f32 -1.442695, %v1799_v39 }
 0x383   :  { %v7448_v55 = vpop.eup %7447  ;;  %7471 = vrcp.f32 %v1816_v36 }
 0x384   :  { %7473 = vrcp.f32 %v1846_v54  ;;  %v1817_v20 = vadd.f32 1.0, %v7448_v55  ;;  %v7450_v18 = vpop.eup %7449 }
 0x385   :  { %7475 = vpow2.f32 %v6913_v57  ;;  %v7452_v0 = vpop.eup %7451 }
 0x386   :  { %7477 = vrcp.f32 %v1817_v20  ;;  %v7454_v56 = vpop.eup %7453  ;;  %v1847_v52 = vadd.f32 1.0, %v7452_v0 }
 0x387   :  { %7479 = vpow2.f32 %v6910_v22  ;;  %v7456_v14 = vpop.eup %7455  ;;  %v1880_v42 = vadd.f32 1.0, %v7454_v56 }
 0x388   :  { %7481 = vpow2.f32 %v6914_v45  ;;  %v1818_v33 = vadd.f32 1.0, %v7456_v14 }
 0x389   :  { %v7458_v4 = vpop.eup %7457  ;;  %7483 = vrcp.f32 %v1847_v52 }
 0x38a   :  { %v7460_v53 = vpop.eup %7459  ;;  %7485 = vtanh.f32 %v1794_v21  ;;  %v1848_v27 = vadd.f32 1.0, %v7458_v4 }
 0x38b   :  { %v7462_v26 = vpop.eup %7461  ;;  %7487 = vrcp.f32 %v1818_v33 }
 0x38c   :  { %v7464_v50 = vpop.eup %7463  ;;  %7489 = vrcp.f32 %v1848_v27  ;;  %v1900_v62 = vmul.f32 %v7462_v26, %v7450_v18 }
 0x38d   :  { %v7466_v11 = vpop.eup %7465  ;;  %v1881_v48 = vadd.f32 1.0, %v7464_v50  ;;  %7491 = vrcp.f32 %v1880_v42 }
 0x38e   :  { %v7468_v34 = vpop.eup %7467  ;;  %v1895_v28 = vmul.f32 %v7466_v11, %v10632_v40  ;;  %7493 = vtanh.f32 %v1798_v12 }
 0x38f   :  { %v7470_v44 = vpop.eup %7469  ;;  %v1819_v7 = vadd.f32 1.0, %v7468_v34 }
 0x390   :  { %v7472_v3 = vpop.eup %7471  ;;  %v10984_v41 = vadd.f32 %v1900_v62, %v1895_v28  ;;  %v14780_v62 = vld [vmem:[#allocation195_spill] sm:$0xff] }
 0x391   :  { %v7474_v63 = vpop.eup %7473  ;;  %v1901_v30 = vmul.f32 %v7472_v3, %v7460_v53 }
 0x392   :  { %v7476_v61 = vpop.eup %7475  ;;  %7495 = vtanh.f32 %v10984_v41  ;;  %v1896_v36 = vmul.f32 %v7474_v63, %v10636_v43  ;;  %v14784_v63 = vld [vmem:[#allocation199_spill] sm:$0xff] }
 0x393   :  { %v7478_v57 = vpop.eup %7477  ;;  %7497 = vrcp.f32 %v1881_v48  ;;  %v1882_v22 = vadd.f32 1.0, %v7476_v61  ;;  %v14782_v48 = vld [vmem:[#allocation197_spill] sm:$0xff]  ;;  %v11043_v61 = vld [vmem:[%s14012_s3 + $0x1e8] sm:$0xff] }
 0x394   :  { %v7480_v23 = vpop.eup %7479  ;;  %7499 = vpow2.f32 %v6915_v5  ;;  %v10988_v40 = vadd.f32 %v1901_v30, %v1896_v36  ;;  %v1902_v45 = vmul.f32 %v7478_v57, %v7470_v44  ;;  %v14781_v44 = vld [vmem:[#allocation196_spill] sm:$0xff]  ;;  %v14783_v5 = vld [vmem:[#allocation198_spill] sm:$0xff]  ;;  %v14786_v30 = vld [vmem:[#allocation201_spill] sm:$0xff] }
 0x395   :  { %v7482_v54 = vpop.eup %7481  ;;  %7501 = vrcp.f32 %v1819_v7  ;;  %v1849_v13 = vadd.f32 1.0, %v7480_v23  ;;  %v14785_v7 = vld [vmem:[#allocation200_spill] sm:$0xff]  ;;  %v6916_v36 = vld [vmem:[%s14017_s0 + $0x78] sm:$0xff]  ;;  %v6917_v23 = vld [vmem:[%s14017_s0 + $0x80] sm:$0xff] }
 0x396   :  { %v7484_v55 = vpop.eup %7483  ;;  %7503 = vtanh.f32 %v10988_v40  ;;  %v1883_v0 = vadd.f32 1.0, %v7482_v54  ;;  %v11055_v57 = vld [vmem:[%s14012_s3 + $0x1f8] sm:$0xff]  ;;  %v11068_v54 = vld [vmem:[%s14012_s3 + $0x1e0] sm:$0xff] }
 0x397   :  { %v7486_v20 = vpop.eup %7485  ;;  %v1897_v18 = vmul.f32 %v7484_v55, %v10640_v49  ;;  %7505 = vrcp.f32 %v1849_v13  ;;  %v11074_v13 = vld [vmem:[%s14012_s3 + $0x1f0] sm:$0xff]  ;;  %v11080_v55 = vld [vmem:[%s14012_s3 + $0x1c8] sm:$0xff] }
 0x398   :  { %v7488_v25 = vpop.eup %7487  ;;  %7507 = vrcp.f32 %v1882_v22  ;;  %v11086_v22 = vld [vmem:[%s14012_s3 + $0x1d8] sm:$0xff] }
 0x399   :  { %v7490_v43 = vpop.eup %7489  ;;  %v10992_v21 = vadd.f32 %v1902_v45, %v1897_v18  ;;  %v1903_v56 = vmul.f32 %v7488_v25, %v7486_v20  ;;  %v6918_v20 = vld [vmem:[%s14017_s0 + $0x88] sm:$0xff]  ;;  %v11099_v45 = vld [vmem:[%s14012_s3 + $0x1c0] sm:$0xff]  ;;  %v11105_v18 = vld [vmem:[%s14012_s3 + $0x1d0] sm:$0xff] }
 0x39a   :  { %v1898_v52 = vmul.f32 %v7490_v43, %v10644_v8  ;;  %v7492_v59 = vpop.eup %7491  ;;  %v11111_v25 = vld [vmem:[%s14012_s3 + $0x1a8] sm:$0xff]  ;;  %v11117_v43 = vld [vmem:[%s14012_s3 + $0x1b8] sm:$0xff] }
 0x39b   :  { %7509 = vtanh.f32 %v10992_v21  ;;  %v7494_v4 = vpop.eup %7493 }
 0x39c   :  { %v10996_v14 = vadd.f32 %v1903_v56, %v1898_v52  ;;  %7511 = vrcp.f32 %v1883_v0  ;;  %v6919_v0 = vld [vmem:[%s14017_s0 + $0x90] sm:$0xff]  ;;  %v11130_v56 = vld [vmem:[%s14012_s3 + $0x1a0] sm:$0xff] }
 0x39d   :  { %v11136_v52 = vld [vmem:[%s14012_s3 + $0x1b0] sm:$0xff] }
 0x39e   :  { %7513 = vtanh.f32 %v10996_v14 }
 0x39f   :  { %v7496_v49 = vpop.eup %7495 }
 0x3a0   :  { %v7498_v33 = vpop.eup %7497  ;;  %v1915_v38 = vmul.f32 %v7496_v49, %v7492_v59  ;;  %v11142_v59 = vld [vmem:[%s14012_s3 + $0x188] sm:$0xff]  ;;  %v6920_v49 = vld [vmem:[%s14017_s0 + $0x98] sm:$0xff] }
 0x3a1   :  { %v7500_v53 = vpop.eup %7499 }
 0x3a2   :  { %v7502_v27 = vpop.eup %7501  ;;  %1991 = vmatmul.mubr.f32.vlgmr.msra.gmra.mxu0 %v1915_v38  ;;  %2086 = vmatmul.mubr.f32.vlgmr.msra.gmra.mxu1 %v1915_v38  ;;  %v1884_v50 = vadd.f32 1.0, %v7500_v53  ;;  %v11167_v38 = vld [vmem:[%s14012_s3 + $0x190] sm:$0xff]  ;;  %v11173_v53 = vld [vmem:[%s14012_s3 + $0x168] sm:$0xff] }
 0x3a3   :  { %v7504_v26 = vpop.eup %7503  ;;  %2148 = vmatpush1.msra.mxu0 %v10650_v32  ;;  %1996 = vmatprep.mubr.f32.mxu0 %v14587_v58  ;;  %v1904_v39 = vmul.f32 %v7502_v27, %v7494_v4  ;;  %v11148_v4 = vld [vmem:[%s14012_s3 + $0x198] sm:$0xff]  ;;  %14788 = vst [vmem:[#allocation135_spill] sm:$0xff] %v11167_v38  ;;  %14789 = vst [vmem:[#allocation136_spill] sm:$0xff] %v11173_v53 }
 0x3a4   :  { %v7506_v8 = vpop.eup %7505  ;;  %2091 = vmatprep.mubr.f32.mxu1 %v14587_v58  ;;  %2149 = vmatprep.subr.mxu0 %v10658_v10  ;;  %v1916_v42 = vmul.f32 %v7504_v26, %v7498_v33  ;;  %7515 = vrcp.f32 %v1884_v50  ;;  %v11161_v33 = vld [vmem:[%s14012_s3 + $0x180] sm:$0xff]  ;;  %v11179_v27 = vld [vmem:[%s14012_s3 + $0x178] sm:$0xff]  ;;  %v11199_v50 = vld [vmem:[%s14012_s3 + $0x148] sm:$0xff] }
 0x3a5   :  { %v1899_v11 = vmul.f32 %v7506_v8, %v10686_v29  ;;  %2150 = vmatpush1.msra.mxu0 %v10664_v24  ;;  %2243 = vmatpush1.msra.mxu1 %v10670_v35  ;;  %v7508_v12 = vpop.eup %7507  ;;  %v14772_v29 = vld [vmem:[#allocation187_spill] sm:$0xff]  ;;  %14787 = vst [vmem:[#allocation134_spill] sm:$0xff] %v11161_v33  ;;  %14790 = vst [vmem:[#allocation137_spill] sm:$0xff] %v11179_v27  ;;  %v11187_v26 = vld [vmem:[%s14012_s3 + $0x160] sm:$0xff] }
 0x3a6   :  { %1997 = vmatmul.mubr.f32.gmra.mxu0 %v1916_v42  ;;  %2092 = vmatmul.mubr.f32.gmra.mxu1 %v1916_v42  ;;  %14791 = vst [vmem:[#allocation138_spill] sm:$0xff] %v11187_v26  ;;  %v11193_v8 = vld [vmem:[%s14012_s3 + $0x170] sm:$0xff]  ;;  %14793 = vst [vmem:[#allocation142_spill] sm:$0xff] %v11199_v50  ;;  %v11205_v42 = vld [vmem:[%s14012_s3 + $0x158] sm:$0xff] }
 0x3a7   :  { %2151 = vmatprep.subr.mxu0 %v10677_v60  ;;  %2244 = vmatprep.subr.mxu1 %v10683_v15  ;;  %v11008_v32 = vadd.f32 %v1904_v39, %v1899_v11  ;;  %v14771_v15 = vld [vmem:[#allocation186_spill] sm:$0xff]  ;;  %14792 = vst [vmem:[#allocation139_spill] sm:$0xff] %v11193_v8  ;;  %14794 = vst [vmem:[#allocation140_spill] sm:$0xff] %v11205_v42  ;;  %v11217_v11 = vld [vmem:[%s14012_s3 + $0x150] sm:$0xff] }
 0x3a8   :  { %v7510_v34 = vpop.eup %7509  ;;  %2152 = vmatpush1.msra.mxu0 %v10691_v19  ;;  %2002 = vmatprep.mubr.f32.mxu0 %v14587_v58  ;;  %v14773_v19 = vld [vmem:[#allocation188_spill] sm:$0xff]  ;;  %v11211_v39 = vld [vmem:[%s14012_s3 + $0x140] sm:$0xff]  ;;  %14796 = vst [vmem:[#allocation143_spill] sm:$0xff] %v11217_v11 }
 0x3a9   :  { %2097 = vmatprep.mubr.f32.mxu1 %v14587_v58  ;;  %2245 = vmatpush1.msra.mxu1 %v10699_v6  ;;  %v1917_v10 = vmul.f32 %v7510_v34, %v7508_v12  ;;  %7517 = vtanh.f32 %v11008_v32  ;;  %v7512_v24 = vpop.eup %7511  ;;  %v14774_v6 = vld [vmem:[#allocation189_spill] sm:$0xff]  ;;  %14795 = vst [vmem:[#allocation141_spill] sm:$0xff] %v11211_v39  ;;  %v11223_v12 = vld [vmem:[%s14012_s3 + $0x128] sm:$0xff] }
 0x3aa   :  { %2153 = vmatprep.subr.mxu0 %v10706_v37  ;;  %2246 = vmatprep.subr.mxu1 %v10712_v46  ;;  %v14775_v37 = vld [vmem:[#allocation190_spill] sm:$0xff]  ;;  %v14776_v46 = vld [vmem:[#allocation191_spill] sm:$0xff]  ;;  %14797 = vst [vmem:[#allocation145_spill] sm:$0xff] %v11223_v12  ;;  %v11229_v34 = vld [vmem:[%s14012_s3 + $0x138] sm:$0xff] }
 0x3ab   :  { %v7514_v35 = vpop.eup %7513  ;;  %2003 = vmatmul.mubr.f32.gmra.mxu0 %v1917_v10  ;;  %2098 = vmatmul.mubr.f32.gmra.mxu1 %v1917_v10  ;;  %14798 = vst [vmem:[#allocation144_spill] sm:$0xff] %v11229_v34  ;;  %v11235_v10 = vld [vmem:[%s14012_s3 + $0x120] sm:$0xff] }
 0x3ac   :  { %2154 = vmatpush1.msra.mxu0 %v10718_v17  ;;  %2247 = vmatpush1.msra.mxu1 %v10724_v31  ;;  %v1918_v60 = vmul.f32 %v7514_v35, %v7512_v24  ;;  %v14777_v17 = vld [vmem:[#allocation192_spill] sm:$0xff]  ;;  %v14778_v31 = vld [vmem:[#allocation193_spill] sm:$0xff]  ;;  %14799 = vst [vmem:[#allocation147_spill] sm:$0xff] %v11235_v10  ;;  %v11247_v35 = vld [vmem:[%s14012_s3 + $0x108] sm:$0xff] }
 0x3ad   :  { %2155 = vmatprep.subr.mxu0 %v10730_v2  ;;  %2248 = vmatprep.subr.mxu1 %v10736_v1  ;;  %v14779_v1 = vld [vmem:[#allocation194_spill] sm:$0xff]  ;;  %v11241_v24 = vld [vmem:[%s14012_s3 + $0x130] sm:$0xff]  ;;  %14801 = vst [vmem:[#allocation148_spill] sm:$0xff] %v11247_v35 }
 0x3ae   :  { %2008 = vmatprep.mubr.f32.mxu0 %v14587_v58  ;;  %2103 = vmatprep.mubr.f32.mxu1 %v14587_v58  ;;  %14800 = vst [vmem:[#allocation146_spill] sm:$0xff] %v11241_v24 }
 0x3af   :  { %2156 = vmatpush1.msra.mxu0 %v14771_v15  ;;  %2249 = vmatpush1.msra.mxu1 %v14772_v29  ;;  %v11259_v15 = vld [vmem:[%s14012_s3 + $0x100] sm:$0xff]  ;;  %v11265_v29 = vld [vmem:[%s14012_s3 + $0x110] sm:$0xff] }
 0x3b0   :  { %2009 = vmatmul.mubr.f32.gmra.mxu0 %v1918_v60  ;;  %2104 = vmatmul.mubr.f32.gmra.mxu1 %v1918_v60  ;;  %v11253_v60 = vld [vmem:[%s14012_s3 + $0x118] sm:$0xff]  ;;  %14803 = vst [vmem:[#allocation150_spill] sm:$0xff] %v11259_v15  ;;  %14804 = vst [vmem:[#allocation151_spill] sm:$0xff] %v11265_v29 }
 0x3b1   :  { %2250 = vmatprep.subr.mxu1 %v14773_v19  ;;  %2157 = vmatprep.subr.mxu0 %v14774_v6  ;;  %v7516_v2 = vpop.eup %7515  ;;  %14802 = vst [vmem:[#allocation149_spill] sm:$0xff] %v11253_v60  ;;  %v11271_v19 = vld [vmem:[%s14012_s3 + $0xe8] sm:$0xff]  ;;  %v11277_v6 = vld [vmem:[%s14012_s3 + $0xf8] sm:$0xff] }
 0x3b2   :  { %2251 = vmatpush1.msra.mxu1 %v14775_v37  ;;  %2158 = vmatpush1.msra.mxu0 %v14776_v46  ;;  %14805 = vst [vmem:[#allocation152_spill] sm:$0xff] %v11271_v19  ;;  %14806 = vst [vmem:[#allocation153_spill] sm:$0xff] %v11277_v6  ;;  %v11283_v37 = vld [vmem:[%s14012_s3 + $0xe0] sm:$0xff]  ;;  %v11289_v46 = vld [vmem:[%s14012_s3 + $0xf0] sm:$0xff] }
 0x3b3   :  { %2252 = vmatprep.subr.mxu1 %v14777_v17  ;;  %2014 = vmatprep.mubr.f32.mxu0 %v14587_v58  ;;  %14807 = vst [vmem:[#allocation154_spill] sm:$0xff] %v11283_v37  ;;  %14808 = vst [vmem:[#allocation155_spill] sm:$0xff] %v11289_v46  ;;  %v11295_v17 = vld [vmem:[%s14012_s3 + $0xc8] sm:$0xff] }
 0x3b4   :  { %2109 = vmatprep.mubr.f32.mxu1 %v14587_v58  ;;  %2159 = vmatprep.subr.mxu0 %v14778_v31  ;;  %14809 = vst [vmem:[#allocation156_spill] sm:$0xff] %v11295_v17  ;;  %v11301_v31 = vld [vmem:[%s14012_s3 + $0xd8] sm:$0xff] }
 0x3b5   :  { %2253 = vmatpush1.msra.mxu1 %v14779_v1  ;;  %2160 = vmatpush1.msra.mxu0 %v14780_v62  ;;  %14810 = vst [vmem:[#allocation157_spill] sm:$0xff] %v11301_v31  ;;  %v11313_v1 = vld [vmem:[%s14012_s3 + $0xd0] sm:$0xff]  ;;  %v11319_v62 = vld [vmem:[%s14012_s3 + $0xa8] sm:$0xff] }
 0x3b6   :  { %v7518_v28 = vpop.eup %7517  ;;  %2254 = vmatprep.subr.mxu1 %v14781_v44  ;;  %2161 = vmatprep.subr.mxu0 %v14782_v48  ;;  %14812 = vst [vmem:[#allocation159_spill] sm:$0xff] %v11313_v1  ;;  %14813 = vst [vmem:[#allocation160_spill] sm:$0xff] %v11319_v62  ;;  %v11331_v44 = vld [vmem:[%s14012_s3 + $0xa0] sm:$0xff]  ;;  %v11337_v48 = vld [vmem:[%s14012_s3 + $0xb0] sm:$0xff] }
 0x3b7   :  { %v1919_v3 = vmul.f32 %v7518_v28, %v7516_v2  ;;  %2255 = vmatpush1.msra.mxu1 %v14783_v5  ;;  %2162 = vmatpush1.msra.mxu0 %v14784_v63  ;;  %v11307_v2 = vld [vmem:[%s14012_s3 + $0xc0] sm:$0xff]  ;;  %v11325_v28 = vld [vmem:[%s14012_s3 + $0xb8] sm:$0xff]  ;;  %14815 = vst [vmem:[#allocation162_spill] sm:$0xff] %v11331_v44  ;;  %14816 = vst [vmem:[#allocation163_spill] sm:$0xff] %v11337_v48 }
 0x3b8   :  { %2256 = vmatprep.subr.mxu1 %v14785_v7  ;;  %2467 = vmatprep.subr.mxu0 %v11043_v61  ;;  %14811 = vst [vmem:[#allocation158_spill] sm:$0xff] %v11307_v2  ;;  %14814 = vst [vmem:[#allocation161_spill] sm:$0xff] %v11325_v28  ;;  %v11349_v5 = vld [vmem:[%s14012_s3 + $0x98] sm:$0xff]  ;;  %v11355_v63 = vld [vmem:[%s14012_s3 + $0x80] sm:$0xff] }
 0x3b9   :  { %2015 = vmatmul.mubr.f32.gmra.mxu0 %v1919_v3  ;;  %2110 = vmatmul.mubr.f32.gmra.mxu1 %v1919_v3  ;;  %v11343_v3 = vld [vmem:[%s14012_s3 + $0x88] sm:$0xff]  ;;  %14818 = vst [vmem:[#allocation165_spill] sm:$0xff] %v11349_v5  ;;  %14819 = vst [vmem:[#allocation166_spill] sm:$0xff] %v11355_v63  ;;  %v11361_v7 = vld [vmem:[%s14012_s3 + $0x90] sm:$0xff] }
 0x3ba   :  { %2195 = vmatprep.mubr.f32.mxu0 %v14587_v58  ;;  %2257 = vmatpush1.msra.mxu1 %v14786_v30  ;;  %14817 = vst [vmem:[#allocation164_spill] sm:$0xff] %v11343_v3  ;;  %14820 = vst [vmem:[#allocation167_spill] sm:$0xff] %v11361_v7  ;;  %v11367_v30 = vld [vmem:[%s14012_s3 + $0x68] sm:$0xff] }
 0x3bb   :  { %2290 = vmatprep.mubr.f32.mxu1 %v14587_v58  ;;  %2562 = vmatprep.subr.mxu1 %v11055_v57  ;;  %14821 = vst [vmem:[#allocation168_spill] sm:$0xff] %v11367_v30 }
 0x3bd   :  { %6921 = vmatmul.mubr.msk.f32.vlgmr.msra.gmra.mxu0 %vm492_vm0, %v6916_v36  ;;  %6926 = vmatmul.mubr.msk.f32.vlgmr.msra.gmra.mxu1 %vm492_vm0, %v6916_v36  ;;  %v11373_v36 = vld [vmem:[%s14012_s3 + $0x78] sm:$0xff] }
 0x3be   :  { %2201 = vmatprep.mubr.f32.mxu0 %v14587_v58  ;;  %2296 = vmatprep.mubr.f32.mxu1 %v14587_v58  ;;  %14822 = vst [vmem:[#allocation169_spill] sm:$0xff] %v11373_v36 }
 0x3bf   :  { %2468 = vmatpush1.msra.mxu0 %v11068_v54  ;;  %2563 = vmatpush1.msra.mxu1 %v11074_v13 }
 0x3c0   :  { %2469 = vmatprep.subr.mxu0 %v11080_v55  ;;  %2564 = vmatprep.subr.mxu1 %v11086_v22 }
 0x3c1   :  { %6922 = vmatmul.mubr.msk.f32.gmra.mxu0 %vm492_vm0, %v6917_v23  ;;  %6927 = vmatmul.mubr.msk.f32.gmra.mxu1 %vm492_vm0, %v6917_v23  ;;  %v11379_v23 = vld [vmem:[%s14012_s3 + $0x60] sm:$0xff] }
 0x3c2   :  { %2207 = vmatprep.mubr.f32.mxu0 %v14587_v58  ;;  %2302 = vmatprep.mubr.f32.mxu1 %v14587_v58  ;;  %14823 = vst [vmem:[#allocation170_spill] sm:$0xff] %v11379_v23 }
 0x3c3   :  { %2470 = vmatpush1.msra.mxu0 %v11099_v45  ;;  %2565 = vmatpush1.msra.mxu1 %v11105_v18 }
 0x3c4   :  { %2471 = vmatprep.subr.mxu0 %v11111_v25  ;;  %2566 = vmatprep.subr.mxu1 %v11117_v43 }
 0x3c5   :  { %6923 = vmatmul.mubr.msk.f32.gmra.mxu0 %vm492_vm0, %v6918_v20  ;;  %6928 = vmatmul.mubr.msk.f32.gmra.mxu1 %vm492_vm0, %v6918_v20  ;;  %v11385_v20 = vld [vmem:[%s14012_s3 + $0x70] sm:$0xff] }
 0x3c6   :  { %2213 = vmatprep.mubr.f32.mxu0 %v14587_v58  ;;  %2308 = vmatprep.mubr.f32.mxu1 %v14587_v58  ;;  %14824 = vst [vmem:[#allocation171_spill] sm:$0xff] %v11385_v20 }
 0x3c7   :  { %2472 = vmatpush1.msra.mxu0 %v11130_v56  ;;  %2567 = vmatpush1.msra.mxu1 %v11136_v52 }
 0x3c8   :  { %2473 = vmatprep.subr.mxu0 %v11142_v59  ;;  %2568 = vmatprep.subr.mxu1 %v11148_v4 }
 0x3c9   :  { %6924 = vmatmul.mubr.msk.f32.gmra.mxu0 %vm492_vm0, %v6919_v0  ;;  %6929 = vmatmul.mubr.msk.f32.gmra.mxu1 %vm492_vm0, %v6919_v0  ;;  %v11391_v0 = vld [vmem:[%s14012_s3 + $0x48] sm:$0xff] }
 0x3ca   :  { %2219 = vmatprep.mubr.f32.mxu0 %v14587_v58  ;;  %2314 = vmatprep.mubr.f32.mxu1 %v14587_v58  ;;  %14825 = vst [vmem:[#allocation172_spill] sm:$0xff] %v11391_v0 }
 0x3cb   :  { %2474 = vmatpush1.msra.mxu0 %v11161_v33  ;;  %2569 = vmatpush1.msra.mxu1 %v11167_v38 }
 0x3cc   :  { %2475 = vmatprep.subr.mxu0 %v11173_v53  ;;  %2570 = vmatprep.subr.mxu1 %v11179_v27 }
 0x3cd   :  { %6925 = vmatmul.mubr.msk.f32.gmra.mxu0 %vm492_vm0, %v6920_v49  ;;  %6930 = vmatmul.mubr.msk.f32.gmra.mxu1 %vm492_vm0, %v6920_v49  ;;  %v11397_v49 = vld [vmem:[%s14012_s3 + $0x58] sm:$0xff] }
 0x3ce   :  { %2476 = vmatpush1.msra.mxu0 %v11187_v26  ;;  %2571 = vmatpush1.msra.mxu1 %v11193_v8  ;;  %14826 = vst [vmem:[#allocation173_spill] sm:$0xff] %v11397_v49 }
 0x3cf   :  { %2477 = vmatprep.subr.mxu0 %v11199_v50  ;;  %2572 = vmatprep.subr.mxu1 %v11205_v42 }
 0x3d0   :  { %2478 = vmatpush1.msra.mxu0 %v11211_v39  ;;  %2573 = vmatpush1.msra.mxu1 %v11217_v11 }
 0x3d1   :  { %2479 = vmatprep.subr.mxu0 %v11223_v12  ;;  %2574 = vmatprep.subr.mxu1 %v11229_v34 }
 0x3d2   :  { %2480 = vmatpush1.msra.mxu0 %v11235_v10  ;;  %2575 = vmatpush1.msra.mxu1 %v11241_v24 }
 0x3d3   :  { %2481 = vmatprep.subr.mxu0 %v11247_v35  ;;  %2576 = vmatprep.subr.mxu1 %v11253_v60 }
 0x3d4   :  { %2482 = vmatpush1.msra.mxu0 %v11259_v15  ;;  %2577 = vmatpush1.msra.mxu1 %v11265_v29 }
 0x3d5   :  { %2483 = vmatprep.subr.mxu0 %v11271_v19  ;;  %2578 = vmatprep.subr.mxu1 %v11277_v6 }
 0x3d6   :  { %2484 = vmatpush1.msra.mxu0 %v11283_v37  ;;  %2579 = vmatpush1.msra.mxu1 %v11289_v46 }
 0x3d7   :  { %2485 = vmatprep.subr.mxu0 %v11295_v17  ;;  %2580 = vmatprep.subr.mxu1 %v11301_v31 }
 0x3d8   :  { %2486 = vmatpush1.msra.mxu0 %v11307_v2  ;;  %2581 = vmatpush1.msra.mxu1 %v11313_v1 }
 0x3d9   :  { %2487 = vmatprep.subr.mxu0 %v11319_v62  ;;  %2582 = vmatprep.subr.mxu1 %v11325_v28 }
 0x3da   :  { %2488 = vmatpush1.msra.mxu0 %v11331_v44  ;;  %2583 = vmatpush1.msra.mxu1 %v11337_v48 }
 0x3db   :  { %2489 = vmatprep.subr.mxu0 %v11343_v3  ;;  %2584 = vmatprep.subr.mxu1 %v11349_v5 }
 0x3dc   :  { %2490 = vmatpush1.msra.mxu0 %v11355_v63  ;;  %2585 = vmatpush1.msra.mxu1 %v11361_v7 }
 0x3dd   :  { %2491 = vmatprep.subr.mxu0 %v11367_v30  ;;  %2586 = vmatprep.subr.mxu1 %v11373_v36 }
 0x3de   :  { %2492 = vmatpush1.msra.mxu0 %v11379_v23  ;;  %2587 = vmatpush1.msra.mxu1 %v11385_v20  ;;  %v11403_v23 = vld [vmem:[%s14012_s3 + $0x40] sm:$0xff]  ;;  %v11409_v20 = vld [vmem:[%s14012_s3 + $0x50] sm:$0xff] }
 0x3df   :  { %2493 = vmatprep.subr.mxu0 %v11391_v0  ;;  %2588 = vmatprep.subr.mxu1 %v11397_v49  ;;  %14827 = vst [vmem:[#allocation174_spill] sm:$0xff] %v11403_v23  ;;  %14828 = vst [vmem:[#allocation175_spill] sm:$0xff] %v11409_v20  ;;  %v11415_v0 = vld [vmem:[%s14012_s3 + $0x28] sm:$0xff]  ;;  %v11421_v49 = vld [vmem:[%s14012_s3 + $0x38] sm:$0xff] }
 0x3e0   :  { %2494 = vmatpush1.msra.mxu0 %v11403_v23  ;;  %2589 = vmatpush1.msra.mxu1 %v11409_v20  ;;  %14829 = vst [vmem:[#allocation176_spill] sm:$0xff] %v11415_v0  ;;  %14830 = vst [vmem:[#allocation177_spill] sm:$0xff] %v11421_v49  ;;  %v11427_v23 = vld [vmem:[%s14012_s3 + $0x20] sm:$0xff]  ;;  %v11433_v20 = vld [vmem:[%s14012_s3 + $0x30] sm:$0xff] }
 0x3e1   :  { %2495 = vmatprep.subr.mxu0 %v11415_v0  ;;  %2590 = vmatprep.subr.mxu1 %v11421_v49  ;;  %14831 = vst [vmem:[#allocation178_spill] sm:$0xff] %v11427_v23  ;;  %14832 = vst [vmem:[#allocation179_spill] sm:$0xff] %v11433_v20  ;;  %v11439_v0 = vld [vmem:[%s14012_s3 + $0x8] sm:$0xff]  ;;  %v11445_v49 = vld [vmem:[%s14012_s3 + $0x18] sm:$0xff] }
 0x3e2   :  { %2496 = vmatpush1.msra.mxu0 %v11427_v23  ;;  %2591 = vmatpush1.msra.mxu1 %v11433_v20  ;;  %14833 = vst [vmem:[#allocation180_spill] sm:$0xff] %v11439_v0  ;;  %14834 = vst [vmem:[#allocation181_spill] sm:$0xff] %v11445_v49  ;;  %v11451_v23 = vld [vmem:[%s14012_s3] sm:$0xff] }
 0x3e3   :  { %2497 = vmatprep.subr.mxu0 %v11439_v0  ;;  %2592 = vmatprep.subr.mxu1 %v11445_v49  ;;  %14835 = vst [vmem:[#allocation182_spill] sm:$0xff] %v11451_v23  ;;  %v11458_v0 = vld [vmem:[%s14012_s3 + $0x10] sm:$0xff]  ;;  %v11465_v49 = vld [vmem:[%s14016_s2 + $0xe8] sm:$0xff] }
 0x3e4   :  { %2498 = vmatpush1.msra.mxu0 %v11451_v23  ;;  %2531 = vmatprep.mubr.f32.mxu0 %v14587_v58  ;;  %14836 = vst [vmem:[#allocation183_spill] sm:$0xff] %v11458_v0  ;;  %14837 = vst [vmem:[#allocation184_spill] sm:$0xff] %v11465_v49  ;;  %v11471_v23 = vld [vmem:[%s14016_s2 + $0xf8] sm:$0xff] }
 0x3e5   :  { %2593 = vmatpush1.msra.mxu1 %v11458_v0  ;;  %2626 = vmatprep.mubr.f32.mxu1 %v14587_v58  ;;  %14838 = vst [vmem:[#allocation185_spill] sm:$0xff] %v11471_v23 }
 0x3e6   :  { %2688 = vmatprep.subr.mxu0 %v11465_v49  ;;  %2783 = vmatprep.subr.mxu1 %v11471_v23 }
 0x462   :  { %v1992_v20 = vpop.f32.mrf.mxu0  ;;  %v2087_v36 = vpop.f32.mrf.mxu1 }
 0x464   :  { %v1994_v30 = vpop.f32.mrf.mxu0  ;;  %v2089_v0 = vpop.f32.mrf.mxu1 }
 0x466   :  { %v1998_v7 = vpop.f32.mrf.mxu0  ;;  %v2093_v63 = vpop.f32.mrf.mxu1 }
 0x468   :  { %v2000_v5 = vpop.f32.mrf.mxu0  ;;  %v2095_v3 = vpop.f32.mrf.mxu1 }
 0x46b   :  { %v2004_v48 = vpop.f32.mrf.mxu0  ;;  %v11474_v44 = vpop.f32.mrf.mxu1 }
 0x46d   :  { %v2006_v28 = vpop.f32.mrf.mxu0  ;;  %v11476_v49 = vpop.f32.mrf.mxu1 }
 0x470   :  { %v2010_v62 = vpop.f32.mrf.mxu0  ;;  %v11478_v1 = vpop.f32.mrf.mxu1 }
 0x472   :  { %v2012_v2 = vpop.f32.mrf.mxu0  ;;  %v11480_v31 = vpop.f32.mrf.mxu1 }
 0x479   :  { %v2016_v23 = vpop.f32.mrf.mxu0  ;;  %v11482_v17 = vpop.f32.mrf.mxu1 }
 0x47b   :  { %v11484_v46 = vpop.f32.mrf.mxu0  ;;  %v11486_v37 = vpop.f32.mrf.mxu1 }
 0x47d   :  { %v2197_v6 = vpop.f32.mrf.mxu0  ;;  %v2292_v19 = vpop.f32.mrf.mxu1 }
 0x47e   :  { %v2198_v29 = vadd.f32 %v2197_v6, %v1992_v20  ;;  %v2293_v38 = vadd.f32 %v2292_v19, %v2087_v36 }
 0x47f   :  { %v2199_v15 = vpop.f32.mrf.mxu0  ;;  %v2294_v60 = vpop.f32.mrf.mxu1 }
 0x480   :  { %v2321_v35 = vadd.f32 %v2198_v29, %v10069_v47  ;;  %v2200_v24 = vadd.f32 %v2199_v15, %v1994_v30  ;;  %v2295_v26 = vadd.f32 %v2294_v60, %v2089_v0 }
 0x481   :  { %v2203_v10 = vpop.f32.mrf.mxu0  ;;  %v2298_v34 = vpop.f32.mrf.mxu1 }
 0x482   :  { %v6931_v12 = vmul.f32 -1.442695, %v2321_v35  ;;  %v2322_v11 = vadd.f32 %v2200_v24, %v10071_v51  ;;  %v2204_v39 = vadd.f32 %v2203_v10, %v1998_v7  ;;  %v2324_v10 = vadd.f32 %v2295_v26, %v10076_v9 }
 0x483   :  { %v2205_v42 = vpop.f32.mrf.mxu0  ;;  %v2300_v50 = vpop.f32.mrf.mxu1 }
 0x484   :  { %7519 = vpow2.f32 %v6931_v12  ;;  %v6936_v8 = vmul.f32 -1.442695, %v2322_v11  ;;  %v2206_v27 = vadd.f32 %v2205_v42, %v2000_v5  ;;  %v2325_v53 = vadd.f32 %v2204_v39, %v10069_v47 }
 0x485   :  { %v2209_v6 = vpop.f32.mrf.mxu0  ;;  %v2304_v20 = vpop.f32.mrf.mxu1  ;;  %v2301_v11 = vadd.f32 %v2300_v50, %v2095_v3  ;;  %v2323_v39 = vadd.f32 %v2293_v38, %v10079_v16  ;;  %v2299_v5 = vadd.f32 %v2298_v34, %v2093_v63  ;;  %v6941_v7 = vmul.f32 -1.442695, %v2324_v10 }
 0x486   :  { %7521 = vpow2.f32 %v6936_v8  ;;  %v2326_v15 = vadd.f32 %v2206_v27, %v10071_v51  ;;  %v2210_v29 = vadd.f32 %v2209_v6, %v2004_v48  ;;  %v6932_v30 = vmul.f32 -1.442695, %v2325_v53 }
 0x487   :  { %v2211_v35 = vpop.f32.mrf.mxu0  ;;  %v2306_v33 = vpop.f32.mrf.mxu1  ;;  %v2328_v0 = vadd.f32 %v2301_v11, %v10076_v9  ;;  %v2327_v34 = vadd.f32 %v2299_v5, %v10079_v16 }
 0x488   :  { %v6937_v24 = vmul.f32 -1.442695, %v2326_v15  ;;  %v2329_v12 = vadd.f32 %v2210_v29, %v10069_v47  ;;  %7523 = vpow2.f32 %v6932_v30  ;;  %v2212_v42 = vadd.f32 %v2211_v35, %v2006_v28 }
 0x489   :  { %v2215_v60 = vpop.f32.mrf.mxu0  ;;  %v2310_v53 = vpop.f32.mrf.mxu1  ;;  %v2305_v29 = vadd.f32 %v2304_v20, %v11474_v44  ;;  %v6942_v10 = vmul.f32 -1.442695, %v2328_v0 }
 0x48a   :  { %7525 = vpow2.f32 %v6937_v24  ;;  %v6933_v19 = vmul.f32 -1.442695, %v2329_v12  ;;  %v2216_v8 = vadd.f32 %v2215_v60, %v2010_v62  ;;  %v2330_v27 = vadd.f32 %v2212_v42, %v10071_v51 }
 0x48b   :  { %v2217_v48 = vpop.f32.mrf.mxu0  ;;  %v2307_v62 = vadd.f32 %v2306_v33, %v11476_v49  ;;  %v2312_v63 = vpop.f32.mrf.mxu1  ;;  %v2331_v44 = vadd.f32 %v2305_v29, %v10079_v16 }
 0x48c   :  { %7527 = vpow2.f32 %v6933_v19  ;;  %v2333_v26 = vadd.f32 %v2216_v8, %v10069_v47  ;;  %v2218_v36 = vadd.f32 %v2217_v48, %v2012_v2  ;;  %v6938_v50 = vmul.f32 -1.442695, %v2330_v27 }
 0x48d   :  { %v2221_v28 = vpop.f32.mrf.mxu0  ;;  %7529 = vtanh.f32 %v2323_v39  ;;  %v2332_v33 = vadd.f32 %v2307_v62, %v10076_v9  ;;  %v2311_v27 = vadd.f32 %v2310_v53, %v11478_v1 }
 0x48e   :  { %v6934_v3 = vmul.f32 -1.442695, %v2333_v26  ;;  %v2334_v38 = vadd.f32 %v2218_v36, %v10071_v51  ;;  %v2222_v6 = vadd.f32 %v2221_v28, %v2016_v23  ;;  %7531 = vpow2.f32 %v6938_v50 }
 0x48f   :  { %v2223_v15 = vpop.f32.mrf.mxu0  ;;  %7533 = vpow2.f32 %v6941_v7  ;;  %v2313_v23 = vadd.f32 %v2312_v63, %v11480_v31  ;;  %v6943_v8 = vmul.f32 -1.442695, %v2332_v33  ;;  %v2316_v31 = vpop.f32.mrf.mxu1 }
 0x490   :  { %v6939_v2 = vmul.f32 -1.442695, %v2334_v38  ;;  %v2337_v30 = vadd.f32 %v2222_v6, %v10069_v47  ;;  %7535 = vpow2.f32 %v6934_v3  ;;  %v2224_v24 = vadd.f32 %v2223_v15, %v11484_v46 }
 0x491   :  { %v7520_v35 = vpop.eup %7519  ;;  %v2336_v46 = vadd.f32 %v2313_v23, %v10076_v9  ;;  %v2318_v50 = vpop.f32.mrf.mxu1  ;;  %v2335_v3 = vadd.f32 %v2311_v27, %v10079_v16  ;;  %v2317_v63 = vadd.f32 %v2316_v31, %v11482_v17 }
 0x492   :  { %v2356_v12 = vadd.f32 1.0, %v7520_v35  ;;  %7537 = vpow2.f32 %v6939_v2  ;;  %v6935_v49 = vmul.f32 -1.442695, %v2337_v30  ;;  %v2338_v20 = vadd.f32 %v2224_v24, %v10071_v51 }
 0x493   :  { %v7522_v11 = vpop.eup %7521  ;;  %7539 = vtanh.f32 %v2327_v34  ;;  %v6944_v36 = vmul.f32 -1.442695, %v2336_v46  ;;  %v2319_v1 = vadd.f32 %v2318_v50, %v11486_v37 }
 0x494   :  { %7541 = vrcp.f32 %v2356_v12  ;;  %v2386_v42 = vadd.f32 1.0, %v7522_v11  ;;  %v6940_v7 = vmul.f32 -1.442695, %v2338_v20  ;;  %v2339_v12 = vadd.f32 %v2317_v63, %v10079_v16 }
 0x495   :  { %7543 = vpow2.f32 %v6942_v10  ;;  %v7524_v60 = vpop.eup %7523  ;;  %v2340_v10 = vadd.f32 %v2319_v1, %v10076_v9 }
 0x496   :  { %7545 = vrcp.f32 %v2386_v42  ;;  %v2357_v19 = vadd.f32 1.0, %v7524_v60 }
 0x497   :  { %v7526_v39 = vpop.eup %7525  ;;  %7547 = vpow2.f32 %v6935_v49 }
 0x498   :  { %v2387_v5 = vadd.f32 1.0, %v7526_v39  ;;  %7549 = vtanh.f32 %v2331_v44  ;;  %v6945_v44 = vmul.f32 -1.442695, %v2340_v10  ;;  %v11542_v10 = vld [vmem:[%s14016_s2 + $0xc8] sm:$0xff] }
 0x499   :  { %v7528_v48 = vpop.eup %7527  ;;  %7551 = vrcp.f32 %v2357_v19 }
 0x49a   :  { %7553 = vrcp.f32 %v2387_v5  ;;  %v2358_v26 = vadd.f32 1.0, %v7528_v48  ;;  %v7530_v0 = vpop.eup %7529 }
 0x49b   :  { %7555 = vpow2.f32 %v6943_v8  ;;  %v7532_v28 = vpop.eup %7531 }
 0x49c   :  { %7557 = vrcp.f32 %v2358_v26  ;;  %v7534_v38 = vpop.eup %7533  ;;  %v2388_v6 = vadd.f32 1.0, %v7532_v28 }
 0x49d   :  { %7559 = vpow2.f32 %v6940_v7  ;;  %v7536_v34 = vpop.eup %7535  ;;  %v2421_v35 = vadd.f32 1.0, %v7534_v38 }
 0x49e   :  { %7561 = vpow2.f32 %v6944_v36  ;;  %v2359_v62 = vadd.f32 1.0, %v7536_v34 }
 0x49f   :  { %v7538_v53 = vpop.eup %7537  ;;  %7563 = vrcp.f32 %v2388_v6 }
 0x4a0   :  { %v7540_v15 = vpop.eup %7539  ;;  %7565 = vtanh.f32 %v2335_v3  ;;  %v2389_v29 = vadd.f32 1.0, %v7538_v53 }
 0x4a1   :  { %v7542_v2 = vpop.eup %7541  ;;  %7567 = vrcp.f32 %v2359_v62 }
 0x4a2   :  { %v7544_v30 = vpop.eup %7543  ;;  %7569 = vrcp.f32 %v2389_v29  ;;  %v2441_v37 = vmul.f32 %v7542_v2, %v7530_v0 }
 0x4a3   :  { %v7546_v24 = vpop.eup %7545  ;;  %v2422_v49 = vadd.f32 1.0, %v7544_v30  ;;  %7571 = vrcp.f32 %v2421_v35 }
 0x4a4   :  { %v7548_v23 = vpop.eup %7547  ;;  %v2436_v11 = vmul.f32 %v7546_v24, %v10984_v41  ;;  %7573 = vtanh.f32 %v2339_v12 }
 0x4a5   :  { %v7550_v33 = vpop.eup %7549  ;;  %v2360_v60 = vadd.f32 1.0, %v7548_v23 }
 0x4a6   :  { %v7552_v17 = vpop.eup %7551  ;;  %v11516_v42 = vadd.f32 %v2441_v37, %v2436_v11  ;;  %v11549_v37 = vld [vmem:[%s14016_s2 + $0xc0] sm:$0xff]  ;;  %v11555_v11 = vld [vmem:[%s14016_s2 + $0xf0] sm:$0xff] }
 0x4a7   :  { %v7554_v20 = vpop.eup %7553  ;;  %v2442_v39 = vmul.f32 %v7552_v17, %v7540_v15 }
 0x4a8   :  { %v7556_v46 = vpop.eup %7555  ;;  %7575 = vtanh.f32 %v11516_v42  ;;  %v2437_v19 = vmul.f32 %v7554_v20, %v10988_v40  ;;  %v11575_v20 = vld [vmem:[%s14016_s2 + $0xa0] sm:$0xff] }
 0x4a9   :  { %v7558_v8 = vpop.eup %7557  ;;  %7577 = vrcp.f32 %v2422_v49  ;;  %v2423_v7 = vadd.f32 1.0, %v7556_v46  ;;  %v11567_v49 = vld [vmem:[%s14016_s2 + $0xd8] sm:$0xff] }
 0x4aa   :  { %v7560_v31 = vpop.eup %7559  ;;  %7579 = vpow2.f32 %v6945_v44  ;;  %v11520_v41 = vadd.f32 %v2442_v39, %v2437_v19  ;;  %v2443_v36 = vmul.f32 %v7558_v8, %v7550_v33  ;;  %v11590_v19 = vld [vmem:[%s14016_s2 + $0x88] sm:$0xff]  ;;  %v11596_v8 = vld [vmem:[%s14016_s2 + $0xb8] sm:$0xff] }
 0x4ab   :  { %v7562_v5 = vpop.eup %7561  ;;  %7581 = vrcp.f32 %v2360_v60  ;;  %v2390_v27 = vadd.f32 1.0, %v7560_v31  ;;  %v11583_v60 = vld [vmem:[%s14016_s2 + $0xd0] sm:$0xff] }
 0x4ac   :  { %v7564_v48 = vpop.eup %7563  ;;  %7583 = vtanh.f32 %v11520_v41  ;;  %v2424_v28 = vadd.f32 1.0, %v7562_v5  ;;  %v11602_v5 = vld [vmem:[%s14016_s2 + $0x80] sm:$0xff] }
 0x4ad   :  { %v7566_v26 = vpop.eup %7565  ;;  %v2438_v0 = vmul.f32 %v7564_v48, %v10992_v21  ;;  %7585 = vrcp.f32 %v2390_v27  ;;  %v11608_v27 = vld [vmem:[%s14016_s2 + $0xb0] sm:$0xff] }
 0x4ae   :  { %v7568_v50 = vpop.eup %7567  ;;  %7587 = vrcp.f32 %v2423_v7  ;;  %v11614_v7 = vld [vmem:[%s14016_s2 + $0x68] sm:$0xff] }
 0x4af   :  { %v7570_v40 = vpop.eup %7569  ;;  %v11524_v3 = vadd.f32 %v2443_v36, %v2438_v0  ;;  %v2444_v38 = vmul.f32 %v7568_v50, %v7566_v26  ;;  %v11620_v26 = vld [vmem:[%s14016_s2 + $0x98] sm:$0xff]  ;;  %v11628_v36 = vld [vmem:[%s14016_s2 + $0x60] sm:$0xff]  ;;  %v11634_v0 = vld [vmem:[%s14016_s2 + $0x90] sm:$0xff] }
 0x4b0   :  { %v2439_v6 = vmul.f32 %v7570_v40, %v10996_v14  ;;  %v7572_v1 = vpop.eup %7571  ;;  %v11534_v14 = vld [vmem:[%s14016_s2 + $0xe0] sm:$0xff]  ;;  %14839 = vst [vmem:[#allocation186_spill] sm:$0xff] %v11628_v36  ;;  %14840 = vst [vmem:[#allocation187_spill] sm:$0xff] %v11634_v0  ;;  %v11640_v50 = vld [vmem:[%s14016_s2 + $0x78] sm:$0xff] }
 0x4b1   :  { %7589 = vtanh.f32 %v11524_v3  ;;  %v7574_v53 = vpop.eup %7573  ;;  %14841 = vst [vmem:[#allocation188_spill] sm:$0xff] %v11640_v50  ;;  %v11646_v40 = vld [vmem:[%s14016_s2 + $0x48] sm:$0xff] }
 0x4b2   :  { %v11528_v34 = vadd.f32 %v2444_v38, %v2439_v6  ;;  %7591 = vrcp.f32 %v2424_v28  ;;  %14842 = vst [vmem:[#allocation189_spill] sm:$0xff] %v11646_v40  ;;  %v11652_v28 = vld [vmem:[%s14016_s2 + $0x70] sm:$0xff]  ;;  %v11658_v38 = vld [vmem:[%s14016_s2 + $0x40] sm:$0xff]  ;;  %v11664_v6 = vld [vmem:[%s14016_s2 + $0x58] sm:$0xff] }
 0x4b3   :  { %14843 = vst [vmem:[#allocation190_spill] sm:$0xff] %v11652_v28  ;;  %14844 = vst [vmem:[#allocation191_spill] sm:$0xff] %v11658_v38 }
 0x4b4   :  { %7593 = vtanh.f32 %v11528_v34  ;;  %14845 = vst [vmem:[#allocation192_spill] sm:$0xff] %v11664_v6 }
 0x4b5   :  { %v7576_v21 = vpop.eup %7575 }
 0x4b6   :  { %v7578_v62 = vpop.eup %7577  ;;  %v2456_v63 = vmul.f32 %v7576_v21, %v7572_v1  ;;  %v11672_v1 = vld [vmem:[%s14016_s2 + $0x28] sm:$0xff]  ;;  %v11678_v21 = vld [vmem:[%s14016_s2 + $0x50] sm:$0xff] }
 0x4b7   :  { %v7580_v15 = vpop.eup %7579  ;;  %14846 = vst [vmem:[#allocation193_spill] sm:$0xff] %v11672_v1  ;;  %14847 = vst [vmem:[#allocation194_spill] sm:$0xff] %v11678_v21 }
 0x4b8   :  { %v7582_v29 = vpop.eup %7581  ;;  %2532 = vmatmul.mubr.f32.vlgmr.msra.gmra.mxu0 %v2456_v63  ;;  %2627 = vmatmul.mubr.f32.vlgmr.msra.gmra.mxu1 %v2456_v63  ;;  %v2425_v35 = vadd.f32 1.0, %v7580_v15  ;;  %v11690_v15 = vld [vmem:[%s14016_s2 + $0x38] sm:$0xff] }
 0x4b9   :  { %v7584_v2 = vpop.eup %7583  ;;  %2689 = vmatpush1.msra.mxu0 %v11534_v14  ;;  %2537 = vmatprep.mubr.f32.mxu0 %v14587_v58  ;;  %v2445_v12 = vmul.f32 %v7582_v29, %v7574_v53  ;;  %14849 = vst [vmem:[#allocation196_spill] sm:$0xff] %v11690_v15  ;;  %v11696_v29 = vld [vmem:[%s14016_s2 + $0x8] sm:$0xff] }
 0x4ba   :  { %v7586_v30 = vpop.eup %7585  ;;  %2632 = vmatprep.mubr.f32.mxu1 %v14587_v58  ;;  %2690 = vmatprep.subr.mxu0 %v11542_v10  ;;  %v2457_v24 = vmul.f32 %v7584_v2, %v7578_v62  ;;  %7595 = vrcp.f32 %v2425_v35  ;;  %v11684_v62 = vld [vmem:[%s14016_s2 + $0x20] sm:$0xff]  ;;  %14850 = vst [vmem:[#allocation197_spill] sm:$0xff] %v11696_v29 }
 0x4bb   :  { %v2440_v23 = vmul.f32 %v7586_v30, %v11008_v32  ;;  %2691 = vmatpush1.msra.mxu0 %v11549_v37  ;;  %2784 = vmatpush1.msra.mxu1 %v11555_v11  ;;  %v7588_v33 = vpop.eup %7587  ;;  %v11561_v32 = vld [vmem:[%s14016_s2 + $0xa8] sm:$0xff]  ;;  %14848 = vst [vmem:[#allocation195_spill] sm:$0xff] %v11684_v62  ;;  %v11702_v30 = vld [vmem:[%s14016_s2 + $0x30] sm:$0xff]  ;;  %v11708_v35 = vld [vmem:[%s14016_s2] sm:$0xff] }
 0x4bc   :  { %2538 = vmatmul.mubr.f32.gmra.mxu0 %v2457_v24  ;;  %2633 = vmatmul.mubr.f32.gmra.mxu1 %v2457_v24  ;;  %14851 = vst [vmem:[#allocation198_spill] sm:$0xff] %v11702_v30  ;;  %14852 = vst [vmem:[#allocation199_spill] sm:$0xff] %v11708_v35  ;;  %v11714_v24 = vld [vmem:[%s14016_s2 + $0x18] sm:$0xff] }
 0x4bd   :  { %2692 = vmatprep.subr.mxu0 %v11561_v32  ;;  %2785 = vmatprep.subr.mxu1 %v11567_v49  ;;  %v11570_v17 = vadd.f32 %v2445_v12, %v2440_v23  ;;  %14853 = vst [vmem:[#allocation200_spill] sm:$0xff] %v11714_v24  ;;  %v11722_v12 = vld [vmem:[%s14016_s2 + $0x10] sm:$0xff]  ;;  %v6946_v23 = vld [vmem:[%s14017_s0 + $0xa0] sm:$0xff] }
 0x4be   :  { %v7590_v44 = vpop.eup %7589  ;;  %2693 = vmatpush1.msra.mxu0 %v11575_v20  ;;  %2543 = vmatprep.mubr.f32.mxu0 %v14587_v58  ;;  %14854 = vst [vmem:[#allocation201_spill] sm:$0xff] %v11722_v12 }
 0x4bf   :  { %2638 = vmatprep.mubr.f32.mxu1 %v14587_v58  ;;  %2786 = vmatpush1.msra.mxu1 %v11583_v60  ;;  %v2458_v46 = vmul.f32 %v7590_v44, %v7588_v33  ;;  %7597 = vtanh.f32 %v11570_v17  ;;  %v7592_v39 = vpop.eup %7591  ;;  %v14865_v33 = vld [vmem:[#allocation145_spill] sm:$0xff]  ;;  %v14866_v44 = vld [vmem:[#allocation144_spill] sm:$0xff] }
 0x4c0   :  { %2694 = vmatprep.subr.mxu0 %v11590_v19  ;;  %2787 = vmatprep.subr.mxu1 %v11596_v8 }
 0x4c1   :  { %v7594_v31 = vpop.eup %7593  ;;  %2544 = vmatmul.mubr.f32.gmra.mxu0 %v2458_v46  ;;  %2639 = vmatmul.mubr.f32.gmra.mxu1 %v2458_v46  ;;  %v14867_v46 = vld [vmem:[#allocation147_spill] sm:$0xff] }
 0x4c2   :  { %2695 = vmatpush1.msra.mxu0 %v11602_v5  ;;  %2788 = vmatpush1.msra.mxu1 %v11608_v27  ;;  %v2459_v48 = vmul.f32 %v7594_v31, %v7592_v39  ;;  %v14868_v39 = vld [vmem:[#allocation146_spill] sm:$0xff]  ;;  %v14869_v31 = vld [vmem:[#allocation148_spill] sm:$0xff] }
 0x4c3   :  { %2696 = vmatprep.subr.mxu0 %v11614_v7  ;;  %2789 = vmatprep.subr.mxu1 %v11620_v26 }
 0x4c4   :  { %2549 = vmatprep.mubr.f32.mxu0 %v14587_v58  ;;  %2644 = vmatprep.mubr.f32.mxu1 %v14587_v58 }
 0x4c5   :  { %2697 = vmatpush1.msra.mxu0 %v11628_v36  ;;  %2790 = vmatpush1.msra.mxu1 %v11634_v0 }
 0x4c6   :  { %2550 = vmatmul.mubr.f32.gmra.mxu0 %v2459_v48  ;;  %2645 = vmatmul.mubr.f32.gmra.mxu1 %v2459_v48  ;;  %v14870_v48 = vld [vmem:[#allocation149_spill] sm:$0xff] }
 0x4c7   :  { %2791 = vmatprep.subr.mxu1 %v11640_v50  ;;  %2698 = vmatprep.subr.mxu0 %v11646_v40  ;;  %v7596_v53 = vpop.eup %7595 }
 0x4c8   :  { %2792 = vmatpush1.msra.mxu1 %v11652_v28  ;;  %2699 = vmatpush1.msra.mxu0 %v11658_v38 }
 0x4c9   :  { %2793 = vmatprep.subr.mxu1 %v11664_v6  ;;  %2555 = vmatprep.mubr.f32.mxu0 %v14587_v58 }
 0x4ca   :  { %2650 = vmatprep.mubr.f32.mxu1 %v14587_v58  ;;  %2700 = vmatprep.subr.mxu0 %v11672_v1 }
 0x4cb   :  { %2794 = vmatpush1.msra.mxu1 %v11678_v21  ;;  %2701 = vmatpush1.msra.mxu0 %v11684_v62 }
 0x4cc   :  { %v7598_v63 = vpop.eup %7597  ;;  %2795 = vmatprep.subr.mxu1 %v11690_v15  ;;  %2702 = vmatprep.subr.mxu0 %v11696_v29 }
 0x4cd   :  { %v2460_v2 = vmul.f32 %v7598_v63, %v7596_v53  ;;  %2796 = vmatpush1.msra.mxu1 %v11702_v30  ;;  %2703 = vmatpush1.msra.mxu0 %v11708_v35  ;;  %v14871_v53 = vld [vmem:[#allocation150_spill] sm:$0xff]  ;;  %v14872_v63 = vld [vmem:[#allocation151_spill] sm:$0xff] }
 0x4ce   :  { %2797 = vmatprep.subr.mxu1 %v11714_v24  ;;  %3008 = vmatprep.subr.mxu0 %v11043_v61  ;;  %v6947_v61 = vld [vmem:[%s14017_s0 + $0xa8] sm:$0xff] }
 0x4cf   :  { %2556 = vmatmul.mubr.f32.gmra.mxu0 %v2460_v2  ;;  %2651 = vmatmul.mubr.f32.gmra.mxu1 %v2460_v2  ;;  %v14873_v2 = vld [vmem:[#allocation152_spill] sm:$0xff] }
 0x4d0   :  { %2736 = vmatprep.mubr.f32.mxu0 %v14587_v58  ;;  %2798 = vmatpush1.msra.mxu1 %v11722_v12 }
 0x4d1   :  { %2831 = vmatprep.mubr.f32.mxu1 %v14587_v58  ;;  %3103 = vmatprep.subr.mxu1 %v11055_v57  ;;  %v6948_v57 = vld [vmem:[%s14017_s0 + $0xb0] sm:$0xff] }
 0x4d3   :  { %6951 = vmatmul.mubr.msk.f32.vlgmr.msra.gmra.mxu0 %vm492_vm0, %v6946_v23  ;;  %6956 = vmatmul.mubr.msk.f32.vlgmr.msra.gmra.mxu1 %vm492_vm0, %v6946_v23  ;;  %v14874_v23 = vld [vmem:[#allocation153_spill] sm:$0xff] }
 0x4d4   :  { %2742 = vmatprep.mubr.f32.mxu0 %v14587_v58  ;;  %2837 = vmatprep.mubr.f32.mxu1 %v14587_v58 }
 0x4d5   :  { %3009 = vmatpush1.msra.mxu0 %v11068_v54  ;;  %3104 = vmatpush1.msra.mxu1 %v11074_v13  ;;  %v6949_v54 = vld [vmem:[%s14017_s0 + $0xb8] sm:$0xff]  ;;  %v6950_v13 = vld [vmem:[%s14017_s0 + $0xc0] sm:$0xff] }
 0x4d6   :  { %3010 = vmatprep.subr.mxu0 %v11080_v55  ;;  %3105 = vmatprep.subr.mxu1 %v11086_v22  ;;  %v14855_v55 = vld [vmem:[#allocation134_spill] sm:$0xff]  ;;  %v14856_v22 = vld [vmem:[#allocation135_spill] sm:$0xff] }
 0x4d7   :  { %6952 = vmatmul.mubr.msk.f32.gmra.mxu0 %vm492_vm0, %v6947_v61  ;;  %6957 = vmatmul.mubr.msk.f32.gmra.mxu1 %vm492_vm0, %v6947_v61  ;;  %v14875_v61 = vld [vmem:[#allocation154_spill] sm:$0xff] }
 0x4d8   :  { %2748 = vmatprep.mubr.f32.mxu0 %v14587_v58  ;;  %2843 = vmatprep.mubr.f32.mxu1 %v14587_v58 }
 0x4d9   :  { %3011 = vmatpush1.msra.mxu0 %v11099_v45  ;;  %3106 = vmatpush1.msra.mxu1 %v11105_v18  ;;  %v14857_v45 = vld [vmem:[#allocation136_spill] sm:$0xff]  ;;  %v14858_v18 = vld [vmem:[#allocation137_spill] sm:$0xff] }
 0x4da   :  { %3012 = vmatprep.subr.mxu0 %v11111_v25  ;;  %3107 = vmatprep.subr.mxu1 %v11117_v43  ;;  %v14859_v25 = vld [vmem:[#allocation138_spill] sm:$0xff]  ;;  %v14860_v43 = vld [vmem:[#allocation139_spill] sm:$0xff] }
 0x4db   :  { %6953 = vmatmul.mubr.msk.f32.gmra.mxu0 %vm492_vm0, %v6948_v57  ;;  %6958 = vmatmul.mubr.msk.f32.gmra.mxu1 %vm492_vm0, %v6948_v57  ;;  %v14876_v57 = vld [vmem:[#allocation155_spill] sm:$0xff] }
 0x4dc   :  { %2754 = vmatprep.mubr.f32.mxu0 %v14587_v58  ;;  %2849 = vmatprep.mubr.f32.mxu1 %v14587_v58 }
 0x4dd   :  { %3013 = vmatpush1.msra.mxu0 %v11130_v56  ;;  %3108 = vmatpush1.msra.mxu1 %v11136_v52  ;;  %v14861_v56 = vld [vmem:[#allocation142_spill] sm:$0xff]  ;;  %v14862_v52 = vld [vmem:[#allocation140_spill] sm:$0xff] }
 0x4de   :  { %3014 = vmatprep.subr.mxu0 %v11142_v59  ;;  %3109 = vmatprep.subr.mxu1 %v11148_v4  ;;  %v14863_v59 = vld [vmem:[#allocation141_spill] sm:$0xff]  ;;  %v14864_v4 = vld [vmem:[#allocation143_spill] sm:$0xff] }
 0x4df   :  { %6954 = vmatmul.mubr.msk.f32.gmra.mxu0 %vm492_vm0, %v6949_v54  ;;  %6959 = vmatmul.mubr.msk.f32.gmra.mxu1 %vm492_vm0, %v6949_v54  ;;  %v14877_v54 = vld [vmem:[#allocation156_spill] sm:$0xff] }
 0x4e0   :  { %2760 = vmatprep.mubr.f32.mxu0 %v14587_v58  ;;  %2855 = vmatprep.mubr.f32.mxu1 %v14587_v58 }
 0x4e1   :  { %3015 = vmatpush1.msra.mxu0 %v14855_v55  ;;  %3110 = vmatpush1.msra.mxu1 %v14856_v22  ;;  %v14879_v55 = vld [vmem:[#allocation158_spill] sm:$0xff]  ;;  %v14880_v22 = vld [vmem:[#allocation159_spill] sm:$0xff] }
 0x4e2   :  { %3016 = vmatprep.subr.mxu0 %v14857_v45  ;;  %3111 = vmatprep.subr.mxu1 %v14858_v18  ;;  %v14881_v45 = vld [vmem:[#allocation160_spill] sm:$0xff]  ;;  %v14882_v18 = vld [vmem:[#allocation161_spill] sm:$0xff] }
 0x4e3   :  { %6955 = vmatmul.mubr.msk.f32.gmra.mxu0 %vm492_vm0, %v6950_v13  ;;  %6960 = vmatmul.mubr.msk.f32.gmra.mxu1 %vm492_vm0, %v6950_v13  ;;  %v14878_v13 = vld [vmem:[#allocation157_spill] sm:$0xff] }
 0x4e4   :  { %3017 = vmatpush1.msra.mxu0 %v14859_v25  ;;  %3112 = vmatpush1.msra.mxu1 %v14860_v43  ;;  %v14883_v25 = vld [vmem:[#allocation162_spill] sm:$0xff]  ;;  %v14884_v43 = vld [vmem:[#allocation163_spill] sm:$0xff] }
 0x4e5   :  { %3018 = vmatprep.subr.mxu0 %v14861_v56  ;;  %3113 = vmatprep.subr.mxu1 %v14862_v52  ;;  %v14885_v56 = vld [vmem:[#allocation164_spill] sm:$0xff]  ;;  %v14886_v52 = vld [vmem:[#allocation165_spill] sm:$0xff] }
 0x4e6   :  { %3019 = vmatpush1.msra.mxu0 %v14863_v59  ;;  %3114 = vmatpush1.msra.mxu1 %v14864_v4  ;;  %v14887_v59 = vld [vmem:[#allocation166_spill] sm:$0xff]  ;;  %v14888_v4 = vld [vmem:[#allocation167_spill] sm:$0xff] }
 0x4e7   :  { %3020 = vmatprep.subr.mxu0 %v14865_v33  ;;  %3115 = vmatprep.subr.mxu1 %v14866_v44  ;;  %v14889_v33 = vld [vmem:[#allocation168_spill] sm:$0xff]  ;;  %v14890_v44 = vld [vmem:[#allocation169_spill] sm:$0xff] }
 0x4e8   :  { %3021 = vmatpush1.msra.mxu0 %v14867_v46  ;;  %3116 = vmatpush1.msra.mxu1 %v14868_v39  ;;  %v14891_v46 = vld [vmem:[#allocation170_spill] sm:$0xff]  ;;  %v14892_v39 = vld [vmem:[#allocation171_spill] sm:$0xff] }
 0x4e9   :  { %3022 = vmatprep.subr.mxu0 %v14869_v31  ;;  %3117 = vmatprep.subr.mxu1 %v14870_v48  ;;  %v14893_v31 = vld [vmem:[#allocation172_spill] sm:$0xff]  ;;  %v14894_v48 = vld [vmem:[#allocation173_spill] sm:$0xff] }
 0x4ea   :  { %3023 = vmatpush1.msra.mxu0 %v14871_v53  ;;  %3118 = vmatpush1.msra.mxu1 %v14872_v63  ;;  %v14895_v53 = vld [vmem:[#allocation174_spill] sm:$0xff]  ;;  %v14896_v63 = vld [vmem:[#allocation175_spill] sm:$0xff] }
 0x4eb   :  { %3024 = vmatprep.subr.mxu0 %v14873_v2  ;;  %3119 = vmatprep.subr.mxu1 %v14874_v23  ;;  %v14897_v2 = vld [vmem:[#allocation176_spill] sm:$0xff]  ;;  %v14898_v23 = vld [vmem:[#allocation177_spill] sm:$0xff] }
 0x4ec   :  { %3025 = vmatpush1.msra.mxu0 %v14875_v61  ;;  %3120 = vmatpush1.msra.mxu1 %v14876_v57  ;;  %v14899_v61 = vld [vmem:[#allocation178_spill] sm:$0xff]  ;;  %v14900_v57 = vld [vmem:[#allocation179_spill] sm:$0xff] }
 0x4ed   :  { %3026 = vmatprep.subr.mxu0 %v14877_v54  ;;  %3121 = vmatprep.subr.mxu1 %v14878_v13  ;;  %v14901_v54 = vld [vmem:[#allocation180_spill] sm:$0xff]  ;;  %v14902_v13 = vld [vmem:[#allocation181_spill] sm:$0xff] }
 0x4ee   :  { %3027 = vmatpush1.msra.mxu0 %v14879_v55  ;;  %3122 = vmatpush1.msra.mxu1 %v14880_v22  ;;  %v14903_v55 = vld [vmem:[#allocation182_spill] sm:$0xff]  ;;  %v14904_v22 = vld [vmem:[#allocation183_spill] sm:$0xff] }
 0x4ef   :  { %3028 = vmatprep.subr.mxu0 %v14881_v45  ;;  %3123 = vmatprep.subr.mxu1 %v14882_v18  ;;  %v14905_v45 = vld [vmem:[#allocation184_spill] sm:$0xff]  ;;  %v14906_v18 = vld [vmem:[#allocation185_spill] sm:$0xff] }
 0x4f0   :  { %3029 = vmatpush1.msra.mxu0 %v14883_v25  ;;  %3124 = vmatpush1.msra.mxu1 %v14884_v43 }
 0x4f1   :  { %3030 = vmatprep.subr.mxu0 %v14885_v56  ;;  %3125 = vmatprep.subr.mxu1 %v14886_v52 }
 0x4f2   :  { %3031 = vmatpush1.msra.mxu0 %v14887_v59  ;;  %3126 = vmatpush1.msra.mxu1 %v14888_v4 }
 0x4f3   :  { %3032 = vmatprep.subr.mxu0 %v14889_v33  ;;  %3127 = vmatprep.subr.mxu1 %v14890_v44 }
 0x4f4   :  { %3033 = vmatpush1.msra.mxu0 %v14891_v46  ;;  %3128 = vmatpush1.msra.mxu1 %v14892_v39 }
 0x4f5   :  { %3034 = vmatprep.subr.mxu0 %v14893_v31  ;;  %3129 = vmatprep.subr.mxu1 %v14894_v48 }
 0x4f6   :  { %3035 = vmatpush1.msra.mxu0 %v14895_v53  ;;  %3130 = vmatpush1.msra.mxu1 %v14896_v63 }
 0x4f7   :  { %3036 = vmatprep.subr.mxu0 %v14897_v2  ;;  %3131 = vmatprep.subr.mxu1 %v14898_v23 }
 0x4f8   :  { %3037 = vmatpush1.msra.mxu0 %v14899_v61  ;;  %3132 = vmatpush1.msra.mxu1 %v14900_v57 }
 0x4f9   :  { %3038 = vmatprep.subr.mxu0 %v14901_v54  ;;  %3133 = vmatprep.subr.mxu1 %v14902_v13 }
 0x4fa   :  { %3039 = vmatpush1.msra.mxu0 %v14903_v55  ;;  %3072 = vmatprep.mubr.f32.mxu0 %v14587_v58 }
 0x4fb   :  { %3134 = vmatpush1.msra.mxu1 %v14904_v22  ;;  %3167 = vmatprep.mubr.f32.mxu1 %v14587_v58 }
 0x4fc   :  { %3229 = vmatprep.subr.mxu0 %v14905_v45  ;;  %3324 = vmatprep.subr.mxu1 %v14906_v18 }
 0x578   :  { %v2533_v25 = vpop.f32.mrf.mxu0  ;;  %v2628_v43 = vpop.f32.mrf.mxu1 }
 0x57a   :  { %v2535_v56 = vpop.f32.mrf.mxu0  ;;  %v2630_v52 = vpop.f32.mrf.mxu1 }
 0x57c   :  { %v2539_v59 = vpop.f32.mrf.mxu0  ;;  %v2634_v4 = vpop.f32.mrf.mxu1 }
 0x57e   :  { %v2541_v33 = vpop.f32.mrf.mxu0  ;;  %v2636_v44 = vpop.f32.mrf.mxu1 }
 0x581   :  { %v2545_v46 = vpop.f32.mrf.mxu0  ;;  %v11826_v39 = vpop.f32.mrf.mxu1 }
 0x583   :  { %v2547_v31 = vpop.f32.mrf.mxu0  ;;  %v11828_v48 = vpop.f32.mrf.mxu1 }
 0x586   :  { %v2551_v53 = vpop.f32.mrf.mxu0  ;;  %v11830_v63 = vpop.f32.mrf.mxu1 }
 0x588   :  { %v2553_v2 = vpop.f32.mrf.mxu0  ;;  %v11832_v23 = vpop.f32.mrf.mxu1 }
 0x58f   :  { %v2557_v61 = vpop.f32.mrf.mxu0  ;;  %v11834_v57 = vpop.f32.mrf.mxu1 }
 0x591   :  { %v11836_v54 = vpop.f32.mrf.mxu0  ;;  %v11838_v13 = vpop.f32.mrf.mxu1 }
 0x593   :  { %v2738_v55 = vpop.f32.mrf.mxu0  ;;  %v2833_v22 = vpop.f32.mrf.mxu1 }
 0x594   :  { %v2739_v45 = vadd.f32 %v2738_v55, %v2533_v25  ;;  %v2834_v0 = vadd.f32 %v2833_v22, %v2628_v43 }
 0x595   :  { %v2740_v18 = vpop.f32.mrf.mxu0  ;;  %v2835_v12 = vpop.f32.mrf.mxu1 }
 0x596   :  { %v2862_v24 = vadd.f32 %v2739_v45, %v10069_v47  ;;  %v2741_v35 = vadd.f32 %v2740_v18, %v2535_v56  ;;  %v2836_v28 = vadd.f32 %v2835_v12, %v2630_v52 }
 0x597   :  { %v2744_v30 = vpop.f32.mrf.mxu0  ;;  %v2839_v29 = vpop.f32.mrf.mxu1 }
 0x598   :  { %v6961_v15 = vmul.f32 -1.442695, %v2862_v24  ;;  %v2863_v62 = vadd.f32 %v2741_v35, %v10071_v51  ;;  %v2745_v21 = vadd.f32 %v2744_v30, %v2539_v59  ;;  %v2865_v30 = vadd.f32 %v2836_v28, %v10076_v9 }
 0x599   :  { %v2746_v1 = vpop.f32.mrf.mxu0  ;;  %v2841_v6 = vpop.f32.mrf.mxu1  ;;  %v2840_v52 = vadd.f32 %v2839_v29, %v2634_v4 }
 0x59a   :  { %7599 = vpow2.f32 %v6961_v15  ;;  %v6966_v38 = vmul.f32 -1.442695, %v2863_v62  ;;  %v2747_v40 = vadd.f32 %v2746_v1, %v2541_v33  ;;  %v2866_v50 = vadd.f32 %v2745_v21, %v10069_v47 }
 0x59b   :  { %v2750_v25 = vpop.f32.mrf.mxu0  ;;  %v2845_v55 = vpop.f32.mrf.mxu1  ;;  %v2842_v62 = vadd.f32 %v2841_v6, %v2636_v44  ;;  %v2864_v21 = vadd.f32 %v2834_v0, %v10079_v16  ;;  %v6971_v33 = vmul.f32 -1.442695, %v2865_v30  ;;  %v2868_v29 = vadd.f32 %v2840_v52, %v10079_v16 }
 0x59c   :  { %7601 = vpow2.f32 %v6966_v38  ;;  %v2867_v56 = vadd.f32 %v2747_v40, %v10071_v51  ;;  %v2751_v45 = vadd.f32 %v2750_v25, %v2545_v46  ;;  %v6962_v18 = vmul.f32 -1.442695, %v2866_v50 }
 0x59d   :  { %v2752_v24 = vpop.f32.mrf.mxu0  ;;  %v2847_v36 = vpop.f32.mrf.mxu1  ;;  %v2869_v22 = vadd.f32 %v2842_v62, %v10076_v9 }
 0x59e   :  { %v6967_v35 = vmul.f32 -1.442695, %v2867_v56  ;;  %v2870_v15 = vadd.f32 %v2751_v45, %v10069_v47  ;;  %7603 = vpow2.f32 %v6962_v18  ;;  %v2753_v1 = vadd.f32 %v2752_v24, %v2547_v31 }
 0x59f   :  { %v2756_v12 = vpop.f32.mrf.mxu0  ;;  %v2851_v50 = vpop.f32.mrf.mxu1  ;;  %v2848_v4 = vadd.f32 %v2847_v36, %v11828_v48  ;;  %v2846_v45 = vadd.f32 %v2845_v55, %v11826_v39  ;;  %v6972_v30 = vmul.f32 -1.442695, %v2869_v22 }
 0x5a0   :  { %7605 = vpow2.f32 %v6967_v35  ;;  %v6963_v43 = vmul.f32 -1.442695, %v2870_v15  ;;  %v2757_v38 = vadd.f32 %v2756_v12, %v2551_v53  ;;  %v2871_v40 = vadd.f32 %v2753_v1, %v10071_v51 }
 0x5a1   :  { %v2758_v59 = vpop.f32.mrf.mxu0  ;;  %v2853_v53 = vpop.f32.mrf.mxu1  ;;  %v2873_v36 = vadd.f32 %v2848_v4, %v10076_v9  ;;  %v2872_v39 = vadd.f32 %v2846_v45, %v10079_v16 }
 0x5a2   :  { %7607 = vpow2.f32 %v6963_v43  ;;  %v2874_v28 = vadd.f32 %v2757_v38, %v10069_v47  ;;  %v2759_v46 = vadd.f32 %v2758_v59, %v2553_v2  ;;  %v6968_v6 = vmul.f32 -1.442695, %v2871_v40 }
 0x5a3   :  { %v2762_v44 = vpop.f32.mrf.mxu0  ;;  %7609 = vtanh.f32 %v2864_v21  ;;  %v6973_v38 = vmul.f32 -1.442695, %v2873_v36  ;;  %v2852_v40 = vadd.f32 %v2851_v50, %v11830_v63 }
 0x5a4   :  { %v6964_v31 = vmul.f32 -1.442695, %v2874_v28  ;;  %v2875_v0 = vadd.f32 %v2759_v46, %v10071_v51  ;;  %v2763_v25 = vadd.f32 %v2762_v44, %v2557_v61  ;;  %7611 = vpow2.f32 %v6968_v6 }
 0x5a5   :  { %v2764_v56 = vpop.f32.mrf.mxu0  ;;  %7613 = vpow2.f32 %v6971_v33  ;;  %v2854_v61 = vadd.f32 %v2853_v53, %v11832_v23  ;;  %v2857_v23 = vpop.f32.mrf.mxu1 }
 0x5a6   :  { %v6969_v2 = vmul.f32 -1.442695, %v2875_v0  ;;  %v2878_v18 = vadd.f32 %v2763_v25, %v10069_v47  ;;  %7615 = vpow2.f32 %v6964_v31  ;;  %v2765_v35 = vadd.f32 %v2764_v56, %v11836_v54 }
 0x5a7   :  { %v7600_v24 = vpop.eup %7599  ;;  %v2877_v54 = vadd.f32 %v2854_v61, %v10076_v9  ;;  %v2859_v6 = vpop.f32.mrf.mxu1  ;;  %v2876_v31 = vadd.f32 %v2852_v40, %v10079_v16  ;;  %v2858_v53 = vadd.f32 %v2857_v23, %v11834_v57 }
 0x5a8   :  { %v2897_v15 = vadd.f32 1.0, %v7600_v24  ;;  %7617 = vpow2.f32 %v6969_v2  ;;  %v6965_v48 = vmul.f32 -1.442695, %v2878_v18  ;;  %v2879_v55 = vadd.f32 %v2765_v35, %v10071_v51 }
 0x5a9   :  { %v7602_v62 = vpop.eup %7601  ;;  %7619 = vtanh.f32 %v2868_v29  ;;  %v6974_v46 = vmul.f32 -1.442695, %v2877_v54  ;;  %v2860_v63 = vadd.f32 %v2859_v6, %v11838_v13 }
 0x5aa   :  { %7621 = vrcp.f32 %v2897_v15  ;;  %v2927_v1 = vadd.f32 1.0, %v7602_v62  ;;  %v6970_v33 = vmul.f32 -1.442695, %v2879_v55  ;;  %v2880_v15 = vadd.f32 %v2858_v53, %v10079_v16 }
 0x5ab   :  { %7623 = vpow2.f32 %v6972_v30  ;;  %v7604_v12 = vpop.eup %7603  ;;  %v2881_v30 = vadd.f32 %v2860_v63, %v10076_v9 }
 0x5ac   :  { %7625 = vrcp.f32 %v2927_v1  ;;  %v2898_v43 = vadd.f32 1.0, %v7604_v12 }
 0x5ad   :  { %v7606_v21 = vpop.eup %7605  ;;  %7627 = vpow2.f32 %v6965_v48 }
 0x5ae   :  { %v2928_v52 = vadd.f32 1.0, %v7606_v21  ;;  %7629 = vtanh.f32 %v2872_v39  ;;  %v6975_v39 = vmul.f32 -1.442695, %v2881_v30 }
 0x5af   :  { %v7608_v59 = vpop.eup %7607  ;;  %7631 = vrcp.f32 %v2898_v43 }
 0x5b0   :  { %7633 = vrcp.f32 %v2928_v52  ;;  %v2899_v28 = vadd.f32 1.0, %v7608_v59  ;;  %v7610_v22 = vpop.eup %7609 }
 0x5b1   :  { %7635 = vpow2.f32 %v6973_v38  ;;  %v7612_v44 = vpop.eup %7611 }
 0x5b2   :  { %7637 = vrcp.f32 %v2899_v28  ;;  %v7614_v0 = vpop.eup %7613  ;;  %v2929_v25 = vadd.f32 1.0, %v7612_v44 }
 0x5b3   :  { %7639 = vpow2.f32 %v6970_v33  ;;  %v7616_v29 = vpop.eup %7615  ;;  %v2962_v24 = vadd.f32 1.0, %v7614_v0 }
 0x5b4   :  { %7641 = vpow2.f32 %v6974_v46  ;;  %v2900_v4 = vadd.f32 1.0, %v7616_v29 }
 0x5b5   :  { %v7618_v50 = vpop.eup %7617  ;;  %7643 = vrcp.f32 %v2929_v25 }
 0x5b6   :  { %v7620_v56 = vpop.eup %7619  ;;  %7645 = vtanh.f32 %v2876_v31  ;;  %v2930_v45 = vadd.f32 1.0, %v7618_v50 }
 0x5b7   :  { %v7622_v2 = vpop.eup %7621  ;;  %7647 = vrcp.f32 %v2900_v4 }
 0x5b8   :  { %v7624_v18 = vpop.eup %7623  ;;  %7649 = vrcp.f32 %v2930_v45  ;;  %v2982_v13 = vmul.f32 %v7622_v2, %v7610_v22 }
 0x5b9   :  { %v7626_v35 = vpop.eup %7625  ;;  %v2963_v48 = vadd.f32 1.0, %v7624_v18  ;;  %7651 = vrcp.f32 %v2962_v24 }
 0x5ba   :  { %v7628_v61 = vpop.eup %7627  ;;  %v2977_v62 = vmul.f32 %v7626_v35, %v11516_v42  ;;  %7653 = vtanh.f32 %v2880_v15 }
 0x5bb   :  { %v7630_v36 = vpop.eup %7629  ;;  %v2901_v12 = vadd.f32 1.0, %v7628_v61 }
 0x5bc   :  { %v7632_v57 = vpop.eup %7631  ;;  %v11868_v1 = vadd.f32 %v2982_v13, %v2977_v62  ;;  %v14916_v13 = vld [vmem:[#allocation195_spill] sm:$0xff] }
 0x5bd   :  { %v7634_v55 = vpop.eup %7633  ;;  %v2983_v21 = vmul.f32 %v7632_v57, %v7620_v56 }
 0x5be   :  { %v7636_v54 = vpop.eup %7635  ;;  %7655 = vtanh.f32 %v11868_v1  ;;  %v2978_v43 = vmul.f32 %v7634_v55, %v11520_v41  ;;  %v14920_v55 = vld [vmem:[#allocation199_spill] sm:$0xff] }
 0x5bf   :  { %v7638_v38 = vpop.eup %7637  ;;  %7657 = vrcp.f32 %v2963_v48  ;;  %v2964_v33 = vadd.f32 1.0, %v7636_v54  ;;  %v14918_v48 = vld [vmem:[#allocation197_spill] sm:$0xff]  ;;  %v11927_v54 = vld [vmem:[%s14012_s3 + $0x1e8] sm:$0xff] }
 0x5c0   :  { %v7640_v23 = vpop.eup %7639  ;;  %7659 = vpow2.f32 %v6975_v39  ;;  %v11872_v42 = vadd.f32 %v2983_v21, %v2978_v43  ;;  %v2984_v46 = vmul.f32 %v7638_v38, %v7630_v36  ;;  %v14917_v36 = vld [vmem:[#allocation196_spill] sm:$0xff]  ;;  %v14919_v39 = vld [vmem:[#allocation198_spill] sm:$0xff]  ;;  %v14922_v21 = vld [vmem:[#allocation201_spill] sm:$0xff] }
 0x5c1   :  { %v7642_v52 = vpop.eup %7641  ;;  %7661 = vrcp.f32 %v2901_v12  ;;  %v2931_v40 = vadd.f32 1.0, %v7640_v23  ;;  %v14921_v12 = vld [vmem:[#allocation200_spill] sm:$0xff]  ;;  %v6976_v43 = vld [vmem:[%s14017_s0 + $0xc8] sm:$0xff]  ;;  %v11939_v38 = vld [vmem:[%s14012_s3 + $0x1f8] sm:$0xff] }
 0x5c2   :  { %v7644_v59 = vpop.eup %7643  ;;  %7663 = vtanh.f32 %v11872_v42  ;;  %v2965_v44 = vadd.f32 1.0, %v7642_v52  ;;  %v6977_v23 = vld [vmem:[%s14017_s0 + $0xd0] sm:$0xff]  ;;  %v11952_v52 = vld [vmem:[%s14012_s3 + $0x1e0] sm:$0xff] }
 0x5c3   :  { %v7646_v28 = vpop.eup %7645  ;;  %v2979_v22 = vmul.f32 %v7644_v59, %v11524_v3  ;;  %7665 = vrcp.f32 %v2931_v40  ;;  %v11958_v40 = vld [vmem:[%s14012_s3 + $0x1f0] sm:$0xff]  ;;  %v11964_v59 = vld [vmem:[%s14012_s3 + $0x1c8] sm:$0xff] }
 0x5c4   :  { %v7648_v6 = vpop.eup %7647  ;;  %7667 = vrcp.f32 %v2964_v33  ;;  %v11970_v33 = vld [vmem:[%s14012_s3 + $0x1d8] sm:$0xff] }
 0x5c5   :  { %v7650_v41 = vpop.eup %7649  ;;  %v11876_v31 = vadd.f32 %v2984_v46, %v2979_v22  ;;  %v2985_v0 = vmul.f32 %v7648_v6, %v7646_v28  ;;  %v6978_v28 = vld [vmem:[%s14017_s0 + $0xd8] sm:$0xff]  ;;  %v11983_v46 = vld [vmem:[%s14012_s3 + $0x1c0] sm:$0xff]  ;;  %v11989_v22 = vld [vmem:[%s14012_s3 + $0x1d0] sm:$0xff] }
 0x5c6   :  { %v2980_v25 = vmul.f32 %v7650_v41, %v11528_v34  ;;  %v7652_v63 = vpop.eup %7651  ;;  %v11995_v6 = vld [vmem:[%s14012_s3 + $0x1a8] sm:$0xff]  ;;  %v12001_v41 = vld [vmem:[%s14012_s3 + $0x1b8] sm:$0xff] }
 0x5c7   :  { %7669 = vtanh.f32 %v11876_v31  ;;  %v7654_v50 = vpop.eup %7653 }
 0x5c8   :  { %v11880_v29 = vadd.f32 %v2985_v0, %v2980_v25  ;;  %7671 = vrcp.f32 %v2965_v44  ;;  %v6979_v44 = vld [vmem:[%s14017_s0 + $0xe0] sm:$0xff]  ;;  %v12020_v25 = vld [vmem:[%s14012_s3 + $0x1b0] sm:$0xff] }
 0x5c9   :  { %v12014_v0 = vld [vmem:[%s14012_s3 + $0x1a0] sm:$0xff] }
 0x5ca   :  { %7673 = vtanh.f32 %v11880_v29 }
 0x5cb   :  { %v7656_v3 = vpop.eup %7655 }
 0x5cc   :  { %v7658_v4 = vpop.eup %7657  ;;  %v2997_v53 = vmul.f32 %v7656_v3, %v7652_v63  ;;  %v12026_v63 = vld [vmem:[%s14012_s3 + $0x188] sm:$0xff] }
 0x5cd   :  { %v7660_v56 = vpop.eup %7659  ;;  %v6980_v3 = vld [vmem:[%s14017_s0 + $0xe8] sm:$0xff] }
 0x5ce   :  { %v7662_v45 = vpop.eup %7661  ;;  %3073 = vmatmul.mubr.f32.vlgmr.msra.gmra.mxu0 %v2997_v53  ;;  %3168 = vmatmul.mubr.f32.vlgmr.msra.gmra.mxu1 %v2997_v53  ;;  %v2966_v18 = vadd.f32 1.0, %v7660_v56  ;;  %v12051_v53 = vld [vmem:[%s14012_s3 + $0x190] sm:$0xff]  ;;  %v12057_v56 = vld [vmem:[%s14012_s3 + $0x168] sm:$0xff] }
 0x5cf   :  { %v7664_v2 = vpop.eup %7663  ;;  %3230 = vmatpush1.msra.mxu0 %v11534_v14  ;;  %3078 = vmatprep.mubr.f32.mxu0 %v14587_v58  ;;  %v2986_v30 = vmul.f32 %v7662_v45, %v7654_v50  ;;  %v12032_v50 = vld [vmem:[%s14012_s3 + $0x198] sm:$0xff]  ;;  %14924 = vst [vmem:[#allocation135_spill] sm:$0xff] %v12051_v53  ;;  %14925 = vst [vmem:[#allocation136_spill] sm:$0xff] %v12057_v56 }
 0x5d0   :  { %v7666_v34 = vpop.eup %7665  ;;  %3173 = vmatprep.mubr.f32.mxu1 %v14587_v58  ;;  %3231 = vmatprep.subr.mxu0 %v11542_v10  ;;  %v2998_v24 = vmul.f32 %v7664_v2, %v7658_v4  ;;  %7675 = vrcp.f32 %v2966_v18  ;;  %v12045_v4 = vld [vmem:[%s14012_s3 + $0x180] sm:$0xff]  ;;  %v12063_v45 = vld [vmem:[%s14012_s3 + $0x178] sm:$0xff]  ;;  %v12083_v18 = vld [vmem:[%s14012_s3 + $0x148] sm:$0xff] }
 0x5d1   :  { %v2981_v35 = vmul.f32 %v7666_v34, %v11570_v17  ;;  %3232 = vmatpush1.msra.mxu0 %v11549_v37  ;;  %3325 = vmatpush1.msra.mxu1 %v11555_v11  ;;  %v7668_v15 = vpop.eup %7667  ;;  %v14908_v17 = vld [vmem:[#allocation187_spill] sm:$0xff]  ;;  %14923 = vst [vmem:[#allocation134_spill] sm:$0xff] %v12045_v4  ;;  %14926 = vst [vmem:[#allocation137_spill] sm:$0xff] %v12063_v45  ;;  %v12071_v2 = vld [vmem:[%s14012_s3 + $0x160] sm:$0xff] }
 0x5d2   :  { %3079 = vmatmul.mubr.f32.gmra.mxu0 %v2998_v24  ;;  %3174 = vmatmul.mubr.f32.gmra.mxu1 %v2998_v24  ;;  %14927 = vst [vmem:[#allocation138_spill] sm:$0xff] %v12071_v2  ;;  %v12077_v34 = vld [vmem:[%s14012_s3 + $0x170] sm:$0xff]  ;;  %14929 = vst [vmem:[#allocation142_spill] sm:$0xff] %v12083_v18  ;;  %v12089_v24 = vld [vmem:[%s14012_s3 + $0x158] sm:$0xff] }
 0x5d3   :  { %3233 = vmatprep.subr.mxu0 %v11561_v32  ;;  %3326 = vmatprep.subr.mxu1 %v11567_v49  ;;  %v11892_v14 = vadd.f32 %v2986_v30, %v2981_v35  ;;  %v14907_v49 = vld [vmem:[#allocation186_spill] sm:$0xff]  ;;  %14928 = vst [vmem:[#allocation139_spill] sm:$0xff] %v12077_v34  ;;  %14930 = vst [vmem:[#allocation140_spill] sm:$0xff] %v12089_v24  ;;  %v12101_v35 = vld [vmem:[%s14012_s3 + $0x150] sm:$0xff] }
 0x5d4   :  { %v7670_v61 = vpop.eup %7669  ;;  %3234 = vmatpush1.msra.mxu0 %v11575_v20  ;;  %3084 = vmatprep.mubr.f32.mxu0 %v14587_v58  ;;  %v14909_v20 = vld [vmem:[#allocation188_spill] sm:$0xff]  ;;  %v12095_v30 = vld [vmem:[%s14012_s3 + $0x140] sm:$0xff]  ;;  %14932 = vst [vmem:[#allocation143_spill] sm:$0xff] %v12101_v35 }
 0x5d5   :  { %3179 = vmatprep.mubr.f32.mxu1 %v14587_v58  ;;  %3327 = vmatpush1.msra.mxu1 %v11583_v60  ;;  %v2999_v10 = vmul.f32 %v7670_v61, %v7668_v15  ;;  %7677 = vtanh.f32 %v11892_v14  ;;  %v7672_v37 = vpop.eup %7671  ;;  %v14910_v60 = vld [vmem:[#allocation189_spill] sm:$0xff]  ;;  %14931 = vst [vmem:[#allocation141_spill] sm:$0xff] %v12095_v30  ;;  %v12107_v15 = vld [vmem:[%s14012_s3 + $0x128] sm:$0xff] }
 0x5d6   :  { %3235 = vmatprep.subr.mxu0 %v11590_v19  ;;  %3328 = vmatprep.subr.mxu1 %v11596_v8  ;;  %v14911_v19 = vld [vmem:[#allocation190_spill] sm:$0xff]  ;;  %v14912_v8 = vld [vmem:[#allocation191_spill] sm:$0xff]  ;;  %14933 = vst [vmem:[#allocation145_spill] sm:$0xff] %v12107_v15  ;;  %v12113_v61 = vld [vmem:[%s14012_s3 + $0x138] sm:$0xff] }
 0x5d7   :  { %v7674_v11 = vpop.eup %7673  ;;  %3085 = vmatmul.mubr.f32.gmra.mxu0 %v2999_v10  ;;  %3180 = vmatmul.mubr.f32.gmra.mxu1 %v2999_v10  ;;  %14934 = vst [vmem:[#allocation144_spill] sm:$0xff] %v12113_v61  ;;  %v12119_v10 = vld [vmem:[%s14012_s3 + $0x120] sm:$0xff] }
 0x5d8   :  { %3236 = vmatpush1.msra.mxu0 %v11602_v5  ;;  %3329 = vmatpush1.msra.mxu1 %v11608_v27  ;;  %v3000_v32 = vmul.f32 %v7674_v11, %v7672_v37  ;;  %v14913_v5 = vld [vmem:[#allocation192_spill] sm:$0xff]  ;;  %v14914_v27 = vld [vmem:[#allocation193_spill] sm:$0xff]  ;;  %14935 = vst [vmem:[#allocation147_spill] sm:$0xff] %v12119_v10  ;;  %v12131_v11 = vld [vmem:[%s14012_s3 + $0x108] sm:$0xff] }
 0x5d9   :  { %3237 = vmatprep.subr.mxu0 %v11614_v7  ;;  %3330 = vmatprep.subr.mxu1 %v11620_v26  ;;  %v14915_v26 = vld [vmem:[#allocation194_spill] sm:$0xff]  ;;  %v12125_v37 = vld [vmem:[%s14012_s3 + $0x130] sm:$0xff]  ;;  %14937 = vst [vmem:[#allocation148_spill] sm:$0xff] %v12131_v11 }
 0x5da   :  { %3090 = vmatprep.mubr.f32.mxu0 %v14587_v58  ;;  %3185 = vmatprep.mubr.f32.mxu1 %v14587_v58  ;;  %14936 = vst [vmem:[#allocation146_spill] sm:$0xff] %v12125_v37 }
 0x5db   :  { %3238 = vmatpush1.msra.mxu0 %v14907_v49  ;;  %3331 = vmatpush1.msra.mxu1 %v14908_v17  ;;  %v12143_v49 = vld [vmem:[%s14012_s3 + $0x100] sm:$0xff]  ;;  %v12149_v17 = vld [vmem:[%s14012_s3 + $0x110] sm:$0xff] }
 0x5dc   :  { %3091 = vmatmul.mubr.f32.gmra.mxu0 %v3000_v32  ;;  %3186 = vmatmul.mubr.f32.gmra.mxu1 %v3000_v32  ;;  %v12137_v32 = vld [vmem:[%s14012_s3 + $0x118] sm:$0xff]  ;;  %14939 = vst [vmem:[#allocation150_spill] sm:$0xff] %v12143_v49  ;;  %14940 = vst [vmem:[#allocation151_spill] sm:$0xff] %v12149_v17 }
 0x5dd   :  { %3332 = vmatprep.subr.mxu1 %v14909_v20  ;;  %3239 = vmatprep.subr.mxu0 %v14910_v60  ;;  %v7676_v7 = vpop.eup %7675  ;;  %14938 = vst [vmem:[#allocation149_spill] sm:$0xff] %v12137_v32  ;;  %v12155_v20 = vld [vmem:[%s14012_s3 + $0xe8] sm:$0xff]  ;;  %v12161_v60 = vld [vmem:[%s14012_s3 + $0xf8] sm:$0xff] }
 0x5de   :  { %3333 = vmatpush1.msra.mxu1 %v14911_v19  ;;  %3240 = vmatpush1.msra.mxu0 %v14912_v8  ;;  %14941 = vst [vmem:[#allocation152_spill] sm:$0xff] %v12155_v20  ;;  %14942 = vst [vmem:[#allocation153_spill] sm:$0xff] %v12161_v60  ;;  %v12167_v19 = vld [vmem:[%s14012_s3 + $0xe0] sm:$0xff]  ;;  %v12173_v8 = vld [vmem:[%s14012_s3 + $0xf0] sm:$0xff] }
 0x5df   :  { %3334 = vmatprep.subr.mxu1 %v14913_v5  ;;  %3096 = vmatprep.mubr.f32.mxu0 %v14587_v58  ;;  %14943 = vst [vmem:[#allocation154_spill] sm:$0xff] %v12167_v19  ;;  %14944 = vst [vmem:[#allocation155_spill] sm:$0xff] %v12173_v8  ;;  %v12179_v5 = vld [vmem:[%s14012_s3 + $0xc8] sm:$0xff] }
 0x5e0   :  { %3191 = vmatprep.mubr.f32.mxu1 %v14587_v58  ;;  %3241 = vmatprep.subr.mxu0 %v14914_v27  ;;  %14945 = vst [vmem:[#allocation156_spill] sm:$0xff] %v12179_v5  ;;  %v12185_v27 = vld [vmem:[%s14012_s3 + $0xd8] sm:$0xff] }
 0x5e1   :  { %3335 = vmatpush1.msra.mxu1 %v14915_v26  ;;  %3242 = vmatpush1.msra.mxu0 %v14916_v13  ;;  %14946 = vst [vmem:[#allocation157_spill] sm:$0xff] %v12185_v27  ;;  %v12197_v26 = vld [vmem:[%s14012_s3 + $0xd0] sm:$0xff]  ;;  %v12203_v13 = vld [vmem:[%s14012_s3 + $0xa8] sm:$0xff] }
 0x5e2   :  { %v7678_v62 = vpop.eup %7677  ;;  %3336 = vmatprep.subr.mxu1 %v14917_v36  ;;  %3243 = vmatprep.subr.mxu0 %v14918_v48  ;;  %14948 = vst [vmem:[#allocation159_spill] sm:$0xff] %v12197_v26  ;;  %14949 = vst [vmem:[#allocation160_spill] sm:$0xff] %v12203_v13  ;;  %v12215_v36 = vld [vmem:[%s14012_s3 + $0xa0] sm:$0xff]  ;;  %v12221_v48 = vld [vmem:[%s14012_s3 + $0xb0] sm:$0xff] }
 0x5e3   :  { %v3001_v57 = vmul.f32 %v7678_v62, %v7676_v7  ;;  %3337 = vmatpush1.msra.mxu1 %v14919_v39  ;;  %3244 = vmatpush1.msra.mxu0 %v14920_v55  ;;  %v12191_v7 = vld [vmem:[%s14012_s3 + $0xc0] sm:$0xff]  ;;  %v12209_v62 = vld [vmem:[%s14012_s3 + $0xb8] sm:$0xff]  ;;  %14951 = vst [vmem:[#allocation162_spill] sm:$0xff] %v12215_v36  ;;  %14952 = vst [vmem:[#allocation163_spill] sm:$0xff] %v12221_v48 }
 0x5e4   :  { %3338 = vmatprep.subr.mxu1 %v14921_v12  ;;  %3549 = vmatprep.subr.mxu0 %v11927_v54  ;;  %14947 = vst [vmem:[#allocation158_spill] sm:$0xff] %v12191_v7  ;;  %14950 = vst [vmem:[#allocation161_spill] sm:$0xff] %v12209_v62  ;;  %v12233_v39 = vld [vmem:[%s14012_s3 + $0x98] sm:$0xff]  ;;  %v12239_v55 = vld [vmem:[%s14012_s3 + $0x80] sm:$0xff] }
 0x5e5   :  { %3097 = vmatmul.mubr.f32.gmra.mxu0 %v3001_v57  ;;  %3192 = vmatmul.mubr.f32.gmra.mxu1 %v3001_v57  ;;  %v12227_v57 = vld [vmem:[%s14012_s3 + $0x88] sm:$0xff]  ;;  %14954 = vst [vmem:[#allocation165_spill] sm:$0xff] %v12233_v39  ;;  %14955 = vst [vmem:[#allocation166_spill] sm:$0xff] %v12239_v55  ;;  %v12245_v12 = vld [vmem:[%s14012_s3 + $0x90] sm:$0xff] }
 0x5e6   :  { %3277 = vmatprep.mubr.f32.mxu0 %v14587_v58  ;;  %3339 = vmatpush1.msra.mxu1 %v14922_v21  ;;  %14953 = vst [vmem:[#allocation164_spill] sm:$0xff] %v12227_v57  ;;  %14956 = vst [vmem:[#allocation167_spill] sm:$0xff] %v12245_v12  ;;  %v12251_v21 = vld [vmem:[%s14012_s3 + $0x68] sm:$0xff] }
 0x5e7   :  { %3372 = vmatprep.mubr.f32.mxu1 %v14587_v58  ;;  %3644 = vmatprep.subr.mxu1 %v11939_v38  ;;  %14957 = vst [vmem:[#allocation168_spill] sm:$0xff] %v12251_v21 }
 0x5e9   :  { %6981 = vmatmul.mubr.msk.f32.vlgmr.msra.gmra.mxu0 %vm492_vm0, %v6976_v43  ;;  %6986 = vmatmul.mubr.msk.f32.vlgmr.msra.gmra.mxu1 %vm492_vm0, %v6976_v43  ;;  %v12257_v43 = vld [vmem:[%s14012_s3 + $0x78] sm:$0xff] }
 0x5ea   :  { %3283 = vmatprep.mubr.f32.mxu0 %v14587_v58  ;;  %3378 = vmatprep.mubr.f32.mxu1 %v14587_v58  ;;  %14958 = vst [vmem:[#allocation169_spill] sm:$0xff] %v12257_v43 }
 0x5eb   :  { %3550 = vmatpush1.msra.mxu0 %v11952_v52  ;;  %3645 = vmatpush1.msra.mxu1 %v11958_v40 }
 0x5ec   :  { %3551 = vmatprep.subr.mxu0 %v11964_v59  ;;  %3646 = vmatprep.subr.mxu1 %v11970_v33 }
 0x5ed   :  { %6982 = vmatmul.mubr.msk.f32.gmra.mxu0 %vm492_vm0, %v6977_v23  ;;  %6987 = vmatmul.mubr.msk.f32.gmra.mxu1 %vm492_vm0, %v6977_v23  ;;  %v12263_v23 = vld [vmem:[%s14012_s3 + $0x60] sm:$0xff] }
 0x5ee   :  { %3289 = vmatprep.mubr.f32.mxu0 %v14587_v58  ;;  %3384 = vmatprep.mubr.f32.mxu1 %v14587_v58  ;;  %14959 = vst [vmem:[#allocation170_spill] sm:$0xff] %v12263_v23 }
 0x5ef   :  { %3552 = vmatpush1.msra.mxu0 %v11983_v46  ;;  %3647 = vmatpush1.msra.mxu1 %v11989_v22 }
 0x5f0   :  { %3553 = vmatprep.subr.mxu0 %v11995_v6  ;;  %3648 = vmatprep.subr.mxu1 %v12001_v41 }
 0x5f1   :  { %6983 = vmatmul.mubr.msk.f32.gmra.mxu0 %vm492_vm0, %v6978_v28  ;;  %6988 = vmatmul.mubr.msk.f32.gmra.mxu1 %vm492_vm0, %v6978_v28  ;;  %v12269_v28 = vld [vmem:[%s14012_s3 + $0x70] sm:$0xff] }
 0x5f2   :  { %3295 = vmatprep.mubr.f32.mxu0 %v14587_v58  ;;  %3390 = vmatprep.mubr.f32.mxu1 %v14587_v58  ;;  %14960 = vst [vmem:[#allocation171_spill] sm:$0xff] %v12269_v28 }
 0x5f3   :  { %3554 = vmatpush1.msra.mxu0 %v12014_v0  ;;  %3649 = vmatpush1.msra.mxu1 %v12020_v25 }
 0x5f4   :  { %3555 = vmatprep.subr.mxu0 %v12026_v63  ;;  %3650 = vmatprep.subr.mxu1 %v12032_v50 }
 0x5f5   :  { %6984 = vmatmul.mubr.msk.f32.gmra.mxu0 %vm492_vm0, %v6979_v44  ;;  %6989 = vmatmul.mubr.msk.f32.gmra.mxu1 %vm492_vm0, %v6979_v44  ;;  %v12275_v44 = vld [vmem:[%s14012_s3 + $0x48] sm:$0xff] }
 0x5f6   :  { %3301 = vmatprep.mubr.f32.mxu0 %v14587_v58  ;;  %3396 = vmatprep.mubr.f32.mxu1 %v14587_v58  ;;  %14961 = vst [vmem:[#allocation172_spill] sm:$0xff] %v12275_v44 }
 0x5f7   :  { %3556 = vmatpush1.msra.mxu0 %v12045_v4  ;;  %3651 = vmatpush1.msra.mxu1 %v12051_v53 }
 0x5f8   :  { %3557 = vmatprep.subr.mxu0 %v12057_v56  ;;  %3652 = vmatprep.subr.mxu1 %v12063_v45 }
 0x5f9   :  { %6985 = vmatmul.mubr.msk.f32.gmra.mxu0 %vm492_vm0, %v6980_v3  ;;  %6990 = vmatmul.mubr.msk.f32.gmra.mxu1 %vm492_vm0, %v6980_v3  ;;  %v12281_v3 = vld [vmem:[%s14012_s3 + $0x58] sm:$0xff] }
 0x5fa   :  { %3558 = vmatpush1.msra.mxu0 %v12071_v2  ;;  %3653 = vmatpush1.msra.mxu1 %v12077_v34  ;;  %14962 = vst [vmem:[#allocation173_spill] sm:$0xff] %v12281_v3 }
 0x5fb   :  { %3559 = vmatprep.subr.mxu0 %v12083_v18  ;;  %3654 = vmatprep.subr.mxu1 %v12089_v24 }
 0x5fc   :  { %3560 = vmatpush1.msra.mxu0 %v12095_v30  ;;  %3655 = vmatpush1.msra.mxu1 %v12101_v35 }
 0x5fd   :  { %3561 = vmatprep.subr.mxu0 %v12107_v15  ;;  %3656 = vmatprep.subr.mxu1 %v12113_v61 }
 0x5fe   :  { %3562 = vmatpush1.msra.mxu0 %v12119_v10  ;;  %3657 = vmatpush1.msra.mxu1 %v12125_v37 }
 0x5ff   :  { %3563 = vmatprep.subr.mxu0 %v12131_v11  ;;  %3658 = vmatprep.subr.mxu1 %v12137_v32 }
 0x600   :  { %3564 = vmatpush1.msra.mxu0 %v12143_v49  ;;  %3659 = vmatpush1.msra.mxu1 %v12149_v17 }
 0x601   :  { %3565 = vmatprep.subr.mxu0 %v12155_v20  ;;  %3660 = vmatprep.subr.mxu1 %v12161_v60 }
 0x602   :  { %3566 = vmatpush1.msra.mxu0 %v12167_v19  ;;  %3661 = vmatpush1.msra.mxu1 %v12173_v8 }
 0x603   :  { %3567 = vmatprep.subr.mxu0 %v12179_v5  ;;  %3662 = vmatprep.subr.mxu1 %v12185_v27 }
 0x604   :  { %3568 = vmatpush1.msra.mxu0 %v12191_v7  ;;  %3663 = vmatpush1.msra.mxu1 %v12197_v26 }
 0x605   :  { %3569 = vmatprep.subr.mxu0 %v12203_v13  ;;  %3664 = vmatprep.subr.mxu1 %v12209_v62 }
 0x606   :  { %3570 = vmatpush1.msra.mxu0 %v12215_v36  ;;  %3665 = vmatpush1.msra.mxu1 %v12221_v48 }
 0x607   :  { %3571 = vmatprep.subr.mxu0 %v12227_v57  ;;  %3666 = vmatprep.subr.mxu1 %v12233_v39 }
 0x608   :  { %3572 = vmatpush1.msra.mxu0 %v12239_v55  ;;  %3667 = vmatpush1.msra.mxu1 %v12245_v12 }
 0x609   :  { %3573 = vmatprep.subr.mxu0 %v12251_v21  ;;  %3668 = vmatprep.subr.mxu1 %v12257_v43 }
 0x60a   :  { %3574 = vmatpush1.msra.mxu0 %v12263_v23  ;;  %3669 = vmatpush1.msra.mxu1 %v12269_v28  ;;  %v12287_v23 = vld [vmem:[%s14012_s3 + $0x40] sm:$0xff]  ;;  %v12293_v28 = vld [vmem:[%s14012_s3 + $0x50] sm:$0xff] }
 0x60b   :  { %3575 = vmatprep.subr.mxu0 %v12275_v44  ;;  %3670 = vmatprep.subr.mxu1 %v12281_v3  ;;  %14963 = vst [vmem:[#allocation174_spill] sm:$0xff] %v12287_v23  ;;  %14964 = vst [vmem:[#allocation175_spill] sm:$0xff] %v12293_v28  ;;  %v12299_v44 = vld [vmem:[%s14012_s3 + $0x28] sm:$0xff]  ;;  %v12305_v3 = vld [vmem:[%s14012_s3 + $0x38] sm:$0xff] }
 0x60c   :  { %3576 = vmatpush1.msra.mxu0 %v12287_v23  ;;  %3671 = vmatpush1.msra.mxu1 %v12293_v28  ;;  %14965 = vst [vmem:[#allocation176_spill] sm:$0xff] %v12299_v44  ;;  %14966 = vst [vmem:[#allocation177_spill] sm:$0xff] %v12305_v3  ;;  %v12311_v23 = vld [vmem:[%s14012_s3 + $0x20] sm:$0xff]  ;;  %v12317_v28 = vld [vmem:[%s14012_s3 + $0x30] sm:$0xff] }
 0x60d   :  { %3577 = vmatprep.subr.mxu0 %v12299_v44  ;;  %3672 = vmatprep.subr.mxu1 %v12305_v3  ;;  %14967 = vst [vmem:[#allocation178_spill] sm:$0xff] %v12311_v23  ;;  %14968 = vst [vmem:[#allocation179_spill] sm:$0xff] %v12317_v28  ;;  %v12323_v44 = vld [vmem:[%s14012_s3 + $0x8] sm:$0xff]  ;;  %v12329_v3 = vld [vmem:[%s14012_s3 + $0x18] sm:$0xff] }
 0x60e   :  { %3578 = vmatpush1.msra.mxu0 %v12311_v23  ;;  %3673 = vmatpush1.msra.mxu1 %v12317_v28  ;;  %14969 = vst [vmem:[#allocation180_spill] sm:$0xff] %v12323_v44  ;;  %14970 = vst [vmem:[#allocation181_spill] sm:$0xff] %v12329_v3  ;;  %v12335_v23 = vld [vmem:[%s14012_s3] sm:$0xff] }
 0x60f   :  { %3579 = vmatprep.subr.mxu0 %v12323_v44  ;;  %3674 = vmatprep.subr.mxu1 %v12329_v3  ;;  %14971 = vst [vmem:[#allocation182_spill] sm:$0xff] %v12335_v23  ;;  %v12342_v44 = vld [vmem:[%s14012_s3 + $0x10] sm:$0xff]  ;;  %v12349_v3 = vld [vmem:[%s14016_s2 + $0xe8] sm:$0xff] }
 0x610   :  { %3580 = vmatpush1.msra.mxu0 %v12335_v23  ;;  %3613 = vmatprep.mubr.f32.mxu0 %v14587_v58  ;;  %14972 = vst [vmem:[#allocation183_spill] sm:$0xff] %v12342_v44  ;;  %14973 = vst [vmem:[#allocation184_spill] sm:$0xff] %v12349_v3  ;;  %v12355_v23 = vld [vmem:[%s14016_s2 + $0xf8] sm:$0xff] }
 0x611   :  { %3675 = vmatpush1.msra.mxu1 %v12342_v44  ;;  %3708 = vmatprep.mubr.f32.mxu1 %v14587_v58  ;;  %14974 = vst [vmem:[#allocation185_spill] sm:$0xff] %v12355_v23 }
 0x612   :  { %3770 = vmatprep.subr.mxu0 %v12349_v3  ;;  %3865 = vmatprep.subr.mxu1 %v12355_v23 }
 0x68e   :  { %v3074_v28 = vpop.f32.mrf.mxu0  ;;  %v3169_v43 = vpop.f32.mrf.mxu1 }
 0x690   :  { %v3076_v21 = vpop.f32.mrf.mxu0  ;;  %v3171_v44 = vpop.f32.mrf.mxu1 }
 0x692   :  { %v3080_v12 = vpop.f32.mrf.mxu0  ;;  %v3175_v55 = vpop.f32.mrf.mxu1 }
 0x694   :  { %v3082_v39 = vpop.f32.mrf.mxu0  ;;  %v3177_v57 = vpop.f32.mrf.mxu1 }
 0x697   :  { %v3086_v48 = vpop.f32.mrf.mxu0  ;;  %v12358_v36 = vpop.f32.mrf.mxu1 }
 0x699   :  { %v3088_v62 = vpop.f32.mrf.mxu0  ;;  %v12360_v3 = vpop.f32.mrf.mxu1 }
 0x69c   :  { %v3092_v13 = vpop.f32.mrf.mxu0  ;;  %v12362_v26 = vpop.f32.mrf.mxu1 }
 0x69e   :  { %v3094_v7 = vpop.f32.mrf.mxu0  ;;  %v12364_v27 = vpop.f32.mrf.mxu1 }
 0x6a5   :  { %v3098_v23 = vpop.f32.mrf.mxu0  ;;  %v12366_v5 = vpop.f32.mrf.mxu1 }
 0x6a7   :  { %v12368_v8 = vpop.f32.mrf.mxu0  ;;  %v12370_v19 = vpop.f32.mrf.mxu1 }
 0x6a9   :  { %v3279_v60 = vpop.f32.mrf.mxu0  ;;  %v3374_v20 = vpop.f32.mrf.mxu1 }
 0x6aa   :  { %v3280_v17 = vadd.f32 %v3279_v60, %v3074_v28  ;;  %v3375_v53 = vadd.f32 %v3374_v20, %v3169_v43 }
 0x6ab   :  { %v3281_v49 = vpop.f32.mrf.mxu0  ;;  %v3376_v32 = vpop.f32.mrf.mxu1 }
 0x6ac   :  { %v3403_v11 = vadd.f32 %v3280_v17, %v10069_v47  ;;  %v3282_v37 = vadd.f32 %v3281_v49, %v3076_v21  ;;  %v3377_v2 = vadd.f32 %v3376_v32, %v3171_v44 }
 0x6ad   :  { %v3285_v10 = vpop.f32.mrf.mxu0  ;;  %v3380_v61 = vpop.f32.mrf.mxu1 }
 0x6ae   :  { %v6991_v15 = vmul.f32 -1.442695, %v3403_v11  ;;  %v3404_v35 = vadd.f32 %v3282_v37, %v10071_v51  ;;  %v3286_v30 = vadd.f32 %v3285_v10, %v3080_v12  ;;  %v3406_v10 = vadd.f32 %v3377_v2, %v10076_v9 }
 0x6af   :  { %v3287_v24 = vpop.f32.mrf.mxu0  ;;  %v3382_v18 = vpop.f32.mrf.mxu1 }
 0x6b0   :  { %7679 = vpow2.f32 %v6991_v15  ;;  %v6996_v34 = vmul.f32 -1.442695, %v3404_v35  ;;  %v3288_v45 = vadd.f32 %v3287_v24, %v3082_v39  ;;  %v3407_v56 = vadd.f32 %v3286_v30, %v10069_v47 }
 0x6b1   :  { %v3291_v60 = vpop.f32.mrf.mxu0  ;;  %v3386_v28 = vpop.f32.mrf.mxu1  ;;  %v3383_v35 = vadd.f32 %v3382_v18, %v3177_v57  ;;  %v3405_v30 = vadd.f32 %v3375_v53, %v10079_v16  ;;  %v3381_v39 = vadd.f32 %v3380_v61, %v3175_v55  ;;  %v7001_v12 = vmul.f32 -1.442695, %v3406_v10 }
 0x6b2   :  { %7681 = vpow2.f32 %v6996_v34  ;;  %v3408_v49 = vadd.f32 %v3288_v45, %v10071_v51  ;;  %v3292_v17 = vadd.f32 %v3291_v60, %v3086_v48  ;;  %v6992_v21 = vmul.f32 -1.442695, %v3407_v56 }
 0x6b3   :  { %v3293_v11 = vpop.f32.mrf.mxu0  ;;  %v3388_v4 = vpop.f32.mrf.mxu1  ;;  %v3410_v44 = vadd.f32 %v3383_v35, %v10076_v9  ;;  %v3409_v61 = vadd.f32 %v3381_v39, %v10079_v16 }
 0x6b4   :  { %v6997_v37 = vmul.f32 -1.442695, %v3408_v49  ;;  %v3411_v15 = vadd.f32 %v3292_v17, %v10069_v47  ;;  %7683 = vpow2.f32 %v6992_v21  ;;  %v3294_v24 = vadd.f32 %v3293_v11, %v3088_v62 }
 0x6b5   :  { %v3297_v32 = vpop.f32.mrf.mxu0  ;;  %v3392_v56 = vpop.f32.mrf.mxu1  ;;  %v3387_v17 = vadd.f32 %v3386_v28, %v12358_v36  ;;  %v7002_v10 = vmul.f32 -1.442695, %v3410_v44 }
 0x6b6   :  { %7685 = vpow2.f32 %v6997_v37  ;;  %v6993_v20 = vmul.f32 -1.442695, %v3411_v15  ;;  %v3298_v34 = vadd.f32 %v3297_v32, %v3092_v13  ;;  %v3412_v45 = vadd.f32 %v3294_v24, %v10071_v51 }
 0x6b7   :  { %v3299_v48 = vpop.f32.mrf.mxu0  ;;  %v3389_v13 = vadd.f32 %v3388_v4, %v12360_v3  ;;  %v3394_v55 = vpop.f32.mrf.mxu1  ;;  %v3413_v36 = vadd.f32 %v3387_v17, %v10079_v16 }
 0x6b8   :  { %7687 = vpow2.f32 %v6993_v20  ;;  %v3415_v2 = vadd.f32 %v3298_v34, %v10069_v47  ;;  %v3300_v43 = vadd.f32 %v3299_v48, %v3094_v7  ;;  %v6998_v18 = vmul.f32 -1.442695, %v3412_v45 }
 0x6b9   :  { %v3303_v62 = vpop.f32.mrf.mxu0  ;;  %7689 = vtanh.f32 %v3405_v30  ;;  %v3414_v4 = vadd.f32 %v3389_v13, %v10076_v9  ;;  %v3393_v45 = vadd.f32 %v3392_v56, %v12362_v26 }
 0x6ba   :  { %v6994_v57 = vmul.f32 -1.442695, %v3415_v2  ;;  %v3416_v53 = vadd.f32 %v3300_v43, %v10071_v51  ;;  %v3304_v60 = vadd.f32 %v3303_v62, %v3098_v23  ;;  %7691 = vpow2.f32 %v6998_v18 }
 0x6bb   :  { %v3305_v49 = vpop.f32.mrf.mxu0  ;;  %7693 = vpow2.f32 %v7001_v12  ;;  %v3395_v23 = vadd.f32 %v3394_v55, %v12364_v27  ;;  %v7003_v34 = vmul.f32 -1.442695, %v3414_v4  ;;  %v3398_v27 = vpop.f32.mrf.mxu1 }
 0x6bc   :  { %v6999_v7 = vmul.f32 -1.442695, %v3416_v53  ;;  %v3419_v21 = vadd.f32 %v3304_v60, %v10069_v47  ;;  %7695 = vpow2.f32 %v6994_v57  ;;  %v3306_v37 = vadd.f32 %v3305_v49, %v12368_v8 }
 0x6bd   :  { %v7680_v11 = vpop.eup %7679  ;;  %v3418_v8 = vadd.f32 %v3395_v23, %v10076_v9  ;;  %v3400_v18 = vpop.f32.mrf.mxu1  ;;  %v3417_v57 = vadd.f32 %v3393_v45, %v10079_v16  ;;  %v3399_v55 = vadd.f32 %v3398_v27, %v12366_v5 }
 0x6be   :  { %v3438_v15 = vadd.f32 1.0, %v7680_v11  ;;  %7697 = vpow2.f32 %v6999_v7  ;;  %v6995_v3 = vmul.f32 -1.442695, %v3419_v21  ;;  %v3420_v28 = vadd.f32 %v3306_v37, %v10071_v51 }
 0x6bf   :  { %v7682_v35 = vpop.eup %7681  ;;  %7699 = vtanh.f32 %v3409_v61  ;;  %v7004_v43 = vmul.f32 -1.442695, %v3418_v8  ;;  %v3401_v26 = vadd.f32 %v3400_v18, %v12370_v19 }
 0x6c0   :  { %7701 = vrcp.f32 %v3438_v15  ;;  %v3468_v24 = vadd.f32 1.0, %v7682_v35  ;;  %v7000_v12 = vmul.f32 -1.442695, %v3420_v28  ;;  %v3421_v15 = vadd.f32 %v3399_v55, %v10079_v16 }
 0x6c1   :  { %7703 = vpow2.f32 %v7002_v10  ;;  %v7684_v32 = vpop.eup %7683  ;;  %v3422_v10 = vadd.f32 %v3401_v26, %v10076_v9 }
 0x6c2   :  { %7705 = vrcp.f32 %v3468_v24  ;;  %v3439_v20 = vadd.f32 1.0, %v7684_v32 }
 0x6c3   :  { %v7686_v30 = vpop.eup %7685  ;;  %7707 = vpow2.f32 %v6995_v3 }
 0x6c4   :  { %v3469_v39 = vadd.f32 1.0, %v7686_v30  ;;  %7709 = vtanh.f32 %v3413_v36  ;;  %v7005_v36 = vmul.f32 -1.442695, %v3422_v10  ;;  %v12426_v10 = vld [vmem:[%s14016_s2 + $0xc8] sm:$0xff] }
 0x6c5   :  { %v7688_v48 = vpop.eup %7687  ;;  %7711 = vrcp.f32 %v3439_v20 }
 0x6c6   :  { %7713 = vrcp.f32 %v3469_v39  ;;  %v3440_v2 = vadd.f32 1.0, %v7688_v48  ;;  %v7690_v44 = vpop.eup %7689 }
 0x6c7   :  { %7715 = vpow2.f32 %v7003_v34  ;;  %v7692_v62 = vpop.eup %7691 }
 0x6c8   :  { %7717 = vrcp.f32 %v3440_v2  ;;  %v7694_v53 = vpop.eup %7693  ;;  %v3470_v60 = vadd.f32 1.0, %v7692_v62 }
 0x6c9   :  { %7719 = vpow2.f32 %v7000_v12  ;;  %v7696_v61 = vpop.eup %7695  ;;  %v3503_v11 = vadd.f32 1.0, %v7694_v53 }
 0x6ca   :  { %7721 = vpow2.f32 %v7004_v43  ;;  %v3441_v13 = vadd.f32 1.0, %v7696_v61 }
 0x6cb   :  { %v7698_v56 = vpop.eup %7697  ;;  %7723 = vrcp.f32 %v3470_v60 }
 0x6cc   :  { %v7700_v49 = vpop.eup %7699  ;;  %7725 = vtanh.f32 %v3417_v57  ;;  %v3471_v17 = vadd.f32 1.0, %v7698_v56 }
 0x6cd   :  { %v7702_v7 = vpop.eup %7701  ;;  %7727 = vrcp.f32 %v3441_v13 }
 0x6ce   :  { %v7704_v21 = vpop.eup %7703  ;;  %7729 = vrcp.f32 %v3471_v17  ;;  %v3523_v19 = vmul.f32 %v7702_v7, %v7690_v44 }
 0x6cf   :  { %v7706_v37 = vpop.eup %7705  ;;  %v3504_v3 = vadd.f32 1.0, %v7704_v21  ;;  %7731 = vrcp.f32 %v3503_v11 }
 0x6d0   :  { %v7708_v23 = vpop.eup %7707  ;;  %v3518_v35 = vmul.f32 %v7706_v37, %v11868_v1  ;;  %7733 = vtanh.f32 %v3421_v15 }
 0x6d1   :  { %v7710_v4 = vpop.eup %7709  ;;  %v3442_v32 = vadd.f32 1.0, %v7708_v23 }
 0x6d2   :  { %v7712_v5 = vpop.eup %7711  ;;  %v12400_v24 = vadd.f32 %v3523_v19, %v3518_v35  ;;  %v12433_v19 = vld [vmem:[%s14016_s2 + $0xc0] sm:$0xff]  ;;  %v12439_v35 = vld [vmem:[%s14016_s2 + $0xf0] sm:$0xff] }
 0x6d3   :  { %v7714_v28 = vpop.eup %7713  ;;  %v3524_v30 = vmul.f32 %v7712_v5, %v7700_v49 }
 0x6d4   :  { %v7716_v8 = vpop.eup %7715  ;;  %7735 = vtanh.f32 %v12400_v24  ;;  %v3519_v20 = vmul.f32 %v7714_v28, %v11872_v42  ;;  %v12459_v28 = vld [vmem:[%s14016_s2 + $0xa0] sm:$0xff] }
 0x6d5   :  { %v7718_v34 = vpop.eup %7717  ;;  %7737 = vrcp.f32 %v3504_v3  ;;  %v3505_v12 = vadd.f32 1.0, %v7716_v8  ;;  %v12451_v3 = vld [vmem:[%s14016_s2 + $0xd8] sm:$0xff] }
 0x6d6   :  { %v7720_v27 = vpop.eup %7719  ;;  %7739 = vpow2.f32 %v7005_v36  ;;  %v12404_v1 = vadd.f32 %v3524_v30, %v3519_v20  ;;  %v3525_v43 = vmul.f32 %v7718_v34, %v7710_v4  ;;  %v12474_v20 = vld [vmem:[%s14016_s2 + $0x88] sm:$0xff]  ;;  %v12480_v34 = vld [vmem:[%s14016_s2 + $0xb8] sm:$0xff] }
 0x6d7   :  { %v7722_v39 = vpop.eup %7721  ;;  %7741 = vrcp.f32 %v3442_v32  ;;  %v3472_v45 = vadd.f32 1.0, %v7720_v27  ;;  %v12467_v32 = vld [vmem:[%s14016_s2 + $0xd0] sm:$0xff] }
 0x6d8   :  { %v7724_v48 = vpop.eup %7723  ;;  %7743 = vtanh.f32 %v12404_v1  ;;  %v3506_v62 = vadd.f32 1.0, %v7722_v39  ;;  %v12486_v39 = vld [vmem:[%s14016_s2 + $0x80] sm:$0xff] }
 0x6d9   :  { %v7726_v2 = vpop.eup %7725  ;;  %v3520_v44 = vmul.f32 %v7724_v48, %v11876_v31  ;;  %7745 = vrcp.f32 %v3472_v45  ;;  %v12492_v45 = vld [vmem:[%s14016_s2 + $0xb0] sm:$0xff] }
 0x6da   :  { %v7728_v18 = vpop.eup %7727  ;;  %7747 = vrcp.f32 %v3505_v12  ;;  %v12498_v12 = vld [vmem:[%s14016_s2 + $0x68] sm:$0xff] }
 0x6db   :  { %v7730_v42 = vpop.eup %7729  ;;  %v12408_v57 = vadd.f32 %v3525_v43, %v3520_v44  ;;  %v3526_v53 = vmul.f32 %v7728_v18, %v7726_v2  ;;  %v12504_v2 = vld [vmem:[%s14016_s2 + $0x98] sm:$0xff]  ;;  %v12512_v43 = vld [vmem:[%s14016_s2 + $0x60] sm:$0xff]  ;;  %v12518_v44 = vld [vmem:[%s14016_s2 + $0x90] sm:$0xff] }
 0x6dc   :  { %v3521_v60 = vmul.f32 %v7730_v42, %v11880_v29  ;;  %v7732_v26 = vpop.eup %7731  ;;  %v12418_v29 = vld [vmem:[%s14016_s2 + $0xe0] sm:$0xff]  ;;  %14975 = vst [vmem:[#allocation186_spill] sm:$0xff] %v12512_v43  ;;  %14976 = vst [vmem:[#allocation187_spill] sm:$0xff] %v12518_v44  ;;  %v12524_v18 = vld [vmem:[%s14016_s2 + $0x78] sm:$0xff] }
 0x6dd   :  { %7749 = vtanh.f32 %v12408_v57  ;;  %v7734_v56 = vpop.eup %7733  ;;  %14977 = vst [vmem:[#allocation188_spill] sm:$0xff] %v12524_v18  ;;  %v12530_v42 = vld [vmem:[%s14016_s2 + $0x48] sm:$0xff] }
 0x6de   :  { %v12412_v61 = vadd.f32 %v3526_v53, %v3521_v60  ;;  %7751 = vrcp.f32 %v3506_v62  ;;  %14978 = vst [vmem:[#allocation189_spill] sm:$0xff] %v12530_v42  ;;  %v12536_v62 = vld [vmem:[%s14016_s2 + $0x70] sm:$0xff]  ;;  %v12542_v53 = vld [vmem:[%s14016_s2 + $0x40] sm:$0xff]  ;;  %v12548_v60 = vld [vmem:[%s14016_s2 + $0x58] sm:$0xff] }
 0x6df   :  { %14979 = vst [vmem:[#allocation190_spill] sm:$0xff] %v12536_v62  ;;  %14980 = vst [vmem:[#allocation191_spill] sm:$0xff] %v12542_v53 }
 0x6e0   :  { %7753 = vtanh.f32 %v12412_v61  ;;  %14981 = vst [vmem:[#allocation192_spill] sm:$0xff] %v12548_v60 }
 0x6e1   :  { %v7736_v31 = vpop.eup %7735 }
 0x6e2   :  { %v7738_v13 = vpop.eup %7737  ;;  %v3538_v55 = vmul.f32 %v7736_v31, %v7732_v26  ;;  %v12556_v26 = vld [vmem:[%s14016_s2 + $0x28] sm:$0xff]  ;;  %v12562_v31 = vld [vmem:[%s14016_s2 + $0x50] sm:$0xff] }
 0x6e3   :  { %v7740_v49 = vpop.eup %7739  ;;  %14982 = vst [vmem:[#allocation193_spill] sm:$0xff] %v12556_v26  ;;  %14983 = vst [vmem:[#allocation194_spill] sm:$0xff] %v12562_v31 }
 0x6e4   :  { %v7742_v17 = vpop.eup %7741  ;;  %3614 = vmatmul.mubr.f32.vlgmr.msra.gmra.mxu0 %v3538_v55  ;;  %3709 = vmatmul.mubr.f32.vlgmr.msra.gmra.mxu1 %v3538_v55  ;;  %v3507_v11 = vadd.f32 1.0, %v7740_v49  ;;  %v12574_v49 = vld [vmem:[%s14016_s2 + $0x38] sm:$0xff] }
 0x6e5   :  { %v7744_v7 = vpop.eup %7743  ;;  %3771 = vmatpush1.msra.mxu0 %v12418_v29  ;;  %3619 = vmatprep.mubr.f32.mxu0 %v14587_v58  ;;  %v3527_v15 = vmul.f32 %v7742_v17, %v7734_v56  ;;  %14985 = vst [vmem:[#allocation196_spill] sm:$0xff] %v12574_v49  ;;  %v12580_v17 = vld [vmem:[%s14016_s2 + $0x8] sm:$0xff] }
 0x6e6   :  { %v7746_v21 = vpop.eup %7745  ;;  %3714 = vmatprep.mubr.f32.mxu1 %v14587_v58  ;;  %3772 = vmatprep.subr.mxu0 %v12426_v10  ;;  %v3539_v37 = vmul.f32 %v7744_v7, %v7738_v13  ;;  %7755 = vrcp.f32 %v3507_v11  ;;  %v12568_v13 = vld [vmem:[%s14016_s2 + $0x20] sm:$0xff]  ;;  %14986 = vst [vmem:[#allocation197_spill] sm:$0xff] %v12580_v17 }
 0x6e7   :  { %v3522_v23 = vmul.f32 %v7746_v21, %v11892_v14  ;;  %3773 = vmatpush1.msra.mxu0 %v12433_v19  ;;  %3866 = vmatpush1.msra.mxu1 %v12439_v35  ;;  %v7748_v4 = vpop.eup %7747  ;;  %v12445_v14 = vld [vmem:[%s14016_s2 + $0xa8] sm:$0xff]  ;;  %14984 = vst [vmem:[#allocation195_spill] sm:$0xff] %v12568_v13  ;;  %v12586_v21 = vld [vmem:[%s14016_s2 + $0x30] sm:$0xff]  ;;  %v12592_v11 = vld [vmem:[%s14016_s2] sm:$0xff] }
 0x6e8   :  { %3620 = vmatmul.mubr.f32.gmra.mxu0 %v3539_v37  ;;  %3715 = vmatmul.mubr.f32.gmra.mxu1 %v3539_v37  ;;  %14987 = vst [vmem:[#allocation198_spill] sm:$0xff] %v12586_v21  ;;  %14988 = vst [vmem:[#allocation199_spill] sm:$0xff] %v12592_v11  ;;  %v12598_v37 = vld [vmem:[%s14016_s2 + $0x18] sm:$0xff] }
 0x6e9   :  { %3774 = vmatprep.subr.mxu0 %v12445_v14  ;;  %3867 = vmatprep.subr.mxu1 %v12451_v3  ;;  %v12454_v5 = vadd.f32 %v3527_v15, %v3522_v23  ;;  %14989 = vst [vmem:[#allocation200_spill] sm:$0xff] %v12598_v37  ;;  %v12606_v15 = vld [vmem:[%s14016_s2 + $0x10] sm:$0xff] }
 0x6ea   :  { %v7750_v36 = vpop.eup %7749  ;;  %3775 = vmatpush1.msra.mxu0 %v12459_v28  ;;  %3625 = vmatprep.mubr.f32.mxu0 %v14587_v58  ;;  %14990 = vst [vmem:[#allocation201_spill] sm:$0xff] %v12606_v15  ;;  %v7006_v23 = vld [vmem:[%s14017_s0 + $0xf0] sm:$0xff] }
 0x6eb   :  { %3720 = vmatprep.mubr.f32.mxu1 %v14587_v58  ;;  %3868 = vmatpush1.msra.mxu1 %v12467_v32  ;;  %v3540_v8 = vmul.f32 %v7750_v36, %v7748_v4  ;;  %7757 = vtanh.f32 %v12454_v5  ;;  %v7752_v30 = vpop.eup %7751  ;;  %v15001_v4 = vld [vmem:[#allocation145_spill] sm:$0xff]  ;;  %v15002_v36 = vld [vmem:[#allocation144_spill] sm:$0xff] }
 0x6ec   :  { %3776 = vmatprep.subr.mxu0 %v12474_v20  ;;  %3869 = vmatprep.subr.mxu1 %v12480_v34 }
 0x6ed   :  { %v7754_v27 = vpop.eup %7753  ;;  %3626 = vmatmul.mubr.f32.gmra.mxu0 %v3540_v8  ;;  %3721 = vmatmul.mubr.f32.gmra.mxu1 %v3540_v8  ;;  %v15003_v8 = vld [vmem:[#allocation147_spill] sm:$0xff] }
 0x6ee   :  { %3777 = vmatpush1.msra.mxu0 %v12486_v39  ;;  %3870 = vmatpush1.msra.mxu1 %v12492_v45  ;;  %v3541_v48 = vmul.f32 %v7754_v27, %v7752_v30  ;;  %v15004_v30 = vld [vmem:[#allocation146_spill] sm:$0xff]  ;;  %v15005_v27 = vld [vmem:[#allocation148_spill] sm:$0xff] }
 0x6ef   :  { %3778 = vmatprep.subr.mxu0 %v12498_v12  ;;  %3871 = vmatprep.subr.mxu1 %v12504_v2 }
 0x6f0   :  { %3631 = vmatprep.mubr.f32.mxu0 %v14587_v58  ;;  %3726 = vmatprep.mubr.f32.mxu1 %v14587_v58 }
 0x6f1   :  { %3779 = vmatpush1.msra.mxu0 %v12512_v43  ;;  %3872 = vmatpush1.msra.mxu1 %v12518_v44 }
 0x6f2   :  { %3632 = vmatmul.mubr.f32.gmra.mxu0 %v3541_v48  ;;  %3727 = vmatmul.mubr.f32.gmra.mxu1 %v3541_v48  ;;  %v15006_v48 = vld [vmem:[#allocation149_spill] sm:$0xff] }
 0x6f3   :  { %3873 = vmatprep.subr.mxu1 %v12524_v18  ;;  %3780 = vmatprep.subr.mxu0 %v12530_v42  ;;  %v7756_v56 = vpop.eup %7755 }
 0x6f4   :  { %3874 = vmatpush1.msra.mxu1 %v12536_v62  ;;  %3781 = vmatpush1.msra.mxu0 %v12542_v53 }
 0x6f5   :  { %3875 = vmatprep.subr.mxu1 %v12548_v60  ;;  %3637 = vmatprep.mubr.f32.mxu0 %v14587_v58 }
 0x6f6   :  { %3732 = vmatprep.mubr.f32.mxu1 %v14587_v58  ;;  %3782 = vmatprep.subr.mxu0 %v12556_v26 }
 0x6f7   :  { %3876 = vmatpush1.msra.mxu1 %v12562_v31  ;;  %3783 = vmatpush1.msra.mxu0 %v12568_v13 }
 0x6f8   :  { %v7758_v55 = vpop.eup %7757  ;;  %3877 = vmatprep.subr.mxu1 %v12574_v49  ;;  %3784 = vmatprep.subr.mxu0 %v12580_v17 }
 0x6f9   :  { %v3542_v7 = vmul.f32 %v7758_v55, %v7756_v56  ;;  %3878 = vmatpush1.msra.mxu1 %v12586_v21  ;;  %3785 = vmatpush1.msra.mxu0 %v12592_v11  ;;  %v15007_v56 = vld [vmem:[#allocation150_spill] sm:$0xff]  ;;  %v15008_v55 = vld [vmem:[#allocation151_spill] sm:$0xff] }
 0x6fa   :  { %3879 = vmatprep.subr.mxu1 %v12598_v37  ;;  %4090 = vmatprep.subr.mxu0 %v11927_v54  ;;  %v7007_v54 = vld [vmem:[%s14017_s0 + $0xf8] sm:$0xff] }
 0x6fb   :  { %3638 = vmatmul.mubr.f32.gmra.mxu0 %v3542_v7  ;;  %3733 = vmatmul.mubr.f32.gmra.mxu1 %v3542_v7  ;;  %v15009_v7 = vld [vmem:[#allocation152_spill] sm:$0xff] }
 0x6fc   :  { %3818 = vmatprep.mubr.f32.mxu0 %v14587_v58  ;;  %3880 = vmatpush1.msra.mxu1 %v12606_v15 }
 0x6fd   :  { %3913 = vmatprep.mubr.f32.mxu1 %v14587_v58  ;;  %4185 = vmatprep.subr.mxu1 %v11939_v38  ;;  %v7008_v38 = vld [vmem:[%s14017_s0 + $0x100] sm:$0xff] }
 0x6ff   :  { %7011 = vmatmul.mubr.msk.f32.vlgmr.msra.gmra.mxu0 %vm492_vm0, %v7006_v23  ;;  %7016 = vmatmul.mubr.msk.f32.vlgmr.msra.gmra.mxu1 %vm492_vm0, %v7006_v23  ;;  %v15010_v23 = vld [vmem:[#allocation153_spill] sm:$0xff] }
 0x700   :  { %3824 = vmatprep.mubr.f32.mxu0 %v14587_v58  ;;  %3919 = vmatprep.mubr.f32.mxu1 %v14587_v58 }
 0x701   :  { %4091 = vmatpush1.msra.mxu0 %v11952_v52  ;;  %4186 = vmatpush1.msra.mxu1 %v11958_v40  ;;  %v7009_v52 = vld [vmem:[%s14017_s0 + $0x108] sm:$0xff]  ;;  %v7010_v40 = vld [vmem:[%s14017_s0 + $0x110] sm:$0xff] }
 0x702   :  { %4092 = vmatprep.subr.mxu0 %v11964_v59  ;;  %4187 = vmatprep.subr.mxu1 %v11970_v33  ;;  %v14991_v59 = vld [vmem:[#allocation134_spill] sm:$0xff]  ;;  %v14992_v33 = vld [vmem:[#allocation135_spill] sm:$0xff] }
 0x703   :  { %7012 = vmatmul.mubr.msk.f32.gmra.mxu0 %vm492_vm0, %v7007_v54  ;;  %7017 = vmatmul.mubr.msk.f32.gmra.mxu1 %vm492_vm0, %v7007_v54  ;;  %v15011_v54 = vld [vmem:[#allocation154_spill] sm:$0xff] }
 0x704   :  { %3830 = vmatprep.mubr.f32.mxu0 %v14587_v58  ;;  %3925 = vmatprep.mubr.f32.mxu1 %v14587_v58 }
 0x705   :  { %4093 = vmatpush1.msra.mxu0 %v11983_v46  ;;  %4188 = vmatpush1.msra.mxu1 %v11989_v22  ;;  %v14993_v46 = vld [vmem:[#allocation136_spill] sm:$0xff]  ;;  %v14994_v22 = vld [vmem:[#allocation137_spill] sm:$0xff] }
 0x706   :  { %4094 = vmatprep.subr.mxu0 %v11995_v6  ;;  %4189 = vmatprep.subr.mxu1 %v12001_v41  ;;  %v14995_v6 = vld [vmem:[#allocation138_spill] sm:$0xff]  ;;  %v14996_v41 = vld [vmem:[#allocation139_spill] sm:$0xff] }
 0x707   :  { %7013 = vmatmul.mubr.msk.f32.gmra.mxu0 %vm492_vm0, %v7008_v38  ;;  %7018 = vmatmul.mubr.msk.f32.gmra.mxu1 %vm492_vm0, %v7008_v38  ;;  %v15012_v38 = vld [vmem:[#allocation155_spill] sm:$0xff] }
 0x708   :  { %3836 = vmatprep.mubr.f32.mxu0 %v14587_v58  ;;  %3931 = vmatprep.mubr.f32.mxu1 %v14587_v58 }
 0x709   :  { %4095 = vmatpush1.msra.mxu0 %v12014_v0  ;;  %4190 = vmatpush1.msra.mxu1 %v12020_v25  ;;  %v14997_v0 = vld [vmem:[#allocation142_spill] sm:$0xff]  ;;  %v14998_v25 = vld [vmem:[#allocation140_spill] sm:$0xff] }
 0x70a   :  { %4096 = vmatprep.subr.mxu0 %v12026_v63  ;;  %4191 = vmatprep.subr.mxu1 %v12032_v50  ;;  %v14999_v63 = vld [vmem:[#allocation141_spill] sm:$0xff]  ;;  %v15000_v50 = vld [vmem:[#allocation143_spill] sm:$0xff] }
 0x70b   :  { %7014 = vmatmul.mubr.msk.f32.gmra.mxu0 %vm492_vm0, %v7009_v52  ;;  %7019 = vmatmul.mubr.msk.f32.gmra.mxu1 %vm492_vm0, %v7009_v52  ;;  %v15013_v52 = vld [vmem:[#allocation156_spill] sm:$0xff] }
 0x70c   :  { %3842 = vmatprep.mubr.f32.mxu0 %v14587_v58  ;;  %3937 = vmatprep.mubr.f32.mxu1 %v14587_v58 }
 0x70d   :  { %4097 = vmatpush1.msra.mxu0 %v14991_v59  ;;  %4192 = vmatpush1.msra.mxu1 %v14992_v33  ;;  %v15015_v59 = vld [vmem:[#allocation158_spill] sm:$0xff]  ;;  %v15016_v33 = vld [vmem:[#allocation159_spill] sm:$0xff] }
 0x70e   :  { %4098 = vmatprep.subr.mxu0 %v14993_v46  ;;  %4193 = vmatprep.subr.mxu1 %v14994_v22  ;;  %v15017_v46 = vld [vmem:[#allocation160_spill] sm:$0xff]  ;;  %v15018_v22 = vld [vmem:[#allocation161_spill] sm:$0xff] }
 0x70f   :  { %7015 = vmatmul.mubr.msk.f32.gmra.mxu0 %vm492_vm0, %v7010_v40  ;;  %7020 = vmatmul.mubr.msk.f32.gmra.mxu1 %vm492_vm0, %v7010_v40  ;;  %v15014_v40 = vld [vmem:[#allocation157_spill] sm:$0xff] }
 0x710   :  { %4099 = vmatpush1.msra.mxu0 %v14995_v6  ;;  %4194 = vmatpush1.msra.mxu1 %v14996_v41  ;;  %v15019_v6 = vld [vmem:[#allocation162_spill] sm:$0xff]  ;;  %v15020_v41 = vld [vmem:[#allocation163_spill] sm:$0xff] }
 0x711   :  { %4100 = vmatprep.subr.mxu0 %v14997_v0  ;;  %4195 = vmatprep.subr.mxu1 %v14998_v25  ;;  %v15021_v0 = vld [vmem:[#allocation164_spill] sm:$0xff]  ;;  %v15022_v25 = vld [vmem:[#allocation165_spill] sm:$0xff] }
 0x712   :  { %4101 = vmatpush1.msra.mxu0 %v14999_v63  ;;  %4196 = vmatpush1.msra.mxu1 %v15000_v50  ;;  %v15023_v63 = vld [vmem:[#allocation166_spill] sm:$0xff]  ;;  %v15024_v50 = vld [vmem:[#allocation167_spill] sm:$0xff] }
 0x713   :  { %4102 = vmatprep.subr.mxu0 %v15001_v4  ;;  %4197 = vmatprep.subr.mxu1 %v15002_v36  ;;  %v15025_v4 = vld [vmem:[#allocation168_spill] sm:$0xff]  ;;  %v15026_v36 = vld [vmem:[#allocation169_spill] sm:$0xff] }
 0x714   :  { %4103 = vmatpush1.msra.mxu0 %v15003_v8  ;;  %4198 = vmatpush1.msra.mxu1 %v15004_v30  ;;  %v15027_v8 = vld [vmem:[#allocation170_spill] sm:$0xff]  ;;  %v15028_v30 = vld [vmem:[#allocation171_spill] sm:$0xff] }
 0x715   :  { %4104 = vmatprep.subr.mxu0 %v15005_v27  ;;  %4199 = vmatprep.subr.mxu1 %v15006_v48  ;;  %v15029_v27 = vld [vmem:[#allocation172_spill] sm:$0xff]  ;;  %v15030_v48 = vld [vmem:[#allocation173_spill] sm:$0xff] }
 0x716   :  { %4105 = vmatpush1.msra.mxu0 %v15007_v56  ;;  %4200 = vmatpush1.msra.mxu1 %v15008_v55  ;;  %v15031_v56 = vld [vmem:[#allocation174_spill] sm:$0xff]  ;;  %v15032_v55 = vld [vmem:[#allocation175_spill] sm:$0xff] }
 0x717   :  { %4106 = vmatprep.subr.mxu0 %v15009_v7  ;;  %4201 = vmatprep.subr.mxu1 %v15010_v23  ;;  %v15033_v7 = vld [vmem:[#allocation176_spill] sm:$0xff]  ;;  %v15034_v23 = vld [vmem:[#allocation177_spill] sm:$0xff] }
 0x718   :  { %4107 = vmatpush1.msra.mxu0 %v15011_v54  ;;  %4202 = vmatpush1.msra.mxu1 %v15012_v38  ;;  %v15035_v54 = vld [vmem:[#allocation178_spill] sm:$0xff]  ;;  %v15036_v38 = vld [vmem:[#allocation179_spill] sm:$0xff] }
 0x719   :  { %4108 = vmatprep.subr.mxu0 %v15013_v52  ;;  %4203 = vmatprep.subr.mxu1 %v15014_v40  ;;  %v15037_v52 = vld [vmem:[#allocation180_spill] sm:$0xff]  ;;  %v15038_v40 = vld [vmem:[#allocation181_spill] sm:$0xff] }
 0x71a   :  { %4109 = vmatpush1.msra.mxu0 %v15015_v59  ;;  %4204 = vmatpush1.msra.mxu1 %v15016_v33  ;;  %v15039_v59 = vld [vmem:[#allocation182_spill] sm:$0xff]  ;;  %v15040_v33 = vld [vmem:[#allocation183_spill] sm:$0xff] }
 0x71b   :  { %4110 = vmatprep.subr.mxu0 %v15017_v46  ;;  %4205 = vmatprep.subr.mxu1 %v15018_v22  ;;  %v15041_v46 = vld [vmem:[#allocation184_spill] sm:$0xff]  ;;  %v15042_v22 = vld [vmem:[#allocation185_spill] sm:$0xff] }
 0x71c   :  { %4111 = vmatpush1.msra.mxu0 %v15019_v6  ;;  %4206 = vmatpush1.msra.mxu1 %v15020_v41 }
 0x71d   :  { %4112 = vmatprep.subr.mxu0 %v15021_v0  ;;  %4207 = vmatprep.subr.mxu1 %v15022_v25 }
 0x71e   :  { %4113 = vmatpush1.msra.mxu0 %v15023_v63  ;;  %4208 = vmatpush1.msra.mxu1 %v15024_v50 }
 0x71f   :  { %4114 = vmatprep.subr.mxu0 %v15025_v4  ;;  %4209 = vmatprep.subr.mxu1 %v15026_v36 }
 0x720   :  { %4115 = vmatpush1.msra.mxu0 %v15027_v8  ;;  %4210 = vmatpush1.msra.mxu1 %v15028_v30 }
 0x721   :  { %4116 = vmatprep.subr.mxu0 %v15029_v27  ;;  %4211 = vmatprep.subr.mxu1 %v15030_v48 }
 0x722   :  { %4117 = vmatpush1.msra.mxu0 %v15031_v56  ;;  %4212 = vmatpush1.msra.mxu1 %v15032_v55 }
 0x723   :  { %4118 = vmatprep.subr.mxu0 %v15033_v7  ;;  %4213 = vmatprep.subr.mxu1 %v15034_v23 }
 0x724   :  { %4119 = vmatpush1.msra.mxu0 %v15035_v54  ;;  %4214 = vmatpush1.msra.mxu1 %v15036_v38 }
 0x725   :  { %4120 = vmatprep.subr.mxu0 %v15037_v52  ;;  %4215 = vmatprep.subr.mxu1 %v15038_v40 }
 0x726   :  { %4121 = vmatpush1.msra.mxu0 %v15039_v59  ;;  %4154 = vmatprep.mubr.f32.mxu0 %v14587_v58 }
 0x727   :  { %4216 = vmatpush1.msra.mxu1 %v15040_v33  ;;  %4249 = vmatprep.mubr.f32.mxu1 %v14587_v58 }
 0x728   :  { %4311 = vmatprep.subr.mxu0 %v15041_v46  ;;  %4406 = vmatprep.subr.mxu1 %v15042_v22 }
 0x7a4   :  { %v3615_v6 = vpop.f32.mrf.mxu0  ;;  %v3710_v41 = vpop.f32.mrf.mxu1 }
 0x7a6   :  { %v3617_v0 = vpop.f32.mrf.mxu0  ;;  %v3712_v25 = vpop.f32.mrf.mxu1 }
 0x7a8   :  { %v3621_v63 = vpop.f32.mrf.mxu0  ;;  %v3716_v50 = vpop.f32.mrf.mxu1 }
 0x7aa   :  { %v3623_v4 = vpop.f32.mrf.mxu0  ;;  %v3718_v36 = vpop.f32.mrf.mxu1 }
 0x7ad   :  { %v3627_v8 = vpop.f32.mrf.mxu0  ;;  %v12710_v30 = vpop.f32.mrf.mxu1 }
 0x7af   :  { %v3629_v27 = vpop.f32.mrf.mxu0  ;;  %v12712_v48 = vpop.f32.mrf.mxu1 }
 0x7b2   :  { %v3633_v56 = vpop.f32.mrf.mxu0  ;;  %v12714_v55 = vpop.f32.mrf.mxu1 }
 0x7b4   :  { %v3635_v7 = vpop.f32.mrf.mxu0  ;;  %v12716_v23 = vpop.f32.mrf.mxu1 }
 0x7bb   :  { %v3639_v54 = vpop.f32.mrf.mxu0  ;;  %v12718_v38 = vpop.f32.mrf.mxu1 }
 0x7bd   :  { %v12720_v52 = vpop.f32.mrf.mxu0  ;;  %v12722_v40 = vpop.f32.mrf.mxu1 }
 0x7bf   :  { %v3820_v59 = vpop.f32.mrf.mxu0  ;;  %v3915_v33 = vpop.f32.mrf.mxu1 }
 0x7c0   :  { %v3821_v46 = vadd.f32 %v3820_v59, %v3615_v6  ;;  %v3916_v44 = vadd.f32 %v3915_v33, %v3710_v41 }
 0x7c1   :  { %v3822_v22 = vpop.f32.mrf.mxu0  ;;  %v3917_v15 = vpop.f32.mrf.mxu1 }
 0x7c2   :  { %v3944_v37 = vadd.f32 %v3821_v46, %v10069_v47  ;;  %v3823_v11 = vadd.f32 %v3822_v22, %v3617_v0  ;;  %v3918_v62 = vadd.f32 %v3917_v15, %v3712_v25 }
 0x7c3   :  { %v3826_v21 = vpop.f32.mrf.mxu0  ;;  %v3921_v17 = vpop.f32.mrf.mxu1 }
 0x7c4   :  { %v7021_v49 = vmul.f32 -1.442695, %v3944_v37  ;;  %v3945_v13 = vadd.f32 %v3823_v11, %v10071_v51  ;;  %v3827_v31 = vadd.f32 %v3826_v21, %v3621_v63  ;;  %v3947_v21 = vadd.f32 %v3918_v62, %v10076_v9 }
 0x7c5   :  { %v3828_v26 = vpop.f32.mrf.mxu0  ;;  %v3923_v60 = vpop.f32.mrf.mxu1  ;;  %v3922_v25 = vadd.f32 %v3921_v17, %v3716_v50 }
 0x7c6   :  { %7759 = vpow2.f32 %v7021_v49  ;;  %v7026_v53 = vmul.f32 -1.442695, %v3945_v13  ;;  %v3829_v42 = vadd.f32 %v3828_v26, %v3623_v4  ;;  %v3948_v18 = vadd.f32 %v3827_v31, %v10069_v47 }
 0x7c7   :  { %v3832_v6 = vpop.f32.mrf.mxu0  ;;  %v3927_v59 = vpop.f32.mrf.mxu1  ;;  %v3924_v13 = vadd.f32 %v3923_v60, %v3718_v36  ;;  %v3946_v31 = vadd.f32 %v3916_v44, %v10079_v16  ;;  %v7031_v4 = vmul.f32 -1.442695, %v3947_v21  ;;  %v3950_v17 = vadd.f32 %v3922_v25, %v10079_v16 }
 0x7c8   :  { %7761 = vpow2.f32 %v7026_v53  ;;  %v3949_v0 = vadd.f32 %v3829_v42, %v10071_v51  ;;  %v3833_v46 = vadd.f32 %v3832_v6, %v3627_v8  ;;  %v7022_v22 = vmul.f32 -1.442695, %v3948_v18 }
 0x7c9   :  { %v3834_v37 = vpop.f32.mrf.mxu0  ;;  %v3929_v43 = vpop.f32.mrf.mxu1  ;;  %v3951_v33 = vadd.f32 %v3924_v13, %v10076_v9 }
 0x7ca   :  { %v7027_v11 = vmul.f32 -1.442695, %v3949_v0  ;;  %v3952_v49 = vadd.f32 %v3833_v46, %v10069_v47  ;;  %7763 = vpow2.f32 %v7022_v22  ;;  %v3835_v26 = vadd.f32 %v3834_v37, %v3629_v27 }
 0x7cb   :  { %v3838_v15 = vpop.f32.mrf.mxu0  ;;  %v3933_v18 = vpop.f32.mrf.mxu1  ;;  %v3930_v50 = vadd.f32 %v3929_v43, %v12712_v48  ;;  %v3928_v46 = vadd.f32 %v3927_v59, %v12710_v30  ;;  %v7032_v21 = vmul.f32 -1.442695, %v3951_v33 }
 0x7cc   :  { %7765 = vpow2.f32 %v7027_v11  ;;  %v7023_v41 = vmul.f32 -1.442695, %v3952_v49  ;;  %v3839_v53 = vadd.f32 %v3838_v15, %v3633_v56  ;;  %v3953_v42 = vadd.f32 %v3835_v26, %v10071_v51 }
 0x7cd   :  { %v3840_v63 = vpop.f32.mrf.mxu0  ;;  %v3935_v56 = vpop.f32.mrf.mxu1  ;;  %v3955_v43 = vadd.f32 %v3930_v50, %v10076_v9  ;;  %v3954_v30 = vadd.f32 %v3928_v46, %v10079_v16 }
 0x7ce   :  { %7767 = vpow2.f32 %v7023_v41  ;;  %v3956_v62 = vadd.f32 %v3839_v53, %v10069_v47  ;;  %v3841_v8 = vadd.f32 %v3840_v63, %v3635_v7  ;;  %v7028_v60 = vmul.f32 -1.442695, %v3953_v42 }
 0x7cf   :  { %v3844_v36 = vpop.f32.mrf.mxu0  ;;  %7769 = vtanh.f32 %v3946_v31  ;;  %v7033_v53 = vmul.f32 -1.442695, %v3955_v43  ;;  %v3934_v42 = vadd.f32 %v3933_v18, %v12714_v55 }
 0x7d0   :  { %v7024_v27 = vmul.f32 -1.442695, %v3956_v62  ;;  %v3957_v44 = vadd.f32 %v3841_v8, %v10071_v51  ;;  %v3845_v6 = vadd.f32 %v3844_v36, %v3639_v54  ;;  %7771 = vpow2.f32 %v7028_v60 }
 0x7d1   :  { %v3846_v0 = vpop.f32.mrf.mxu0  ;;  %7773 = vpow2.f32 %v7031_v4  ;;  %v3936_v54 = vadd.f32 %v3935_v56, %v12716_v23  ;;  %v3939_v23 = vpop.f32.mrf.mxu1 }
 0x7d2   :  { %v7029_v7 = vmul.f32 -1.442695, %v3957_v44  ;;  %v3960_v22 = vadd.f32 %v3845_v6, %v10069_v47  ;;  %7775 = vpow2.f32 %v7024_v27  ;;  %v3847_v11 = vadd.f32 %v3846_v0, %v12720_v52 }
 0x7d3   :  { %v7760_v37 = vpop.eup %7759  ;;  %v3959_v52 = vadd.f32 %v3936_v54, %v10076_v9  ;;  %v3941_v60 = vpop.f32.mrf.mxu1  ;;  %v3958_v27 = vadd.f32 %v3934_v42, %v10079_v16  ;;  %v3940_v56 = vadd.f32 %v3939_v23, %v12718_v38 }
 0x7d4   :  { %v3979_v49 = vadd.f32 1.0, %v7760_v37  ;;  %7777 = vpow2.f32 %v7029_v7  ;;  %v7025_v48 = vmul.f32 -1.442695, %v3960_v22  ;;  %v3961_v59 = vadd.f32 %v3847_v11, %v10071_v51 }
 0x7d5   :  { %v7762_v13 = vpop.eup %7761  ;;  %7779 = vtanh.f32 %v3950_v17  ;;  %v7034_v8 = vmul.f32 -1.442695, %v3959_v52  ;;  %v3942_v55 = vadd.f32 %v3941_v60, %v12722_v40 }
 0x7d6   :  { %7781 = vrcp.f32 %v3979_v49  ;;  %v4009_v26 = vadd.f32 1.0, %v7762_v13  ;;  %v7030_v4 = vmul.f32 -1.442695, %v3961_v59  ;;  %v3962_v49 = vadd.f32 %v3940_v56, %v10079_v16 }
 0x7d7   :  { %7783 = vpow2.f32 %v7032_v21  ;;  %v7764_v15 = vpop.eup %7763  ;;  %v3963_v21 = vadd.f32 %v3942_v55, %v10076_v9 }
 0x7d8   :  { %7785 = vrcp.f32 %v4009_v26  ;;  %v3980_v41 = vadd.f32 1.0, %v7764_v15 }
 0x7d9   :  { %v7766_v31 = vpop.eup %7765  ;;  %7787 = vpow2.f32 %v7025_v48 }
 0x7da   :  { %v4010_v25 = vadd.f32 1.0, %v7766_v31  ;;  %7789 = vtanh.f32 %v3954_v30  ;;  %v7035_v30 = vmul.f32 -1.442695, %v3963_v21 }
 0x7db   :  { %v7768_v63 = vpop.eup %7767  ;;  %7791 = vrcp.f32 %v3980_v41 }
 0x7dc   :  { %7793 = vrcp.f32 %v4010_v25  ;;  %v3981_v62 = vadd.f32 1.0, %v7768_v63  ;;  %v7770_v33 = vpop.eup %7769 }
 0x7dd   :  { %7795 = vpow2.f32 %v7033_v53  ;;  %v7772_v36 = vpop.eup %7771 }
 0x7de   :  { %7797 = vrcp.f32 %v3981_v62  ;;  %v7774_v44 = vpop.eup %7773  ;;  %v4011_v6 = vadd.f32 1.0, %v7772_v36 }
 0x7df   :  { %7799 = vpow2.f32 %v7030_v4  ;;  %v7776_v17 = vpop.eup %7775  ;;  %v4044_v37 = vadd.f32 1.0, %v7774_v44 }
 0x7e0   :  { %7801 = vpow2.f32 %v7034_v8  ;;  %v3982_v50 = vadd.f32 1.0, %v7776_v17 }
 0x7e1   :  { %v7778_v18 = vpop.eup %7777  ;;  %7803 = vrcp.f32 %v4011_v6 }
 0x7e2   :  { %v7780_v0 = vpop.eup %7779  ;;  %7805 = vtanh.f32 %v3958_v27  ;;  %v4012_v46 = vadd.f32 1.0, %v7778_v18 }
 0x7e3   :  { %v7782_v7 = vpop.eup %7781  ;;  %7807 = vrcp.f32 %v3982_v50 }
 0x7e4   :  { %v7784_v22 = vpop.eup %7783  ;;  %7809 = vrcp.f32 %v4012_v46  ;;  %v4064_v40 = vmul.f32 %v7782_v7, %v7770_v33 }
 0x7e5   :  { %v7786_v11 = vpop.eup %7785  ;;  %v4045_v48 = vadd.f32 1.0, %v7784_v22  ;;  %7811 = vrcp.f32 %v4044_v37 }
 0x7e6   :  { %v7788_v54 = vpop.eup %7787  ;;  %v4059_v13 = vmul.f32 %v7786_v11, %v12400_v24  ;;  %7813 = vtanh.f32 %v3962_v49 }
 0x7e7   :  { %v7790_v43 = vpop.eup %7789  ;;  %v3983_v15 = vadd.f32 1.0, %v7788_v54 }
 0x7e8   :  { %v7792_v38 = vpop.eup %7791  ;;  %v12752_v26 = vadd.f32 %v4064_v40, %v4059_v13  ;;  %v15052_v40 = vld [vmem:[#allocation195_spill] sm:$0xff] }
 0x7e9   :  { %v7794_v59 = vpop.eup %7793  ;;  %v4065_v31 = vmul.f32 %v7792_v38, %v7780_v0 }
 0x7ea   :  { %v7796_v52 = vpop.eup %7795  ;;  %7815 = vtanh.f32 %v12752_v26  ;;  %v4060_v41 = vmul.f32 %v7794_v59, %v12404_v1  ;;  %v15056_v59 = vld [vmem:[#allocation199_spill] sm:$0xff] }
 0x7eb   :  { %v7798_v53 = vpop.eup %7797  ;;  %7817 = vrcp.f32 %v4045_v48  ;;  %v4046_v4 = vadd.f32 1.0, %v7796_v52  ;;  %v15054_v48 = vld [vmem:[#allocation197_spill] sm:$0xff] }
 0x7ec   :  { %v7800_v23 = vpop.eup %7799  ;;  %7819 = vpow2.f32 %v7035_v30  ;;  %v12756_v24 = vadd.f32 %v4065_v31, %v4060_v41  ;;  %v4066_v8 = vmul.f32 %v7798_v53, %v7790_v43  ;;  %v15053_v43 = vld [vmem:[#allocation196_spill] sm:$0xff]  ;;  %v15055_v30 = vld [vmem:[#allocation198_spill] sm:$0xff]  ;;  %v15058_v52 = vld [vmem:[#allocation201_spill] sm:$0xff] }
 0x7ed   :  { %v7802_v25 = vpop.eup %7801  ;;  %7821 = vrcp.f32 %v3983_v15  ;;  %v4013_v42 = vadd.f32 1.0, %v7800_v23  ;;  %v15057_v15 = vld [vmem:[#allocation200_spill] sm:$0xff]  ;;  %v7036_v31 = vld [vmem:[%s14017_s0 + $0x118] sm:$0xff]  ;;  %v7037_v41 = vld [vmem:[%s14017_s0 + $0x120] sm:$0xff] }
 0x7ee   :  { %v7804_v63 = vpop.eup %7803  ;;  %7823 = vtanh.f32 %v12756_v24  ;;  %v4047_v36 = vadd.f32 1.0, %v7802_v25  ;;  %v7038_v53 = vld [vmem:[%s14017_s0 + $0x128] sm:$0xff]  ;;  %v7039_v23 = vld [vmem:[%s14017_s0 + $0x130] sm:$0xff]  ;;  %v7040_v25 = vld [vmem:[%s14017_s0 + $0x138] sm:$0xff] }
 0x7ef   :  { %v7806_v62 = vpop.eup %7805  ;;  %v4061_v33 = vmul.f32 %v7804_v63, %v12408_v57  ;;  %7825 = vrcp.f32 %v4013_v42  ;;  %v12847_v42 = vld [vmem:[%s14020_s1] sm:$0xff]   ;;  %v12852_v63 = vld [vmem:[%s14020_s1 + $0x8] sm:$0xff]  }
 0x7f0   :  { %v7808_v60 = vpop.eup %7807  ;;  %7827 = vrcp.f32 %v4046_v4  ;;  %v12862_v4 = vld [vmem:[%s14020_s1 + $0x18] sm:$0xff]  }
 0x7f1   :  { %v7810_v1 = vpop.eup %7809  ;;  %v12760_v27 = vadd.f32 %v4066_v8, %v4061_v33  ;;  %v4067_v44 = vmul.f32 %v7808_v60, %v7806_v62  ;;  %v12867_v62 = vld [vmem:[%s14020_s1 + $0x20] sm:$0xff]  }
 0x7f2   :  { %v4062_v6 = vmul.f32 %v7810_v1, %v12412_v61  ;;  %v7812_v55 = vpop.eup %7811 }
 0x7f3   :  { %7829 = vtanh.f32 %v12760_v27  ;;  %v7814_v18 = vpop.eup %7813 }
 0x7f4   :  { %v12764_v17 = vadd.f32 %v4067_v44, %v4062_v6  ;;  %7831 = vrcp.f32 %v4047_v36 }
 0x7f6   :  { %7833 = vtanh.f32 %v12764_v17 }
 0x7f7   :  { %v7816_v57 = vpop.eup %7815 }
 0x7f8   :  { %v7818_v50 = vpop.eup %7817  ;;  %v4079_v56 = vmul.f32 %v7816_v57, %v7812_v55 }
 0x7f9   :  { %v7820_v0 = vpop.eup %7819 }
 0x7fa   :  { %v7822_v46 = vpop.eup %7821  ;;  %4155 = vmatmul.mubr.f32.vlgmr.msra.gmra.mxu0 %v4079_v56  ;;  %4250 = vmatmul.mubr.f32.vlgmr.msra.gmra.mxu1 %v4079_v56  ;;  %v4048_v22 = vadd.f32 1.0, %v7820_v0 }
 0x7fb   :  { %v7824_v7 = vpop.eup %7823  ;;  %4312 = vmatpush1.msra.mxu0 %v12418_v29  ;;  %4160 = vmatprep.mubr.f32.mxu0 %v14587_v58  ;;  %v4068_v21 = vmul.f32 %v7822_v46, %v7814_v18 }
 0x7fc   :  { %v7826_v61 = vpop.eup %7825  ;;  %4255 = vmatprep.mubr.f32.mxu1 %v14587_v58  ;;  %4313 = vmatprep.subr.mxu0 %v12426_v10  ;;  %v4080_v37 = vmul.f32 %v7824_v7, %v7818_v50  ;;  %7835 = vrcp.f32 %v4048_v22 }
 0x7fd   :  { %v4063_v11 = vmul.f32 %v7826_v61, %v12454_v5  ;;  %4314 = vmatpush1.msra.mxu0 %v12433_v19  ;;  %4407 = vmatpush1.msra.mxu1 %v12439_v35  ;;  %v7828_v49 = vpop.eup %7827  ;;  %v15044_v5 = vld [vmem:[#allocation187_spill] sm:$0xff] }
 0x7fe   :  { %4161 = vmatmul.mubr.f32.gmra.mxu0 %v4080_v37  ;;  %4256 = vmatmul.mubr.f32.gmra.mxu1 %v4080_v37 }
 0x7ff   :  { %4315 = vmatprep.subr.mxu0 %v12445_v14  ;;  %4408 = vmatprep.subr.mxu1 %v12451_v3  ;;  %v12776_v29 = vadd.f32 %v4068_v21, %v4063_v11  ;;  %v15043_v3 = vld [vmem:[#allocation186_spill] sm:$0xff] }
 0x800   :  { %v7830_v54 = vpop.eup %7829  ;;  %4316 = vmatpush1.msra.mxu0 %v12459_v28  ;;  %4166 = vmatprep.mubr.f32.mxu0 %v14587_v58  ;;  %v15045_v28 = vld [vmem:[#allocation188_spill] sm:$0xff] }
 0x801   :  { %4261 = vmatprep.mubr.f32.mxu1 %v14587_v58  ;;  %4409 = vmatpush1.msra.mxu1 %v12467_v32  ;;  %v4081_v10 = vmul.f32 %v7830_v54, %v7828_v49  ;;  %7837 = vtanh.f32 %v12776_v29  ;;  %v7832_v19 = vpop.eup %7831  ;;  %v15046_v32 = vld [vmem:[#allocation189_spill] sm:$0xff] }
 0x802   :  { %4317 = vmatprep.subr.mxu0 %v12474_v20  ;;  %4410 = vmatprep.subr.mxu1 %v12480_v34  ;;  %v15047_v20 = vld [vmem:[#allocation190_spill] sm:$0xff]  ;;  %v15048_v34 = vld [vmem:[#allocation191_spill] sm:$0xff] }
 0x803   :  { %v7834_v35 = vpop.eup %7833  ;;  %4167 = vmatmul.mubr.f32.gmra.mxu0 %v4081_v10  ;;  %4262 = vmatmul.mubr.f32.gmra.mxu1 %v4081_v10 }
 0x804   :  { %4318 = vmatpush1.msra.mxu0 %v12486_v39  ;;  %4411 = vmatpush1.msra.mxu1 %v12492_v45  ;;  %v4082_v14 = vmul.f32 %v7834_v35, %v7832_v19  ;;  %v15049_v39 = vld [vmem:[#allocation192_spill] sm:$0xff]  ;;  %v15050_v45 = vld [vmem:[#allocation193_spill] sm:$0xff] }
 0x805   :  { %4319 = vmatprep.subr.mxu0 %v12498_v12  ;;  %4412 = vmatprep.subr.mxu1 %v12504_v2  ;;  %v15051_v2 = vld [vmem:[#allocation194_spill] sm:$0xff] }
 0x806   :  { %4172 = vmatprep.mubr.f32.mxu0 %v14587_v58  ;;  %4267 = vmatprep.mubr.f32.mxu1 %v14587_v58 }
 0x807   :  { %4320 = vmatpush1.msra.mxu0 %v15043_v3  ;;  %4413 = vmatpush1.msra.mxu1 %v15044_v5 }
 0x808   :  { %4173 = vmatmul.mubr.f32.gmra.mxu0 %v4082_v14  ;;  %4268 = vmatmul.mubr.f32.gmra.mxu1 %v4082_v14 }
 0x809   :  { %4414 = vmatprep.subr.mxu1 %v15045_v28  ;;  %4321 = vmatprep.subr.mxu0 %v15046_v32  ;;  %v7836_v12 = vpop.eup %7835 }
 0x80a   :  { %4415 = vmatpush1.msra.mxu1 %v15047_v20  ;;  %4322 = vmatpush1.msra.mxu0 %v15048_v34 }
 0x80b   :  { %4416 = vmatprep.subr.mxu1 %v15049_v39  ;;  %4178 = vmatprep.mubr.f32.mxu0 %v14587_v58 }
 0x80c   :  { %4273 = vmatprep.mubr.f32.mxu1 %v14587_v58  ;;  %4323 = vmatprep.subr.mxu0 %v15050_v45 }
 0x80d   :  { %4417 = vmatpush1.msra.mxu1 %v15051_v2  ;;  %4324 = vmatpush1.msra.mxu0 %v15052_v40 }
 0x80e   :  { %v7838_v13 = vpop.eup %7837  ;;  %4418 = vmatprep.subr.mxu1 %v15053_v43  ;;  %4325 = vmatprep.subr.mxu0 %v15054_v48 }
 0x80f   :  { %v4083_v38 = vmul.f32 %v7838_v13, %v7836_v12  ;;  %4419 = vmatpush1.msra.mxu1 %v15055_v30  ;;  %4326 = vmatpush1.msra.mxu0 %v15056_v59 }
 0x810   :  { %4420 = vmatprep.subr.mxu1 %v15057_v15 }
 0x811   :  { %4179 = vmatmul.mubr.f32.gmra.mxu0 %v4083_v38  ;;  %4274 = vmatmul.mubr.f32.gmra.mxu1 %v4083_v38 }
 0x812   :  { %4359 = vmatprep.mubr.f32.mxu0 %v14587_v58  ;;  %4421 = vmatpush1.msra.mxu1 %v15058_v52 }
 0x813   :  { %4454 = vmatprep.mubr.f32.mxu1 %v14587_v58 }
 0x815   :  { %7041 = vmatmul.mubr.msk.f32.vlgmr.msra.gmra.mxu0 %vm492_vm0, %v7036_v31  ;;  %7046 = vmatmul.mubr.msk.f32.vlgmr.msra.gmra.mxu1 %vm492_vm0, %v7036_v31 }
 0x816   :  { %4365 = vmatprep.mubr.f32.mxu0 %v14587_v58  ;;  %4460 = vmatprep.mubr.f32.mxu1 %v14587_v58 }
 0x819   :  { %7042 = vmatmul.mubr.msk.f32.gmra.mxu0 %vm492_vm0, %v7037_v41  ;;  %7047 = vmatmul.mubr.msk.f32.gmra.mxu1 %vm492_vm0, %v7037_v41 }
 0x81a   :  { %4371 = vmatprep.mubr.f32.mxu0 %v14587_v58  ;;  %4466 = vmatprep.mubr.f32.mxu1 %v14587_v58 }
 0x81d   :  { %7043 = vmatmul.mubr.msk.f32.gmra.mxu0 %vm492_vm0, %v7038_v53  ;;  %7048 = vmatmul.mubr.msk.f32.gmra.mxu1 %vm492_vm0, %v7038_v53 }
 0x81e   :  { %4377 = vmatprep.mubr.f32.mxu0 %v14587_v58  ;;  %4472 = vmatprep.mubr.f32.mxu1 %v14587_v58 }
 0x821   :  { %7044 = vmatmul.mubr.msk.f32.gmra.mxu0 %vm492_vm0, %v7039_v23  ;;  %7049 = vmatmul.mubr.msk.f32.gmra.mxu1 %vm492_vm0, %v7039_v23 }
 0x822   :  { %4383 = vmatprep.mubr.f32.mxu0 %v14587_v58  ;;  %4478 = vmatprep.mubr.f32.mxu1 %v14587_v58  ;;  %v12857_v58 = vld [vmem:[%s14020_s1 + $0x10] sm:$0xff]   ;;  %s12954_s1 = smov 0  }
 0x825   :  { %7045 = vmatmul.mubr.msk.f32.gmra.mxu0 %vm492_vm0, %v7040_v25  ;;  %7050 = vmatmul.mubr.msk.f32.gmra.mxu1 %vm492_vm0, %v7040_v25 }
 0x8ba   :  { %v4156_v8 = vpop.f32.mrf.mxu0  ;;  %v4251_v33 = vpop.f32.mrf.mxu1 }
 0x8bc   :  { %v4158_v60 = vpop.f32.mrf.mxu0  ;;  %v4253_v1 = vpop.f32.mrf.mxu1 }
 0x8be   :  { %v4162_v36 = vpop.f32.mrf.mxu0  ;;  %v4257_v44 = vpop.f32.mrf.mxu1 }
 0x8c0   :  { %v4164_v6 = vpop.f32.mrf.mxu0  ;;  %v4259_v55 = vpop.f32.mrf.mxu1 }
 0x8c3   :  { %v4168_v18 = vpop.f32.mrf.mxu0  ;;  %v12869_v57 = vpop.f32.mrf.mxu1 }
 0x8c5   :  { %v4170_v50 = vpop.f32.mrf.mxu0  ;;  %v12871_v56 = vpop.f32.mrf.mxu1 }
 0x8c8   :  { %v4174_v0 = vpop.f32.mrf.mxu0  ;;  %v12873_v46 = vpop.f32.mrf.mxu1 }
 0x8ca   :  { %v4176_v7 = vpop.f32.mrf.mxu0  ;;  %v12875_v61 = vpop.f32.mrf.mxu1 }
 0x8d1   :  { %v4180_v22 = vpop.f32.mrf.mxu0  ;;  %v12877_v37 = vpop.f32.mrf.mxu1 }
 0x8d3   :  { %v12879_v21 = vpop.f32.mrf.mxu0  ;;  %v12881_v11 = vpop.f32.mrf.mxu1 }
 0x8d5   :  { %v4361_v49 = vpop.f32.mrf.mxu0  ;;  %v4456_v54 = vpop.f32.mrf.mxu1 }
 0x8d6   :  { %v4362_v10 = vadd.f32 %v4361_v49, %v4156_v8  ;;  %v4457_v38 = vadd.f32 %v4456_v54, %v4251_v33 }
 0x8d7   :  { %v4363_v19 = vpop.f32.mrf.mxu0  ;;  %v4458_v35 = vpop.f32.mrf.mxu1 }
 0x8d8   :  { %v4485_v14 = vadd.f32 %v4362_v10, %v10069_v47  ;;  %v4364_v3 = vadd.f32 %v4363_v19, %v4158_v60  ;;  %v4459_v2 = vadd.f32 %v4458_v35, %v4253_v1  ;;  %v4487_v1 = vadd.f32 %v4457_v38, %v10079_v16 }
 0x8d9   :  { %v4367_v5 = vpop.f32.mrf.mxu0  ;;  %v4462_v28 = vpop.f32.mrf.mxu1 }
 0x8da   :  { %v7051_v32 = vmul.f32 -1.442695, %v4485_v14  ;;  %v4486_v20 = vadd.f32 %v4364_v3, %v10071_v51  ;;  %v4368_v34 = vadd.f32 %v4367_v5, %v4162_v36  ;;  %v4488_v41 = vadd.f32 %v4459_v2, %v10076_v9 }
 0x8db   :  { %v4369_v39 = vpop.f32.mrf.mxu0  ;;  %v4464_v45 = vpop.f32.mrf.mxu1 }
 0x8dc   :  { %7839 = vpow2.f32 %v7051_v32  ;;  %v7056_v12 = vmul.f32 -1.442695, %v4486_v20  ;;  %v4370_v40 = vadd.f32 %v4369_v39, %v4164_v6  ;;  %v4489_v13 = vadd.f32 %v4368_v34, %v10069_v47 }
 0x8dd   :  { %v4373_v43 = vpop.f32.mrf.mxu0  ;;  %v4468_v48 = vpop.f32.mrf.mxu1  ;;  %v4465_v25 = vadd.f32 %v4464_v45, %v4259_v55  ;;  %v4463_v6 = vadd.f32 %v4462_v28, %v4257_v44  ;;  %v7061_v10 = vmul.f32 -1.442695, %v4488_v41 }
 0x8de   :  { %7841 = vpow2.f32 %v7056_v12  ;;  %v4490_v30 = vadd.f32 %v4370_v40, %v10071_v51  ;;  %v4374_v59 = vadd.f32 %v4373_v43, %v4168_v18  ;;  %v7052_v15 = vmul.f32 -1.442695, %v4489_v13 }
 0x8df   :  { %v4375_v52 = vpop.f32.mrf.mxu0  ;;  %v4470_v31 = vpop.f32.mrf.mxu1  ;;  %v4492_v14 = vadd.f32 %v4465_v25, %v10076_v9  ;;  %v4491_v44 = vadd.f32 %v4463_v6, %v10079_v16  ;;  %v4469_v34 = vadd.f32 %v4468_v48, %v12869_v57 }
 0x8e0   :  { %v7057_v53 = vmul.f32 -1.442695, %v4490_v30  ;;  %v4493_v23 = vadd.f32 %v4374_v59, %v10069_v47  ;;  %7843 = vpow2.f32 %v7052_v15  ;;  %v4376_v8 = vadd.f32 %v4375_v52, %v4170_v50 }
 0x8e1   :  { %v4379_v60 = vpop.f32.mrf.mxu0  ;;  %v4474_v49 = vpop.f32.mrf.mxu1  ;;  %v7062_v12 = vmul.f32 -1.442695, %v4492_v14  ;;  %v4495_v57 = vadd.f32 %v4469_v34, %v10079_v16 }
 0x8e2   :  { %7845 = vpow2.f32 %v7057_v53  ;;  %v7053_v33 = vmul.f32 -1.442695, %v4493_v23  ;;  %v4380_v36 = vadd.f32 %v4379_v60, %v4174_v0  ;;  %v4494_v18 = vadd.f32 %v4376_v8, %v10071_v51 }
 0x8e3   :  { %v4381_v54 = vpop.f32.mrf.mxu0  ;;  %v4471_v0 = vadd.f32 %v4470_v31, %v12871_v56  ;;  %v4476_v28 = vpop.f32.mrf.mxu1  ;;  %v4475_v31 = vadd.f32 %v4474_v49, %v12873_v46 }
 0x8e4   :  { %7847 = vpow2.f32 %v7053_v33  ;;  %v4497_v19 = vadd.f32 %v4380_v36, %v10069_v47  ;;  %v4382_v35 = vadd.f32 %v4381_v54, %v4176_v7  ;;  %v7058_v55 = vmul.f32 -1.442695, %v4494_v18 }
 0x8e5   :  { %v4385_v50 = vpop.f32.mrf.mxu0  ;;  %7849 = vtanh.f32 %v4487_v1  ;;  %v4496_v56 = vadd.f32 %v4471_v0, %v10076_v9  ;;  %v4499_v1 = vadd.f32 %v4475_v31, %v10079_v16 }
 0x8e6   :  { %v7054_v3 = vmul.f32 -1.442695, %v4497_v19  ;;  %v4498_v5 = vadd.f32 %v4382_v35, %v10071_v51  ;;  %v4386_v32 = vadd.f32 %v4385_v50, %v4180_v22  ;;  %7851 = vpow2.f32 %v7058_v55 }
 0x8e7   :  { %v4387_v20 = vpop.f32.mrf.mxu0  ;;  %7853 = vpow2.f32 %v7061_v10  ;;  %v4477_v22 = vadd.f32 %v4476_v28, %v12875_v61  ;;  %v7063_v15 = vmul.f32 -1.442695, %v4496_v56  ;;  %v4480_v61 = vpop.f32.mrf.mxu1 }
 0x8e8   :  { %v7059_v7 = vmul.f32 -1.442695, %v4498_v5  ;;  %v4501_v39 = vadd.f32 %v4386_v32, %v10069_v47  ;;  %7855 = vpow2.f32 %v7054_v3  ;;  %v4388_v2 = vadd.f32 %v4387_v20, %v12879_v21 }
 0x8e9   :  { %v7840_v45 = vpop.eup %7839  ;;  %v4500_v21 = vadd.f32 %v4477_v22, %v10076_v9  ;;  %v4482_v8 = vpop.f32.mrf.mxu1  ;;  %v4481_v54 = vadd.f32 %v4480_v61, %v12877_v37 }
 0x8ea   :  { %v4520_v40 = vadd.f32 1.0, %v7840_v45  ;;  %7857 = vpow2.f32 %v7059_v7  ;;  %v7055_v43 = vmul.f32 -1.442695, %v4501_v39  ;;  %v4502_v47 = vadd.f32 %v4388_v2, %v10071_v51 }
 0x8eb   :  { %v7842_v13 = vpop.eup %7841  ;;  %7859 = vtanh.f32 %v4491_v44  ;;  %v7064_v25 = vmul.f32 -1.442695, %v4500_v21  ;;  %v4483_v46 = vadd.f32 %v4482_v8, %v12881_v11  ;;  %v4503_v5 = vadd.f32 %v4481_v54, %v10079_v16 }
 0x8ec   :  { %7861 = vrcp.f32 %v4520_v40  ;;  %v4550_v38 = vadd.f32 1.0, %v7842_v13  ;;  %v7060_v53 = vmul.f32 -1.442695, %v4502_v47 }
 0x8ed   :  { %7863 = vpow2.f32 %v7062_v12  ;;  %v7844_v48 = vpop.eup %7843  ;;  %v4504_v50 = vadd.f32 %v4483_v46, %v10076_v9 }
 0x8ee   :  { %7865 = vrcp.f32 %v4550_v38  ;;  %v4521_v59 = vadd.f32 1.0, %v7844_v48 }
 0x8ef   :  { %v7846_v30 = vpop.eup %7845  ;;  %7867 = vpow2.f32 %v7055_v43  ;;  %v7065_v34 = vmul.f32 -1.442695, %v4504_v50 }
 0x8f0   :  { %v4551_v52 = vadd.f32 1.0, %v7846_v30  ;;  %7869 = vtanh.f32 %v4495_v57 }
 0x8f1   :  { %v7848_v41 = vpop.eup %7847  ;;  %7871 = vrcp.f32 %v4521_v59 }
 0x8f2   :  { %7873 = vrcp.f32 %v4551_v52  ;;  %v4522_v23 = vadd.f32 1.0, %v7848_v41  ;;  %v7850_v51 = vpop.eup %7849 }
 0x8f3   :  { %7875 = vpow2.f32 %v7063_v15  ;;  %v7852_v60 = vpop.eup %7851 }
 0x8f4   :  { %7877 = vrcp.f32 %v4522_v23  ;;  %v7854_v33 = vpop.eup %7853  ;;  %v4552_v36 = vadd.f32 1.0, %v7852_v60 }
 0x8f5   :  { %7879 = vpow2.f32 %v7060_v53  ;;  %v7856_v6 = vpop.eup %7855  ;;  %v4585_v55 = vadd.f32 1.0, %v7854_v33 }
 0x8f6   :  { %7881 = vpow2.f32 %v7064_v25  ;;  %v4523_v49 = vadd.f32 1.0, %v7856_v6 }
 0x8f7   :  { %v7858_v18 = vpop.eup %7857  ;;  %7883 = vrcp.f32 %v4552_v36 }
 0x8f8   :  { %v7860_v10 = vpop.eup %7859  ;;  %7885 = vtanh.f32 %v4499_v1  ;;  %v4553_v19 = vadd.f32 1.0, %v7858_v18 }
 0x8f9   :  { %v7862_v35 = vpop.eup %7861  ;;  %7887 = vrcp.f32 %v4523_v49 }
 0x8fa   :  { %v7864_v14 = vpop.eup %7863  ;;  %7889 = vrcp.f32 %v4553_v19  ;;  %v4605_v11 = vmul.f32 %v7862_v35, %v7850_v51 }
 0x8fb   :  { %v7866_v3 = vpop.eup %7865  ;;  %v4586_v28 = vadd.f32 1.0, %v7864_v14  ;;  %7891 = vrcp.f32 %v4585_v55 }
 0x8fc   :  { %v7868_v32 = vpop.eup %7867  ;;  %v4600_v44 = vmul.f32 %v7866_v3, %v12752_v26  ;;  %7893 = vtanh.f32 %v4503_v5 }
 0x8fd   :  { %v7870_v0 = vpop.eup %7869  ;;  %v4524_v39 = vadd.f32 1.0, %v7868_v32 }
 0x8fe   :  { %v7872_v37 = vpop.eup %7871  ;;  %v12911_v20 = vadd.f32 %v4605_v11, %v4600_v44  }
 0x8ff   :  { %v7874_v7 = vpop.eup %7873  ;;  %v4606_v9 = vmul.f32 %v7872_v37, %v7860_v10 }
 0x900   :  { %v7876_v45 = vpop.eup %7875  ;;  %7895 = vtanh.f32 %v12911_v20  ;;  %v4601_v16 = vmul.f32 %v7874_v7, %v12756_v24 }
 0x901   :  { %v7878_v12 = vpop.eup %7877  ;;  %7897 = vrcp.f32 %v4586_v28  ;;  %v4587_v56 = vadd.f32 1.0, %v7876_v45 }
 0x902   :  { %v7880_v2 = vpop.eup %7879  ;;  %v4611_v26 = vadd.f32 %v4606_v9, %v4601_v16   ;;  %7899 = vpow2.f32 %v7065_v34  ;;  %v4607_v38 = vmul.f32 %v7878_v12, %v7870_v0 }
 0x903   :  { %v7882_v40 = vpop.eup %7881  ;;  %7901 = vrcp.f32 %v4524_v39  ;;  %v4554_v22 = vadd.f32 1.0, %v7880_v2 }
 0x904   :  { %v7884_v13 = vpop.eup %7883  ;;  %7903 = vtanh.f32 %v4611_v26  ;;  %v4588_v24 = vadd.f32 1.0, %v7882_v40 }
 0x905   :  { %v7886_v43 = vpop.eup %7885  ;;  %v4602_v57 = vmul.f32 %v7884_v13, %v12760_v27  ;;  %7905 = vrcp.f32 %v4554_v22 }
 0x906   :  { %v7888_v47 = vpop.eup %7887  ;;  %7907 = vrcp.f32 %v4587_v56 }
 0x907   :  { %v7890_v48 = vpop.eup %7889  ;;  %v4612_v21 = vadd.f32 %v4607_v38, %v4602_v57   ;;  %v4608_v30 = vmul.f32 %v7888_v47, %v7886_v43 }
 0x908   :  { %v4603_v59 = vmul.f32 %v7890_v48, %v12764_v17  ;;  %v7892_v61 = vpop.eup %7891 }
 0x909   :  { %7909 = vtanh.f32 %v4612_v21  ;;  %v7894_v52 = vpop.eup %7893 }
 0x90a   :  { %v4613_v15 = vadd.f32 %v4608_v30, %v4603_v59   ;;  %7911 = vrcp.f32 %v4588_v24 }
 0x90c   :  { %7913 = vtanh.f32 %v4613_v15 }
 0x90d   :  { %v7896_v31 = vpop.eup %7895 }
 0x90e   :  { %v7898_v41 = vpop.eup %7897  ;;  %v4620_v53 = vmul.f32 %v7896_v31, %v7892_v61  }
 0x90f   :  { %v7900_v23 = vpop.eup %7899 }
 0x910   :  { %v7902_v27 = vpop.eup %7901  ;;  %v4589_v60 = vadd.f32 1.0, %v7900_v23 }
 0x911   :  { %v7904_v25 = vpop.eup %7903  ;;  %v4609_v1 = vmul.f32 %v7902_v27, %v7894_v52 }
 0x912   :  { %v7906_v51 = vpop.eup %7905  ;;  %v4621_v8 = vmul.f32 %v7904_v25, %v7898_v41   ;;  %7915 = vrcp.f32 %v4589_v60 }
 0x913   :  { %v4604_v33 = vmul.f32 %v7906_v51, %v12776_v29  ;;  %v7908_v36 = vpop.eup %7907 }
 0x915   :  { %v4614_v17 = vadd.f32 %v4609_v1, %v4604_v33  }
 0x916   :  { %v7910_v6 = vpop.eup %7909 }
 0x917   :  { %v4622_v46 = vmul.f32 %v7910_v6, %v7908_v36   ;;  %7917 = vtanh.f32 %v4614_v17  ;;  %v7912_v18 = vpop.eup %7911 }
 0x919   :  { %v7914_v49 = vpop.eup %7913 }
 0x91a   :  { %v4623_v54 = vmul.f32 %v7914_v49, %v7912_v18  }
 0x91f   :  { %v7916_v10 = vpop.eup %7915 }
 0x924   :  { %v7918_v19 = vpop.eup %7917 }
 0x925   :  { %v4624_v35 = vmul.f32 %v7918_v19, %v7916_v10  }
 0x926 LB: > { %15059 = vst [vmem:[#allocation202_spill] sm:$0xff] %v8593_v17  ;;  %15060 = vst [vmem:[#allocation203_spill] sm:$0xff] %v8597_v15  ;;  %v15064_v29 = vld [vmem:[#allocation127_spill] sm:$0xff]  ;;  %v15065_v14 = vld [vmem:[#allocation129_spill] sm:$0xff]  ;;  %s7082_s4 = smul.u32 160, %s8653_s1  ;;  %s4635_s1 = sadd.s32 1, %s8653_s1   ;;  %s8653_s1 = sphi %s12954_s1, %s4635_s1   ;;  %v8649_v42 = vphi %v12847_v42, %v15525_v42   ;;  %v8645_v63 = vphi %v12852_v63, %v15524_v63   ;;  %v8641_v58 = vphi %v12857_v58, %v15523_v58   ;;  %v8637_v4 = vphi %v12862_v4, %v15522_v4   ;;  %v8633_v62 = vphi %v12867_v62, %v15521_v62   ;;  %v8629_v53 = vphi %v4620_v53, %v15520_v53   ;;  %v8625_v8 = vphi %v4621_v8, %v15519_v8   ;;  %v8621_v46 = vphi %v4622_v46, %v15518_v46   ;;  %v8617_v54 = vphi %v4623_v54, %v15517_v54   ;;  %v8613_v35 = vphi %v4624_v35, %v15516_v35   ;;  %v8609_v20 = vphi %v12911_v20, %v13960_v20   ;;  %v8605_v26 = vphi %v4611_v26, %v6741_v26   ;;  %v8601_v21 = vphi %v4612_v21, %v6742_v21   ;;  %v8597_v15 = vphi %v4613_v15, %v6743_v15   ;;  %v8593_v17 = vphi %v4614_v17, %v6744_v17  }
 0x927   : > { %15061 = vst [vmem:[#allocation204_spill] sm:$0xff] %v8601_v21  ;;  %15062 = vst [vmem:[#allocation205_spill] sm:$0xff] %v8605_v26  ;;  %4652 = vmatprep.subr.mxu0 %v15064_v29  ;;  %4747 = vmatprep.subr.mxu1 %v15065_v14  ;;  %v15066_v55 = vld [vmem:[#allocation126_spill] sm:$0xff]  ;;  %v15067_v50 = vld [vmem:[#allocation128_spill] sm:$0xff]  ;;  %p13973_p0 = scmp.ge.s32.totalorder %s4635_s1, 10  }
 0x928   : > { %15063 = vst [vmem:[#allocation206_spill] sm:$0xff] %v8609_v20  ;;  %4653 = vmatpush1.msra.mxu0 %v15066_v55  ;;  %4748 = vmatpush1.msra.mxu1 %v15067_v50  ;;  %v15068_v3 = vld [vmem:[#allocation123_spill] sm:$0xff]  ;;  %v15069_v5 = vld [vmem:[#allocation125_spill] sm:$0xff]  ;;  %v15070_v32 = vld [vmem:[#allocation122_spill] sm:$0xff]  ;;  %s13301_s26 = scalar_lea.vmem %s14014_s8, %s7082_s4 }
 0x929   : > { %4654 = vmatprep.subr.mxu0 %v15068_v3  ;;  %4749 = vmatprep.subr.mxu1 %v15069_v5  ;;  %v15071_v11 = vld [vmem:[#allocation124_spill] sm:$0xff]  ;;  %v15072_v44 = vld [vmem:[#allocation119_spill] sm:$0xff]  ;;  %v15073_v0 = vld [vmem:[#allocation121_spill] sm:$0xff] }
 0x92a   : > { %4655 = vmatpush1.msra.mxu0 %v15070_v32  ;;  %4750 = vmatpush1.msra.mxu1 %v15071_v11  ;;  %v15074_v28 = vld [vmem:[#allocation118_spill] sm:$0xff]  ;;  %v15075_v37 = vld [vmem:[#allocation120_spill] sm:$0xff]  ;;  %v15076_v34 = vld [vmem:[#allocation115_spill] sm:$0xff] }
 0x92b   : > { %4656 = vmatprep.subr.mxu0 %v15072_v44  ;;  %4751 = vmatprep.subr.mxu1 %v15073_v0  ;;  %v15077_v7 = vld [vmem:[#allocation117_spill] sm:$0xff]  ;;  %v15078_v39 = vld [vmem:[#allocation114_spill] sm:$0xff]  ;;  %v15079_v45 = vld [vmem:[#allocation116_spill] sm:$0xff] }
 0x92c   : > { %4657 = vmatpush1.msra.mxu0 %v15074_v28  ;;  %4752 = vmatpush1.msra.mxu1 %v15075_v37  ;;  %v15080_v9 = vld [vmem:[#allocation111_spill] sm:$0xff]  ;;  %v15081_v16 = vld [vmem:[#allocation113_spill] sm:$0xff]  ;;  %v15082_v12 = vld [vmem:[#allocation110_spill] sm:$0xff] }
 0x92d   : > { %4658 = vmatprep.subr.mxu0 %v15076_v34  ;;  %4753 = vmatprep.subr.mxu1 %v15077_v7  ;;  %v15083_v2 = vld [vmem:[#allocation112_spill] sm:$0xff]  ;;  %v15084_v40 = vld [vmem:[#allocation107_spill] sm:$0xff]  ;;  %v15085_v22 = vld [vmem:[#allocation109_spill] sm:$0xff] }
 0x92e   : > { %4659 = vmatpush1.msra.mxu0 %v15078_v39  ;;  %4754 = vmatpush1.msra.mxu1 %v15079_v45  ;;  %v15086_v13 = vld [vmem:[#allocation106_spill] sm:$0xff]  ;;  %v15087_v56 = vld [vmem:[#allocation108_spill] sm:$0xff]  ;;  %v15088_v43 = vld [vmem:[#allocation103_spill] sm:$0xff] }
 0x92f   : > { %4660 = vmatprep.subr.mxu0 %v15080_v9  ;;  %4755 = vmatprep.subr.mxu1 %v15081_v16  ;;  %v15089_v38 = vld [vmem:[#allocation105_spill] sm:$0xff]  ;;  %v15090_v57 = vld [vmem:[#allocation102_spill] sm:$0xff]  ;;  %v15091_v47 = vld [vmem:[#allocation104_spill] sm:$0xff] }
 0x930   : > { %4661 = vmatpush1.msra.mxu0 %v15082_v12  ;;  %4756 = vmatpush1.msra.mxu1 %v15083_v2  ;;  %v15092_v48 = vld [vmem:[#allocation99_spill] sm:$0xff]  ;;  %v15093_v24 = vld [vmem:[#allocation101_spill] sm:$0xff]  ;;  %v15094_v30 = vld [vmem:[#allocation98_spill] sm:$0xff] }
 0x931   : > { %4662 = vmatprep.subr.mxu0 %v15084_v40  ;;  %4757 = vmatprep.subr.mxu1 %v15085_v22  ;;  %v15095_v59 = vld [vmem:[#allocation100_spill] sm:$0xff]  ;;  %v15096_v61 = vld [vmem:[#allocation95_spill] sm:$0xff]  ;;  %v15097_v52 = vld [vmem:[#allocation97_spill] sm:$0xff] }
 0x932   : > { %4663 = vmatpush1.msra.mxu0 %v15086_v13  ;;  %4758 = vmatpush1.msra.mxu1 %v15087_v56  ;;  %v15098_v31 = vld [vmem:[#allocation94_spill] sm:$0xff]  ;;  %v15099_v41 = vld [vmem:[#allocation96_spill] sm:$0xff]  ;;  %v15100_v23 = vld [vmem:[#allocation91_spill] sm:$0xff] }
 0x933   : > { %4664 = vmatprep.subr.mxu0 %v15088_v43  ;;  %4759 = vmatprep.subr.mxu1 %v15089_v38  ;;  %v15101_v27 = vld [vmem:[#allocation93_spill] sm:$0xff]  ;;  %v15102_v25 = vld [vmem:[#allocation90_spill] sm:$0xff]  ;;  %v15103_v51 = vld [vmem:[#allocation92_spill] sm:$0xff] }
 0x934   : > { %4665 = vmatpush1.msra.mxu0 %v15090_v57  ;;  %4760 = vmatpush1.msra.mxu1 %v15091_v47  ;;  %v15104_v60 = vld [vmem:[#allocation87_spill] sm:$0xff]  ;;  %v15105_v1 = vld [vmem:[#allocation89_spill] sm:$0xff]  ;;  %v15106_v33 = vld [vmem:[#allocation86_spill] sm:$0xff] }
 0x935   : > { %4666 = vmatprep.subr.mxu0 %v15092_v48  ;;  %4761 = vmatprep.subr.mxu1 %v15093_v24  ;;  %v15107_v36 = vld [vmem:[#allocation88_spill] sm:$0xff]  ;;  %v15108_v6 = vld [vmem:[#allocation83_spill] sm:$0xff]  ;;  %v15109_v18 = vld [vmem:[#allocation85_spill] sm:$0xff] }
 0x936   : > { %4667 = vmatpush1.msra.mxu0 %v15094_v30  ;;  %4762 = vmatpush1.msra.mxu1 %v15095_v59  ;;  %v15110_v49 = vld [vmem:[#allocation82_spill] sm:$0xff]  ;;  %v15111_v10 = vld [vmem:[#allocation84_spill] sm:$0xff]  ;;  %v15112_v19 = vld [vmem:[#allocation79_spill] sm:$0xff] }
 0x937   : > { %4668 = vmatprep.subr.mxu0 %v15096_v61  ;;  %4763 = vmatprep.subr.mxu1 %v15097_v52  ;;  %v15113_v17 = vld [vmem:[#allocation81_spill] sm:$0xff]  ;;  %v15114_v15 = vld [vmem:[#allocation78_spill] sm:$0xff]  ;;  %v15115_v21 = vld [vmem:[#allocation80_spill] sm:$0xff] }
 0x938   : > { %4669 = vmatpush1.msra.mxu0 %v15098_v31  ;;  %4764 = vmatpush1.msra.mxu1 %v15099_v41  ;;  %v15116_v26 = vld [vmem:[#allocation75_spill] sm:$0xff]  ;;  %v15117_v20 = vld [vmem:[#allocation77_spill] sm:$0xff] }
 0x939   : > { %4670 = vmatprep.subr.mxu0 %v15100_v23  ;;  %4765 = vmatprep.subr.mxu1 %v15101_v27 }
 0x93a   : > { %4671 = vmatpush1.msra.mxu0 %v15102_v25  ;;  %4766 = vmatpush1.msra.mxu1 %v15103_v51  ;;  %v15123_v25 = vld [vmem:[#allocation72_spill] sm:$0xff]  ;;  %v15150_v51 = vld [vmem:[#allocation42_spill] sm:$0xff] }
 0x93b   : > { %4672 = vmatprep.subr.mxu0 %v15104_v60  ;;  %4767 = vmatprep.subr.mxu1 %v15105_v1  ;;  %v15159_v60 = vld [vmem:[#allocation34_spill] sm:$0xff] }
 0x93c   : > { %4673 = vmatpush1.msra.mxu0 %v15106_v33  ;;  %4768 = vmatpush1.msra.mxu1 %v15107_v36  ;;  %v15118_v36 = vld [vmem:[#allocation74_spill] sm:$0xff]  ;;  %v15147_v33 = vld [vmem:[#allocation48_spill] sm:$0xff] }
 0x93d   : > { %4674 = vmatprep.subr.mxu0 %v15108_v6  ;;  %4769 = vmatprep.subr.mxu1 %v15109_v18  ;;  %v15119_v6 = vld [vmem:[#allocation76_spill] sm:$0xff]  ;;  %v15120_v18 = vld [vmem:[#allocation71_spill] sm:$0xff] }
 0x93e   : > { %4675 = vmatpush1.msra.mxu0 %v15110_v49  ;;  %4770 = vmatpush1.msra.mxu1 %v15111_v10  ;;  %v15121_v49 = vld [vmem:[#allocation73_spill] sm:$0xff]  ;;  %v15122_v10 = vld [vmem:[#allocation70_spill] sm:$0xff] }
 0x93f   : > { %4676 = vmatprep.subr.mxu0 %v15112_v19  ;;  %4771 = vmatprep.subr.mxu1 %v15113_v17  ;;  %v15124_v17 = vld [vmem:[#allocation67_spill] sm:$0xff] }
 0x940   : > { %4677 = vmatpush1.msra.mxu0 %v15114_v15  ;;  %4772 = vmatpush1.msra.mxu1 %v15115_v21  ;;  %v15125_v15 = vld [vmem:[#allocation69_spill] sm:$0xff]  ;;  %v15126_v21 = vld [vmem:[#allocation66_spill] sm:$0xff]  ;;  %v15194_v19 = vld [vmem:[#allocation3_spill] sm:$0xff] }
 0x941   : > { %4678 = vmatprep.subr.mxu0 %v15116_v26  ;;  %4773 = vmatprep.subr.mxu1 %v15117_v20  ;;  %v14394_v26 = vmov 0.0   ;;  %v15127_v20 = vld [vmem:[#allocation68_spill] sm:$0xff] }
 0x942   : > { %4679 = vmatpush1.msra.mxu0 %v15118_v36  ;;  %4774 = vmatpush1.msra.mxu1 %v15119_v6  ;;  %v15134_v36 = vld [vmem:[#allocation58_spill] sm:$0xff]  ;;  %v15136_v6 = vld [vmem:[#allocation55_spill] sm:$0xff] }
 0x943   : > { %4680 = vmatprep.subr.mxu0 %v15120_v18  ;;  %4775 = vmatprep.subr.mxu1 %v15121_v49  ;;  %v15128_v49 = vld [vmem:[#allocation63_spill] sm:$0xff]  ;;  %v15145_v18 = vld [vmem:[#allocation49_spill] sm:$0xff] }
 0x944   : > { %4681 = vmatpush1.msra.mxu0 %v15122_v10  ;;  %4776 = vmatpush1.msra.mxu1 %v15123_v25  ;;  %v15129_v10 = vld [vmem:[#allocation65_spill] sm:$0xff] }
 0x945   : > { %4682 = vmatprep.subr.mxu0 %v15124_v17  ;;  %4777 = vmatprep.subr.mxu1 %v15125_v15  ;;  %v15130_v17 = vld [vmem:[#allocation62_spill] sm:$0xff]  ;;  %v15131_v15 = vld [vmem:[#allocation64_spill] sm:$0xff]  ;;  %v15133_v25 = vld [vmem:[#allocation61_spill] sm:$0xff] }
 0x946   : > { %4683 = vmatpush1.msra.mxu0 %v15126_v21  ;;  %4716 = vmatprep.mubr.f32.mxu0 %v14394_v26  ;;  %v15132_v21 = vld [vmem:[#allocation59_spill] sm:$0xff] }
 0x947   : > { %4778 = vmatpush1.msra.mxu1 %v15127_v20  ;;  %4717 = vmatmul.mubr.f32.vlgmr.msra.gmra.mxu0 %v8629_v53  ;;  %v15135_v20 = vld [vmem:[#allocation60_spill] sm:$0xff] }
 0x948   : > { %4811 = vmatprep.mubr.f32.mxu1 %v14394_v26  ;;  %4842 = vmatprep.subr.mxu0 %v15128_v49  ;;  %v15137_v26 = vld [vmem:[#allocation57_spill] sm:$0xff]  ;;  %v15138_v49 = vld [vmem:[#allocation54_spill] sm:$0xff] }
 0x949   : > { %4937 = vmatprep.subr.mxu1 %v15129_v10  ;;  %4812 = vmatmul.mubr.f32.vlgmr.msra.gmra.mxu1 %v8629_v53  ;;  %v15139_v10 = vld [vmem:[#allocation56_spill] sm:$0xff]  ;;  %v15140_v53 = vld [vmem:[#allocation51_spill] sm:$0xff] }
 0x94a   : > { %4843 = vmatpush1.msra.mxu0 %v15130_v17  ;;  %4938 = vmatpush1.msra.mxu1 %v15131_v15  ;;  %v15141_v17 = vld [vmem:[#allocation53_spill] sm:$0xff]  ;;  %v15142_v15 = vld [vmem:[#allocation50_spill] sm:$0xff] }
 0x94b   : > { %4844 = vmatprep.subr.mxu0 %v15132_v21  ;;  %4939 = vmatprep.subr.mxu1 %v15133_v25  ;;  %v15143_v21 = vld [vmem:[#allocation52_spill] sm:$0xff]  ;;  %v15144_v25 = vld [vmem:[#allocation47_spill] sm:$0xff] }
 0x94c   : > { %4845 = vmatpush1.msra.mxu0 %v15134_v36  ;;  %4940 = vmatpush1.msra.mxu1 %v15135_v20  ;;  %v15146_v20 = vld [vmem:[#allocation46_spill] sm:$0xff]  ;;  %v15156_v36 = vld [vmem:[#allocation40_spill] sm:$0xff] }
 0x94d   : > { %4846 = vmatprep.subr.mxu0 %v15136_v6  ;;  %4941 = vmatprep.subr.mxu1 %v15137_v26  ;;  %v15148_v26 = vld [vmem:[#allocation43_spill] sm:$0xff]  ;;  %v15164_v6 = vld [vmem:[#allocation32_spill] sm:$0xff] }
 0x94e   : > { %4847 = vmatpush1.msra.mxu0 %v15138_v49  ;;  %4942 = vmatpush1.msra.mxu1 %v15139_v10  ;;  %v15149_v49 = vld [vmem:[#allocation45_spill] sm:$0xff] }
 0x94f   : > { %4848 = vmatprep.subr.mxu0 %v15140_v53  ;;  %4943 = vmatprep.subr.mxu1 %v15141_v17  ;;  %v15151_v53 = vld [vmem:[#allocation44_spill] sm:$0xff]  ;;  %v15152_v17 = vld [vmem:[#allocation39_spill] sm:$0xff] }
 0x950   : > { %4849 = vmatpush1.msra.mxu0 %v15142_v15  ;;  %4944 = vmatpush1.msra.mxu1 %v15143_v21  ;;  %v15153_v15 = vld [vmem:[#allocation41_spill] sm:$0xff]  ;;  %v15154_v21 = vmov 0.0  }
 0x951   : > { %4850 = vmatprep.subr.mxu0 %v15144_v25  ;;  %4945 = vmatprep.subr.mxu1 %v15145_v18  ;;  %v15155_v25 = vld [vmem:[#allocation38_spill] sm:$0xff] }
 0x952   : > { %4851 = vmatpush1.msra.mxu0 %v15146_v20  ;;  %4946 = vmatpush1.msra.mxu1 %v15147_v33  ;;  %v15157_v20 = vld [vmem:[#allocation35_spill] sm:$0xff]  ;;  %v15172_v33 = vld [vmem:[#allocation24_spill] sm:$0xff] }
 0x953   : > { %4852 = vmatprep.subr.mxu0 %v15148_v26  ;;  %4947 = vmatprep.subr.mxu1 %v15149_v49  ;;  %v15158_v26 = vld [vmem:[#allocation37_spill] sm:$0xff] }
 0x954   : > { %4853 = vmatpush1.msra.mxu0 %v15150_v51  ;;  %4948 = vmatpush1.msra.mxu1 %v15151_v53  ;;  %v15160_v53 = vld [vmem:[#allocation36_spill] sm:$0xff] }
 0x955   : > { %4854 = vmatprep.subr.mxu0 %v15152_v17  ;;  %4949 = vmatprep.subr.mxu1 %v15153_v15  ;;  %v15161_v17 = vld [vmem:[#allocation31_spill] sm:$0xff]  ;;  %v15162_v15 = vld [vmem:[#allocation33_spill] sm:$0xff] }
 0x956   : > { %4722 = vmatprep.mubr.f32.mxu0 %v15154_v21  ;;  %4855 = vmatpush1.msra.mxu0 %v15155_v25  ;;  %v15180_v25 = vld [vmem:[#allocation16_spill] sm:$0xff] }
 0x957   : > { %4950 = vmatpush1.msra.mxu1 %v15156_v36  ;;  %4723 = vmatmul.mubr.f32.gmra.mxu0 %v8625_v8  ;;  %v15163_v36 = vld [vmem:[#allocation30_spill] sm:$0xff] }
 0x958   : > { %4856 = vmatprep.subr.mxu0 %v15157_v20  ;;  %4951 = vmatprep.subr.mxu1 %v15158_v26  ;;  %v15165_v20 = vld [vmem:[#allocation27_spill] sm:$0xff]  ;;  %v15166_v26 = vld [vmem:[#allocation29_spill] sm:$0xff] }
 0x959   : > { %4817 = vmatprep.mubr.f32.mxu1 %v15154_v21  ;;  %4857 = vmatpush1.msra.mxu0 %v15159_v60 }
 0x95a   : > { %4952 = vmatpush1.msra.mxu1 %v15160_v53  ;;  %4858 = vmatprep.subr.mxu0 %v15161_v17  ;;  %v15167_v53 = vld [vmem:[#allocation26_spill] sm:$0xff]  ;;  %v15168_v17 = vld [vmem:[#allocation28_spill] sm:$0xff] }
 0x95b   : > { %4818 = vmatmul.mubr.f32.gmra.mxu1 %v8625_v8  ;;  %4953 = vmatprep.subr.mxu1 %v15162_v15  ;;  %v15169_v8 = vld [vmem:[#allocation23_spill] sm:$0xff]  ;;  %v15170_v15 = vld [vmem:[#allocation25_spill] sm:$0xff] }
 0x95c   : > { %4728 = vmatprep.mubr.f32.mxu0 %v15154_v21  ;;  %4859 = vmatpush1.msra.mxu0 %v15163_v36 }
 0x95d   : > { %4954 = vmatpush1.msra.mxu1 %v15164_v6  ;;  %4729 = vmatmul.mubr.f32.gmra.mxu0 %v8621_v46  ;;  %v15171_v6 = vld [vmem:[#allocation22_spill] sm:$0xff] }
 0x95e   : > { %4860 = vmatprep.subr.mxu0 %v15165_v20  ;;  %4955 = vmatprep.subr.mxu1 %v15166_v26  ;;  %v15173_v20 = vld [vmem:[#allocation19_spill] sm:$0xff]  ;;  %v15174_v26 = vld [vmem:[#allocation21_spill] sm:$0xff] }
 0x95f   : > { %4823 = vmatprep.mubr.f32.mxu1 %v15154_v21  ;;  %4861 = vmatpush1.msra.mxu0 %v15167_v53  ;;  %v15175_v53 = vld [vmem:[#allocation18_spill] sm:$0xff] }
 0x960   : > { %4956 = vmatpush1.msra.mxu1 %v15168_v17  ;;  %4862 = vmatprep.subr.mxu0 %v15169_v8  ;;  %v15176_v17 = vld [vmem:[#allocation20_spill] sm:$0xff]  ;;  %v15178_v8 = vld [vmem:[#allocation17_spill] sm:$0xff] }
 0x961   : > { %4824 = vmatmul.mubr.f32.gmra.mxu1 %v8621_v46  ;;  %4957 = vmatprep.subr.mxu1 %v15170_v15  ;;  %v15177_v46 = vld [vmem:[#allocation15_spill] sm:$0xff]  ;;  %v15179_v15 = vld [vmem:[#allocation14_spill] sm:$0xff] }
 0x962   : > { %4734 = vmatprep.mubr.f32.mxu0 %v15154_v21  ;;  %4863 = vmatpush1.msra.mxu0 %v15171_v6 }
 0x963   : > { %4958 = vmatpush1.msra.mxu1 %v15172_v33  ;;  %4735 = vmatmul.mubr.f32.gmra.mxu0 %v8617_v54 }
 0x964   : > { %4864 = vmatprep.subr.mxu0 %v15173_v20  ;;  %4959 = vmatprep.subr.mxu1 %v15174_v26  ;;  %v15181_v20 = vld [vmem:[#allocation11_spill] sm:$0xff]  ;;  %v15182_v26 = vld [vmem:[#allocation13_spill] sm:$0xff] }
 0x965   : > { %4829 = vmatprep.mubr.f32.mxu1 %v15154_v21  ;;  %4865 = vmatpush1.msra.mxu0 %v15175_v53  ;;  %v15183_v53 = vld [vmem:[#allocation10_spill] sm:$0xff] }
 0x966   : > { %4960 = vmatpush1.msra.mxu1 %v15176_v17  ;;  %4866 = vmatprep.subr.mxu0 %v15177_v46  ;;  %v15184_v60 = vmov %v15183_v53  ;;  %v15185_v17 = vld [vmem:[#allocation12_spill] sm:$0xff]  ;;  %v15188_v46 = vld [vmem:[#allocation9_spill] sm:$0xff] }
 0x967   : > { %4830 = vmatmul.mubr.f32.gmra.mxu1 %v8617_v54  ;;  %4961 = vmatprep.subr.mxu1 %v15178_v8  ;;  %v15186_v54 = vld [vmem:[#allocation7_spill] sm:$0xff]  ;;  %v15189_v33 = vmov %v15188_v46  ;;  %v15190_v8 = vld [vmem:[#allocation6_spill] sm:$0xff] }
 0x968   : > { %4740 = vmatprep.mubr.f32.mxu0 %v15154_v21  ;;  %4867 = vmatpush1.msra.mxu0 %v15179_v15  ;;  %v15187_v36 = vmov %v15186_v54  ;;  %v15191_v6 = vmov %v15190_v8  ;;  %v15192_v15 = vld [vmem:[#allocation8_spill] sm:$0xff] }
 0x969   : > { %4962 = vmatpush1.msra.mxu1 %v15180_v25  ;;  %4741 = vmatmul.mubr.f32.gmra.mxu0 %v8613_v35  ;;  %v15193_v25 = vmov %v15192_v15 }
 0x96a   : > { %4868 = vmatprep.subr.mxu0 %v15181_v20  ;;  %4963 = vmatprep.subr.mxu1 %v15182_v26  ;;  %v15195_v20 = vld [vmem:[#allocation5_spill] sm:$0xff]  ;;  %v15197_v26 = vld [vmem:[#allocation2_spill] sm:$0xff] }
 0x96b   : > { %4835 = vmatprep.mubr.f32.mxu1 %v15154_v21  ;;  %4869 = vmatpush1.msra.mxu0 %v15183_v53  ;;  %v15196_v51 = vmov %v15195_v20  ;;  %v15198_v49 = vmov %v15197_v26  ;;  %v15199_v53 = vld [vmem:[#allocation4_spill] sm:$0xff] }
 0x96c   : > { %4964 = vmatpush1.msra.mxu1 %v15185_v17  ;;  %4870 = vmatprep.subr.mxu0 %v15186_v54  ;;  %v15200_v1 = vmov %v15199_v53  ;;  %v15207_v17 = vld [vmem:[#allocation83_spill] sm:$0xff]  ;;  %v15208_v54 = vld [vmem:[#allocation85_spill] sm:$0xff] }
 0x96d   : > { %4836 = vmatmul.mubr.f32.gmra.mxu1 %v8613_v35  ;;  %4965 = vmatprep.subr.mxu1 %v15188_v46  ;;  %v15206_v35 = vld [vmem:[#allocation88_spill] sm:$0xff]  ;;  %v15209_v46 = vld [vmem:[#allocation82_spill] sm:$0xff] }
 0x96e   : > { %4871 = vmatpush1.msra.mxu0 %v15190_v8  ;;  %4966 = vmatpush1.msra.mxu1 %v15192_v15  ;;  %v15210_v8 = vld [vmem:[#allocation84_spill] sm:$0xff]  ;;  %v15211_v15 = vld [vmem:[#allocation79_spill] sm:$0xff] }
 0x96f   : > { %4872 = vmatprep.subr.mxu0 %v15194_v19  ;;  %4967 = vmatprep.subr.mxu1 %v15195_v20  ;;  %v15212_v20 = vld [vmem:[#allocation81_spill] sm:$0xff] }
 0x970   : > { %4873 = vmatpush1.msra.mxu0 %v15197_v26  ;;  %4906 = vmatprep.mubr.f32.mxu0 %v15154_v21  ;;  %v15213_v26 = vld [vmem:[#allocation78_spill] sm:$0xff] }
 0x971   : > { %4968 = vmatpush1.msra.mxu1 %v15199_v53  ;;  %5001 = vmatprep.mubr.f32.mxu1 %v15154_v21  ;;  %v15214_v53 = vld [vmem:[#allocation80_spill] sm:$0xff] }
 0x972   : > { %4907 = vmatmul.mubr.f32.vlgmr.msra.gmra.mxu0 %v8649_v42  ;;  %5002 = vmatmul.mubr.f32.vlgmr.msra.gmra.mxu1 %v8649_v42  ;;  %v15201_v42 = vld [vmem:[#allocation90_spill] sm:$0xff] }
 0x973   : > { %4912 = vmatprep.mubr.f32.mxu0 %v15154_v21  ;;  %5007 = vmatprep.mubr.f32.mxu1 %v15154_v21 }
 0x974   : > { %5179 = vmatprep.subr.mxu0 %v15064_v29  ;;  %5274 = vmatprep.subr.mxu1 %v15065_v14 }
 0x975   : > { %5180 = vmatpush1.msra.mxu0 %v15066_v55  ;;  %5275 = vmatpush1.msra.mxu1 %v15067_v50 }
 0x976   : > { %4913 = vmatmul.mubr.f32.gmra.mxu0 %v8645_v63  ;;  %5008 = vmatmul.mubr.f32.gmra.mxu1 %v8645_v63  ;;  %v15202_v63 = vld [vmem:[#allocation92_spill] sm:$0xff] }
 0x977   : > { %4918 = vmatprep.mubr.f32.mxu0 %v15154_v21  ;;  %5013 = vmatprep.mubr.f32.mxu1 %v15154_v21 }
 0x978   : > { %5181 = vmatprep.subr.mxu0 %v15068_v3  ;;  %5276 = vmatprep.subr.mxu1 %v15069_v5 }
 0x979   : > { %5182 = vmatpush1.msra.mxu0 %v15070_v32  ;;  %5277 = vmatpush1.msra.mxu1 %v15071_v11 }
 0x97a   : > { %4919 = vmatmul.mubr.f32.gmra.mxu0 %v8641_v58  ;;  %5014 = vmatmul.mubr.f32.gmra.mxu1 %v8641_v58  ;;  %v15203_v58 = vld [vmem:[#allocation87_spill] sm:$0xff] }
 0x97b   : > { %4924 = vmatprep.mubr.f32.mxu0 %v15154_v21  ;;  %5019 = vmatprep.mubr.f32.mxu1 %v15154_v21 }
 0x97c   : > { %5183 = vmatprep.subr.mxu0 %v15072_v44  ;;  %5278 = vmatprep.subr.mxu1 %v15073_v0 }
 0x97d   : > { %5184 = vmatpush1.msra.mxu0 %v15074_v28  ;;  %5279 = vmatpush1.msra.mxu1 %v15075_v37 }
 0x97e   : > { %4925 = vmatmul.mubr.f32.gmra.mxu0 %v8637_v4  ;;  %5020 = vmatmul.mubr.f32.gmra.mxu1 %v8637_v4  ;;  %v15204_v4 = vld [vmem:[#allocation89_spill] sm:$0xff] }
 0x97f   : > { %4930 = vmatprep.mubr.f32.mxu0 %v15154_v21  ;;  %5025 = vmatprep.mubr.f32.mxu1 %v15154_v21 }
 0x980   : > { %5185 = vmatprep.subr.mxu0 %v15076_v34  ;;  %5280 = vmatprep.subr.mxu1 %v15077_v7 }
 0x981   : > { %5186 = vmatpush1.msra.mxu0 %v15078_v39  ;;  %5281 = vmatpush1.msra.mxu1 %v15079_v45 }
 0x982   : > { %4931 = vmatmul.mubr.f32.gmra.mxu0 %v8633_v62  ;;  %5026 = vmatmul.mubr.f32.gmra.mxu1 %v8633_v62  ;;  %v15205_v62 = vld [vmem:[#allocation86_spill] sm:$0xff] }
 0x983   : > { %5187 = vmatprep.subr.mxu0 %v15080_v9  ;;  %5282 = vmatprep.subr.mxu1 %v15081_v16 }
 0x984   : > { %5188 = vmatpush1.msra.mxu0 %v15082_v12  ;;  %5283 = vmatpush1.msra.mxu1 %v15083_v2 }
 0x985   : > { %5189 = vmatprep.subr.mxu0 %v15084_v40  ;;  %5284 = vmatprep.subr.mxu1 %v15085_v22  ;;  %v15230_v40 = vld [vmem:[#allocation131_spill] sm:$0xff] }
 0x986   : > { %5190 = vmatpush1.msra.mxu0 %v15086_v13  ;;  %5285 = vmatpush1.msra.mxu1 %v15087_v56 }
 0x987   : > { %5191 = vmatprep.subr.mxu0 %v15088_v43  ;;  %5286 = vmatprep.subr.mxu1 %v15089_v38 }
 0x988   : > { %5192 = vmatpush1.msra.mxu0 %v15090_v57  ;;  %5287 = vmatpush1.msra.mxu1 %v15091_v47  ;;  %v15229_v57 = vld [vmem:[#allocation130_spill] sm:$0xff] }
 0x989   : > { %5193 = vmatprep.subr.mxu0 %v15092_v48  ;;  %5288 = vmatprep.subr.mxu1 %v15093_v24 }
 0x98a   : > { %5194 = vmatpush1.msra.mxu0 %v15094_v30  ;;  %5289 = vmatpush1.msra.mxu1 %v15095_v59 }
 0x98b   : > { %5195 = vmatprep.subr.mxu0 %v15096_v61  ;;  %5290 = vmatprep.subr.mxu1 %v15097_v52 }
 0x98c   : > { %5196 = vmatpush1.msra.mxu0 %v15098_v31  ;;  %5291 = vmatpush1.msra.mxu1 %v15099_v41 }
 0x98d   : > { %5197 = vmatprep.subr.mxu0 %v15100_v23  ;;  %5292 = vmatprep.subr.mxu1 %v15101_v27 }
 0x98e   : > { %5198 = vmatpush1.msra.mxu0 %v15201_v42  ;;  %5293 = vmatpush1.msra.mxu1 %v15202_v63  ;;  %v15215_v42 = vld [vmem:[#allocation75_spill] sm:$0xff]  ;;  %v15216_v63 = vld [vmem:[#allocation77_spill] sm:$0xff] }
 0x98f   : > { %5199 = vmatprep.subr.mxu0 %v15203_v58  ;;  %5294 = vmatprep.subr.mxu1 %v15204_v4  ;;  %v15217_v58 = vld [vmem:[#allocation74_spill] sm:$0xff]  ;;  %v15218_v4 = vld [vmem:[#allocation76_spill] sm:$0xff] }
 0x990   : > { %5200 = vmatpush1.msra.mxu0 %v15205_v62  ;;  %5295 = vmatpush1.msra.mxu1 %v15206_v35  ;;  %v15219_v62 = vld [vmem:[#allocation71_spill] sm:$0xff]  ;;  %v15220_v35 = vld [vmem:[#allocation73_spill] sm:$0xff] }
 0x991   : > { %5201 = vmatprep.subr.mxu0 %v15207_v17  ;;  %5296 = vmatprep.subr.mxu1 %v15208_v54  ;;  %v15221_v17 = vld [vmem:[#allocation70_spill] sm:$0xff]  ;;  %v15222_v54 = vld [vmem:[#allocation72_spill] sm:$0xff] }
 0x992   : > { %5202 = vmatpush1.msra.mxu0 %v15209_v46  ;;  %5297 = vmatpush1.msra.mxu1 %v15210_v8  ;;  %v15223_v46 = vld [vmem:[#allocation67_spill] sm:$0xff]  ;;  %v15224_v8 = vld [vmem:[#allocation69_spill] sm:$0xff] }
 0x993   : > { %5203 = vmatprep.subr.mxu0 %v15211_v15  ;;  %5298 = vmatprep.subr.mxu1 %v15212_v20  ;;  %v15225_v15 = vld [vmem:[#allocation66_spill] sm:$0xff]  ;;  %v15226_v20 = vld [vmem:[#allocation68_spill] sm:$0xff] }
 0x994   : > { %5204 = vmatpush1.msra.mxu0 %v15213_v26  ;;  %5299 = vmatpush1.msra.mxu1 %v15214_v53  ;;  %v15227_v26 = vld [vmem:[#allocation63_spill] sm:$0xff]  ;;  %v15228_v53 = vld [vmem:[#allocation65_spill] sm:$0xff] }
 0x995   : > { %5205 = vmatprep.subr.mxu0 %v15215_v42  ;;  %5300 = vmatprep.subr.mxu1 %v15216_v63 }
 0x996   : > { %5206 = vmatpush1.msra.mxu0 %v15217_v58  ;;  %5301 = vmatpush1.msra.mxu1 %v15218_v4 }
 0x997   : > { %5207 = vmatprep.subr.mxu0 %v15219_v62  ;;  %5302 = vmatprep.subr.mxu1 %v15220_v35 }
 0x998   : > { %5208 = vmatpush1.msra.mxu0 %v15221_v17  ;;  %5303 = vmatpush1.msra.mxu1 %v15222_v54 }
 0x999   : > { %5209 = vmatprep.subr.mxu0 %v15223_v46  ;;  %5304 = vmatprep.subr.mxu1 %v15224_v8 }
 0x99a   : > { %5210 = vmatpush1.msra.mxu0 %v15225_v15  ;;  %5305 = vmatpush1.msra.mxu1 %v15226_v20 }
 0x99b   : > { %5243 = vmatprep.mubr.f32.mxu0 %v15154_v21  ;;  %5338 = vmatprep.mubr.f32.mxu1 %v15154_v21 }
 0x99c   : > { %5369 = vmatprep.subr.mxu0 %v15227_v26  ;;  %5464 = vmatprep.subr.mxu1 %v15228_v53 }
 0xa07   : > { %v4718_v42 = vpop.f32.mrf.mxu0 }
 0xa09   : > { %v4813_v63 = vpop.f32.mrf.mxu1  ;;  %v4720_v58 = vpop.f32.mrf.mxu0 }
 0xa0b   : > { %v4815_v62 = vpop.f32.mrf.mxu1 }
 0xa17   : > { %v4724_v4 = vpop.f32.mrf.mxu0 }
 0xa19   : > { %v4726_v35 = vpop.f32.mrf.mxu0 }
 0xa1b   : > { %v4819_v17 = vpop.f32.mrf.mxu1 }
 0xa1d   : > { %v4730_v54 = vpop.f32.mrf.mxu0  ;;  %v4821_v46 = vpop.f32.mrf.mxu1 }
 0xa1f   : > { %v4732_v8 = vpop.f32.mrf.mxu0 }
 0xa21   : > { %v13240_v15 = vpop.f32.mrf.mxu1 }
 0xa23   : > { %v13242_v20 = vpop.f32.mrf.mxu1  ;;  %v4736_v61 = vpop.f32.mrf.mxu0 }
 0xa25   : > { %v4738_v26 = vpop.f32.mrf.mxu0 }
 0xa27   : > { %v13244_v59 = vpop.f32.mrf.mxu1 }
 0xa29   : > { %v13246_v23 = vpop.f32.mrf.mxu1  ;;  %v4742_v53 = vpop.f32.mrf.mxu0 }
 0xa2b   : > { %v13252_v24 = vpop.f32.mrf.mxu0 }
 0xa2d   : > { %v13248_v41 = vpop.f32.mrf.mxu1 }
 0xa2f   : > { %v13250_v30 = vpop.f32.mrf.mxu1 }
 0xa32   : > { %v4908_v48 = vpop.f32.mrf.mxu0  ;;  %v5003_v47 = vpop.f32.mrf.mxu1 }
 0xa33   : > { %v4909_v31 = vadd.f32 %v4908_v48, %v4718_v42  ;;  %v5004_v37 = vadd.f32 %v5003_v47, %v4813_v63 }
 0xa34   : > { %v4910_v52 = vpop.f32.mrf.mxu0  ;;  %v5005_v27 = vpop.f32.mrf.mxu1 }
 0xa35   : > { %v5032_v38 = vadd.f32 %v4909_v31, %v15229_v57  ;;  %v4911_v43 = vadd.f32 %v4910_v52, %v4720_v58  ;;  %v5006_v39 = vadd.f32 %v5005_v27, %v4815_v62 }
 0xa36   : > { %v4914_v56 = vpop.f32.mrf.mxu0  ;;  %v5009_v13 = vpop.f32.mrf.mxu1 }
 0xa37   : > { %v7067_v22 = vmul.f32 -1.442695, %v5032_v38  ;;  %v5033_v2 = vadd.f32 %v4911_v43, %v15230_v40  ;;  %v4915_v12 = vadd.f32 %v4914_v56, %v4724_v4  ;;  %v15231_v43 = vld [vmem:[#allocation133_spill] sm:$0xff]  ;;  %v5010_v63 = vadd.f32 %v5009_v13, %v4819_v17 }
 0xa38   : > { %v4916_v16 = vpop.f32.mrf.mxu0  ;;  %v5011_v9 = vpop.f32.mrf.mxu1  ;;  %v5035_v56 = vadd.f32 %v5006_v39, %v15231_v43 }
 0xa39   : > { %8207 = vpow2.f32 %v7067_v22  ;;  %v7072_v45 = vmul.f32 -1.442695, %v5033_v2  ;;  %v4917_v7 = vadd.f32 %v4916_v16, %v4726_v35  ;;  %v5036_v34 = vadd.f32 %v4915_v12, %v15229_v57  ;;  %v15232_v12 = vld [vmem:[#allocation132_spill] sm:$0xff] }
 0xa3a   : > { %v4920_v48 = vpop.f32.mrf.mxu0  ;;  %v5015_v42 = vpop.f32.mrf.mxu1  ;;  %v5012_v2 = vadd.f32 %v5011_v9, %v4821_v46  ;;  %v5034_v62 = vadd.f32 %v5004_v37, %v15232_v12  ;;  %v5038_v13 = vadd.f32 %v5010_v63, %v15232_v12 }
 0xa3b   : > { %8209 = vpow2.f32 %v7072_v45  ;;  %v5037_v52 = vadd.f32 %v4917_v7, %v15230_v40  ;;  %v4921_v31 = vadd.f32 %v4920_v48, %v4730_v54  ;;  %v7068_v58 = vmul.f32 -1.442695, %v5036_v34 }
 0xa3c   : > { %v4922_v38 = vpop.f32.mrf.mxu0  ;;  %v5017_v28 = vpop.f32.mrf.mxu1  ;;  %v7077_v54 = vmul.f32 -1.442695, %v5035_v56 }
 0xa3d   : > { %v7073_v4 = vmul.f32 -1.442695, %v5037_v52  ;;  %v5040_v22 = vadd.f32 %v4921_v31, %v15229_v57  ;;  %8211 = vpow2.f32 %v7068_v58  ;;  %v4923_v16 = vadd.f32 %v4922_v38, %v4732_v8 }
 0xa3e   : > { %v4926_v27 = vpop.f32.mrf.mxu0  ;;  %v5021_v34 = vpop.f32.mrf.mxu1  ;;  %v5039_v52 = vadd.f32 %v5012_v2, %v15231_v43  ;;  %v5016_v38 = vadd.f32 %v5015_v42, %v13240_v15 }
 0xa3f   : > { %8213 = vpow2.f32 %v7073_v4  ;;  %v7069_v47 = vmul.f32 -1.442695, %v5040_v22  ;;  %v4927_v45 = vadd.f32 %v4926_v27, %v4736_v61  ;;  %v5041_v7 = vadd.f32 %v4923_v16, %v15230_v40 }
 0xa40   : > { %v4928_v35 = vpop.f32.mrf.mxu0  ;;  %v5018_v61 = vadd.f32 %v5017_v28, %v13242_v20  ;;  %v5023_v17 = vpop.f32.mrf.mxu1  ;;  %v7078_v22 = vmul.f32 -1.442695, %v5039_v52  ;;  %v5042_v15 = vadd.f32 %v5016_v38, %v15232_v12 }
 0xa41   : > { %8215 = vpow2.f32 %v7069_v47  ;;  %v5044_v39 = vadd.f32 %v4927_v45, %v15229_v57  ;;  %v4929_v48 = vadd.f32 %v4928_v35, %v4738_v26  ;;  %v7074_v9 = vmul.f32 -1.442695, %v5041_v7 }
 0xa42   : > { %v4932_v46 = vpop.f32.mrf.mxu0  ;;  %8217 = vtanh.f32 %v5034_v62  ;;  %v5043_v28 = vadd.f32 %v5018_v61, %v15231_v43 }
 0xa43   : > { %v7070_v8 = vmul.f32 -1.442695, %v5044_v39  ;;  %v5045_v37 = vadd.f32 %v4929_v48, %v15230_v40  ;;  %v4933_v31 = vadd.f32 %v4932_v46, %v4742_v53  ;;  %8219 = vpow2.f32 %v7074_v9 }
 0xa44   : > { %v4934_v58 = vpop.f32.mrf.mxu0  ;;  %8221 = vpow2.f32 %v7077_v54  ;;  %v5024_v53 = vadd.f32 %v5023_v17, %v13246_v23  ;;  %v7079_v7 = vmul.f32 -1.442695, %v5043_v28  ;;  %v5027_v23 = vpop.f32.mrf.mxu1  ;;  %v5022_v54 = vadd.f32 %v5021_v34, %v13244_v59 }
 0xa45   : > { %v7075_v26 = vmul.f32 -1.442695, %v5045_v37  ;;  %v5048_v56 = vadd.f32 %v4933_v31, %v15229_v57  ;;  %8223 = vpow2.f32 %v7070_v8  ;;  %v4935_v2 = vadd.f32 %v4934_v58, %v13252_v24 }
 0xa46   : > { %v8208_v4 = vpop.eup %8207  ;;  %v5047_v24 = vadd.f32 %v5024_v53, %v15231_v43  ;;  %v5029_v8 = vpop.f32.mrf.mxu1  ;;  %v5046_v31 = vadd.f32 %v5022_v54, %v15232_v12  ;;  %v5028_v38 = vadd.f32 %v5027_v23, %v13248_v41 }
 0xa47   : > { %v5067_v16 = vadd.f32 1.0, %v8208_v4  ;;  %8225 = vpow2.f32 %v7075_v26  ;;  %v7071_v20 = vmul.f32 -1.442695, %v5048_v56  ;;  %v5049_v42 = vadd.f32 %v4935_v2, %v15230_v40 }
 0xa48   : > { %v8210_v27 = vpop.eup %8209  ;;  %8227 = vtanh.f32 %v5038_v13  ;;  %v7080_v9 = vmul.f32 -1.442695, %v5047_v24  ;;  %v5030_v59 = vadd.f32 %v5029_v8, %v13250_v30 }
 0xa49   : > { %8229 = vrcp.f32 %v5067_v16  ;;  %v5097_v62 = vadd.f32 1.0, %v8210_v27  ;;  %v7076_v48 = vmul.f32 -1.442695, %v5049_v42  ;;  %v5050_v27 = vadd.f32 %v5028_v38, %v15232_v12 }
 0xa4a   : > { %8231 = vpow2.f32 %v7078_v22  ;;  %v8212_v47 = vpop.eup %8211  ;;  %v5051_v16 = vadd.f32 %v5030_v59, %v15231_v43 }
 0xa4b   : > { %8233 = vrcp.f32 %v5097_v62  ;;  %v5068_v63 = vadd.f32 1.0, %v8212_v47 }
 0xa4c   : > { %v8214_v45 = vpop.eup %8213  ;;  %8235 = vpow2.f32 %v7071_v20  ;;  %v15233_v20 = vld [vmem:[#allocation206_spill] sm:$0xff]  ;;  %v7081_v24 = vmul.f32 -1.442695, %v5051_v16 }
 0xa4d   : > { %v5098_v35 = vadd.f32 1.0, %v8214_v45  ;;  %8237 = vtanh.f32 %v5042_v15 }
 0xa4e   : > { %v8216_v39 = vpop.eup %8215  ;;  %8239 = vrcp.f32 %v5068_v63 }
 0xa4f   : > { %8241 = vrcp.f32 %v5098_v35  ;;  %v5069_v52 = vadd.f32 1.0, %v8216_v39  ;;  %v8218_v46 = vpop.eup %8217  ;;  %v15234_v35 = vld [vmem:[#allocation205_spill] sm:$0xff] }
 0xa50   : > { %8243 = vpow2.f32 %v7079_v7  ;;  %v8220_v37 = vpop.eup %8219 }
 0xa51   : > { %8245 = vrcp.f32 %v5069_v52  ;;  %v8222_v13 = vpop.eup %8221  ;;  %v5099_v61 = vadd.f32 1.0, %v8220_v37 }
 0xa52   : > { %8247 = vpow2.f32 %v7076_v48  ;;  %v8224_v17 = vpop.eup %8223  ;;  %v5132_v2 = vadd.f32 1.0, %v8222_v13 }
 0xa53   : > { %8249 = vpow2.f32 %v7080_v9  ;;  %v5070_v58 = vadd.f32 1.0, %v8224_v17 }
 0xa54   : > { %v8226_v34 = vpop.eup %8225  ;;  %8251 = vrcp.f32 %v5099_v61  ;;  %v15235_v61 = vld [vmem:[#allocation204_spill] sm:$0xff] }
 0xa55   : > { %v8228_v26 = vpop.eup %8227  ;;  %8253 = vtanh.f32 %v5046_v31  ;;  %v5100_v56 = vadd.f32 1.0, %v8226_v34 }
 0xa56   : > { %v8230_v4 = vpop.eup %8229  ;;  %8255 = vrcp.f32 %v5070_v58 }
 0xa57   : > { %v8232_v22 = vpop.eup %8231  ;;  %8257 = vrcp.f32 %v5100_v56  ;;  %v5152_v30 = vmul.f32 %v8230_v4, %v8218_v46  ;;  %v15236_v56 = vld [vmem:[#allocation203_spill] sm:$0xff] }
 0xa58   : > { %v8234_v53 = vpop.eup %8233  ;;  %v5133_v42 = vadd.f32 1.0, %v8232_v22  ;;  %8259 = vrcp.f32 %v5132_v2 }
 0xa59   : > { %v8236_v28 = vpop.eup %8235  ;;  %v5147_v62 = vmul.f32 %v15233_v20, %v8234_v53  ;;  %8261 = vtanh.f32 %v5050_v27 }
 0xa5a   : > { %v8238_v15 = vpop.eup %8237  ;;  %v5071_v63 = vadd.f32 1.0, %v8236_v28 }
 0xa5b   : > { %v8240_v41 = vpop.eup %8239  ;;  %v13282_v47 = vadd.f32 %v5152_v30, %v5147_v62 }
 0xa5c   : > { %v8242_v45 = vpop.eup %8241  ;;  %v5153_v23 = vmul.f32 %v8240_v41, %v8228_v26 }
 0xa5d   : > { %v8244_v7 = vpop.eup %8243  ;;  %8263 = vtanh.f32 %v13282_v47  ;;  %v5148_v54 = vmul.f32 %v15234_v35, %v8242_v45 }
 0xa5e   : > { %v8246_v39 = vpop.eup %8245  ;;  %8265 = vrcp.f32 %v5133_v42  ;;  %v5134_v37 = vadd.f32 1.0, %v8244_v7  ;;  %v15239_v42 = vld [vmem:[#allocation64_spill] sm:$0xff]  ;;  %v15241_v7 = vld [vmem:[#allocation59_spill] sm:$0xff] }
 0xa5f   : > { %v8248_v48 = vpop.eup %8247  ;;  %v13286_v52 = vadd.f32 %v5153_v23, %v5148_v54  ;;  %8267 = vpow2.f32 %v7081_v24  ;;  %v5154_v13 = vmul.f32 %v8246_v39, %v8238_v15  ;;  %v15237_v15 = vld [vmem:[#allocation62_spill] sm:$0xff]  ;;  %v15240_v24 = vmov %v15239_v42  ;;  %v15242_v23 = vld [vmem:[#allocation61_spill] sm:$0xff] }
 0xa60   : > { %v8250_v9 = vpop.eup %8249  ;;  %8269 = vrcp.f32 %v5071_v63  ;;  %v5101_v46 = vadd.f32 1.0, %v8248_v48  ;;  %v15238_v41 = vmov %v15237_v15  ;;  %v15243_v39 = vld [vmem:[#allocation202_spill] sm:$0xff] }
 0xa61   : > { %v8252_v8 = vpop.eup %8251  ;;  %8271 = vtanh.f32 %v13286_v52  ;;  %v5135_v38 = vadd.f32 1.0, %v8250_v9  ;;  %v15244_v9 = vld [vmem:[#allocation58_spill] sm:$0xff] }
 0xa62   : > { %v8254_v31 = vpop.eup %8253  ;;  %v5149_v17 = vmul.f32 %v15235_v61, %v8252_v8  ;;  %8273 = vrcp.f32 %v5101_v46  ;;  %v15245_v46 = vld [vmem:[#allocation60_spill] sm:$0xff]  ;;  %v15248_v61 = vld [vmem:[#allocation57_spill] sm:$0xff] }
 0xa63   : > { %v8256_v59 = vpop.eup %8255  ;;  %8275 = vrcp.f32 %v5134_v37  ;;  %v15246_v37 = vmov %v15245_v46 }
 0xa64   : > { %v8258_v34 = vpop.eup %8257  ;;  %v13290_v58 = vadd.f32 %v5154_v13, %v5149_v17  ;;  %v5155_v26 = vmul.f32 %v8256_v59, %v8254_v31  ;;  %v15247_v13 = vld [vmem:[#allocation55_spill] sm:$0xff]  ;;  %v15249_v59 = vld [vmem:[#allocation54_spill] sm:$0xff] }
 0xa65   : > { %v5150_v4 = vmul.f32 %v15236_v56, %v8258_v34  ;;  %v8260_v2 = vpop.eup %8259 }
 0xa66   : > { %8277 = vtanh.f32 %v13290_v58  ;;  %v8262_v16 = vpop.eup %8261 }
 0xa67   : > { %v13295_v22 = vadd.f32 %v5155_v26, %v5150_v4  ;;  %8279 = vrcp.f32 %v5135_v38  ;;  %v15250_v26 = vld [vmem:[#allocation51_spill] sm:$0xff]  ;;  %v15251_v4 = vld [vmem:[#allocation53_spill] sm:$0xff] }
 0xa69   : > { %8281 = vtanh.f32 %v13295_v22 }
 0xa6a   : > { %v8264_v53 = vpop.eup %8263 }
 0xa6b   : > { %v8266_v27 = vpop.eup %8265  ;;  %v13303_v28 = vmul.f32 %v8264_v53, %v8260_v2  ;;  %v15252_v53 = vld [vmem:[#allocation50_spill] sm:$0xff] }
 0xa6c   : > { %v8268_v30 = vpop.eup %8267 }
 0xa6d   : > { %v8270_v20 = vpop.eup %8269  ;;  %5174 = vst [vmem:[%s13301_s26] sm:$0xff] %v13303_v28  ;;  %5244 = vmatmul.mubr.f32.vlgmr.msra.gmra.mxu0 %v13303_v28  ;;  %5339 = vmatmul.mubr.f32.vlgmr.msra.gmra.mxu1 %v13303_v28  ;;  %v5136_v63 = vadd.f32 1.0, %v8268_v30  ;;  %v15253_v30 = vld [vmem:[#allocation52_spill] sm:$0xff] }
 0xa6e   : > { %v8272_v62 = vpop.eup %8271  ;;  %5370 = vmatpush1.msra.mxu0 %v15237_v15  ;;  %5465 = vmatpush1.msra.mxu1 %v15239_v42  ;;  %v5156_v54 = vmul.f32 %v8270_v20, %v8262_v16  ;;  %v15255_v15 = vld [vmem:[#allocation46_spill] sm:$0xff]  ;;  %v15256_v42 = vld [vmem:[#allocation48_spill] sm:$0xff] }
 0xa6f   : > { %v8274_v45 = vpop.eup %8273  ;;  %5371 = vmatprep.subr.mxu0 %v15241_v7  ;;  %5466 = vmatprep.subr.mxu1 %v15242_v23  ;;  %v13313_v35 = vmul.f32 %v8272_v62, %v8266_v27  ;;  %8283 = vrcp.f32 %v5136_v63  ;;  %v15254_v62 = vld [vmem:[#allocation47_spill] sm:$0xff] }
 0xa70   : > { %v5151_v48 = vmul.f32 %v15243_v39, %v8274_v45  ;;  %5372 = vmatpush1.msra.mxu0 %v15244_v9  ;;  %5467 = vmatpush1.msra.mxu1 %v15245_v46  ;;  %v8276_v8 = vpop.eup %8275  ;;  %v15257_v63 = vld [vmem:[#allocation43_spill] sm:$0xff]  ;;  %v15259_v46 = vld [vmem:[#allocation42_spill] sm:$0xff] }
 0xa71   : > { %5249 = vmatprep.mubr.f32.mxu0 %v15154_v21  ;;  %5344 = vmatprep.mubr.f32.mxu1 %v15154_v21  ;;  %5175 = vst [vmem:[%s13301_s26 + $0x8] sm:$0xff] %v13313_v35 }
 0xa72   : > { %v13322_v31 = vadd.f32 %v5156_v54, %v5151_v48  ;;  %5373 = vmatprep.subr.mxu0 %v15247_v13  ;;  %5468 = vmatprep.subr.mxu1 %v15248_v61  ;;  %v15258_v54 = vld [vmem:[#allocation45_spill] sm:$0xff]  ;;  %v15281_v48 = vld [vmem:[#allocation19_spill] sm:$0xff] }
 0xa73   : > { %v8278_v17 = vpop.eup %8277  ;;  %5250 = vmatmul.mubr.f32.gmra.mxu0 %v13313_v35  ;;  %5345 = vmatmul.mubr.f32.gmra.mxu1 %v13313_v35 }
 0xa74   : > { %8285 = vtanh.f32 %v13322_v31  ;;  %5374 = vmatpush1.msra.mxu0 %v15249_v59  ;;  %5469 = vmatpush1.msra.mxu1 %v15139_v10  ;;  %v13331_v34 = vmul.f32 %v8278_v17, %v8276_v8  ;;  %v8280_v38 = vpop.eup %8279  ;;  %v15260_v8 = vld [vmem:[#allocation44_spill] sm:$0xff]  ;;  %v15261_v17 = vld [vmem:[#allocation39_spill] sm:$0xff] }
 0xa75   : > { %5375 = vmatprep.subr.mxu0 %v15250_v26  ;;  %5470 = vmatprep.subr.mxu1 %v15251_v4  ;;  %v15262_v26 = vld [vmem:[#allocation41_spill] sm:$0xff] }
 0xa76   : > { %v8282_v16 = vpop.eup %8281  ;;  %5376 = vmatpush1.msra.mxu0 %v15252_v53  ;;  %5471 = vmatpush1.msra.mxu1 %v15253_v30  ;;  %5176 = vst [vmem:[%s13301_s26 + $0x10] sm:$0xff] %v13331_v34  ;;  %v15263_v53 = vld [vmem:[#allocation38_spill] sm:$0xff] }
 0xa77   : > { %5255 = vmatprep.mubr.f32.mxu0 %v15154_v21  ;;  %5350 = vmatprep.mubr.f32.mxu1 %v15154_v21  ;;  %v13341_v20 = vmul.f32 %v8282_v16, %v8280_v38 }
 0xa78   : > { %5377 = vmatprep.subr.mxu0 %v15254_v62  ;;  %5472 = vmatprep.subr.mxu1 %v15145_v18  ;;  %v15264_v62 = vld [vmem:[#allocation40_spill] sm:$0xff] }
 0xa79   : > { %5256 = vmatmul.mubr.f32.gmra.mxu0 %v13331_v34  ;;  %5351 = vmatmul.mubr.f32.gmra.mxu1 %v13331_v34  ;;  %5177 = vst [vmem:[%s13301_s26 + $0x18] sm:$0xff] %v13341_v20 }
 0xa7a   : > { %5378 = vmatpush1.msra.mxu0 %v15255_v15  ;;  %5473 = vmatpush1.msra.mxu1 %v15256_v42  ;;  %v15265_v42 = vld [vmem:[#allocation35_spill] sm:$0xff] }
 0xa7b   : > { %5379 = vmatprep.subr.mxu0 %v15257_v63  ;;  %5474 = vmatprep.subr.mxu1 %v15258_v54  ;;  %v15266_v63 = vld [vmem:[#allocation37_spill] sm:$0xff]  ;;  %v15267_v54 = vld [vmem:[#allocation34_spill] sm:$0xff] }
 0xa7c   : > { %5380 = vmatpush1.msra.mxu0 %v15259_v46  ;;  %5475 = vmatpush1.msra.mxu1 %v15260_v8  ;;  %v8284_v4 = vpop.eup %8283  ;;  %v15268_v46 = vld [vmem:[#allocation36_spill] sm:$0xff] }
 0xa7d   : > { %5261 = vmatprep.mubr.f32.mxu0 %v15154_v21  ;;  %5356 = vmatprep.mubr.f32.mxu1 %v15154_v21 }
 0xa7e   : > { %5381 = vmatprep.subr.mxu0 %v15261_v17  ;;  %5476 = vmatprep.subr.mxu1 %v15262_v26  ;;  %v15269_v17 = vld [vmem:[#allocation31_spill] sm:$0xff]  ;;  %v15270_v26 = vld [vmem:[#allocation33_spill] sm:$0xff] }
 0xa7f   : > { %5262 = vmatmul.mubr.f32.gmra.mxu0 %v13341_v20  ;;  %5357 = vmatmul.mubr.f32.gmra.mxu1 %v13341_v20 }
 0xa80   : > { %5382 = vmatpush1.msra.mxu0 %v15263_v53  ;;  %5477 = vmatpush1.msra.mxu1 %v15264_v62  ;;  %v15271_v53 = vld [vmem:[#allocation30_spill] sm:$0xff]  ;;  %v15272_v62 = vld [vmem:[#allocation32_spill] sm:$0xff] }
 0xa81   : > { %v8286_v15 = vpop.eup %8285  ;;  %5383 = vmatprep.subr.mxu0 %v15265_v42  ;;  %5478 = vmatprep.subr.mxu1 %v15266_v63  ;;  %v15275_v42 = vld [vmem:[#allocation26_spill] sm:$0xff]  ;;  %v15276_v63 = vld [vmem:[#allocation28_spill] sm:$0xff] }
 0xa82   : > { %5384 = vmatpush1.msra.mxu0 %v15267_v54  ;;  %5479 = vmatpush1.msra.mxu1 %v15268_v46  ;;  %v13367_v8 = vmul.f32 %v8286_v15, %v8284_v4  ;;  %v15273_v4 = vld [vmem:[#allocation27_spill] sm:$0xff]  ;;  %v15274_v15 = vld [vmem:[#allocation29_spill] sm:$0xff] }
 0xa83   : > { %5267 = vmatprep.mubr.f32.mxu0 %v15154_v21  ;;  %5362 = vmatprep.mubr.f32.mxu1 %v15154_v21  ;;  %v15277_v54 = vld [vmem:[#allocation23_spill] sm:$0xff]  ;;  %v15278_v46 = vld [vmem:[#allocation25_spill] sm:$0xff] }
 0xa84   : > { %5385 = vmatprep.subr.mxu0 %v15269_v17  ;;  %5480 = vmatprep.subr.mxu1 %v15270_v26  ;;  %5178 = vst [vmem:[%s13301_s26 + $0x20] sm:$0xff] %v13367_v8  ;;  %v15279_v17 = vld [vmem:[#allocation22_spill] sm:$0xff]  ;;  %v15280_v26 = vld [vmem:[#allocation24_spill] sm:$0xff] }
 0xa85   : > { %5268 = vmatmul.mubr.f32.gmra.mxu0 %v13367_v8  ;;  %5363 = vmatmul.mubr.f32.gmra.mxu1 %v13367_v8 }
 0xa86   : > { %5386 = vmatpush1.msra.mxu0 %v15271_v53  ;;  %5481 = vmatpush1.msra.mxu1 %v15272_v62  ;;  %v15282_v53 = vld [vmem:[#allocation21_spill] sm:$0xff]  ;;  %v15283_v62 = vld [vmem:[#allocation18_spill] sm:$0xff] }
 0xa87   : > { %5387 = vmatprep.subr.mxu0 %v15273_v4  ;;  %5482 = vmatprep.subr.mxu1 %v15274_v15  ;;  %v15284_v30 = vmov %v15283_v62  ;;  %v15285_v4 = vld [vmem:[#allocation20_spill] sm:$0xff]  ;;  %v15287_v15 = vld [vmem:[#allocation15_spill] sm:$0xff] }
 0xa88   : > { %5388 = vmatpush1.msra.mxu0 %v15275_v42  ;;  %5483 = vmatpush1.msra.mxu1 %v15276_v63  ;;  %v15286_v16 = vmov %v15285_v4  ;;  %v15288_v38 = vmov %v15287_v15  ;;  %v15289_v42 = vld [vmem:[#allocation17_spill] sm:$0xff]  ;;  %v15290_v63 = vld [vmem:[#allocation14_spill] sm:$0xff] }
 0xa89   : > { %5389 = vmatprep.subr.mxu0 %v15277_v54  ;;  %5484 = vmatprep.subr.mxu1 %v15278_v46  ;;  %v15291_v54 = vld [vmem:[#allocation16_spill] sm:$0xff]  ;;  %v15292_v46 = vld [vmem:[#allocation11_spill] sm:$0xff] }
 0xa8a   : > { %5390 = vmatpush1.msra.mxu0 %v15279_v17  ;;  %5485 = vmatpush1.msra.mxu1 %v15280_v26  ;;  %v15293_v17 = vld [vmem:[#allocation13_spill] sm:$0xff]  ;;  %v15294_v26 = vld [vmem:[#allocation12_spill] sm:$0xff] }
 0xa8b   : > { %5391 = vmatprep.subr.mxu0 %v15281_v48  ;;  %5486 = vmatprep.subr.mxu1 %v15282_v53  ;;  %v15298_v53 = vld [vmem:[#allocation117_spill] sm:$0xff] }
 0xa8c   : > { %5392 = vmatpush1.msra.mxu0 %v15283_v62  ;;  %5487 = vmatpush1.msra.mxu1 %v15285_v4  ;;  %v15299_v62 = vld [vmem:[#allocation114_spill] sm:$0xff]  ;;  %v15300_v4 = vld [vmem:[#allocation116_spill] sm:$0xff] }
 0xa8d   : > { %5393 = vmatprep.subr.mxu0 %v15287_v15  ;;  %5488 = vmatprep.subr.mxu1 %v15289_v42  ;;  %v15301_v15 = vld [vmem:[#allocation111_spill] sm:$0xff]  ;;  %v15302_v42 = vld [vmem:[#allocation113_spill] sm:$0xff] }
 0xa8e   : > { %5394 = vmatpush1.msra.mxu0 %v15290_v63  ;;  %5489 = vmatpush1.msra.mxu1 %v15291_v54  ;;  %v15304_v63 = vld [vmem:[#allocation112_spill] sm:$0xff]  ;;  %v15305_v54 = vld [vmem:[#allocation107_spill] sm:$0xff] }
 0xa8f   : > { %5395 = vmatprep.subr.mxu0 %v15292_v46  ;;  %5490 = vmatprep.subr.mxu1 %v15293_v17  ;;  %v15306_v46 = vld [vmem:[#allocation109_spill] sm:$0xff]  ;;  %v15307_v17 = vld [vmem:[#allocation106_spill] sm:$0xff] }
 0xa90   : > { %5396 = vmatpush1.msra.mxu0 %v15184_v60  ;;  %5491 = vmatpush1.msra.mxu1 %v15294_v26  ;;  %v15308_v26 = vld [vmem:[#allocation108_spill] sm:$0xff] }
 0xa91   : > { %5397 = vmatprep.subr.mxu0 %v15187_v36  ;;  %5492 = vmatprep.subr.mxu1 %v15189_v33 }
 0xa92   : > { %5398 = vmatpush1.msra.mxu0 %v15191_v6  ;;  %5493 = vmatpush1.msra.mxu1 %v15193_v25 }
 0xa93   : > { %5399 = vmatprep.subr.mxu0 %v15194_v19  ;;  %5494 = vmatprep.subr.mxu1 %v15196_v51 }
 0xa94   : > { %5400 = vmatpush1.msra.mxu0 %v15198_v49  ;;  %5433 = vmatprep.mubr.f32.mxu0 %v15154_v21 }
 0xa95   : > { %5495 = vmatpush1.msra.mxu1 %v15200_v1  ;;  %5528 = vmatprep.mubr.f32.mxu1 %v15154_v21 }
 0xa96   : > { %5434 = vmatmul.mubr.f32.vlgmr.msra.gmra.mxu0 %v13303_v28  ;;  %5529 = vmatmul.mubr.f32.vlgmr.msra.gmra.mxu1 %v13303_v28  ;;  %v15295_v28 = vld [vmem:[#allocation118_spill] sm:$0xff] }
 0xa97   : > { %5439 = vmatprep.mubr.f32.mxu0 %v15154_v21  ;;  %5534 = vmatprep.mubr.f32.mxu1 %v15154_v21 }
 0xa98   : > { %5707 = vmatprep.subr.mxu0 %v15064_v29  ;;  %5802 = vmatprep.subr.mxu1 %v15065_v14 }
 0xa99   : > { %5708 = vmatpush1.msra.mxu0 %v15066_v55  ;;  %5803 = vmatpush1.msra.mxu1 %v15067_v50 }
 0xa9a   : > { %5440 = vmatmul.mubr.f32.gmra.mxu0 %v13313_v35  ;;  %5535 = vmatmul.mubr.f32.gmra.mxu1 %v13313_v35  ;;  %v15296_v35 = vld [vmem:[#allocation120_spill] sm:$0xff] }
 0xa9b   : > { %5445 = vmatprep.mubr.f32.mxu0 %v15154_v21  ;;  %5540 = vmatprep.mubr.f32.mxu1 %v15154_v21 }
 0xa9c   : > { %5709 = vmatprep.subr.mxu0 %v15068_v3  ;;  %5804 = vmatprep.subr.mxu1 %v15069_v5 }
 0xa9d   : > { %5710 = vmatpush1.msra.mxu0 %v15070_v32  ;;  %5805 = vmatpush1.msra.mxu1 %v15071_v11 }
 0xa9e   : > { %5446 = vmatmul.mubr.f32.gmra.mxu0 %v13331_v34  ;;  %5541 = vmatmul.mubr.f32.gmra.mxu1 %v13331_v34  ;;  %v15297_v34 = vld [vmem:[#allocation115_spill] sm:$0xff] }
 0xa9f   : > { %5451 = vmatprep.mubr.f32.mxu0 %v15154_v21  ;;  %5546 = vmatprep.mubr.f32.mxu1 %v15154_v21 }
 0xaa0   : > { %5711 = vmatprep.subr.mxu0 %v15072_v44  ;;  %5806 = vmatprep.subr.mxu1 %v15073_v0 }
 0xaa1   : > { %5712 = vmatpush1.msra.mxu0 %v15295_v28  ;;  %5807 = vmatpush1.msra.mxu1 %v15296_v35  ;;  %v15309_v35 = vld [vmem:[#allocation103_spill] sm:$0xff] }
 0xaa2   : > { %5452 = vmatmul.mubr.f32.gmra.mxu0 %v13341_v20  ;;  %5547 = vmatmul.mubr.f32.gmra.mxu1 %v13341_v20  ;;  %v15303_v20 = vld [vmem:[#allocation110_spill] sm:$0xff] }
 0xaa3   : > { %5457 = vmatprep.mubr.f32.mxu0 %v15154_v21  ;;  %5552 = vmatprep.mubr.f32.mxu1 %v15154_v21 }
 0xaa4   : > { %5713 = vmatprep.subr.mxu0 %v15297_v34  ;;  %5808 = vmatprep.subr.mxu1 %v15298_v53  ;;  %v15310_v53 = vld [vmem:[#allocation105_spill] sm:$0xff] }
 0xaa5   : > { %5714 = vmatpush1.msra.mxu0 %v15299_v62  ;;  %5809 = vmatpush1.msra.mxu1 %v15300_v4  ;;  %v15312_v62 = vld [vmem:[#allocation104_spill] sm:$0xff]  ;;  %v15313_v4 = vld [vmem:[#allocation99_spill] sm:$0xff] }
 0xaa6   : > { %5458 = vmatmul.mubr.f32.gmra.mxu0 %v13367_v8  ;;  %5553 = vmatmul.mubr.f32.gmra.mxu1 %v13367_v8  ;;  %v15311_v8 = vld [vmem:[#allocation102_spill] sm:$0xff] }
 0xaa7   : > { %5715 = vmatprep.subr.mxu0 %v15301_v15  ;;  %5810 = vmatprep.subr.mxu1 %v15302_v42  ;;  %v15314_v15 = vld [vmem:[#allocation101_spill] sm:$0xff]  ;;  %v15315_v42 = vld [vmem:[#allocation98_spill] sm:$0xff] }
 0xaa8   : > { %5716 = vmatpush1.msra.mxu0 %v15303_v20  ;;  %5811 = vmatpush1.msra.mxu1 %v15304_v63  ;;  %v15316_v20 = vld [vmem:[#allocation100_spill] sm:$0xff]  ;;  %v15317_v63 = vld [vmem:[#allocation95_spill] sm:$0xff] }
 0xaa9   : > { %5717 = vmatprep.subr.mxu0 %v15305_v54  ;;  %5812 = vmatprep.subr.mxu1 %v15306_v46  ;;  %v15318_v54 = vld [vmem:[#allocation97_spill] sm:$0xff]  ;;  %v15319_v46 = vld [vmem:[#allocation94_spill] sm:$0xff] }
 0xaaa   : > { %5718 = vmatpush1.msra.mxu0 %v15307_v17  ;;  %5813 = vmatpush1.msra.mxu1 %v15308_v26  ;;  %v15320_v17 = vld [vmem:[#allocation96_spill] sm:$0xff]  ;;  %v15321_v26 = vld [vmem:[#allocation91_spill] sm:$0xff] }
 0xaab   : > { %5719 = vmatprep.subr.mxu0 %v15309_v35  ;;  %5814 = vmatprep.subr.mxu1 %v15310_v53  ;;  %v15322_v35 = vld [vmem:[#allocation93_spill] sm:$0xff]  ;;  %v15323_v53 = vld [vmem:[#allocation90_spill] sm:$0xff] }
 0xaac   : > { %5720 = vmatpush1.msra.mxu0 %v15311_v8  ;;  %5815 = vmatpush1.msra.mxu1 %v15312_v62  ;;  %v15324_v8 = vld [vmem:[#allocation92_spill] sm:$0xff]  ;;  %v15325_v62 = vld [vmem:[#allocation87_spill] sm:$0xff] }
 0xaad   : > { %5721 = vmatprep.subr.mxu0 %v15313_v4  ;;  %5816 = vmatprep.subr.mxu1 %v15314_v15  ;;  %v15326_v4 = vld [vmem:[#allocation89_spill] sm:$0xff]  ;;  %v15327_v15 = vld [vmem:[#allocation86_spill] sm:$0xff] }
 0xaae   : > { %5722 = vmatpush1.msra.mxu0 %v15315_v42  ;;  %5817 = vmatpush1.msra.mxu1 %v15316_v20  ;;  %v15328_v42 = vld [vmem:[#allocation88_spill] sm:$0xff]  ;;  %v15329_v20 = vld [vmem:[#allocation83_spill] sm:$0xff] }
 0xaaf   : > { %5723 = vmatprep.subr.mxu0 %v15317_v63  ;;  %5818 = vmatprep.subr.mxu1 %v15318_v54  ;;  %v15330_v63 = vld [vmem:[#allocation85_spill] sm:$0xff]  ;;  %v15331_v54 = vld [vmem:[#allocation82_spill] sm:$0xff] }
 0xab0   : > { %5724 = vmatpush1.msra.mxu0 %v15319_v46  ;;  %5819 = vmatpush1.msra.mxu1 %v15320_v17  ;;  %v15332_v46 = vld [vmem:[#allocation84_spill] sm:$0xff]  ;;  %v15333_v17 = vld [vmem:[#allocation79_spill] sm:$0xff] }
 0xab1   : > { %5725 = vmatprep.subr.mxu0 %v15321_v26  ;;  %5820 = vmatprep.subr.mxu1 %v15322_v35  ;;  %v15334_v26 = vld [vmem:[#allocation81_spill] sm:$0xff]  ;;  %v15335_v35 = vld [vmem:[#allocation78_spill] sm:$0xff] }
 0xab2   : > { %5726 = vmatpush1.msra.mxu0 %v15323_v53  ;;  %5821 = vmatpush1.msra.mxu1 %v15324_v8  ;;  %v15336_v53 = vld [vmem:[#allocation80_spill] sm:$0xff]  ;;  %v15337_v8 = vld [vmem:[#allocation75_spill] sm:$0xff] }
 0xab3   : > { %5727 = vmatprep.subr.mxu0 %v15325_v62  ;;  %5822 = vmatprep.subr.mxu1 %v15326_v4  ;;  %v15338_v62 = vld [vmem:[#allocation77_spill] sm:$0xff]  ;;  %v15339_v4 = vld [vmem:[#allocation74_spill] sm:$0xff] }
 0xab4   : > { %5728 = vmatpush1.msra.mxu0 %v15327_v15  ;;  %5823 = vmatpush1.msra.mxu1 %v15328_v42  ;;  %v15340_v15 = vld [vmem:[#allocation76_spill] sm:$0xff]  ;;  %v15341_v42 = vld [vmem:[#allocation71_spill] sm:$0xff] }
 0xab5   : > { %5729 = vmatprep.subr.mxu0 %v15329_v20  ;;  %5824 = vmatprep.subr.mxu1 %v15330_v63  ;;  %v15342_v20 = vld [vmem:[#allocation73_spill] sm:$0xff]  ;;  %v15343_v63 = vld [vmem:[#allocation70_spill] sm:$0xff] }
 0xab6   : > { %5730 = vmatpush1.msra.mxu0 %v15331_v54  ;;  %5825 = vmatpush1.msra.mxu1 %v15332_v46  ;;  %v15344_v54 = vld [vmem:[#allocation72_spill] sm:$0xff]  ;;  %v15345_v46 = vld [vmem:[#allocation67_spill] sm:$0xff] }
 0xab7   : > { %5731 = vmatprep.subr.mxu0 %v15333_v17  ;;  %5826 = vmatprep.subr.mxu1 %v15334_v26  ;;  %v15346_v17 = vld [vmem:[#allocation69_spill] sm:$0xff]  ;;  %v15347_v26 = vld [vmem:[#allocation66_spill] sm:$0xff] }
 0xab8   : > { %5732 = vmatpush1.msra.mxu0 %v15335_v35  ;;  %5827 = vmatpush1.msra.mxu1 %v15336_v53  ;;  %v15348_v35 = vld [vmem:[#allocation68_spill] sm:$0xff]  ;;  %v15349_v53 = vld [vmem:[#allocation63_spill] sm:$0xff] }
 0xab9   : > { %5733 = vmatprep.subr.mxu0 %v15337_v8  ;;  %5828 = vmatprep.subr.mxu1 %v15338_v62  ;;  %v15350_v8 = vld [vmem:[#allocation65_spill] sm:$0xff] }
 0xaba   : > { %5734 = vmatpush1.msra.mxu0 %v15339_v4  ;;  %5829 = vmatpush1.msra.mxu1 %v15340_v15 }
 0xabb   : > { %5735 = vmatprep.subr.mxu0 %v15341_v42  ;;  %5830 = vmatprep.subr.mxu1 %v15342_v20 }
 0xabc   : > { %5736 = vmatpush1.msra.mxu0 %v15343_v63  ;;  %5831 = vmatpush1.msra.mxu1 %v15344_v54 }
 0xabd   : > { %5737 = vmatprep.subr.mxu0 %v15345_v46  ;;  %5832 = vmatprep.subr.mxu1 %v15346_v17 }
 0xabe   : > { %5738 = vmatpush1.msra.mxu0 %v15347_v26  ;;  %5833 = vmatpush1.msra.mxu1 %v15348_v35 }
 0xabf   : > { %5771 = vmatprep.mubr.f32.mxu0 %v15154_v21  ;;  %5866 = vmatprep.mubr.f32.mxu1 %v15154_v21 }
 0xac0   : > { %5897 = vmatprep.subr.mxu0 %v15349_v53  ;;  %5992 = vmatprep.subr.mxu1 %v15350_v8 }
 0xb2d   : > { %v5245_v62 = vpop.f32.mrf.mxu0  ;;  %v5340_v4 = vpop.f32.mrf.mxu1 }
 0xb2f   : > { %v5247_v15 = vpop.f32.mrf.mxu0  ;;  %v5342_v42 = vpop.f32.mrf.mxu1 }
 0xb33   : > { %v5251_v20 = vpop.f32.mrf.mxu0  ;;  %v5346_v63 = vpop.f32.mrf.mxu1 }
 0xb35   : > { %v5253_v54 = vpop.f32.mrf.mxu0  ;;  %v5348_v46 = vpop.f32.mrf.mxu1 }
 0xb39   : > { %v5257_v17 = vpop.f32.mrf.mxu0  ;;  %v13495_v26 = vpop.f32.mrf.mxu1 }
 0xb3b   : > { %v5259_v35 = vpop.f32.mrf.mxu0  ;;  %v13497_v44 = vpop.f32.mrf.mxu1 }
 0xb3f   : > { %v5263_v32 = vpop.f32.mrf.mxu0  ;;  %v13499_v11 = vpop.f32.mrf.mxu1 }
 0xb41   : > { %v5265_v53 = vpop.f32.mrf.mxu0  ;;  %v13501_v28 = vpop.f32.mrf.mxu1 }
 0xb45   : > { %v5269_v8 = vpop.f32.mrf.mxu0  ;;  %v13503_v3 = vpop.f32.mrf.mxu1 }
 0xb47   : > { %v13505_v50 = vpop.f32.mrf.mxu0  ;;  %v13507_v5 = vpop.f32.mrf.mxu1 }
 0xb56   : > { %v5435_v0 = vpop.f32.mrf.mxu0  ;;  %v5530_v55 = vpop.f32.mrf.mxu1 }
 0xb57   : > { %v5436_v34 = vadd.f32 %v5435_v0, %v5245_v62  ;;  %v5531_v27 = vadd.f32 %v5530_v55, %v5340_v4 }
 0xb58   : > { %v5437_v14 = vpop.f32.mrf.mxu0  ;;  %v5532_v29 = vpop.f32.mrf.mxu1 }
 0xb59   : > { %v5559_v1 = vadd.f32 %v5436_v34, %v15229_v57  ;;  %v5438_v49 = vadd.f32 %v5437_v14, %v5247_v15  ;;  %v5533_v56 = vadd.f32 %v5532_v29, %v5342_v42 }
 0xb5a   : > { %v5441_v51 = vpop.f32.mrf.mxu0  ;;  %v5536_v19 = vpop.f32.mrf.mxu1 }
 0xb5b   : > { %v7083_v25 = vmul.f32 -1.442695, %v5559_v1  ;;  %v5560_v6 = vadd.f32 %v5438_v49, %v15230_v40  ;;  %v5442_v33 = vadd.f32 %v5441_v51, %v5251_v20  ;;  %v5562_v51 = vadd.f32 %v5533_v56, %v15231_v43 }
 0xb5c   : > { %v5443_v36 = vpop.f32.mrf.mxu0  ;;  %v5538_v18 = vpop.f32.mrf.mxu1  ;;  %v5537_v4 = vadd.f32 %v5536_v19, %v5346_v63 }
 0xb5d   : > { %8287 = vpow2.f32 %v7083_v25  ;;  %v7088_v60 = vmul.f32 -1.442695, %v5560_v6  ;;  %v5444_v2 = vadd.f32 %v5443_v36, %v5253_v54  ;;  %v5563_v39 = vadd.f32 %v5442_v33, %v15229_v57 }
 0xb5e   : > { %v5447_v0 = vpop.f32.mrf.mxu0  ;;  %v5542_v62 = vpop.f32.mrf.mxu1  ;;  %v5539_v29 = vadd.f32 %v5538_v18, %v5348_v46  ;;  %v5561_v33 = vadd.f32 %v5531_v27, %v15232_v12  ;;  %v7093_v20 = vmul.f32 -1.442695, %v5562_v51 }
 0xb5f   : > { %8289 = vpow2.f32 %v7088_v60  ;;  %v5564_v14 = vadd.f32 %v5444_v2, %v15230_v40  ;;  %v5448_v34 = vadd.f32 %v5447_v0, %v5257_v17  ;;  %v7084_v15 = vmul.f32 -1.442695, %v5563_v39 }
 0xb60   : > { %v5449_v1 = vpop.f32.mrf.mxu0  ;;  %v5544_v45 = vpop.f32.mrf.mxu1  ;;  %v5566_v17 = vadd.f32 %v5539_v29, %v15231_v43 }
 0xb61   : > { %v7089_v49 = vmul.f32 -1.442695, %v5564_v14  ;;  %v5567_v25 = vadd.f32 %v5448_v34, %v15229_v57  ;;  %8291 = vpow2.f32 %v7084_v15  ;;  %v5450_v36 = vadd.f32 %v5449_v1, %v5259_v35 }
 0xb62   : > { %v5453_v6 = vpop.f32.mrf.mxu0  ;;  %v5548_v39 = vpop.f32.mrf.mxu1  ;;  %v5545_v19 = vadd.f32 %v5544_v45, %v13497_v44  ;;  %v5543_v34 = vadd.f32 %v5542_v62, %v13495_v26  ;;  %v7094_v51 = vmul.f32 -1.442695, %v5566_v17 }
 0xb63   : > { %8293 = vpow2.f32 %v7089_v49  ;;  %v7085_v55 = vmul.f32 -1.442695, %v5567_v25  ;;  %v5454_v60 = vadd.f32 %v5453_v6, %v5263_v32  ;;  %v5568_v2 = vadd.f32 %v5450_v36, %v15230_v40 }
 0xb64   : > { %v5455_v42 = vpop.f32.mrf.mxu0  ;;  %v5565_v32 = vadd.f32 %v5537_v4, %v15232_v12  ;;  %v5550_v63 = vpop.f32.mrf.mxu1  ;;  %v5570_v44 = vadd.f32 %v5545_v19, %v15231_v43  ;;  %v5569_v26 = vadd.f32 %v5543_v34, %v15232_v12 }
 0xb65   : > { %8295 = vpow2.f32 %v7085_v55  ;;  %v5571_v56 = vadd.f32 %v5454_v60, %v15229_v57  ;;  %v5456_v54 = vadd.f32 %v5455_v42, %v5265_v53  ;;  %v7090_v18 = vmul.f32 -1.442695, %v5568_v2 }
 0xb66   : > { %v5459_v46 = vpop.f32.mrf.mxu0  ;;  %8297 = vtanh.f32 %v5561_v33  ;;  %v7095_v60 = vmul.f32 -1.442695, %v5570_v44  ;;  %v5549_v2 = vadd.f32 %v5548_v39, %v13499_v11 }
 0xb67   : > { %v7086_v35 = vmul.f32 -1.442695, %v5571_v56  ;;  %v5572_v27 = vadd.f32 %v5456_v54, %v15230_v40  ;;  %v5460_v0 = vadd.f32 %v5459_v46, %v5269_v8  ;;  %8299 = vpow2.f32 %v7090_v18 }
 0xb68   : > { %v5461_v14 = vpop.f32.mrf.mxu0  ;;  %8301 = vpow2.f32 %v7093_v20  ;;  %v5551_v8 = vadd.f32 %v5550_v63, %v13501_v28  ;;  %v5554_v28 = vpop.f32.mrf.mxu1 }
 0xb69   : > { %v7091_v53 = vmul.f32 -1.442695, %v5572_v27  ;;  %v5575_v15 = vadd.f32 %v5460_v0, %v15229_v57  ;;  %8303 = vpow2.f32 %v7086_v35  ;;  %v5462_v49 = vadd.f32 %v5461_v14, %v13505_v50 }
 0xb6a   : > { %v8288_v1 = vpop.eup %8287  ;;  %v5574_v50 = vadd.f32 %v5551_v8, %v15231_v43  ;;  %v5556_v18 = vpop.f32.mrf.mxu1  ;;  %v5573_v35 = vadd.f32 %v5549_v2, %v15232_v12  ;;  %v5555_v63 = vadd.f32 %v5554_v28, %v13503_v3 }
 0xb6b   : > { %v5594_v25 = vadd.f32 1.0, %v8288_v1  ;;  %8305 = vpow2.f32 %v7091_v53  ;;  %v7087_v45 = vmul.f32 -1.442695, %v5575_v15  ;;  %v5576_v62 = vadd.f32 %v5462_v49, %v15230_v40 }
 0xb6c   : > { %v8290_v29 = vpop.eup %8289  ;;  %8307 = vtanh.f32 %v5565_v32  ;;  %v7096_v54 = vmul.f32 -1.442695, %v5574_v50  ;;  %v5557_v11 = vadd.f32 %v5556_v18, %v13507_v5 }
 0xb6d   : > { %8309 = vrcp.f32 %v5594_v25  ;;  %v5624_v36 = vadd.f32 1.0, %v8290_v29  ;;  %v7092_v20 = vmul.f32 -1.442695, %v5576_v62  ;;  %v5577_v25 = vadd.f32 %v5555_v63, %v15232_v12 }
 0xb6e   : > { %8311 = vpow2.f32 %v7094_v51  ;;  %v8292_v6 = vpop.eup %8291  ;;  %v5578_v51 = vadd.f32 %v5557_v11, %v15231_v43 }
 0xb6f   : > { %8313 = vrcp.f32 %v5624_v36  ;;  %v5595_v55 = vadd.f32 1.0, %v8292_v6 }
 0xb70   : > { %v8294_v33 = vpop.eup %8293  ;;  %8315 = vpow2.f32 %v7087_v45 }
 0xb71   : > { %v5625_v4 = vadd.f32 1.0, %v8294_v33  ;;  %8317 = vtanh.f32 %v5569_v26  ;;  %v7097_v26 = vmul.f32 -1.442695, %v5578_v51 }
 0xb72   : > { %v8296_v42 = vpop.eup %8295  ;;  %8319 = vrcp.f32 %v5595_v55 }
 0xb73   : > { %8321 = vrcp.f32 %v5625_v4  ;;  %v5596_v56 = vadd.f32 1.0, %v8296_v42  ;;  %v8298_v17 = vpop.eup %8297 }
 0xb74   : > { %8323 = vpow2.f32 %v7095_v60  ;;  %v8300_v46 = vpop.eup %8299 }
 0xb75   : > { %8325 = vrcp.f32 %v5596_v56  ;;  %v8302_v27 = vpop.eup %8301  ;;  %v5626_v0 = vadd.f32 1.0, %v8300_v46 }
 0xb76   : > { %8327 = vpow2.f32 %v7092_v20  ;;  %v8304_v32 = vpop.eup %8303  ;;  %v5659_v1 = vadd.f32 1.0, %v8302_v27 }
 0xb77   : > { %8329 = vpow2.f32 %v7096_v54  ;;  %v5597_v19 = vadd.f32 1.0, %v8304_v32 }
 0xb78   : > { %v8306_v39 = vpop.eup %8305  ;;  %8331 = vrcp.f32 %v5626_v0 }
 0xb79   : > { %v8308_v14 = vpop.eup %8307  ;;  %8333 = vtanh.f32 %v5573_v35  ;;  %v5627_v34 = vadd.f32 1.0, %v8306_v39 }
 0xb7a   : > { %v8310_v53 = vpop.eup %8309  ;;  %8335 = vrcp.f32 %v5597_v19 }
 0xb7b   : > { %v8312_v15 = vpop.eup %8311  ;;  %8337 = vrcp.f32 %v5627_v34  ;;  %v5679_v5 = vmul.f32 %v8310_v53, %v8298_v17 }
 0xb7c   : > { %v8314_v49 = vpop.eup %8313  ;;  %v5660_v45 = vadd.f32 1.0, %v8312_v15  ;;  %8339 = vrcp.f32 %v5659_v1 }
 0xb7d   : > { %v8316_v8 = vpop.eup %8315  ;;  %v5674_v29 = vmul.f32 %v8314_v49, %v13282_v47  ;;  %8341 = vtanh.f32 %v5577_v25 }
 0xb7e   : > { %v8318_v44 = vpop.eup %8317  ;;  %v5598_v6 = vadd.f32 1.0, %v8316_v8 }
 0xb7f   : > { %v8320_v3 = vpop.eup %8319  ;;  %v13537_v36 = vadd.f32 %v5679_v5, %v5674_v29 }
 0xb80   : > { %v8322_v62 = vpop.eup %8321  ;;  %v5680_v33 = vmul.f32 %v8320_v3, %v8308_v14 }
 0xb81   : > { %v8324_v50 = vpop.eup %8323  ;;  %8343 = vtanh.f32 %v13537_v36  ;;  %v5675_v55 = vmul.f32 %v8322_v62, %v13286_v52  ;;  %v15355_v62 = vld [vmem:[#allocation52_spill] sm:$0xff] }
 0xb82   : > { %v8326_v60 = vpop.eup %8325  ;;  %8345 = vrcp.f32 %v5660_v45  ;;  %v5661_v20 = vadd.f32 1.0, %v8324_v50  ;;  %v15352_v45 = vld [vmem:[#allocation53_spill] sm:$0xff]  ;;  %v15356_v50 = vmov %v15355_v62 }
 0xb83   : > { %v8328_v28 = vpop.eup %8327  ;;  %v13541_v47 = vadd.f32 %v5680_v33, %v5675_v55  ;;  %8347 = vpow2.f32 %v7097_v26  ;;  %v5681_v54 = vmul.f32 %v8326_v60, %v8318_v44  ;;  %v15351_v44 = vld [vmem:[#allocation51_spill] sm:$0xff]  ;;  %v15353_v26 = vld [vmem:[#allocation50_spill] sm:$0xff]  ;;  %v15358_v60 = vld [vmem:[#allocation49_spill] sm:$0xff] }
 0xb84   : > { %v8330_v4 = vpop.eup %8329  ;;  %8349 = vrcp.f32 %v5598_v6  ;;  %v5628_v2 = vadd.f32 1.0, %v8328_v28  ;;  %v15354_v6 = vmov %v15353_v26  ;;  %v15357_v55 = vld [vmem:[#allocation47_spill] sm:$0xff]  ;;  %v15359_v28 = vld [vmem:[#allocation46_spill] sm:$0xff] }
 0xb85   : > { %v8332_v42 = vpop.eup %8331  ;;  %8351 = vtanh.f32 %v13541_v47  ;;  %v5662_v35 = vadd.f32 1.0, %v8330_v4  ;;  %v15360_v4 = vld [vmem:[#allocation48_spill] sm:$0xff] }
 0xb86   : > { %v8334_v56 = vpop.eup %8333  ;;  %v5676_v17 = vmul.f32 %v8332_v42, %v13290_v58  ;;  %8353 = vrcp.f32 %v5628_v2  ;;  %v15361_v42 = vld [vmem:[#allocation43_spill] sm:$0xff] }
 0xb87   : > { %v8336_v18 = vpop.eup %8335  ;;  %8355 = vrcp.f32 %v5661_v20  ;;  %v15362_v20 = vld [vmem:[#allocation45_spill] sm:$0xff] }
 0xb88   : > { %v8338_v52 = vpop.eup %8337  ;;  %v13545_v46 = vadd.f32 %v5681_v54, %v5676_v17  ;;  %v5682_v27 = vmul.f32 %v8336_v18, %v8334_v56  ;;  %v15363_v54 = vld [vmem:[#allocation42_spill] sm:$0xff]  ;;  %v15364_v17 = vld [vmem:[#allocation44_spill] sm:$0xff] }
 0xb89   : > { %v5677_v0 = vmul.f32 %v8338_v52, %v13295_v22  ;;  %v8340_v11 = vpop.eup %8339 }
 0xb8a   : > { %8357 = vtanh.f32 %v13545_v46  ;;  %v8342_v39 = vpop.eup %8341 }
 0xb8b   : > { %v13549_v32 = vadd.f32 %v5682_v27, %v5677_v0  ;;  %8359 = vrcp.f32 %v5662_v35  ;;  %v15365_v35 = vld [vmem:[#allocation39_spill] sm:$0xff] }
 0xb8d   : > { %8361 = vtanh.f32 %v13549_v32 }
 0xb8e   : > { %v8344_v58 = vpop.eup %8343 }
 0xb8f   : > { %v8346_v19 = vpop.eup %8345  ;;  %v13552_v63 = vmul.f32 %v8344_v58, %v8340_v11  ;;  %v15366_v11 = vld [vmem:[#allocation41_spill] sm:$0xff]  ;;  %v15367_v58 = vld [vmem:[#allocation38_spill] sm:$0xff] }
 0xb90   : > { %v8348_v14 = vpop.eup %8347 }
 0xb91   : > { %v8350_v34 = vpop.eup %8349  ;;  %7100 = vst [vmem:[%s13301_s26 + $0x28] sm:$0xff] %v13552_v63  ;;  %5772 = vmatmul.mubr.f32.vlgmr.msra.gmra.mxu0 %v13552_v63  ;;  %5867 = vmatmul.mubr.f32.vlgmr.msra.gmra.mxu1 %v13552_v63  ;;  %v5663_v15 = vadd.f32 1.0, %v8348_v14  ;;  %v15368_v14 = vld [vmem:[#allocation40_spill] sm:$0xff] }
 0xb92   : > { %v8352_v22 = vpop.eup %8351  ;;  %5898 = vmatpush1.msra.mxu0 %v15238_v41  ;;  %5993 = vmatpush1.msra.mxu1 %v15240_v24  ;;  %v5683_v51 = vmul.f32 %v8350_v34, %v8342_v39 }
 0xb93   : > { %v8354_v53 = vpop.eup %8353  ;;  %5899 = vmatprep.subr.mxu0 %v15241_v7  ;;  %5994 = vmatprep.subr.mxu1 %v15242_v23  ;;  %v13562_v1 = vmul.f32 %v8352_v22, %v8346_v19  ;;  %8363 = vrcp.f32 %v5663_v15  ;;  %v15369_v22 = vld [vmem:[#allocation35_spill] sm:$0xff]  ;;  %v15371_v15 = vld [vmem:[#allocation34_spill] sm:$0xff] }
 0xb94   : > { %v5678_v49 = vmul.f32 %v8354_v53, %v13322_v31  ;;  %5900 = vmatpush1.msra.mxu0 %v15244_v9  ;;  %5995 = vmatpush1.msra.mxu1 %v15246_v37  ;;  %v8356_v25 = vpop.eup %8355  ;;  %v15370_v53 = vld [vmem:[#allocation37_spill] sm:$0xff] }
 0xb95   : > { %5777 = vmatprep.mubr.f32.mxu0 %v15154_v21  ;;  %5872 = vmatprep.mubr.f32.mxu1 %v15154_v21  ;;  %7101 = vst [vmem:[%s13301_s26 + $0x30] sm:$0xff] %v13562_v1 }
 0xb96   : > { %v13571_v8 = vadd.f32 %v5683_v51, %v5678_v49  ;;  %5901 = vmatprep.subr.mxu0 %v15247_v13  ;;  %5996 = vmatprep.subr.mxu1 %v15248_v61 }
 0xb97   : > { %v8358_v5 = vpop.eup %8357  ;;  %5778 = vmatmul.mubr.f32.gmra.mxu0 %v13562_v1  ;;  %5873 = vmatmul.mubr.f32.gmra.mxu1 %v13562_v1 }
 0xb98   : > { %8365 = vtanh.f32 %v13571_v8  ;;  %5902 = vmatpush1.msra.mxu0 %v15249_v59  ;;  %5997 = vmatpush1.msra.mxu1 %v15139_v10  ;;  %v13580_v31 = vmul.f32 %v8358_v5, %v8356_v25  ;;  %v8360_v29 = vpop.eup %8359  ;;  %v15372_v25 = vld [vmem:[#allocation36_spill] sm:$0xff] }
 0xb99   : > { %5903 = vmatprep.subr.mxu0 %v15351_v44  ;;  %5998 = vmatprep.subr.mxu1 %v15352_v45 }
 0xb9a   : > { %v8362_v3 = vpop.eup %8361  ;;  %5904 = vmatpush1.msra.mxu0 %v15353_v26  ;;  %5999 = vmatpush1.msra.mxu1 %v15355_v62  ;;  %7102 = vst [vmem:[%s13301_s26 + $0x38] sm:$0xff] %v13580_v31  ;;  %v15375_v26 = vld [vmem:[#allocation30_spill] sm:$0xff]  ;;  %v15376_v62 = vld [vmem:[#allocation32_spill] sm:$0xff] }
 0xb9b   : > { %5783 = vmatprep.mubr.f32.mxu0 %v15154_v21  ;;  %5878 = vmatprep.mubr.f32.mxu1 %v15154_v21  ;;  %v13590_v33 = vmul.f32 %v8362_v3, %v8360_v29  ;;  %v15373_v29 = vld [vmem:[#allocation31_spill] sm:$0xff]  ;;  %v15374_v3 = vld [vmem:[#allocation33_spill] sm:$0xff] }
 0xb9c   : > { %5905 = vmatprep.subr.mxu0 %v15357_v55  ;;  %6000 = vmatprep.subr.mxu1 %v15358_v60 }
 0xb9d   : > { %5784 = vmatmul.mubr.f32.gmra.mxu0 %v13580_v31  ;;  %5879 = vmatmul.mubr.f32.gmra.mxu1 %v13580_v31  ;;  %7103 = vst [vmem:[%s13301_s26 + $0x40] sm:$0xff] %v13590_v33 }
 0xb9e   : > { %5906 = vmatpush1.msra.mxu0 %v15359_v28  ;;  %6001 = vmatpush1.msra.mxu1 %v15360_v4  ;;  %v15377_v4 = vld [vmem:[#allocation27_spill] sm:$0xff] }
 0xb9f   : > { %5907 = vmatprep.subr.mxu0 %v15361_v42  ;;  %6002 = vmatprep.subr.mxu1 %v15362_v20  ;;  %v15378_v42 = vld [vmem:[#allocation29_spill] sm:$0xff]  ;;  %v15379_v20 = vld [vmem:[#allocation26_spill] sm:$0xff] }
 0xba0   : > { %5908 = vmatpush1.msra.mxu0 %v15363_v54  ;;  %6003 = vmatpush1.msra.mxu1 %v15364_v17  ;;  %v8364_v39 = vpop.eup %8363  ;;  %v15380_v54 = vld [vmem:[#allocation28_spill] sm:$0xff]  ;;  %v15381_v17 = vld [vmem:[#allocation23_spill] sm:$0xff] }
 0xba1   : > { %5789 = vmatprep.mubr.f32.mxu0 %v15154_v21  ;;  %5884 = vmatprep.mubr.f32.mxu1 %v15154_v21 }
 0xba2   : > { %5909 = vmatprep.subr.mxu0 %v15365_v35  ;;  %6004 = vmatprep.subr.mxu1 %v15366_v11  ;;  %v15382_v35 = vld [vmem:[#allocation25_spill] sm:$0xff] }
 0xba3   : > { %5790 = vmatmul.mubr.f32.gmra.mxu0 %v13590_v33  ;;  %5885 = vmatmul.mubr.f32.gmra.mxu1 %v13590_v33 }
 0xba4   : > { %5910 = vmatpush1.msra.mxu0 %v15367_v58  ;;  %6005 = vmatpush1.msra.mxu1 %v15368_v14  ;;  %v15383_v58 = vld [vmem:[#allocation22_spill] sm:$0xff] }
 0xba5   : > { %v8366_v34 = vpop.eup %8365  ;;  %5911 = vmatprep.subr.mxu0 %v15369_v22  ;;  %6006 = vmatprep.subr.mxu1 %v15370_v53  ;;  %v15384_v53 = vld [vmem:[#allocation24_spill] sm:$0xff] }
 0xba6   : > { %5912 = vmatpush1.msra.mxu0 %v15371_v15  ;;  %6007 = vmatpush1.msra.mxu1 %v15372_v25  ;;  %v13616_v5 = vmul.f32 %v8366_v34, %v8364_v39  ;;  %v15385_v15 = vld [vmem:[#allocation21_spill] sm:$0xff] }
 0xba7   : > { %5795 = vmatprep.mubr.f32.mxu0 %v15154_v21  ;;  %5890 = vmatprep.mubr.f32.mxu1 %v15154_v21 }
 0xba8   : > { %5913 = vmatprep.subr.mxu0 %v15373_v29  ;;  %6008 = vmatprep.subr.mxu1 %v15374_v3  ;;  %7104 = vst [vmem:[%s13301_s26 + $0x48] sm:$0xff] %v13616_v5 }
 0xba9   : > { %5796 = vmatmul.mubr.f32.gmra.mxu0 %v13616_v5  ;;  %5891 = vmatmul.mubr.f32.gmra.mxu1 %v13616_v5 }
 0xbaa   : > { %5914 = vmatpush1.msra.mxu0 %v15375_v26  ;;  %6009 = vmatpush1.msra.mxu1 %v15376_v62  ;;  %v15386_v26 = vld [vmem:[#allocation17_spill] sm:$0xff]  ;;  %v15387_v62 = vld [vmem:[#allocation14_spill] sm:$0xff] }
 0xbab   : > { %5915 = vmatprep.subr.mxu0 %v15377_v4  ;;  %6010 = vmatprep.subr.mxu1 %v15378_v42  ;;  %v15388_v4 = vld [vmem:[#allocation16_spill] sm:$0xff]  ;;  %v15389_v42 = vld [vmem:[#allocation11_spill] sm:$0xff] }
 0xbac   : > { %5916 = vmatpush1.msra.mxu0 %v15379_v20  ;;  %6011 = vmatpush1.msra.mxu1 %v15380_v54  ;;  %v15390_v20 = vld [vmem:[#allocation13_spill] sm:$0xff]  ;;  %v15391_v54 = vld [vmem:[#allocation10_spill] sm:$0xff] }
 0xbad   : > { %5917 = vmatprep.subr.mxu0 %v15381_v17  ;;  %6012 = vmatprep.subr.mxu1 %v15382_v35  ;;  %v15392_v17 = vld [vmem:[#allocation12_spill] sm:$0xff]  ;;  %v15393_v35 = vld [vmem:[#allocation7_spill] sm:$0xff] }
 0xbae   : > { %5918 = vmatpush1.msra.mxu0 %v15383_v58  ;;  %6013 = vmatpush1.msra.mxu1 %v15384_v53  ;;  %v15394_v58 = vld [vmem:[#allocation9_spill] sm:$0xff]  ;;  %v15395_v53 = vld [vmem:[#allocation6_spill] sm:$0xff] }
 0xbaf   : > { %5919 = vmatprep.subr.mxu0 %v15281_v48  ;;  %6014 = vmatprep.subr.mxu1 %v15385_v15  ;;  %v15396_v15 = vld [vmem:[#allocation8_spill] sm:$0xff] }
 0xbb0   : > { %5920 = vmatpush1.msra.mxu0 %v15284_v30  ;;  %6015 = vmatpush1.msra.mxu1 %v15286_v16 }
 0xbb1   : > { %5921 = vmatprep.subr.mxu0 %v15288_v38  ;;  %6016 = vmatprep.subr.mxu1 %v15386_v26  ;;  %v15397_v26 = vld [vmem:[#allocation3_spill] sm:$0xff] }
 0xbb2   : > { %5922 = vmatpush1.msra.mxu0 %v15387_v62  ;;  %6017 = vmatpush1.msra.mxu1 %v15388_v4  ;;  %v15398_v62 = vld [vmem:[#allocation5_spill] sm:$0xff]  ;;  %v15399_v4 = vld [vmem:[#allocation2_spill] sm:$0xff] }
 0xbb3   : > { %5923 = vmatprep.subr.mxu0 %v15389_v42  ;;  %6018 = vmatprep.subr.mxu1 %v15390_v20  ;;  %v15400_v42 = vld [vmem:[#allocation4_spill] sm:$0xff]  ;;  %v15401_v20 = vld [vmem:[#allocation127_spill] sm:$0xff] }
 0xbb4   : > { %5924 = vmatpush1.msra.mxu0 %v15391_v54  ;;  %6019 = vmatpush1.msra.mxu1 %v15392_v17  ;;  %v15402_v54 = vld [vmem:[#allocation129_spill] sm:$0xff]  ;;  %v15403_v17 = vld [vmem:[#allocation126_spill] sm:$0xff] }
 0xbb5   : > { %5925 = vmatprep.subr.mxu0 %v15393_v35  ;;  %6020 = vmatprep.subr.mxu1 %v15394_v58  ;;  %v15404_v35 = vld [vmem:[#allocation128_spill] sm:$0xff]  ;;  %v15406_v58 = vld [vmem:[#allocation125_spill] sm:$0xff] }
 0xbb6   : > { %5926 = vmatpush1.msra.mxu0 %v15395_v53  ;;  %6021 = vmatpush1.msra.mxu1 %v15396_v15  ;;  %v15407_v53 = vld [vmem:[#allocation122_spill] sm:$0xff]  ;;  %v15408_v15 = vld [vmem:[#allocation124_spill] sm:$0xff] }
 0xbb7   : > { %5927 = vmatprep.subr.mxu0 %v15397_v26  ;;  %6022 = vmatprep.subr.mxu1 %v15398_v62  ;;  %v15410_v26 = vld [vmem:[#allocation121_spill] sm:$0xff]  ;;  %v15411_v62 = vld [vmem:[#allocation118_spill] sm:$0xff] }
 0xbb8   : > { %5928 = vmatpush1.msra.mxu0 %v15399_v4  ;;  %5961 = vmatprep.mubr.f32.mxu0 %v15154_v21  ;;  %v15412_v4 = vld [vmem:[#allocation120_spill] sm:$0xff] }
 0xbb9   : > { %6023 = vmatpush1.msra.mxu1 %v15400_v42  ;;  %6056 = vmatprep.mubr.f32.mxu1 %v15154_v21  ;;  %v15414_v42 = vld [vmem:[#allocation117_spill] sm:$0xff] }
 0xbba   : > { %5962 = vmatmul.mubr.f32.vlgmr.msra.gmra.mxu0 %v13552_v63  ;;  %6057 = vmatmul.mubr.f32.vlgmr.msra.gmra.mxu1 %v13552_v63  ;;  %v15405_v63 = vld [vmem:[#allocation123_spill] sm:$0xff] }
 0xbbb   : > { %5967 = vmatprep.mubr.f32.mxu0 %v15154_v21  ;;  %6062 = vmatprep.mubr.f32.mxu1 %v15154_v21 }
 0xbbc   : > { %6235 = vmatprep.subr.mxu0 %v15401_v20  ;;  %6330 = vmatprep.subr.mxu1 %v15402_v54  ;;  %v15415_v20 = vld [vmem:[#allocation114_spill] sm:$0xff]  ;;  %v15416_v54 = vld [vmem:[#allocation116_spill] sm:$0xff] }
 0xbbd   : > { %6236 = vmatpush1.msra.mxu0 %v15403_v17  ;;  %6331 = vmatpush1.msra.mxu1 %v15404_v35  ;;  %v15417_v17 = vld [vmem:[#allocation111_spill] sm:$0xff]  ;;  %v15418_v35 = vld [vmem:[#allocation113_spill] sm:$0xff] }
 0xbbe   : > { %5968 = vmatmul.mubr.f32.gmra.mxu0 %v13562_v1  ;;  %6063 = vmatmul.mubr.f32.gmra.mxu1 %v13562_v1  ;;  %v15409_v1 = vld [vmem:[#allocation119_spill] sm:$0xff] }
 0xbbf   : > { %5973 = vmatprep.mubr.f32.mxu0 %v15154_v21  ;;  %6068 = vmatprep.mubr.f32.mxu1 %v15154_v21 }
 0xbc0   : > { %6237 = vmatprep.subr.mxu0 %v15405_v63  ;;  %6332 = vmatprep.subr.mxu1 %v15406_v58  ;;  %v15420_v63 = vld [vmem:[#allocation112_spill] sm:$0xff]  ;;  %v15421_v58 = vld [vmem:[#allocation107_spill] sm:$0xff] }
 0xbc1   : > { %6238 = vmatpush1.msra.mxu0 %v15407_v53  ;;  %6333 = vmatpush1.msra.mxu1 %v15408_v15  ;;  %v15422_v53 = vld [vmem:[#allocation109_spill] sm:$0xff]  ;;  %v15423_v15 = vld [vmem:[#allocation106_spill] sm:$0xff] }
 0xbc2   : > { %5974 = vmatmul.mubr.f32.gmra.mxu0 %v13580_v31  ;;  %6069 = vmatmul.mubr.f32.gmra.mxu1 %v13580_v31  ;;  %v15413_v31 = vld [vmem:[#allocation115_spill] sm:$0xff] }
 0xbc3   : > { %5979 = vmatprep.mubr.f32.mxu0 %v15154_v21  ;;  %6074 = vmatprep.mubr.f32.mxu1 %v15154_v21 }
 0xbc4   : > { %6239 = vmatprep.subr.mxu0 %v15409_v1  ;;  %6334 = vmatprep.subr.mxu1 %v15410_v26  ;;  %v15424_v1 = vld [vmem:[#allocation108_spill] sm:$0xff]  ;;  %v15425_v26 = vld [vmem:[#allocation103_spill] sm:$0xff] }
 0xbc5   : > { %6240 = vmatpush1.msra.mxu0 %v15411_v62  ;;  %6335 = vmatpush1.msra.mxu1 %v15412_v4  ;;  %v15426_v62 = vld [vmem:[#allocation105_spill] sm:$0xff]  ;;  %v15428_v4 = vld [vmem:[#allocation104_spill] sm:$0xff] }
 0xbc6   : > { %5980 = vmatmul.mubr.f32.gmra.mxu0 %v13590_v33  ;;  %6075 = vmatmul.mubr.f32.gmra.mxu1 %v13590_v33  ;;  %v15419_v33 = vld [vmem:[#allocation110_spill] sm:$0xff] }
 0xbc7   : > { %5985 = vmatprep.mubr.f32.mxu0 %v15154_v21  ;;  %6080 = vmatprep.mubr.f32.mxu1 %v15154_v21 }
 0xbc8   : > { %6241 = vmatprep.subr.mxu0 %v15413_v31  ;;  %6336 = vmatprep.subr.mxu1 %v15414_v42  ;;  %v15429_v31 = vld [vmem:[#allocation99_spill] sm:$0xff]  ;;  %v15430_v42 = vld [vmem:[#allocation101_spill] sm:$0xff] }
 0xbc9   : > { %6242 = vmatpush1.msra.mxu0 %v15415_v20  ;;  %6337 = vmatpush1.msra.mxu1 %v15416_v54  ;;  %v15431_v20 = vld [vmem:[#allocation98_spill] sm:$0xff]  ;;  %v15432_v54 = vld [vmem:[#allocation100_spill] sm:$0xff] }
 0xbca   : > { %5986 = vmatmul.mubr.f32.gmra.mxu0 %v13616_v5  ;;  %6081 = vmatmul.mubr.f32.gmra.mxu1 %v13616_v5  ;;  %v15427_v5 = vld [vmem:[#allocation102_spill] sm:$0xff] }
 0xbcb   : > { %6243 = vmatprep.subr.mxu0 %v15417_v17  ;;  %6338 = vmatprep.subr.mxu1 %v15418_v35  ;;  %v15433_v17 = vld [vmem:[#allocation95_spill] sm:$0xff]  ;;  %v15434_v35 = vld [vmem:[#allocation97_spill] sm:$0xff] }
 0xbcc   : > { %6244 = vmatpush1.msra.mxu0 %v15419_v33  ;;  %6339 = vmatpush1.msra.mxu1 %v15420_v63  ;;  %v15435_v33 = vld [vmem:[#allocation94_spill] sm:$0xff]  ;;  %v15436_v63 = vld [vmem:[#allocation96_spill] sm:$0xff] }
 0xbcd   : > { %6245 = vmatprep.subr.mxu0 %v15421_v58  ;;  %6340 = vmatprep.subr.mxu1 %v15422_v53  ;;  %v15437_v58 = vld [vmem:[#allocation91_spill] sm:$0xff]  ;;  %v15438_v53 = vld [vmem:[#allocation93_spill] sm:$0xff] }
 0xbce   : > { %6246 = vmatpush1.msra.mxu0 %v15423_v15  ;;  %6341 = vmatpush1.msra.mxu1 %v15424_v1  ;;  %v15439_v15 = vld [vmem:[#allocation90_spill] sm:$0xff]  ;;  %v15440_v1 = vld [vmem:[#allocation92_spill] sm:$0xff] }
 0xbcf   : > { %6247 = vmatprep.subr.mxu0 %v15425_v26  ;;  %6342 = vmatprep.subr.mxu1 %v15426_v62  ;;  %v15441_v26 = vld [vmem:[#allocation87_spill] sm:$0xff]  ;;  %v15442_v62 = vld [vmem:[#allocation89_spill] sm:$0xff] }
 0xbd0   : > { %6248 = vmatpush1.msra.mxu0 %v15427_v5  ;;  %6343 = vmatpush1.msra.mxu1 %v15428_v4  ;;  %v15443_v5 = vld [vmem:[#allocation86_spill] sm:$0xff]  ;;  %v15444_v4 = vld [vmem:[#allocation88_spill] sm:$0xff] }
 0xbd1   : > { %6249 = vmatprep.subr.mxu0 %v15429_v31  ;;  %6344 = vmatprep.subr.mxu1 %v15430_v42  ;;  %v15445_v31 = vld [vmem:[#allocation83_spill] sm:$0xff]  ;;  %v15446_v42 = vld [vmem:[#allocation85_spill] sm:$0xff] }
 0xbd2   : > { %6250 = vmatpush1.msra.mxu0 %v15431_v20  ;;  %6345 = vmatpush1.msra.mxu1 %v15432_v54  ;;  %v15447_v20 = vld [vmem:[#allocation82_spill] sm:$0xff]  ;;  %v15448_v54 = vld [vmem:[#allocation84_spill] sm:$0xff] }
 0xbd3   : > { %6251 = vmatprep.subr.mxu0 %v15433_v17  ;;  %6346 = vmatprep.subr.mxu1 %v15434_v35  ;;  %v15449_v17 = vld [vmem:[#allocation79_spill] sm:$0xff]  ;;  %v15450_v35 = vld [vmem:[#allocation81_spill] sm:$0xff] }
 0xbd4   : > { %6252 = vmatpush1.msra.mxu0 %v15435_v33  ;;  %6347 = vmatpush1.msra.mxu1 %v15436_v63  ;;  %v15451_v33 = vld [vmem:[#allocation78_spill] sm:$0xff]  ;;  %v15452_v63 = vld [vmem:[#allocation80_spill] sm:$0xff] }
 0xbd5   : > { %6253 = vmatprep.subr.mxu0 %v15437_v58  ;;  %6348 = vmatprep.subr.mxu1 %v15438_v53  ;;  %v15453_v58 = vld [vmem:[#allocation75_spill] sm:$0xff]  ;;  %v15454_v53 = vld [vmem:[#allocation77_spill] sm:$0xff] }
 0xbd6   : > { %6254 = vmatpush1.msra.mxu0 %v15439_v15  ;;  %6349 = vmatpush1.msra.mxu1 %v15440_v1  ;;  %v15455_v15 = vld [vmem:[#allocation74_spill] sm:$0xff]  ;;  %v15456_v1 = vld [vmem:[#allocation76_spill] sm:$0xff] }
 0xbd7   : > { %6255 = vmatprep.subr.mxu0 %v15441_v26  ;;  %6350 = vmatprep.subr.mxu1 %v15442_v62  ;;  %v15457_v26 = vld [vmem:[#allocation71_spill] sm:$0xff]  ;;  %v15458_v62 = vld [vmem:[#allocation73_spill] sm:$0xff] }
 0xbd8   : > { %6256 = vmatpush1.msra.mxu0 %v15443_v5  ;;  %6351 = vmatpush1.msra.mxu1 %v15444_v4  ;;  %v15459_v5 = vld [vmem:[#allocation70_spill] sm:$0xff]  ;;  %v15460_v4 = vld [vmem:[#allocation72_spill] sm:$0xff] }
 0xbd9   : > { %6257 = vmatprep.subr.mxu0 %v15445_v31  ;;  %6352 = vmatprep.subr.mxu1 %v15446_v42  ;;  %v15461_v31 = vld [vmem:[#allocation67_spill] sm:$0xff]  ;;  %v15462_v42 = vld [vmem:[#allocation69_spill] sm:$0xff] }
 0xbda   : > { %6258 = vmatpush1.msra.mxu0 %v15447_v20  ;;  %6353 = vmatpush1.msra.mxu1 %v15448_v54  ;;  %v15463_v20 = vld [vmem:[#allocation66_spill] sm:$0xff]  ;;  %v15464_v54 = vld [vmem:[#allocation68_spill] sm:$0xff] }
 0xbdb   : > { %6259 = vmatprep.subr.mxu0 %v15449_v17  ;;  %6354 = vmatprep.subr.mxu1 %v15450_v35  ;;  %v15465_v17 = vld [vmem:[#allocation63_spill] sm:$0xff]  ;;  %v15466_v35 = vld [vmem:[#allocation65_spill] sm:$0xff] }
 0xbdc   : > { %6260 = vmatpush1.msra.mxu0 %v15451_v33  ;;  %6355 = vmatpush1.msra.mxu1 %v15452_v63 }
 0xbdd   : > { %6261 = vmatprep.subr.mxu0 %v15453_v58  ;;  %6356 = vmatprep.subr.mxu1 %v15454_v53 }
 0xbde   : > { %6262 = vmatpush1.msra.mxu0 %v15455_v15  ;;  %6357 = vmatpush1.msra.mxu1 %v15456_v1 }
 0xbdf   : > { %6263 = vmatprep.subr.mxu0 %v15457_v26  ;;  %6358 = vmatprep.subr.mxu1 %v15458_v62 }
 0xbe0   : > { %6264 = vmatpush1.msra.mxu0 %v15459_v5  ;;  %6359 = vmatpush1.msra.mxu1 %v15460_v4 }
 0xbe1   : > { %6265 = vmatprep.subr.mxu0 %v15461_v31  ;;  %6360 = vmatprep.subr.mxu1 %v15462_v42 }
 0xbe2   : > { %6266 = vmatpush1.msra.mxu0 %v15463_v20  ;;  %6361 = vmatpush1.msra.mxu1 %v15464_v54 }
 0xbe3   : > { %6299 = vmatprep.mubr.f32.mxu0 %v15154_v21  ;;  %6394 = vmatprep.mubr.f32.mxu1 %v15154_v21 }
 0xbe4   : > { %6425 = vmatprep.subr.mxu0 %v15465_v17  ;;  %6520 = vmatprep.subr.mxu1 %v15466_v35 }
 0xc51   : > { %v5773_v33 = vpop.f32.mrf.mxu0  ;;  %v5868_v63 = vpop.f32.mrf.mxu1 }
 0xc53   : > { %v5775_v58 = vpop.f32.mrf.mxu0  ;;  %v5870_v53 = vpop.f32.mrf.mxu1 }
 0xc57   : > { %v5779_v15 = vpop.f32.mrf.mxu0  ;;  %v5874_v1 = vpop.f32.mrf.mxu1 }
 0xc59   : > { %v5781_v26 = vpop.f32.mrf.mxu0  ;;  %v5876_v62 = vpop.f32.mrf.mxu1 }
 0xc5d   : > { %v5785_v5 = vpop.f32.mrf.mxu0  ;;  %v13744_v4 = vpop.f32.mrf.mxu1 }
 0xc5f   : > { %v5787_v31 = vpop.f32.mrf.mxu0  ;;  %v13746_v42 = vpop.f32.mrf.mxu1 }
 0xc63   : > { %v5791_v20 = vpop.f32.mrf.mxu0  ;;  %v13748_v54 = vpop.f32.mrf.mxu1 }
 0xc65   : > { %v5793_v17 = vpop.f32.mrf.mxu0  ;;  %v13750_v25 = vpop.f32.mrf.mxu1 }
 0xc69   : > { %v5797_v35 = vpop.f32.mrf.mxu0  ;;  %v13752_v14 = vpop.f32.mrf.mxu1 }
 0xc6b   : > { %v13754_v3 = vpop.f32.mrf.mxu0  ;;  %v13756_v29 = vpop.f32.mrf.mxu1 }
 0xc7a   : > { %v5963_v22 = vpop.f32.mrf.mxu0  ;;  %v6058_v16 = vpop.f32.mrf.mxu1 }
 0xc7b   : > { %v5964_v30 = vadd.f32 %v5963_v22, %v5773_v33  ;;  %v6059_v60 = vadd.f32 %v6058_v16, %v5868_v63 }
 0xc7c   : > { %v5965_v48 = vpop.f32.mrf.mxu0  ;;  %v6060_v51 = vpop.f32.mrf.mxu1 }
 0xc7d   : > { %v6087_v19 = vadd.f32 %v5964_v30, %v15229_v57  ;;  %v5966_v38 = vadd.f32 %v5965_v48, %v5775_v58  ;;  %v6061_v56 = vadd.f32 %v6060_v51, %v5870_v53 }
 0xc7e   : > { %v5969_v34 = vpop.f32.mrf.mxu0  ;;  %v6064_v39 = vpop.f32.mrf.mxu1 }
 0xc7f   : > { %v7105_v49 = vmul.f32 -1.442695, %v6087_v19  ;;  %v6088_v11 = vadd.f32 %v5966_v38, %v15230_v40  ;;  %v5970_v0 = vadd.f32 %v5969_v34, %v5779_v15  ;;  %v6090_v38 = vadd.f32 %v6061_v56, %v15231_v43 }
 0xc80   : > { %v5971_v27 = vpop.f32.mrf.mxu0  ;;  %v6066_v52 = vpop.f32.mrf.mxu1  ;;  %v6065_v63 = vadd.f32 %v6064_v39, %v5874_v1 }
 0xc81   : > { %8367 = vpow2.f32 %v7105_v49  ;;  %v7110_v18 = vmul.f32 -1.442695, %v6088_v11  ;;  %v5972_v2 = vadd.f32 %v5971_v27, %v5781_v26  ;;  %v6091_v28 = vadd.f32 %v5970_v0, %v15229_v57 }
 0xc82   : > { %v5975_v22 = vpop.f32.mrf.mxu0  ;;  %v6070_v33 = vpop.f32.mrf.mxu1  ;;  %v6067_v11 = vadd.f32 %v6066_v52, %v5876_v62  ;;  %v6089_v0 = vadd.f32 %v6059_v60, %v15232_v12  ;;  %v7115_v15 = vmul.f32 -1.442695, %v6090_v38  ;;  %v6093_v39 = vadd.f32 %v6065_v63, %v15232_v12 }
 0xc83   : > { %8369 = vpow2.f32 %v7110_v18  ;;  %v6092_v30 = vadd.f32 %v5972_v2, %v15230_v40  ;;  %v5976_v48 = vadd.f32 %v5975_v22, %v5785_v5  ;;  %v7106_v58 = vmul.f32 -1.442695, %v6091_v28 }
 0xc84   : > { %v5977_v19 = vpop.f32.mrf.mxu0  ;;  %v6072_v55 = vpop.f32.mrf.mxu1  ;;  %v6094_v5 = vadd.f32 %v6067_v11, %v15231_v43 }
 0xc85   : > { %v7111_v34 = vmul.f32 -1.442695, %v6092_v30  ;;  %v6095_v49 = vadd.f32 %v5976_v48, %v15229_v57  ;;  %8371 = vpow2.f32 %v7106_v58  ;;  %v5978_v27 = vadd.f32 %v5977_v19, %v5787_v31 }
 0xc86   : > { %v5981_v51 = vpop.f32.mrf.mxu0  ;;  %v6076_v28 = vpop.f32.mrf.mxu1  ;;  %v6073_v1 = vadd.f32 %v6072_v55, %v13746_v42  ;;  %v6071_v48 = vadd.f32 %v6070_v33, %v13744_v4  ;;  %v7116_v38 = vmul.f32 -1.442695, %v6094_v5 }
 0xc87   : > { %8373 = vpow2.f32 %v7111_v34  ;;  %v7107_v16 = vmul.f32 -1.442695, %v6095_v49  ;;  %v5982_v18 = vadd.f32 %v5981_v51, %v5791_v20  ;;  %v6096_v2 = vadd.f32 %v5978_v27, %v15230_v40 }
 0xc88   : > { %v5983_v53 = vpop.f32.mrf.mxu0  ;;  %v6078_v20 = vpop.f32.mrf.mxu1  ;;  %v6098_v55 = vadd.f32 %v6073_v1, %v15231_v43  ;;  %v6097_v4 = vadd.f32 %v6071_v48, %v15232_v12 }
 0xc89   : > { %8375 = vpow2.f32 %v7107_v16  ;;  %v6099_v56 = vadd.f32 %v5982_v18, %v15229_v57  ;;  %v5984_v26 = vadd.f32 %v5983_v53, %v5793_v17  ;;  %v7112_v52 = vmul.f32 -1.442695, %v6096_v2 }
 0xc8a   : > { %v5987_v62 = vpop.f32.mrf.mxu0  ;;  %8377 = vtanh.f32 %v6089_v0  ;;  %v7117_v18 = vmul.f32 -1.442695, %v6098_v55  ;;  %v6077_v2 = vadd.f32 %v6076_v28, %v13748_v54 }
 0xc8b   : > { %v7108_v31 = vmul.f32 -1.442695, %v6099_v56  ;;  %v6100_v60 = vadd.f32 %v5984_v26, %v15230_v40  ;;  %v5988_v22 = vadd.f32 %v5987_v62, %v5797_v35  ;;  %8379 = vpow2.f32 %v7112_v52 }
 0xc8c   : > { %v5989_v30 = vpop.f32.mrf.mxu0  ;;  %8381 = vpow2.f32 %v7115_v15  ;;  %v6079_v35 = vadd.f32 %v6078_v20, %v13750_v25  ;;  %v6082_v25 = vpop.f32.mrf.mxu1 }
 0xc8d   : > { %v7113_v17 = vmul.f32 -1.442695, %v6100_v60  ;;  %v6103_v58 = vadd.f32 %v5988_v22, %v15229_v57  ;;  %8383 = vpow2.f32 %v7108_v31  ;;  %v5990_v34 = vadd.f32 %v5989_v30, %v13754_v3 }
 0xc8e   : > { %v8368_v19 = vpop.eup %8367  ;;  %v6102_v3 = vadd.f32 %v6079_v35, %v15231_v43  ;;  %v6084_v52 = vpop.f32.mrf.mxu1  ;;  %v6101_v31 = vadd.f32 %v6077_v2, %v15232_v12  ;;  %v6083_v20 = vadd.f32 %v6082_v25, %v13752_v14 }
 0xc8f   : > { %v6122_v49 = vadd.f32 1.0, %v8368_v19  ;;  %8385 = vpow2.f32 %v7113_v17  ;;  %v7109_v42 = vmul.f32 -1.442695, %v6103_v58  ;;  %v6104_v33 = vadd.f32 %v5990_v34, %v15230_v40 }
 0xc90   : > { %v8370_v11 = vpop.eup %8369  ;;  %8387 = vtanh.f32 %v6093_v39  ;;  %v7118_v26 = vmul.f32 -1.442695, %v6102_v3  ;;  %v6085_v54 = vadd.f32 %v6084_v52, %v13756_v29 }
 0xc91   : > { %8389 = vrcp.f32 %v6122_v49  ;;  %v6152_v27 = vadd.f32 1.0, %v8370_v11  ;;  %v7114_v15 = vmul.f32 -1.442695, %v6104_v33  ;;  %v6105_v49 = vadd.f32 %v6083_v20, %v15232_v12 }
 0xc92   : > { %8391 = vpow2.f32 %v7116_v38  ;;  %v8372_v51 = vpop.eup %8371  ;;  %v6106_v38 = vadd.f32 %v6085_v54, %v15231_v43 }
 0xc93   : > { %8393 = vrcp.f32 %v6152_v27  ;;  %v6123_v16 = vadd.f32 1.0, %v8372_v51 }
 0xc94   : > { %v8374_v0 = vpop.eup %8373  ;;  %8395 = vpow2.f32 %v7109_v42 }
 0xc95   : > { %v6153_v63 = vadd.f32 1.0, %v8374_v0  ;;  %8397 = vtanh.f32 %v6097_v4  ;;  %v7119_v4 = vmul.f32 -1.442695, %v6106_v38 }
 0xc96   : > { %v8376_v53 = vpop.eup %8375  ;;  %8399 = vrcp.f32 %v6123_v16 }
 0xc97   : > { %8401 = vrcp.f32 %v6153_v63  ;;  %v6124_v56 = vadd.f32 1.0, %v8376_v53  ;;  %v8378_v5 = vpop.eup %8377 }
 0xc98   : > { %8403 = vpow2.f32 %v7117_v18  ;;  %v8380_v62 = vpop.eup %8379 }
 0xc99   : > { %8405 = vrcp.f32 %v6124_v56  ;;  %v8382_v60 = vpop.eup %8381  ;;  %v6154_v22 = vadd.f32 1.0, %v8380_v62 }
 0xc9a   : > { %8407 = vpow2.f32 %v7114_v15  ;;  %v8384_v39 = vpop.eup %8383  ;;  %v6187_v19 = vadd.f32 1.0, %v8382_v60 }
 0xc9b   : > { %8409 = vpow2.f32 %v7118_v26  ;;  %v6125_v1 = vadd.f32 1.0, %v8384_v39 }
 0xc9c   : > { %v8386_v28 = vpop.eup %8385  ;;  %8411 = vrcp.f32 %v6154_v22 }
 0xc9d   : > { %v8388_v30 = vpop.eup %8387  ;;  %8413 = vtanh.f32 %v6101_v31  ;;  %v6155_v48 = vadd.f32 1.0, %v8386_v28 }
 0xc9e   : > { %v8390_v17 = vpop.eup %8389  ;;  %8415 = vrcp.f32 %v6125_v1 }
 0xc9f   : > { %v8392_v58 = vpop.eup %8391  ;;  %8417 = vrcp.f32 %v6155_v48  ;;  %v6207_v29 = vmul.f32 %v8390_v17, %v8378_v5 }
 0xca0   : > { %v8394_v34 = vpop.eup %8393  ;;  %v6188_v42 = vadd.f32 1.0, %v8392_v58  ;;  %8419 = vrcp.f32 %v6187_v19 }
 0xca1   : > { %v8396_v35 = vpop.eup %8395  ;;  %v6202_v11 = vmul.f32 %v8394_v34, %v13537_v36  ;;  %8421 = vtanh.f32 %v6105_v49 }
 0xca2   : > { %v8398_v55 = vpop.eup %8397  ;;  %v6126_v51 = vadd.f32 1.0, %v8396_v35 }
 0xca3   : > { %v8400_v14 = vpop.eup %8399  ;;  %v13786_v27 = vadd.f32 %v6207_v29, %v6202_v11 }
 0xca4   : > { %v8402_v33 = vpop.eup %8401  ;;  %v6208_v0 = vmul.f32 %v8400_v14, %v8388_v30  ;;  %v15467_v14 = vld [vmem:[#allocation47_spill] sm:$0xff] }
 0xca5   : > { %v8404_v3 = vpop.eup %8403  ;;  %8423 = vtanh.f32 %v13786_v27  ;;  %v6203_v16 = vmul.f32 %v8402_v33, %v13541_v47  ;;  %v15469_v33 = vld [vmem:[#allocation46_spill] sm:$0xff] }
 0xca6   : > { %v8406_v18 = vpop.eup %8405  ;;  %8425 = vrcp.f32 %v6188_v42  ;;  %v6189_v15 = vadd.f32 1.0, %v8404_v3  ;;  %v15471_v3 = vld [vmem:[#allocation43_spill] sm:$0xff] }
 0xca7   : > { %v8408_v25 = vpop.eup %8407  ;;  %v13790_v36 = vadd.f32 %v6208_v0, %v6203_v16  ;;  %8427 = vpow2.f32 %v7119_v4  ;;  %v6209_v26 = vmul.f32 %v8406_v18, %v8398_v55  ;;  %v15468_v4 = vld [vmem:[#allocation49_spill] sm:$0xff]  ;;  %v15473_v16 = vld [vmem:[#allocation42_spill] sm:$0xff]  ;;  %v15474_v18 = vld [vmem:[#allocation44_spill] sm:$0xff] }
 0xca8   : > { %v8410_v63 = vpop.eup %8409  ;;  %8429 = vrcp.f32 %v6126_v51  ;;  %v6156_v2 = vadd.f32 1.0, %v8408_v25  ;;  %v15470_v51 = vld [vmem:[#allocation48_spill] sm:$0xff]  ;;  %v15472_v0 = vld [vmem:[#allocation45_spill] sm:$0xff]  ;;  %v15475_v25 = vld [vmem:[#allocation39_spill] sm:$0xff] }
 0xca9   : > { %v8412_v53 = vpop.eup %8411  ;;  %8431 = vtanh.f32 %v13790_v36  ;;  %v6190_v31 = vadd.f32 1.0, %v8410_v63  ;;  %v15476_v63 = vld [vmem:[#allocation41_spill] sm:$0xff] }
 0xcaa   : > { %v8414_v56 = vpop.eup %8413  ;;  %v6204_v5 = vmul.f32 %v8412_v53, %v13545_v46  ;;  %8433 = vrcp.f32 %v6156_v2  ;;  %v15477_v53 = vld [vmem:[#allocation38_spill] sm:$0xff] }
 0xcab   : > { %v8416_v52 = vpop.eup %8415  ;;  %8435 = vrcp.f32 %v6189_v15  ;;  %v15478_v15 = vld [vmem:[#allocation40_spill] sm:$0xff] }
 0xcac   : > { %v8418_v47 = vpop.eup %8417  ;;  %v13794_v62 = vadd.f32 %v6209_v26, %v6204_v5  ;;  %v6210_v60 = vmul.f32 %v8416_v52, %v8414_v56  ;;  %v15479_v26 = vld [vmem:[#allocation35_spill] sm:$0xff]  ;;  %v15480_v5 = vld [vmem:[#allocation37_spill] sm:$0xff]  ;;  %v15481_v52 = vld [vmem:[#allocation34_spill] sm:$0xff] }
 0xcad   : > { %v6205_v22 = vmul.f32 %v8418_v47, %v13549_v32  ;;  %v8420_v54 = vpop.eup %8419  ;;  %v15482_v47 = vld [vmem:[#allocation36_spill] sm:$0xff] }
 0xcae   : > { %8437 = vtanh.f32 %v13794_v62  ;;  %v8422_v28 = vpop.eup %8421 }
 0xcaf   : > { %v13798_v39 = vadd.f32 %v6210_v60, %v6205_v22  ;;  %8439 = vrcp.f32 %v6190_v31  ;;  %v15483_v60 = vld [vmem:[#allocation31_spill] sm:$0xff]  ;;  %v15484_v22 = vld [vmem:[#allocation33_spill] sm:$0xff] }
 0xcb1   : > { %8441 = vtanh.f32 %v13798_v39 }
 0xcb2   : > { %v8424_v46 = vpop.eup %8423 }
 0xcb3   : > { %v8426_v1 = vpop.eup %8425  ;;  %v13801_v20 = vmul.f32 %v8424_v46, %v8420_v54  ;;  %v15485_v54 = vld [vmem:[#allocation30_spill] sm:$0xff]  ;;  %v15487_v46 = vld [vmem:[#allocation27_spill] sm:$0xff] }
 0xcb4   : > { %v8428_v30 = vpop.eup %8427 }
 0xcb5   : > { %v8430_v48 = vpop.eup %8429  ;;  %7122 = vst [vmem:[%s13301_s26 + $0x50] sm:$0xff] %v13801_v20  ;;  %6300 = vmatmul.mubr.f32.vlgmr.msra.gmra.mxu0 %v13801_v20  ;;  %6395 = vmatmul.mubr.f32.vlgmr.msra.gmra.mxu1 %v13801_v20  ;;  %v6191_v58 = vadd.f32 1.0, %v8428_v30  ;;  %v15489_v30 = vld [vmem:[#allocation26_spill] sm:$0xff] }
 0xcb6   : > { %v8432_v32 = vpop.eup %8431  ;;  %6426 = vmatpush1.msra.mxu0 %v15238_v41  ;;  %6521 = vmatpush1.msra.mxu1 %v15240_v24  ;;  %v6211_v38 = vmul.f32 %v8430_v48, %v8422_v28  ;;  %v15486_v28 = vld [vmem:[#allocation32_spill] sm:$0xff] }
 0xcb7   : > { %v8434_v17 = vpop.eup %8433  ;;  %6427 = vmatprep.subr.mxu0 %v15241_v7  ;;  %6522 = vmatprep.subr.mxu1 %v15242_v23  ;;  %v13811_v19 = vmul.f32 %v8432_v32, %v8426_v1  ;;  %8443 = vrcp.f32 %v6191_v58  ;;  %v15488_v1 = vld [vmem:[#allocation29_spill] sm:$0xff]  ;;  %v15490_v48 = vld [vmem:[#allocation28_spill] sm:$0xff]  ;;  %v15491_v32 = vld [vmem:[#allocation23_spill] sm:$0xff] }
 0xcb8   : > { %v6206_v34 = vmul.f32 %v8434_v17, %v13571_v8  ;;  %6428 = vmatpush1.msra.mxu0 %v15244_v9  ;;  %6523 = vmatpush1.msra.mxu1 %v15246_v37  ;;  %v8436_v49 = vpop.eup %8435  ;;  %v15492_v17 = vld [vmem:[#allocation25_spill] sm:$0xff]  ;;  %v15493_v58 = vld [vmem:[#allocation22_spill] sm:$0xff] }
 0xcb9   : > { %6305 = vmatprep.mubr.f32.mxu0 %v15154_v21  ;;  %6400 = vmatprep.mubr.f32.mxu1 %v15154_v21  ;;  %7123 = vst [vmem:[%s13301_s26 + $0x58] sm:$0xff] %v13811_v19 }
 0xcba   : > { %v13820_v35 = vadd.f32 %v6211_v38, %v6206_v34  ;;  %6429 = vmatprep.subr.mxu0 %v15247_v13  ;;  %6524 = vmatprep.subr.mxu1 %v15248_v61  ;;  %v15494_v38 = vld [vmem:[#allocation24_spill] sm:$0xff]  ;;  %v15495_v34 = vld [vmem:[#allocation19_spill] sm:$0xff] }
 0xcbb   : > { %v8438_v29 = vpop.eup %8437  ;;  %6306 = vmatmul.mubr.f32.gmra.mxu0 %v13811_v19  ;;  %6401 = vmatmul.mubr.f32.gmra.mxu1 %v13811_v19 }
 0xcbc   : > { %8445 = vtanh.f32 %v13820_v35  ;;  %6430 = vmatpush1.msra.mxu0 %v15249_v59  ;;  %6525 = vmatpush1.msra.mxu1 %v15139_v10  ;;  %v13829_v8 = vmul.f32 %v8438_v29, %v8436_v49  ;;  %v8440_v11 = vpop.eup %8439  ;;  %v15496_v49 = vld [vmem:[#allocation21_spill] sm:$0xff]  ;;  %v15497_v29 = vld [vmem:[#allocation18_spill] sm:$0xff] }
 0xcbd   : > { %6431 = vmatprep.subr.mxu0 %v15351_v44  ;;  %6526 = vmatprep.subr.mxu1 %v15352_v45 }
 0xcbe   : > { %v8442_v55 = vpop.eup %8441  ;;  %6432 = vmatpush1.msra.mxu0 %v15354_v6  ;;  %6527 = vmatpush1.msra.mxu1 %v15356_v50  ;;  %7124 = vst [vmem:[%s13301_s26 + $0x60] sm:$0xff] %v13829_v8 }
 0xcbf   : > { %6311 = vmatprep.mubr.f32.mxu0 %v15154_v21  ;;  %6406 = vmatprep.mubr.f32.mxu1 %v15154_v21  ;;  %v13839_v42 = vmul.f32 %v8442_v55, %v8440_v11  ;;  %v15498_v11 = vld [vmem:[#allocation20_spill] sm:$0xff]  ;;  %v15499_v55 = vld [vmem:[#allocation15_spill] sm:$0xff] }
 0xcc0   : > { %6433 = vmatprep.subr.mxu0 %v15467_v14  ;;  %6528 = vmatprep.subr.mxu1 %v15468_v4  ;;  %v15500_v14 = vld [vmem:[#allocation17_spill] sm:$0xff]  ;;  %v15501_v4 = vld [vmem:[#allocation14_spill] sm:$0xff] }
 0xcc1   : > { %6312 = vmatmul.mubr.f32.gmra.mxu0 %v13829_v8  ;;  %6407 = vmatmul.mubr.f32.gmra.mxu1 %v13829_v8  ;;  %7125 = vst [vmem:[%s13301_s26 + $0x68] sm:$0xff] %v13839_v42 }
 0xcc2   : > { %6434 = vmatpush1.msra.mxu0 %v15469_v33  ;;  %6529 = vmatpush1.msra.mxu1 %v15470_v51  ;;  %v15502_v33 = vld [vmem:[#allocation16_spill] sm:$0xff]  ;;  %v15503_v51 = vld [vmem:[#allocation11_spill] sm:$0xff] }
 0xcc3   : > { %6435 = vmatprep.subr.mxu0 %v15471_v3  ;;  %6530 = vmatprep.subr.mxu1 %v15472_v0  ;;  %v15504_v3 = vld [vmem:[#allocation13_spill] sm:$0xff]  ;;  %v15505_v0 = vld [vmem:[#allocation10_spill] sm:$0xff] }
 0xcc4   : > { %6436 = vmatpush1.msra.mxu0 %v15473_v16  ;;  %6531 = vmatpush1.msra.mxu1 %v15474_v18  ;;  %v8444_v2 = vpop.eup %8443  ;;  %v15506_v16 = vld [vmem:[#allocation12_spill] sm:$0xff]  ;;  %v15507_v18 = vld [vmem:[#allocation7_spill] sm:$0xff] }
 0xcc5   : > { %6317 = vmatprep.mubr.f32.mxu0 %v15154_v21  ;;  %6412 = vmatprep.mubr.f32.mxu1 %v15154_v21 }
 0xcc6   : > { %6437 = vmatprep.subr.mxu0 %v15475_v25  ;;  %6532 = vmatprep.subr.mxu1 %v15476_v63  ;;  %v15508_v25 = vld [vmem:[#allocation9_spill] sm:$0xff]  ;;  %v15509_v63 = vld [vmem:[#allocation6_spill] sm:$0xff] }
 0xcc7   : > { %6318 = vmatmul.mubr.f32.gmra.mxu0 %v13839_v42  ;;  %6413 = vmatmul.mubr.f32.gmra.mxu1 %v13839_v42 }
 0xcc8   : > { %6438 = vmatpush1.msra.mxu0 %v15477_v53  ;;  %6533 = vmatpush1.msra.mxu1 %v15478_v15  ;;  %v15511_v53 = vld [vmem:[#allocation3_spill] sm:$0xff]  ;;  %v15512_v15 = vld [vmem:[#allocation5_spill] sm:$0xff] }
 0xcc9   : > { %v8446_v56 = vpop.eup %8445  ;;  %6439 = vmatprep.subr.mxu0 %v15479_v26  ;;  %6534 = vmatprep.subr.mxu1 %v15480_v5  ;;  %v15514_v26 = vld [vmem:[#allocation4_spill] sm:$0xff] }
 0xcca   : > { %6440 = vmatpush1.msra.mxu0 %v15481_v52  ;;  %6535 = vmatpush1.msra.mxu1 %v15482_v47  ;;  %v6226_v31 = vmul.f32 %v8446_v56, %v8444_v2  ;;  %v15510_v2 = vld [vmem:[#allocation8_spill] sm:$0xff]  ;;  %v15513_v56 = vld [vmem:[#allocation2_spill] sm:$0xff] }
 0xccb   : > { %6323 = vmatprep.mubr.f32.mxu0 %v15154_v21  ;;  %6418 = vmatprep.mubr.f32.mxu1 %v15154_v21 }
 0xccc   : > { %6441 = vmatprep.subr.mxu0 %v15483_v60  ;;  %6536 = vmatprep.subr.mxu1 %v15484_v22  ;;  %7126 = vst [vmem:[%s13301_s26 + $0x70] sm:$0xff] %v6226_v31 }
 0xccd   : > { %6324 = vmatmul.mubr.f32.gmra.mxu0 %v6226_v31  ;;  %6419 = vmatmul.mubr.f32.gmra.mxu1 %v6226_v31 }
 0xcce   : > { %6442 = vmatpush1.msra.mxu0 %v15485_v54  ;;  %6537 = vmatpush1.msra.mxu1 %v15486_v28 }
 0xccf   : > { %6443 = vmatprep.subr.mxu0 %v15487_v46  ;;  %6538 = vmatprep.subr.mxu1 %v15488_v1 }
 0xcd0   : > { %6444 = vmatpush1.msra.mxu0 %v15489_v30  ;;  %6539 = vmatpush1.msra.mxu1 %v15490_v48 }
 0xcd1   : > { %6445 = vmatprep.subr.mxu0 %v15491_v32  ;;  %6540 = vmatprep.subr.mxu1 %v15492_v17 }
 0xcd2   : > { %6446 = vmatpush1.msra.mxu0 %v15493_v58  ;;  %6541 = vmatpush1.msra.mxu1 %v15494_v38 }
 0xcd3   : > { %6447 = vmatprep.subr.mxu0 %v15495_v34  ;;  %6542 = vmatprep.subr.mxu1 %v15496_v49 }
 0xcd4   : > { %6448 = vmatpush1.msra.mxu0 %v15497_v29  ;;  %6543 = vmatpush1.msra.mxu1 %v15498_v11 }
 0xcd5   : > { %6449 = vmatprep.subr.mxu0 %v15499_v55  ;;  %6544 = vmatprep.subr.mxu1 %v15500_v14 }
 0xcd6   : > { %6450 = vmatpush1.msra.mxu0 %v15501_v4  ;;  %6545 = vmatpush1.msra.mxu1 %v15502_v33 }
 0xcd7   : > { %6451 = vmatprep.subr.mxu0 %v15503_v51  ;;  %6546 = vmatprep.subr.mxu1 %v15504_v3 }
 0xcd8   : > { %6452 = vmatpush1.msra.mxu0 %v15505_v0  ;;  %6547 = vmatpush1.msra.mxu1 %v15506_v16 }
 0xcd9   : > { %6453 = vmatprep.subr.mxu0 %v15507_v18  ;;  %6548 = vmatprep.subr.mxu1 %v15508_v25 }
 0xcda   : > { %6454 = vmatpush1.msra.mxu0 %v15509_v63  ;;  %6549 = vmatpush1.msra.mxu1 %v15510_v2 }
 0xcdb   : > { %6455 = vmatprep.subr.mxu0 %v15511_v53  ;;  %6550 = vmatprep.subr.mxu1 %v15512_v15 }
 0xcdc   : > { %6456 = vmatpush1.msra.mxu0 %v15513_v56  ;;  %6489 = vmatprep.mubr.f32.mxu0 %v15154_v21 }
 0xcdd   : > { %6551 = vmatpush1.msra.mxu1 %v15514_v26  ;;  %6584 = vmatprep.mubr.f32.mxu1 %v15154_v21 }
 0xcde   : > { %6490 = vmatmul.mubr.f32.vlgmr.msra.gmra.mxu0 %v13801_v20  ;;  %6585 = vmatmul.mubr.f32.vlgmr.msra.gmra.mxu1 %v13801_v20 }
 0xcdf   : > { %6495 = vmatprep.mubr.f32.mxu0 %v15154_v21  ;;  %6590 = vmatprep.mubr.f32.mxu1 %v15154_v21 }
 0xce2   : > { %6496 = vmatmul.mubr.f32.gmra.mxu0 %v13811_v19  ;;  %6591 = vmatmul.mubr.f32.gmra.mxu1 %v13811_v19 }
 0xce3   : > { %6501 = vmatprep.mubr.f32.mxu0 %v15154_v21  ;;  %6596 = vmatprep.mubr.f32.mxu1 %v15154_v21 }
 0xce6   : > { %6502 = vmatmul.mubr.f32.gmra.mxu0 %v13829_v8  ;;  %6597 = vmatmul.mubr.f32.gmra.mxu1 %v13829_v8 }
 0xce7   : > { %6507 = vmatprep.mubr.f32.mxu0 %v15154_v21  ;;  %6602 = vmatprep.mubr.f32.mxu1 %v15154_v21 }
 0xcea   : > { %6508 = vmatmul.mubr.f32.gmra.mxu0 %v13839_v42  ;;  %6603 = vmatmul.mubr.f32.gmra.mxu1 %v13839_v42 }
 0xceb   : > { %6513 = vmatprep.mubr.f32.mxu0 %v15154_v21  ;;  %6608 = vmatprep.mubr.f32.mxu1 %v15154_v21 }
 0xcee   : > { %6514 = vmatmul.mubr.f32.gmra.mxu0 %v6226_v31  ;;  %6609 = vmatmul.mubr.f32.gmra.mxu1 %v6226_v31 }
 0xd75   : > { %v6301_v20 = vpop.f32.mrf.mxu0  ;;  %v6396_v19 = vpop.f32.mrf.mxu1 }
 0xd77   : > { %v6303_v5 = vpop.f32.mrf.mxu0  ;;  %v6398_v52 = vpop.f32.mrf.mxu1 }
 0xd7b   : > { %v6307_v47 = vpop.f32.mrf.mxu0  ;;  %v6402_v8 = vpop.f32.mrf.mxu1 }
 0xd7d   : > { %v6309_v60 = vpop.f32.mrf.mxu0  ;;  %v6404_v22 = vpop.f32.mrf.mxu1 }
 0xd81   : > { %v6313_v54 = vpop.f32.mrf.mxu0  ;;  %v13918_v28 = vpop.f32.mrf.mxu1 }
 0xd83   : > { %v6315_v46 = vpop.f32.mrf.mxu0  ;;  %v13920_v1 = vpop.f32.mrf.mxu1 }
 0xd87   : > { %v6319_v42 = vpop.f32.mrf.mxu0  ;;  %v13922_v30 = vpop.f32.mrf.mxu1 }
 0xd89   : > { %v6321_v21 = vpop.f32.mrf.mxu0  ;;  %v13924_v48 = vpop.f32.mrf.mxu1 }
 0xd8d   : > { %v6325_v31 = vpop.f32.mrf.mxu0  ;;  %v13926_v32 = vpop.f32.mrf.mxu1 }
 0xd8f   : > { %v13928_v17 = vpop.f32.mrf.mxu0  ;;  %v13930_v58 = vpop.f32.mrf.mxu1 }
 0xd9e   : > { %v6491_v38 = vpop.f32.mrf.mxu0  ;;  %v6586_v34 = vpop.f32.mrf.mxu1 }
 0xd9f   : > { %v6492_v49 = vadd.f32 %v6491_v38, %v6301_v20  ;;  %v6587_v26 = vadd.f32 %v6586_v34, %v6396_v19 }
 0xda0   : > { %v6493_v29 = vpop.f32.mrf.mxu0  ;;  %v6588_v11 = vpop.f32.mrf.mxu1 }
 0xda1   : > { %v6615_v55 = vadd.f32 %v6492_v49, %v15229_v57  ;;  %v6494_v14 = vadd.f32 %v6493_v29, %v6303_v5  ;;  %v6589_v63 = vadd.f32 %v6588_v11, %v6398_v52 }
 0xda2   : > { %v6497_v4 = vpop.f32.mrf.mxu0  ;;  %v6592_v33 = vpop.f32.mrf.mxu1 }
 0xda3   : > { %v7127_v51 = vmul.f32 -1.442695, %v6615_v55  ;;  %v6616_v3 = vadd.f32 %v6494_v14, %v15230_v40  ;;  %v6498_v0 = vadd.f32 %v6497_v4, %v6307_v47  ;;  %v6618_v47 = vadd.f32 %v6589_v63, %v15231_v43 }
 0xda4   : > { %v6499_v16 = vpop.f32.mrf.mxu0  ;;  %v6594_v18 = vpop.f32.mrf.mxu1  ;;  %v6617_v4 = vadd.f32 %v6587_v26, %v15232_v12 }
 0xda5   : > { %8447 = vpow2.f32 %v7127_v51  ;;  %v7132_v25 = vmul.f32 -1.442695, %v6616_v3  ;;  %v6500_v2 = vadd.f32 %v6499_v16, %v6309_v60  ;;  %v6619_v53 = vadd.f32 %v6498_v0, %v15229_v57 }
 0xda6   : > { %v6503_v15 = vpop.f32.mrf.mxu0  ;;  %v6598_v56 = vpop.f32.mrf.mxu1  ;;  %v6595_v52 = vadd.f32 %v6594_v18, %v6404_v22  ;;  %v6593_v51 = vadd.f32 %v6592_v33, %v6402_v8  ;;  %v7137_v16 = vmul.f32 -1.442695, %v6618_v47 }
 0xda7   : > { %8449 = vpow2.f32 %v7132_v25  ;;  %v6620_v20 = vadd.f32 %v6500_v2, %v15230_v40  ;;  %v6504_v5 = vadd.f32 %v6503_v15, %v6313_v54  ;;  %v7128_v38 = vmul.f32 -1.442695, %v6619_v53 }
 0xda8   : > { %v6505_v49 = vpop.f32.mrf.mxu0  ;;  %v6600_v29 = vpop.f32.mrf.mxu1  ;;  %v6622_v2 = vadd.f32 %v6595_v52, %v15231_v43  ;;  %v6621_v8 = vadd.f32 %v6593_v51, %v15232_v12 }
 0xda9   : > { %v7133_v55 = vmul.f32 -1.442695, %v6620_v20  ;;  %v6623_v14 = vadd.f32 %v6504_v5, %v15229_v57  ;;  %8451 = vpow2.f32 %v7128_v38  ;;  %v6506_v60 = vadd.f32 %v6505_v49, %v6315_v46 }
 0xdaa   : > { %v6509_v11 = vpop.f32.mrf.mxu0  ;;  %v6604_v3 = vpop.f32.mrf.mxu1  ;;  %v6599_v20 = vadd.f32 %v6598_v56, %v13918_v28  ;;  %v7138_v49 = vmul.f32 -1.442695, %v6622_v2 }
 0xdab   : > { %8453 = vpow2.f32 %v7133_v55  ;;  %v7129_v19 = vmul.f32 -1.442695, %v6623_v14  ;;  %v6510_v34 = vadd.f32 %v6509_v11, %v6319_v42  ;;  %v6624_v54 = vadd.f32 %v6506_v60, %v15230_v40 }
 0xdac   : > { %v6511_v0 = vpop.f32.mrf.mxu0  ;;  %v6601_v42 = vadd.f32 %v6600_v29, %v13920_v1  ;;  %v6606_v33 = vpop.f32.mrf.mxu1  ;;  %v6625_v28 = vadd.f32 %v6599_v20, %v15232_v12  ;;  %v6605_v51 = vadd.f32 %v6604_v3, %v13922_v30 }
 0xdad   : > { %8455 = vpow2.f32 %v7129_v19  ;;  %v6627_v25 = vadd.f32 %v6510_v34, %v15229_v57  ;;  %v6512_v63 = vadd.f32 %v6511_v0, %v6321_v21  ;;  %v7134_v22 = vmul.f32 -1.442695, %v6624_v54 }
 0xdae   : > { %v6515_v46 = vpop.f32.mrf.mxu0  ;;  %8457 = vtanh.f32 %v6617_v4  ;;  %v6626_v1 = vadd.f32 %v6601_v42, %v15231_v43 }
 0xdaf   : > { %v7130_v18 = vmul.f32 -1.442695, %v6627_v25  ;;  %v6628_v53 = vadd.f32 %v6512_v63, %v15230_v40  ;;  %v6516_v15 = vadd.f32 %v6515_v46, %v6325_v31  ;;  %8459 = vpow2.f32 %v7134_v22 }
 0xdb0   : > { %v6517_v26 = vpop.f32.mrf.mxu0  ;;  %8461 = vpow2.f32 %v7137_v16  ;;  %v6607_v31 = vadd.f32 %v6606_v33, %v13924_v48  ;;  %v7139_v19 = vmul.f32 -1.442695, %v6626_v1  ;;  %v6610_v48 = vpop.f32.mrf.mxu1  ;;  %v6629_v46 = vadd.f32 %v6605_v51, %v15232_v12 }
 0xdb1   : > { %v7135_v21 = vmul.f32 -1.442695, %v6628_v53  ;;  %v6631_v5 = vadd.f32 %v6516_v15, %v15229_v57  ;;  %8463 = vpow2.f32 %v7130_v18  ;;  %v6518_v47 = vadd.f32 %v6517_v26, %v13928_v17 }
 0xdb2   : > { %v8448_v38 = vpop.eup %8447  ;;  %v6630_v17 = vadd.f32 %v6607_v31, %v15231_v43  ;;  %v6612_v2 = vpop.f32.mrf.mxu1  ;;  %v6611_v42 = vadd.f32 %v6610_v48, %v13926_v32 }
 0xdb3   : > { %v6650_v55 = vadd.f32 1.0, %v8448_v38  ;;  %8465 = vpow2.f32 %v7135_v21  ;;  %v7131_v29 = vmul.f32 -1.442695, %v6631_v5  ;;  %v6632_v56 = vadd.f32 %v6518_v47, %v15230_v40 }
 0xdb4   : > { %v8450_v14 = vpop.eup %8449  ;;  %8467 = vtanh.f32 %v6621_v8  ;;  %v7140_v25 = vmul.f32 -1.442695, %v6630_v17  ;;  %v6613_v30 = vadd.f32 %v6612_v2, %v13930_v58  ;;  %v6633_v47 = vadd.f32 %v6611_v42, %v15232_v12 }
 0xdb5   : > { %8469 = vrcp.f32 %v6650_v55  ;;  %v6680_v52 = vadd.f32 1.0, %v8450_v14  ;;  %v7136_v0 = vmul.f32 -1.442695, %v6632_v56 }
 0xdb6   : > { %8471 = vpow2.f32 %v7138_v49  ;;  %v8452_v60 = vpop.eup %8451  ;;  %v6634_v38 = vadd.f32 %v6613_v30, %v15231_v43 }
 0xdb7   : > { %8473 = vrcp.f32 %v6680_v52  ;;  %v6651_v4 = vadd.f32 1.0, %v8452_v60 }
 0xdb8   : > { %v8454_v11 = vpop.eup %8453  ;;  %8475 = vpow2.f32 %v7131_v29  ;;  %v7141_v29 = vmul.f32 -1.442695, %v6634_v38 }
 0xdb9   : > { %v6681_v34 = vadd.f32 1.0, %v8454_v11  ;;  %8477 = vtanh.f32 %v6625_v28 }
 0xdba   : > { %v8456_v54 = vpop.eup %8455  ;;  %8479 = vrcp.f32 %v6651_v4 }
 0xdbb   : > { %8481 = vrcp.f32 %v6681_v34  ;;  %v6652_v16 = vadd.f32 1.0, %v8456_v54  ;;  %v8458_v63 = vpop.eup %8457 }
 0xdbc   : > { %8483 = vpow2.f32 %v7139_v19  ;;  %v8460_v22 = vpop.eup %8459 }
 0xdbd   : > { %8485 = vrcp.f32 %v6652_v16  ;;  %v8462_v18 = vpop.eup %8461  ;;  %v6682_v53 = vadd.f32 1.0, %v8460_v22 }
 0xdbe   : > { %8487 = vpow2.f32 %v7136_v0  ;;  %v8464_v15 = vpop.eup %8463  ;;  %v6715_v5 = vadd.f32 1.0, %v8462_v18 }
 0xdbf   : > { %8489 = vpow2.f32 %v7140_v25  ;;  %v6653_v8 = vadd.f32 1.0, %v8464_v15 }
 0xdc0   : > { %v8466_v3 = vpop.eup %8465  ;;  %8491 = vrcp.f32 %v6682_v53 }
 0xdc1   : > { %v8468_v33 = vpop.eup %8467  ;;  %8493 = vtanh.f32 %v6629_v46  ;;  %v6683_v26 = vadd.f32 1.0, %v8466_v3 }
 0xdc2   : > { %v8470_v20 = vpop.eup %8469  ;;  %8495 = vrcp.f32 %v6653_v8 }
 0xdc3   : > { %v8472_v21 = vpop.eup %8471  ;;  %8497 = vrcp.f32 %v6683_v26  ;;  %v6735_v58 = vmul.f32 %v8470_v20, %v8458_v63 }
 0xdc4   : > { %v8474_v49 = vpop.eup %8473  ;;  %v6716_v1 = vadd.f32 1.0, %v8472_v21  ;;  %8499 = vrcp.f32 %v6715_v5 }
 0xdc5   : > { %v8476_v55 = vpop.eup %8475  ;;  %v6730_v31 = vmul.f32 %v8474_v49, %v13786_v27  ;;  %8501 = vtanh.f32 %v6633_v47 }
 0xdc6   : > { %v8478_v14 = vpop.eup %8477  ;;  %v6654_v28 = vadd.f32 1.0, %v8476_v55 }
 0xdc7   : > { %v8480_v32 = vpop.eup %8479  ;;  %v13960_v20 = vadd.f32 %v6735_v58, %v6730_v31  }
 0xdc8   : > { %v8482_v52 = vpop.eup %8481  ;;  %v6736_v60 = vmul.f32 %v8480_v32, %v8468_v33 }
 0xdc9   : > { %v8484_v56 = vpop.eup %8483  ;;  %8503 = vtanh.f32 %v13960_v20  ;;  %v6731_v17 = vmul.f32 %v8482_v52, %v13790_v36 }
 0xdca   : > { %v8486_v11 = vpop.eup %8485  ;;  %8505 = vrcp.f32 %v6716_v1  ;;  %v6717_v34 = vadd.f32 1.0, %v8484_v56 }
 0xdcb   : > { %v8488_v4 = vpop.eup %8487  ;;  %v6741_v26 = vadd.f32 %v6736_v60, %v6731_v17   ;;  %8507 = vpow2.f32 %v7141_v29  ;;  %v6737_v54 = vmul.f32 %v8486_v11, %v8478_v14 }
 0xdcc   : > { %v8490_v27 = vpop.eup %8489  ;;  %8509 = vrcp.f32 %v6654_v28  ;;  %v6684_v19 = vadd.f32 1.0, %v8488_v4 }
 0xdcd   : > { %v8492_v48 = vpop.eup %8491  ;;  %8511 = vtanh.f32 %v6741_v26  ;;  %v6718_v36 = vadd.f32 1.0, %v8490_v27 }
 0xdce   : > { %v8494_v51 = vpop.eup %8493  ;;  %v6732_v0 = vmul.f32 %v8492_v48, %v13794_v62  ;;  %8513 = vrcp.f32 %v6684_v19 }
 0xdcf   : > { %v8496_v16 = vpop.eup %8495  ;;  %8515 = vrcp.f32 %v6717_v34 }
 0xdd0   : > { %v8498_v25 = vpop.eup %8497  ;;  %v6742_v21 = vadd.f32 %v6737_v54, %v6732_v0   ;;  %v6738_v63 = vmul.f32 %v8496_v16, %v8494_v51 }
 0xdd1   : > { %v6733_v2 = vmul.f32 %v8498_v25, %v13798_v39  ;;  %v8500_v22 = vpop.eup %8499 }
 0xdd2   : > { %8517 = vtanh.f32 %v6742_v21  ;;  %v8502_v46 = vpop.eup %8501 }
 0xdd3   : > { %v6743_v15 = vadd.f32 %v6738_v63, %v6733_v2   ;;  %8519 = vrcp.f32 %v6718_v36 }
 0xdd5   : > { %8521 = vtanh.f32 %v6743_v15 }
 0xdd6   : > { %v8504_v18 = vpop.eup %8503 }
 0xdd7   : > { %v8506_v53 = vpop.eup %8505  ;;  %v6750_v30 = vmul.f32 %v8504_v18, %v8500_v22  }
 0xdd8   : > { %v8508_v62 = vpop.eup %8507 }
 0xdd9   : > { %v8510_v3 = vpop.eup %8509  ;;  %7144 = vst [vmem:[%s13301_s26 + $0x78] sm:$0xff] %v6750_v30  ;;  %v6719_v5 = vadd.f32 1.0, %v8508_v62 }
 0xdda   : > { %v8512_v8 = vpop.eup %8511  ;;  %v6739_v39 = vmul.f32 %v8510_v3, %v8502_v46 }
 0xddb   : > { %v8514_v42 = vpop.eup %8513  ;;  %v6751_v33 = vmul.f32 %v8512_v8, %v8506_v53   ;;  %8523 = vrcp.f32 %v6719_v5  ;;  %v15520_v53 = vmov %v6750_v30 }
 0xddc   : > { %v6734_v38 = vmul.f32 %v8514_v42, %v13820_v35  ;;  %v8516_v49 = vpop.eup %8515  ;;  %v15525_v42 = vmov %v6750_v30 }
 0xddd   : > { %7145 = vst [vmem:[%s13301_s26 + $0x80] sm:$0xff] %v6751_v33  ;;  %v15519_v8 = vmov %v6751_v33  ;;  %v15524_v63 = vmov %v6751_v33 }
 0xdde   : > { %v6744_v17 = vadd.f32 %v6739_v39, %v6734_v38  }
 0xddf   : > { %v8518_v47 = vpop.eup %8517 }
 0xde0   : > { %v6752_v55 = vmul.f32 %v8518_v47, %v8516_v49   ;;  %8525 = vtanh.f32 %v6744_v17  ;;  %v8520_v58 = vpop.eup %8519 }
 0xde2   : > { %v8522_v31 = vpop.eup %8521  ;;  %7146 = vst [vmem:[%s13301_s26 + $0x88] sm:$0xff] %v6752_v55  ;;  %v15518_v46 = vmov %v6752_v55 }
 0xde3   : > { %v6753_v14 = vmul.f32 %v8522_v31, %v8520_v58   ;;  %v15523_v58 = vmov %v6752_v55 }
 0xde5   : > { %7147 = vst [vmem:[%s13301_s26 + $0x90] sm:$0xff] %v6753_v14  ;;  %v15517_v54 = vmov %v6753_v14  ;;  %v15522_v4 = vmov %v6753_v14 }
 0xde8   : > { %v8524_v1 = vpop.eup %8523 }
 0xdec   :  { %4634 = sbr.rel (!%p13973_p0) target bundleno = 2342 (0x926), region = 70 }
 0xded   : > { %v8526_v32 = vpop.eup %8525 }
 0xdee   : > { %v6754_v29 = vmul.f32 %v8526_v32, %v8524_v1  }
 0xdf0   : > { %7148 = vst [vmem:[%s13301_s26 + $0x98] sm:$0xff] %v6754_v29  ;;  %v15516_v35 = vmov %v6754_v29  ;;  %v15521_v62 = vmov %v6754_v29 }

</bundles_post_ra>
